<compile_context>
chip_gen: v6e
topology: v6e:2x2x1
jax: 0.10.0
libtpu: 0.0.40
codegen_flags: <defaults>
</compile_context>

<pallas_src>
import jax
import jax.numpy as jnp
import numpy as np
from jax.experimental import pallas as pl
from jax.experimental.pallas import tpu as pltpu

BN_EPS = 1e-5


def bixdfm_kernel(pab_ref, lg_ref, w0k_ref, w1k_ref, rexp_ref,
                  wm1_ref, wm2_ref, c_ref, out_ref):
    FE = w0k_ref.shape[0]              # 4*E  : flat CIN layer-0 input width (128)
    HE = w1k_ref.shape[0]              # 16*E : flat CIN hidden width (512)
    QE = HE // 2                       # 8*E  : split_half boundary (256)
    NH = wm1_ref.shape[1]              # MLP hidden width (16)

    slab = pab_ref[...]                # (TB, 8E) bf16 = [pa | pb]
    pa = slab[:, :FE]                  # [e1, e1, e2, e2]   (vreg-aligned slice)
    pb = slab[:, FE:]                  # [e1, e2, e1, e2]
    c = c_ref[...]                     # (8, 16E) f32 packed constants

    # ---- CIN layer 0: t0 = pa*pb = [e1e1, e1e2, e2e1, e2e2] — one bf16 VPU mul
    t0 = pa * pb                                                      # (TB, 4E) bf16
    z0 = jnp.maximum(
        jnp.dot(t0, w0k_ref[...], preferred_element_type=jnp.float32) + c[0:1, :],
        0.0)                                                          # (TB, 16E) f32

    # ---- CIN layer 1: e1/e2 tiled over 8 hidden channels via 0/1 expansion GEMM
    rep = jnp.dot(pb, rexp_ref[...],
                  preferred_element_type=jnp.float32).astype(jnp.bfloat16)  # exact
    h_bf = z0[:, QE:].astype(jnp.bfloat16)                            # hidden half (TB, 8E)
    t1 = rep * jnp.concatenate([h_bf, h_bf], axis=1)                  # (TB, 16E) bf16
    z1 = jnp.maximum(
        jnp.dot(t1, w1k_ref[...], preferred_element_type=jnp.float32) + c[1:2, :],
        0.0)                                                          # (TB, 16E) f32

    # ---- MLP (BatchNorm eval scale folded host-side; Dropout = identity)
    # TODO(synk): training-mode Dropout / batch-stat BatchNorm are not reproduced.
    h1 = jnp.maximum(
        jnp.dot(pb, wm1_ref[...], preferred_element_type=jnp.float32) + c[4:5, :NH],
        0.0)
    h2 = jnp.maximum(
        jnp.dot(h1.astype(jnp.bfloat16), wm2_ref[...],
                preferred_element_type=jnp.float32) + c[5:6, :NH],
        0.0)                                                          # (TB, 16) f32

    # ---- heads on VPU + XLU (no N=1 MXU dots): lane-dense weight rows, lane sums
    head = (jnp.sum(z0 * c[2:3, :], axis=-1, keepdims=True)   # CIN fc over kept z0 half
            + jnp.sum(z1 * c[3:4, :], axis=-1, keepdims=True) # CIN fc over z1
            + jnp.sum(h2 * c[6:7, :NH], axis=-1, keepdims=True))  # MLP output layer

    lin = lg_ref[:, 0:1]               # linear term + all scalar biases (f32)
    gate = lg_ref[:, 1:2]              # sigmoid(sum(position embedding))
    out_ref[...] = jax.nn.sigmoid(lin + head) * gate


def bixdfm_forward(params, x1, x2, x3, *, block_b=1024):
    """Host-side glue (gathers, gate, weight prep) + one gridded Pallas call."""
    E = params['emb1'].shape[1]
    B = x1.shape[0]
    HE = 16 * E

    # --- per-row glue: embedding gathers, pattern slabs, linear term, gate ---
    e1 = params['emb1'][x1].astype(jnp.bfloat16)
    e2 = params['emb2'][x2].astype(jnp.bfloat16)
    pa = jnp.concatenate([e1, e1, e2, e2], axis=1)                   # (B, 4E)
    pb = jnp.concatenate([e1, e2, e1, e2], axis=1)                   # (B, 4E)
    pab = jnp.concatenate([pa, pb], axis=1)                          # (B, 8E) bf16

    lin = (params['fc1'][x1] + params['fc2'][x2] + params['lin_bias']
           + params['bfc'] + params['bo']).astype(jnp.float32)       # (B, 1)
    pos = params['emb_pos'][x3][:, :, 0]
    gate = jax.nn.sigmoid(jnp.sum(pos, axis=1, keepdims=True))
    lg = jnp.concatenate([lin, gate.astype(jnp.float32)], axis=1)    # (B, 2)

    # --- weight preprocessing (constant folds; bf16 for MXU / HBM traffic) ---
    eye = jnp.eye(E, dtype=jnp.float32)
    w0k = jnp.kron(params['w0'].T, eye).astype(jnp.bfloat16)         # (4E, 16E)
    w1k = jnp.kron(params['w1'].T, eye).astype(jnp.bfloat16)         # (16E, 16E)

    # 0/1 expansion: pb=[e1,e2,e1,e2] -> [e1 x8 | e2 x8]; exact in bf16.
    pat = np.zeros((4, 16), np.float32)
    pat[0, :8] = 1.0                      # e1 lanes feed the first 8 channel groups
    pat[1, 8:] = 1.0                      # e2 lanes feed the last 8
    rexp = jnp.asarray(np.kron(pat, np.eye(E, dtype=np.float32)),
                       dtype=jnp.bfloat16)                            # (4E, 16E)

    inv = np.float32(1.0 / np.sqrt(1.0 + BN_EPS))   # BN eval scale (mean 0, var 1)
    # MLP W1 padded to consume pb directly (second half of pb gets zero weights).
    wm1p = jnp.concatenate([params['wm1'] * inv,
                            jnp.zeros_like(params['wm1'])],
                           axis=0).astype(jnp.bfloat16)               # (4E, 16)
    wm2 = (params['wm2'] * inv).astype(jnp.bfloat16)                  # (16, 16)

    # Consolidated f32 constants: CIN biases, head rows (lane-dense), MLP biases/out.
    c = jnp.zeros((8, HE), jnp.float32)
    c = c.at[0].set(jnp.repeat(params['b0'].reshape(-1), E))          # b0 flat
    c = c.at[1].set(jnp.repeat(params['b1'].reshape(-1), E))          # b1 flat
    c = c.at[2, :8 * E].set(jnp.repeat(params['wfc'][:8, 0], E))      # fc head on kept z0
    c = c.at[3].set(jnp.repeat(params['wfc'][8:, 0], E))              # fc head on z1
    c = c.at[4, :16].set(params['bm1'][0] * inv)                      # MLP bias 1 (BN-folded)
    c = c.at[5, :16].set(params['bm2'][0] * inv)                      # MLP bias 2 (BN-folded)
    c = c.at[6, :16].set(params['wo'][:, 0])                          # MLP output weights

    # --- pad the batch to a multiple of the row tile; pad rows are discarded ---
    tb = min(block_b, max(8, B))
    tb = int(np.ceil(tb / 8)) * 8
    bp = pl.cdiv(B, tb) * tb
    if bp != B:
        pab = jnp.pad(pab, ((0, bp - B), (0, 0)))
        lg = jnp.pad(lg, ((0, bp - B), (0, 0)))

    resident = lambda i: (0, 0)        # weights: fetched once, VMEM-resident
    rows = lambda i: (i, 0)            # per-row tensors: tiled over the batch

    out = pl.pallas_call(
        bixdfm_kernel,
        out_shape=jax.ShapeDtypeStruct((bp, 1), jnp.float32),
        grid_spec=pltpu.PrefetchScalarGridSpec(
            num_scalar_prefetch=0,
            grid=(bp // tb,),
            in_specs=[
                pl.BlockSpec((tb, 8 * E), rows),             # [pa | pb] patterns (bf16)
                pl.BlockSpec((tb, 2), rows),                 # [linear+biases, gate] (f32)
                pl.BlockSpec((4 * E, HE), resident),         # CIN conv0 (Kronecker, bf16)
                pl.BlockSpec((16 * E, HE), resident),        # CIN conv1 (Kronecker, bf16)
                pl.BlockSpec((4 * E, HE), resident),         # 0/1 expansion matrix (bf16)
                pl.BlockSpec((4 * E, 16), resident),         # MLP W1 (padded, BN-folded)
                pl.BlockSpec((16, 16), resident),            # MLP W2 (BN-folded)
                pl.BlockSpec((8, HE), resident),             # packed f32 constants
            ],
            out_specs=pl.BlockSpec((tb, 1), rows),
        ),
        compiler_params=pltpu.CompilerParams(
            dimension_semantics=("parallel",),               # 2 TensorCores on v7x
            vmem_limit_bytes=32 * 1024 * 1024,               # safe on v5e/v6e/v7x
        ),
    )(pab, lg, w0k, w1k, rexp, wm1p, wm2, c)
    return out[:B, 0]                                        # (B,)


def reference_forward(p, x1, x2, x3):
    """Pure-JAX f32 reference mirroring the PyTorch forward (eval semantics)."""
    e1 = p['emb1'][x1]
    e2 = p['emb2'][x2]
    x0 = jnp.stack([e1, e2], axis=1)                  # (B, 2, E)
    B, _, E = x0.shape
    lin = p['fc1'][x1] + p['fc2'][x2] + p['lin_bias']

    h, xs = x0, []
    for i, (w, b) in enumerate(((p['w0'], p['b0']), (p['w1'], p['b1']))):
        t = (x0[:, :, None, :] * h[:, None, :, :]).reshape(B, -1, E)
        z = jnp.maximum(jnp.einsum('oc,bce->boe', w, t) + b, 0.0)
        if i == 0:                                    # split_half (not last layer)
            half = z.shape[1] // 2
            xs.append(z[:, :half]); h = z[:, half:]
        else:
            xs.append(z); h = z
    s = jnp.sum(jnp.concatenate(xs, axis=1), axis=2)
    cin = s @ p['wfc'] + p['bfc']

    inv = 1.0 / np.sqrt(1.0 + BN_EPS)
    zf = x0.reshape(B, -1)
    h1 = jnp.maximum((zf @ p['wm1'] + p['bm1']) * inv, 0.0)
    h2 = jnp.maximum((h1 @ p['wm2'] + p['bm2']) * inv, 0.0)
    mlp = h2 @ p['wo'] + p['bo']

    total = lin + cin + mlp
    pos = p['emb_pos'][x3][:, :, 0]
    gate = jax.nn.sigmoid(jnp.sum(pos, axis=1, keepdims=True))
    return (jax.nn.sigmoid(total) * gate)[:, 0]


def make_params(key, v1, v2, pos_dim, embed_dim):
    ks = jax.random.split(key, 12)
    E = embed_dim

    def xavier(k, shape):
        fan_in, fan_out = shape[-1], shape[-2] if len(shape) > 1 else 1
        bound = np.sqrt(6.0 / (fan_in + fan_out))
        return jax.random.uniform(k, shape, jnp.float32, -bound, bound)

    emb_pos = xavier(ks[11], (pos_dim + 1, 1))
    emb_pos = emb_pos.at[0, :].set(10000.0)           # padding row init (per module)

    return dict(
        emb1=0.1 * jax.random.normal(ks[0], (v1, E), jnp.float32),
        emb2=0.1 * jax.random.normal(ks[1], (v2, E), jnp.float32),
        fc1=0.1 * jax.random.normal(ks[2], (v1, 1), jnp.float32),
        fc2=0.1 * jax.random.normal(ks[3], (v2, 1), jnp.float32),
        lin_bias=jnp.zeros((1, 1), jnp.float32),
        # CIN: Conv1d(4->16,k=1), Conv1d(16->16,k=1), fc Linear(24->1)
        w0=xavier(ks[4], (16, 4)),  b0=0.01 * jax.random.normal(ks[4], (1, 16, 1), jnp.float32),
        w1=xavier(ks[5], (16, 16)), b1=0.01 * jax.random.normal(ks[5], (1, 16, 1), jnp.float32),
        wfc=xavier(ks[6], (24, 1)), bfc=jnp.zeros((1, 1), jnp.float32),
        # MLP: 2E->16->16->1 (weights stored pre-transposed: (in, out))
        wm1=xavier(ks[7], (2 * E, 16)), bm1=0.01 * jax.random.normal(ks[7], (1, 16), jnp.float32),
        wm2=xavier(ks[8], (16, 16)),    bm2=0.01 * jax.random.normal(ks[8], (1, 16), jnp.float32),
        wo=xavier(ks[9], (16, 1)),      bo=jnp.zeros((1, 1), jnp.float32),
        emb_pos=emb_pos,
    )


if __name__ == "__main__":
    key = jax.random.PRNGKey(0)
    V1, V2, POS_DIM, E = 50, 60, 10, 32
    B, L = 1000, 8                                    # batch (2 row tiles + padding), seq len

    pkey, k1, k2, k3 = jax.random.split(key, 4)
    params = make_params(pkey, V1, V2, POS_DIM, E)
    # The kernel consumes these tensors in bf16; round-trip them here so the
    # f32 reference sees the same quantized values (isolates structure from dtype).
    for name in ("emb1", "emb2", "w0", "w1", "wm1", "wm2"):
        params[name] = params[name].astype(jnp.bfloat16).astype(jnp.float32)

    x1 = jax.random.randint(k1, (B,), 0, V1)          # field-1 categorical ids
    x2 = jax.random.randint(k2, (B,), 0, V2)          # field-2 categorical ids
    x3 = jax.random.randint(k3, (B, L), 0, POS_DIM + 1)  # position ids (0 = padding)

    fwd = jax.jit(lambda p, a, b, c: bixdfm_forward(p, a, b, c, block_b=512))
    out = jax.block_until_ready(fwd(params, x1, x2, x3))
    ref = jax.block_until_ready(reference_forward(params, x1, x2, x3))

    np.testing.assert_allclose(np.asarray(out), np.asarray(ref), rtol=1e-2, atol=1e-2)
    assert out.shape == (B,)
    print("KERNEL_OK")
</pallas_src>

<mosaic_0001>
module attributes {stable_mosaic.version = 11 : i64} {
  func.func @bixdfm_kernel(%arg0: i32, %arg1: memref<512x256xbf16, #tpu.memory_space<vmem>>, %arg2: memref<512x2xf32, #tpu.memory_space<vmem>>, %arg3: memref<128x512xbf16, #tpu.memory_space<vmem>>, %arg4: memref<512x512xbf16, #tpu.memory_space<vmem>>, %arg5: memref<128x512xbf16, #tpu.memory_space<vmem>>, %arg6: memref<128x16xbf16, #tpu.memory_space<vmem>>, %arg7: memref<16x16xbf16, #tpu.memory_space<vmem>>, %arg8: memref<8x512xf32, #tpu.memory_space<vmem>>, %arg9: memref<512x1xf32, #tpu.memory_space<vmem>>) attributes {dimension_semantics = [#tpu.dimension_semantics<parallel>], iteration_bounds = array<i64: 2>, scalar_prefetch = 0 : i64, scratch_operands = 0 : i64, tpu.core_type = #tpu.core_type<tc>, window_params = [{transform_indices = @transform_0, window_bounds = array<i64: 512, 256>}, {transform_indices = @transform_1, window_bounds = array<i64: 512, 2>}, {pipeline_mode = #tpu.pipeline_mode<synchronous>, transform_indices = @transform_2, window_bounds = array<i64: 128, 512>}, {pipeline_mode = #tpu.pipeline_mode<synchronous>, transform_indices = @transform_3, window_bounds = array<i64: 512, 512>}, {pipeline_mode = #tpu.pipeline_mode<synchronous>, transform_indices = @transform_4, window_bounds = array<i64: 128, 512>}, {pipeline_mode = #tpu.pipeline_mode<synchronous>, transform_indices = @transform_5, window_bounds = array<i64: 128, 16>}, {pipeline_mode = #tpu.pipeline_mode<synchronous>, transform_indices = @transform_6, window_bounds = array<i64: 16, 16>}, {pipeline_mode = #tpu.pipeline_mode<synchronous>, transform_indices = @transform_7, window_bounds = array<i64: 8, 512>}, {transform_indices = @transform_8, window_bounds = array<i64: 512, 1>}]} {
    %c0 = arith.constant 0 : index
    %c0_0 = arith.constant 0 : index
    %0 = vector.load %arg1[%c0, %c0_0] : memref<512x256xbf16, #tpu.memory_space<vmem>>, vector<512x256xbf16>
    %1 = vector.extract_strided_slice %0 {offsets = [0, 0], sizes = [512, 128], strides = [1, 1]} : vector<512x256xbf16> to vector<512x128xbf16>
    %2 = vector.extract_strided_slice %0 {offsets = [0, 128], sizes = [512, 128], strides = [1, 1]} : vector<512x256xbf16> to vector<512x128xbf16>
    %c0_1 = arith.constant 0 : index
    %c0_2 = arith.constant 0 : index
    %3 = vector.load %arg8[%c0_1, %c0_2] : memref<8x512xf32, #tpu.memory_space<vmem>>, vector<8x512xf32>
    %4 = arith.mulf %1, %2 : vector<512x128xbf16>
    %c0_3 = arith.constant 0 : index
    %c0_4 = arith.constant 0 : index
    %5 = vector.load %arg3[%c0_3, %c0_4] : memref<128x512xbf16, #tpu.memory_space<vmem>>, vector<128x512xbf16>
    %cst = arith.constant dense<0.000000e+00> : vector<512x512xf32>
    %6 = tpu.matmul %4, %5, %cst {dimension_numbers = #tpu.dot_dimension_numbers<[1], [0], [0], [1], [0, 0, 1, 1], [], []>} : vector<512x128xbf16>, vector<128x512xbf16>, vector<512x512xf32> -> vector<512x512xf32>
    %7 = vector.extract_strided_slice %3 {offsets = [0, 0], sizes = [1, 512], strides = [1, 1]} : vector<8x512xf32> to vector<1x512xf32>
    %8 = vector.broadcast %7 : vector<1x512xf32> to vector<512x512xf32>
    %9 = arith.addf %6, %8 : vector<512x512xf32>
    %cst_5 = arith.constant 0.000000e+00 : f32
    %10 = vector.broadcast %cst_5 : f32 to vector<512x512xf32>
    %11 = arith.maximumf %9, %10 : vector<512x512xf32>
    %c0_6 = arith.constant 0 : index
    %c0_7 = arith.constant 0 : index
    %12 = vector.load %arg5[%c0_6, %c0_7] : memref<128x512xbf16, #tpu.memory_space<vmem>>, vector<128x512xbf16>
    %cst_8 = arith.constant dense<0.000000e+00> : vector<512x512xf32>
    %13 = tpu.matmul %2, %12, %cst_8 {dimension_numbers = #tpu.dot_dimension_numbers<[1], [0], [0], [1], [0, 0, 1, 1], [], []>} : vector<512x128xbf16>, vector<128x512xbf16>, vector<512x512xf32> -> vector<512x512xf32>
    %14 = arith.truncf %13 : vector<512x512xf32> to vector<512x512xbf16>
    %15 = vector.extract_strided_slice %11 {offsets = [0, 256], sizes = [512, 256], strides = [1, 1]} : vector<512x512xf32> to vector<512x256xf32>
    %16 = arith.truncf %15 : vector<512x256xf32> to vector<512x256xbf16>
    %17 = tpu.concatenate %16, %16 in 1 : vector<512x256xbf16>, vector<512x256xbf16> -> vector<512x512xbf16>
    %18 = arith.mulf %14, %17 : vector<512x512xbf16>
    %c0_9 = arith.constant 0 : index
    %c0_10 = arith.constant 0 : index
    %19 = vector.load %arg4[%c0_9, %c0_10] : memref<512x512xbf16, #tpu.memory_space<vmem>>, vector<512x512xbf16>
    %cst_11 = arith.constant dense<0.000000e+00> : vector<512x512xf32>
    %20 = tpu.matmul %18, %19, %cst_11 {dimension_numbers = #tpu.dot_dimension_numbers<[1], [0], [0], [1], [0, 0, 1, 1], [], []>} : vector<512x512xbf16>, vector<512x512xbf16>, vector<512x512xf32> -> vector<512x512xf32>
    %21 = vector.extract_strided_slice %3 {offsets = [1, 0], sizes = [1, 512], strides = [1, 1]} : vector<8x512xf32> to vector<1x512xf32>
    %22 = vector.broadcast %21 : vector<1x512xf32> to vector<512x512xf32>
    %23 = arith.addf %20, %22 : vector<512x512xf32>
    %cst_12 = arith.constant 0.000000e+00 : f32
    %24 = vector.broadcast %cst_12 : f32 to vector<512x512xf32>
    %25 = arith.maximumf %23, %24 : vector<512x512xf32>
    %c0_13 = arith.constant 0 : index
    %c0_14 = arith.constant 0 : index
    %26 = vector.load %arg6[%c0_13, %c0_14] : memref<128x16xbf16, #tpu.memory_space<vmem>>, vector<128x16xbf16>
    %cst_15 = arith.constant dense<0.000000e+00> : vector<512x16xf32>
    %27 = tpu.matmul %2, %26, %cst_15 {dimension_numbers = #tpu.dot_dimension_numbers<[1], [0], [0], [1], [0, 0, 1, 1], [], []>} : vector<512x128xbf16>, vector<128x16xbf16>, vector<512x16xf32> -> vector<512x16xf32>
    %28 = vector.extract_strided_slice %3 {offsets = [4, 0], sizes = [1, 16], strides = [1, 1]} : vector<8x512xf32> to vector<1x16xf32>
    %29 = vector.broadcast %28 : vector<1x16xf32> to vector<512x16xf32>
    %30 = arith.addf %27, %29 : vector<512x16xf32>
    %cst_16 = arith.constant 0.000000e+00 : f32
    %31 = vector.broadcast %cst_16 : f32 to vector<512x16xf32>
    %32 = arith.maximumf %30, %31 : vector<512x16xf32>
    %33 = arith.truncf %32 : vector<512x16xf32> to vector<512x16xbf16>
    %c0_17 = arith.constant 0 : index
    %c0_18 = arith.constant 0 : index
    %34 = vector.load %arg7[%c0_17, %c0_18] : memref<16x16xbf16, #tpu.memory_space<vmem>>, vector<16x16xbf16>
    %cst_19 = arith.constant dense<0.000000e+00> : vector<512x16xf32>
    %35 = tpu.matmul %33, %34, %cst_19 {dimension_numbers = #tpu.dot_dimension_numbers<[1], [0], [0], [1], [0, 0, 1, 1], [], []>} : vector<512x16xbf16>, vector<16x16xbf16>, vector<512x16xf32> -> vector<512x16xf32>
    %36 = vector.extract_strided_slice %3 {offsets = [5, 0], sizes = [1, 16], strides = [1, 1]} : vector<8x512xf32> to vector<1x16xf32>
    %37 = vector.broadcast %36 : vector<1x16xf32> to vector<512x16xf32>
    %38 = arith.addf %35, %37 : vector<512x16xf32>
    %cst_20 = arith.constant 0.000000e+00 : f32
    %39 = vector.broadcast %cst_20 : f32 to vector<512x16xf32>
    %40 = arith.maximumf %38, %39 : vector<512x16xf32>
    %41 = vector.extract_strided_slice %3 {offsets = [2, 0], sizes = [1, 512], strides = [1, 1]} : vector<8x512xf32> to vector<1x512xf32>
    %42 = vector.broadcast %41 : vector<1x512xf32> to vector<512x512xf32>
    %43 = arith.mulf %11, %42 : vector<512x512xf32>
    %cst_21 = arith.constant dense<0.000000e+00> : vector<512xf32>
    %44 = vector.multi_reduction <add>, %43, %cst_21 [1] : vector<512x512xf32> to vector<512xf32>
    %45 = vector.shape_cast %44 : vector<512xf32> to vector<512x1xf32>
    %46 = vector.extract_strided_slice %3 {offsets = [3, 0], sizes = [1, 512], strides = [1, 1]} : vector<8x512xf32> to vector<1x512xf32>
    %47 = vector.broadcast %46 : vector<1x512xf32> to vector<512x512xf32>
    %48 = arith.mulf %25, %47 : vector<512x512xf32>
    %cst_22 = arith.constant dense<0.000000e+00> : vector<512xf32>
    %49 = vector.multi_reduction <add>, %48, %cst_22 [1] : vector<512x512xf32> to vector<512xf32>
    %50 = vector.shape_cast %49 : vector<512xf32> to vector<512x1xf32>
    %51 = arith.addf %45, %50 : vector<512x1xf32>
    %52 = vector.extract_strided_slice %3 {offsets = [6, 0], sizes = [1, 16], strides = [1, 1]} : vector<8x512xf32> to vector<1x16xf32>
    %53 = vector.broadcast %52 : vector<1x16xf32> to vector<512x16xf32>
    %54 = arith.mulf %40, %53 : vector<512x16xf32>
    %cst_23 = arith.constant dense<0.000000e+00> : vector<512xf32>
    %55 = vector.multi_reduction <add>, %54, %cst_23 [1] : vector<512x16xf32> to vector<512xf32>
    %56 = vector.shape_cast %55 : vector<512xf32> to vector<512x1xf32>
    %57 = arith.addf %51, %56 : vector<512x1xf32>
    %c0_24 = arith.constant 0 : index
    %c0_25 = arith.constant 0 : index
    %58 = vector.load %arg2[%c0_24, %c0_25] : memref<512x2xf32, #tpu.memory_space<vmem>>, vector<512x1xf32>
    %c0_26 = arith.constant 0 : index
    %c1 = arith.constant 1 : index
    %59 = vector.load %arg2[%c0_26, %c1] : memref<512x2xf32, #tpu.memory_space<vmem>>, vector<512x1xf32>
    %60 = arith.addf %58, %57 : vector<512x1xf32>
    %61 = arith.negf %60 : vector<512x1xf32>
    %62 = math.exp %61 : vector<512x1xf32>
    %cst_27 = arith.constant 1.000000e+00 : f32
    %63 = vector.broadcast %cst_27 : f32 to vector<512x1xf32>
    %64 = arith.addf %63, %62 : vector<512x1xf32>
    %65 = arith.divf %63, %64 : vector<512x1xf32>
    %66 = arith.mulf %65, %59 : vector<512x1xf32>
    %c0_28 = arith.constant 0 : index
    %c0_29 = arith.constant 0 : index
    %67 = vector.load %arg9[%c0_28, %c0_29] : memref<512x1xf32, #tpu.memory_space<vmem>>, vector<512x1xf32>
    tpu.vector_store %arg9[%c0_28, %c0_29], %66 {strides = array<i32>} : memref<512x1xf32, #tpu.memory_space<vmem>>, vector<512x1xf32>,
    return
  }
  func.func @transform_0(%arg0: i32) -> (i32, i32) {
    %c0_i32 = arith.constant 0 : i32
    %c0_i32_0 = arith.constant 0 : i32
    return %arg0, %c0_i32 : i32, i32
  }
  func.func @transform_1(%arg0: i32) -> (i32, i32) {
    %c0_i32 = arith.constant 0 : i32
    %c0_i32_0 = arith.constant 0 : i32
    return %arg0, %c0_i32 : i32, i32
  }
  func.func @transform_2(%arg0: i32) -> (i32, i32) {
    %c0_i32 = arith.constant 0 : i32
    %c0_i32_0 = arith.constant 0 : i32
    %c0_i32_1 = arith.constant 0 : i32
    return %c0_i32, %c0_i32_0 : i32, i32
  }
  func.func @transform_3(%arg0: i32) -> (i32, i32) {
    %c0_i32 = arith.constant 0 : i32
    %c0_i32_0 = arith.constant 0 : i32
    %c0_i32_1 = arith.constant 0 : i32
    return %c0_i32, %c0_i32_0 : i32, i32
  }
  func.func @transform_4(%arg0: i32) -> (i32, i32) {
    %c0_i32 = arith.constant 0 : i32
    %c0_i32_0 = arith.constant 0 : i32
    %c0_i32_1 = arith.constant 0 : i32
    return %c0_i32, %c0_i32_0 : i32, i32
  }
  func.func @transform_5(%arg0: i32) -> (i32, i32) {
    %c0_i32 = arith.constant 0 : i32
    %c0_i32_0 = arith.constant 0 : i32
    %c0_i32_1 = arith.constant 0 : i32
    return %c0_i32, %c0_i32_0 : i32, i32
  }
  func.func @transform_6(%arg0: i32) -> (i32, i32) {
    %c0_i32 = arith.constant 0 : i32
    %c0_i32_0 = arith.constant 0 : i32
    %c0_i32_1 = arith.constant 0 : i32
    return %c0_i32, %c0_i32_0 : i32, i32
  }
  func.func @transform_7(%arg0: i32) -> (i32, i32) {
    %c0_i32 = arith.constant 0 : i32
    %c0_i32_0 = arith.constant 0 : i32
    %c0_i32_1 = arith.constant 0 : i32
    return %c0_i32, %c0_i32_0 : i32, i32
  }
  func.func @transform_8(%arg0: i32) -> (i32, i32) {
    %c0_i32 = arith.constant 0 : i32
    %c0_i32_0 = arith.constant 0 : i32
    return %arg0, %c0_i32 : i32, i32
  }
}

</mosaic_0001>

<bundles_post_ra>
// kernel: _lambda_.1
= control target key start
LH: loop header
LB: loop body
LE: loop exit
PB: predicated region body
PF: predicated region fallthrough
CT: control target
= control target key end

     0   :  { %s10643_s27 = smov 0   ;;  %s15884_s0 = inlined_call_operand.vmem [shape: bf16[1024,256], index: 0, kind: input, shape index: {}]   ;;  %s15885_s1 = inlined_call_operand.vmem [shape: f32[1024,2], index: 1, kind: input, shape index: {}]   ;;  %s15886_s2 = inlined_call_operand.vmem [shape: bf16[128,512], index: 2, kind: input, shape index: {}]   ;;  %s15887_s3 = inlined_call_operand.vmem [shape: bf16[512,512], index: 3, kind: input, shape index: {}]   ;;  %s15888_s4 = inlined_call_operand.vmem [shape: bf16[128,512], index: 4, kind: input, shape index: {}]   ;;  %s15889_s5 = inlined_call_operand.vmem [shape: bf16[128,16], index: 5, kind: input, shape index: {}]   ;;  %s15890_s6 = inlined_call_operand.vmem [shape: bf16[16,16], index: 6, kind: input, shape index: {}]   ;;  %s15891_s7 = inlined_call_operand.vmem [shape: f32[8,512], index: 7, kind: input, shape index: {}]   ;;  %s15892_s8 = inlined_call_operand.vmem [shape: f32[1024,1], index: 8, kind: output, shape index: {}]  }
   0x1 LB: > { %s9271_s28 = sadd.s32 4294967295, %s10594_s27   ;;  %p9275_p0 = scmp.ge.s32.totalorder %s10594_s27, 1  ;;  %s10594_s27 = sphi %s10643_s27, %s18_s27  }
   0x2   : > { %p275_p1 = scmp.lt.s32.totalorder %s10594_s27, 3 }
   0x4   : > { %p276_p2 = pnand %p9275_p0, %p275_p1 }
   0x6   : > { %279 = sbr.rel (%p276_p2) target bundleno = 1846 (0x736), region = 52 }
   0xb   : > { %v9876_v0 = vld [vmem:[%s15886_s2 + $0xe4] ss:$16 sps:$4 sm:$0xff]   ;;  %v9878_v1 = vld [vmem:[%s15886_s2 + $0xec] ss:$16 sps:$4 sm:$0xff]   ;;  %v15893_v2 = vmov 0   ;;  %s9276_s17 = sshll.u32 %s9271_s28, 6 }
   0xc   : > { %1091 = vmatprep.mubr.bf16.mxu0 %v15893_v2  ;;  %1444 = vmatprep.mubr.bf16.mxu1 %v15893_v2  ;;  %v9880_v3 = vld [vmem:[%s15886_s2 + $0xe0] ss:$16 sps:$4 sm:$0xff]   ;;  %v9881_v4 = vld [vmem:[%s15886_s2 + $0xe8] ss:$16 sps:$4 sm:$0xff]   ;;  %v9882_v5 = vld [vmem:[%s15886_s2 + $0xc4] ss:$16 sps:$4 sm:$0xff]  }
   0xd   : > { %1059 = vmatprep.subr.bf16.mxu0 %v9876_v0  ;;  %1412 = vmatprep.subr.bf16.mxu1 %v9878_v1  ;;  %v9884_v6 = vld [vmem:[%s15886_s2 + $0xcc] ss:$16 sps:$4 sm:$0xff]   ;;  %v9886_v7 = vld [vmem:[%s15886_s2 + $0xc0] ss:$16 sps:$4 sm:$0xff]   ;;  %v9887_v8 = vld [vmem:[%s15886_s2 + $0xc8] ss:$16 sps:$4 sm:$0xff]  }
   0xe   : > { %1060 = vmatpush1.bf16.msra.mxu0 %v9880_v3  ;;  %1413 = vmatpush1.bf16.msra.mxu1 %v9881_v4  ;;  %v9888_v9 = vld [vmem:[%s15886_s2 + $0xa4] ss:$16 sps:$4 sm:$0xff]   ;;  %p316_p3 = scmp.lt.s32.totalorder %s9276_s17, 127  ;;  %v9890_v10 = vld [vmem:[%s15886_s2 + $0xac] ss:$16 sps:$4 sm:$0xff]   ;;  %s10597_s25 = smov 127  }
   0xf   : > { %1061 = vmatprep.subr.bf16.mxu0 %v9882_v5  ;;  %1414 = vmatprep.subr.bf16.mxu1 %v9884_v6  ;;  %v9892_v11 = vld [vmem:[%s15886_s2 + $0xa0] ss:$16 sps:$4 sm:$0xff]   ;;  %v9893_v12 = vld [vmem:[%s15886_s2 + $0xa8] ss:$16 sps:$4 sm:$0xff]   ;;  %v9894_v13 = vld [vmem:[%s15886_s2 + $0x84] ss:$16 sps:$4 sm:$0xff]  }
  0x10   : > { %v9896_v14 = vld [vmem:[%s15886_s2 + $0x8c] ss:$16 sps:$4 sm:$0xff]   ;;  %v9898_v15 = vld [vmem:[%s15886_s2 + $0x80] ss:$16 sps:$4 sm:$0xff]   ;;  %s16906_s17 = smov (!%p316_p3, %s9276_s17), 127  ;;  %vm6284_vm0 = vcmask 130048  }
  0x11   : > { %v9899_v16 = vld [vmem:[%s15886_s2 + $0x88] ss:$16 sps:$4 sm:$0xff]   ;;  %v9900_v17 = vld [vmem:[%s15886_s2 + $0x64] ss:$16 sps:$4 sm:$0xff]   ;;  %v9902_v18 = vld [vmem:[%s15886_s2 + $0x6c] ss:$16 sps:$4 sm:$0xff]  }
  0x12   : > { %1062 = vmatpush1.bf16.msra.mxu0 %v9886_v7  ;;  %1415 = vmatpush1.bf16.msra.mxu1 %v9887_v8  ;;  %v9904_v19 = vld [vmem:[%s15886_s2 + $0x60] ss:$16 sps:$4 sm:$0xff]   ;;  %v9905_v20 = vld [vmem:[%s15886_s2 + $0x68] ss:$16 sps:$4 sm:$0xff]   ;;  %s10713_s29 = sshll.u32 %s16906_s17, 3  ;;  %vm9138_vm1 = vcmask 7168  }
  0x13   : > { %1063 = vmatprep.subr.bf16.mxu0 %v9888_v9  ;;  %1416 = vmatprep.subr.bf16.mxu1 %v9890_v10  ;;  %v9906_v21 = vld [vmem:[%s15886_s2 + $0x44] ss:$16 sps:$4 sm:$0xff]   ;;  %v9908_v22 = vld [vmem:[%s15886_s2 + $0x4c] ss:$16 sps:$4 sm:$0xff]   ;;  %s10725_s14 = scalar_lea.vmem %s15884_s0, %s10713_s29  ;;  %v9910_v23 = vld [vmem:[%s15886_s2 + $0x40] ss:$16 sps:$4 sm:$0xff]   ;;  %s10770_s20 = scalar_lea.vmem %s15885_s1, %s10713_s29 }
  0x14   : > { %v9911_v24 = vld [vmem:[%s15886_s2 + $0x48] ss:$16 sps:$4 sm:$0xff]   ;;  %v9912_v25 = vld [vmem:[%s15886_s2 + $0x24] ss:$16 sps:$4 sm:$0xff]   ;;  %v9914_v26 = vld [vmem:[%s15886_s2 + $0x2c] ss:$16 sps:$4 sm:$0xff]   ;;  %s15533_s9 = scalar_lea.vmem %s15892_s8, %s10713_s29 }
  0x15   : > { %v335_v27 = vld [vmem:[%s10725_s14] sm:$0xff]  ;;  %v336_v28 = vld [vmem:[%s10725_s14 + $0x8] sm:$0xff]  ;;  %v337_v40 = vld [vmem:[%s10725_s14 + $0x10] sm:$0xff] }
  0x16   : > { %1064 = vmatpush1.bf16.msra.mxu0 %v9892_v11  ;;  %1417 = vmatpush1.bf16.msra.mxu1 %v9893_v12  ;;  %v10741_v29 = vcombine.high %v335_v27, %v336_v28  ;;  %v467_v30 = vrot.slane %v335_v27, 4  ;;  %v468_v31 = vrot.slane %v336_v28, 4  ;;  %v9916_v32 = vld [vmem:[%s15886_s2 + $0x20] ss:$16 sps:$4 sm:$0xff]   ;;  %v9917_v33 = vld [vmem:[%s15886_s2 + $0x28] ss:$16 sps:$4 sm:$0xff]  }
  0x17   : > { %1065 = vmatprep.subr.bf16.mxu0 %v9894_v13  ;;  %1418 = vmatprep.subr.bf16.mxu1 %v9896_v14  ;;  %v9918_v34 = vld [vmem:[%s15886_s2 + $0x4] ss:$16 sps:$4 sm:$0xff]   ;;  %v9920_v35 = vld [vmem:[%s15886_s2 + $0xc] ss:$16 sps:$4 sm:$0xff]   ;;  %v9922_v36 = vld [vmem:[%s15886_s2] ss:$16 sps:$4 sm:$0xff]  }
  0x18   : > { %16099 = vst [vmem:[#allocation2_spill] sm:$0xff] %v10741_v29  ;;  %v595_v37 = vmul.bf16 %v467_v30, %v335_v27  ;;  %v596_v38 = vmul.bf16 %v468_v31, %v336_v28  ;;  %v9923_v39 = vld [vmem:[%s15886_s2 + $0x8] ss:$16 sps:$4 sm:$0xff]   ;;  %v9927_v42 = vld [vmem:[%s15888_s4 + $0xe4] ss:$16 sps:$4 sm:$0xff]   ;;  %v469_v44 = vrot.slane %v337_v40, 4 }
  0x19   : > { %v338_v41 = vld [vmem:[%s10725_s14 + $0x18] sm:$0xff]  ;;  %v9925_v46 = vld [vmem:[%s15888_s4 + $0xe0] ss:$16 sps:$4 sm:$0xff]   ;;  %v8307_v47 = vld [vmem:[%s10770_s20 + $0x8] sm:$0xff] }
  0x1a   : > { %1066 = vmatpush1.bf16.msra.mxu0 %v9898_v15  ;;  %1419 = vmatpush1.bf16.msra.mxu1 %v9899_v16  ;;  %v9283_v43 = vcombine.low %v595_v37, %v596_v38  ;;  %v470_v45 = vrot.slane %v338_v41, 4  ;;  %v8306_v48 = vld [vmem:[%s10770_s20] sm:$0xff]  ;;  %v597_v50 = vmul.bf16 %v469_v44, %v337_v40  ;;  %v8308_v52 = vld [vmem:[%s10770_s20 + $0x10] sm:$0xff]  ;;  %v340_v55 = vld [vmem:[%s10725_s14 + $0x28] sm:$0xff] }
  0x1b   : > { %1067 = vmatprep.subr.bf16.mxu0 %v9900_v17  ;;  %1420 = vmatprep.subr.bf16.mxu1 %v9902_v18  ;;  %v9930_v49 = vld [vmem:[%s15888_s4 + $0xc4] ss:$16 sps:$4 sm:$0xff]   ;;  %v9928_v56 = vld [vmem:[%s15888_s4 + $0xc0] ss:$16 sps:$4 sm:$0xff]   ;;  %v472_v60 = vrot.slane %v340_v55, 4  ;;  %v8309_v61 = vld [vmem:[%s10770_s20 + $0x18] sm:$0xff] }
  0x1c   : > { %8884 = vrot.lane.b32.xlu1 %v8307_v47, %s10597_s25  ;;  %8882 = vrot.lane.b32.xlu0 %v8306_v48, %s10597_s25  ;;  %v598_v51 = vmul.bf16 %v470_v45, %v338_v41  ;;  %v8310_v53 = vld [vmem:[%s10770_s20 + $0x20] sm:$0xff]  ;;  %v8312_v62 = vld [vmem:[%s10770_s20 + $0x30] sm:$0xff] }
  0x1d   : > { %v339_v54 = vld [vmem:[%s10725_s14 + $0x20] sm:$0xff]  ;;  %v600_v1 = vmul.bf16 %v472_v60, %v340_v55  ;;  %v8311_v3 = vld [vmem:[%s10770_s20 + $0x28] sm:$0xff]  ;;  %v341_v6 = vld [vmem:[%s10725_s14 + $0x30] sm:$0xff] }
  0x1e   : > { %1068 = vmatpush1.bf16.msra.mxu0 %v9904_v19  ;;  %1421 = vmatpush1.bf16.msra.mxu1 %v9905_v20  ;;  %v9933_v57 = vld [vmem:[%s15888_s4 + $0xa4] ss:$16 sps:$4 sm:$0xff]   ;;  %v9284_v58 = vcombine.low %v597_v50, %v598_v51  ;;  %v471_v59 = vrot.slane %v339_v54, 4  ;;  %v9931_v63 = vld [vmem:[%s15888_s4 + $0xa0] ss:$16 sps:$4 sm:$0xff]   ;;  %v342_v7 = vld [vmem:[%s10725_s14 + $0x38] sm:$0xff] }
  0x1f   : > { %1069 = vmatprep.subr.bf16.mxu0 %v9906_v21  ;;  %1422 = vmatprep.subr.bf16.mxu1 %v9908_v22  ;;  %v8314_v4 = vld [vmem:[%s10770_s20 + $0x40] sm:$0xff]  ;;  %v473_v10 = vrot.slane %v341_v6, 4  ;;  %v474_v11 = vrot.slane %v342_v7, 4  ;;  %v8313_v12 = vld [vmem:[%s10770_s20 + $0x38] sm:$0xff]  ;;  %v8316_v13 = vld [vmem:[%s10770_s20 + $0x50] sm:$0xff] }
  0x20   : > { %8886 = vrot.lane.b32.xlu1 %v8308_v52, %s10597_s25  ;;  %8890 = vrot.lane.b32.xlu0 %v8310_v53, %s10597_s25  ;;  %v599_v0 = vmul.bf16 %v471_v59, %v339_v54  ;;  %v9936_v5 = vld [vmem:[%s15888_s4 + $0x84] ss:$16 sps:$4 sm:$0xff]   ;;  %v9934_v8 = vld [vmem:[%s15888_s4 + $0x80] ss:$16 sps:$4 sm:$0xff]  }
  0x21   : > { %v9939_v14 = vld [vmem:[%s15888_s4 + $0x64] ss:$16 sps:$4 sm:$0xff]   ;;  %v601_v15 = vmul.bf16 %v473_v10, %v341_v6  ;;  %v602_v16 = vmul.bf16 %v474_v11, %v342_v7  ;;  %v8315_v17 = vld [vmem:[%s10770_s20 + $0x48] sm:$0xff]  ;;  %v9937_v19 = vld [vmem:[%s15888_s4 + $0x60] ss:$16 sps:$4 sm:$0xff]  }
  0x22   : > { %1070 = vmatpush1.bf16.msra.mxu0 %v9910_v23  ;;  %1423 = vmatpush1.bf16.msra.mxu1 %v9911_v24  ;;  %v9285_v9 = vcombine.low %v599_v0, %v600_v1  ;;  %v8318_v18 = vld [vmem:[%s10770_s20 + $0x60] sm:$0xff]  ;;  %v344_v21 = vld [vmem:[%s10725_s14 + $0x48] sm:$0xff]  ;;  %v8325_v47 = vld [vmem:[%s10770_s20 + $0x98] sm:$0xff] }
  0x23   : > { %1071 = vmatprep.subr.bf16.mxu0 %v9912_v25  ;;  %1424 = vmatprep.subr.bf16.mxu1 %v9914_v26  ;;  %v343_v20 = vld [vmem:[%s10725_s14 + $0x40] sm:$0xff]  ;;  %v9286_v22 = vcombine.low %v601_v15, %v602_v16  ;;  %v476_v24 = vrot.slane %v344_v21, 4  ;;  %v8317_v25 = vld [vmem:[%s10770_s20 + $0x58] sm:$0xff]  ;;  %v8320_v26 = vld [vmem:[%s10770_s20 + $0x70] sm:$0xff] }
  0x24   : > { %8888 = vrot.lane.b32.xlu1 %v8309_v61, %s10597_s25  ;;  %8894 = vrot.lane.b32.xlu0 %v8312_v62, %s10597_s25  ;;  %v475_v23 = vrot.slane %v343_v20, 4  ;;  %v8319_v30 = vld [vmem:[%s10770_s20 + $0x68] sm:$0xff]  ;;  %v8322_v31 = vld [vmem:[%s10770_s20 + $0x80] sm:$0xff] }
  0x25   : > { %v604_v28 = vmul.bf16 %v476_v24, %v344_v21  ;;  %v9942_v44 = vld [vmem:[%s15888_s4 + $0x44] ss:$16 sps:$4 sm:$0xff]   ;;  %v8327_v54 = vld [vmem:[%s10770_s20 + $0xa8] sm:$0xff]  ;;  %v8333_v6 = vld [vmem:[%s10770_s20 + $0xd8] sm:$0xff] }
  0x26   : > { %1072 = vmatpush1.bf16.msra.mxu0 %v9916_v32  ;;  %1425 = vmatpush1.bf16.msra.mxu1 %v9917_v33  ;;  %v603_v27 = vmul.bf16 %v475_v23, %v343_v20  ;;  %v345_v32 = vld [vmem:[%s10725_s14 + $0x50] sm:$0xff]  ;;  %v346_v33 = vld [vmem:[%s10725_s14 + $0x58] sm:$0xff]  ;;  %v347_v45 = vld [vmem:[%s10725_s14 + $0x60] sm:$0xff] }
  0x27   : > { %1073 = vmatprep.subr.bf16.mxu0 %v9918_v34  ;;  %1426 = vmatprep.subr.bf16.mxu1 %v9920_v35  ;;  %v8321_v34 = vld [vmem:[%s10770_s20 + $0x78] sm:$0xff]  ;;  %v8324_v35 = vld [vmem:[%s10770_s20 + $0x90] sm:$0xff]  ;;  %v477_v37 = vrot.slane %v345_v32, 4  ;;  %v478_v38 = vrot.slane %v346_v33, 4  ;;  %v479_v50 = vrot.slane %v347_v45, 4  ;;  %v8330_v55 = vld [vmem:[%s10770_s20 + $0xc0] sm:$0xff] }
  0x28   : > { %8892 = vrot.lane.b32.xlu1 %v8311_v3, %s10597_s25  ;;  %8898 = vrot.lane.b32.xlu0 %v8314_v4, %s10597_s25  ;;  %v8328_v48 = vld [vmem:[%s10770_s20 + $0xb0] sm:$0xff]  ;;  %v8334_v3 = vld [vmem:[%s10770_s20 + $0xe0] sm:$0xff] }
  0x29   : > { %v605_v40 = vmul.bf16 %v477_v37, %v345_v32  ;;  %v606_v41 = vmul.bf16 %v478_v38, %v346_v33  ;;  %v607_v52 = vmul.bf16 %v479_v50, %v347_v45  ;;  %v8332_v59 = vld [vmem:[%s10770_s20 + $0xd0] sm:$0xff]  ;;  %v351_v4 = vld [vmem:[%s10725_s14 + $0x80] sm:$0xff]  ;;  %v8335_v11 = vld [vmem:[%s10770_s20 + $0xe8] sm:$0xff] }
  0x2a   : > { %1074 = vmatpush1.bf16.msra.mxu0 %v9922_v36  ;;  %1427 = vmatpush1.bf16.msra.mxu1 %v9923_v39  ;;  %v9287_v36 = vcombine.low %v603_v27, %v604_v28  ;;  %v8323_v39 = vld [vmem:[%s10770_s20 + $0x88] sm:$0xff]  ;;  %v8336_v7 = vld [vmem:[%s10770_s20 + $0xf0] sm:$0xff]  ;;  %v354_v16 = vld [vmem:[%s10725_s14 + $0x98] sm:$0xff] }
  0x2b   : > { %2341 = vmatprep.subr.bf16.mxu0 %v9927_v42  ;;  %v8326_v42 = vld [vmem:[%s10770_s20 + $0xa0] sm:$0xff]  ;;  %v353_v15 = vld [vmem:[%s10725_s14 + $0x90] sm:$0xff]  ;;  %v486_v21 = vrot.slane %v354_v16, 4  ;;  %v356_v24 = vld [vmem:[%s10725_s14 + $0xa8] sm:$0xff] }
  0x2c   : > { %8896 = vrot.lane.b32.xlu1 %v8313_v12, %s10597_s25  ;;  %8902 = vrot.lane.b32.xlu0 %v8316_v13, %s10597_s25  ;;  %v8338_v12 = vld [vmem:[%s10770_s20 + $0x100] sm:$0xff]  ;;  %v485_v20 = vrot.slane %v353_v15, 4  ;;  %v8341_v28 = vld [vmem:[%s10770_s20 + $0x118] sm:$0xff]  ;;  %v488_v32 = vrot.slane %v356_v24, 4 }
  0x2d   : > { %1092 = vmatmul.mubr.bf16.vlgmr.msra.gmra.mxu0 %v9283_v43  ;;  %1445 = vmatmul.mubr.bf16.vlgmr.msra.gmra.mxu1 %v9283_v43  ;;  %v9940_v43 = vld [vmem:[%s15888_s4 + $0x40] ss:$16 sps:$4 sm:$0xff]   ;;  %v360_v50 = vld [vmem:[%s10725_s14 + $0xc8] sm:$0xff] }
  0x2e   : > { %2342 = vmatpush1.bf16.msra.mxu0 %v9925_v46  ;;  %1101 = vmatprep.mubr.bf16.mxu0 %v15893_v2  ;;  %v348_v46 = vld [vmem:[%s10725_s14 + $0x68] sm:$0xff]  ;;  %v355_v23 = vld [vmem:[%s10725_s14 + $0xa0] sm:$0xff]  ;;  %v8344_v33 = vld [vmem:[%s10770_s20 + $0x130] sm:$0xff] }
  0x2f   : > { %1454 = vmatprep.mubr.bf16.mxu1 %v15893_v2  ;;  %2343 = vmatprep.subr.bf16.mxu0 %v9930_v49  ;;  %v9288_v49 = vcombine.low %v605_v40, %v606_v41  ;;  %v480_v51 = vrot.slane %v348_v46, 4  ;;  %v8342_v27 = vld [vmem:[%s10770_s20 + $0x120] sm:$0xff]  ;;  %v357_v38 = vld [vmem:[%s10725_s14 + $0xb0] sm:$0xff]  ;;  %v616_v41 = vmul.bf16 %v488_v32, %v356_v24  ;;  %v366_v24 = vld [vmem:[%s10725_s14 + $0xf8] sm:$0xff] }
  0x30   : > { %8900 = vrot.lane.b32.xlu1 %v8315_v17, %s10597_s25  ;;  %8906 = vrot.lane.b32.xlu0 %v8318_v18, %s10597_s25  ;;  %v8337_v17 = vld [vmem:[%s10770_s20 + $0xf8] sm:$0xff]  ;;  %v8340_v18 = vld [vmem:[%s10770_s20 + $0x110] sm:$0xff]  ;;  %v489_v45 = vrot.slane %v357_v38, 4 }
  0x31   : > { %v608_v53 = vmul.bf16 %v480_v51, %v348_v46  ;;  %v9943_v37 = vld [vmem:[%s15888_s4 + $0x20] ss:$16 sps:$4 sm:$0xff]  }
  0x32   : > { %2344 = vmatpush1.bf16.msra.mxu0 %v9928_v56  ;;  %v349_v56 = vld [vmem:[%s10725_s14 + $0x70] sm:$0xff]  ;;  %v617_v51 = vmul.bf16 %v489_v45, %v357_v38  ;;  %v9964_v45 = vld [vmem:[%s15888_s4 + $0x48] ss:$16 sps:$4 sm:$0xff]  }
  0x33   : > { %2345 = vmatprep.subr.bf16.mxu0 %v9933_v57  ;;  %v350_v57 = vld [vmem:[%s10725_s14 + $0x78] sm:$0xff]  ;;  %v9289_v60 = vcombine.low %v607_v52, %v608_v53  ;;  %v481_v61 = vrot.slane %v349_v56, 4 }
  0x34   : > { %8904 = vrot.lane.b32.xlu1 %v8317_v25, %s10597_s25  ;;  %8910 = vrot.lane.b32.xlu0 %v8320_v26, %s10597_s25  ;;  %v482_v62 = vrot.slane %v350_v57, 4  ;;  %v613_v25 = vmul.bf16 %v485_v20, %v353_v15  ;;  %v614_v26 = vmul.bf16 %v486_v21, %v354_v16  ;;  %v8357_v16 = vld [vmem:[%s10770_s20 + $0x198] sm:$0xff] }
  0x35   : > { %1102 = vmatmul.mubr.bf16.gmra.mxu0 %v9284_v58  ;;  %1455 = vmatmul.mubr.bf16.gmra.mxu1 %v9284_v58  ;;  %v8329_v58 = vld [vmem:[%s10770_s20 + $0xb8] sm:$0xff]  ;;  %v609_v0 = vmul.bf16 %v481_v61, %v349_v56  ;;  %v492_v56 = vrot.slane %v360_v50, 4 }
  0x36   : > { %1111 = vmatprep.mubr.bf16.mxu0 %v15893_v2  ;;  %1464 = vmatprep.mubr.bf16.mxu1 %v15893_v2  ;;  %v610_v1 = vmul.bf16 %v482_v62, %v350_v57  ;;  %v8352_v57 = vld [vmem:[%s10770_s20 + $0x170] sm:$0xff]  ;;  %v362_v61 = vld [vmem:[%s10725_s14 + $0xd8] sm:$0xff]  ;;  %v8351_v62 = vld [vmem:[%s10770_s20 + $0x168] sm:$0xff] }
  0x37   : > { %2346 = vmatpush1.bf16.msra.mxu0 %v9931_v63  ;;  %v8331_v63 = vld [vmem:[%s10770_s20 + $0xc8] sm:$0xff] }
  0x38   : > { %2347 = vmatprep.subr.bf16.mxu0 %v9936_v5  ;;  %8908 = vrot.lane.b32.xlu1 %v8319_v30, %s10597_s25  ;;  %v352_v5 = vld [vmem:[%s10725_s14 + $0x88] sm:$0xff]  ;;  %v9292_v30 = vcombine.low %v613_v25, %v614_v26 }
  0x39   : > { %8914 = vrot.lane.b32.xlu0 %v8322_v31, %s10597_s25  ;;  %v484_v10 = vrot.slane %v352_v5, 4  ;;  %v487_v31 = vrot.slane %v355_v23, 4  ;;  %v9957_v25 = vld [vmem:[%s15888_s4 + $0xac] ss:$16 sps:$4 sm:$0xff]  }
  0x3b   : > { %2348 = vmatpush1.bf16.msra.mxu0 %v9934_v8  ;;  %v9290_v8 = vcombine.low %v609_v0, %v610_v1  ;;  %v615_v40 = vmul.bf16 %v487_v31, %v355_v23  ;;  %v620_v1 = vmul.bf16 %v492_v56, %v360_v50  ;;  %v365_v23 = vld [vmem:[%s10725_s14 + $0xf0] sm:$0xff]  ;;  %v9960_v31 = vld [vmem:[%s15888_s4 + $0x8c] ss:$16 sps:$4 sm:$0xff]   ;;  %v9970_v56 = vld [vmem:[%s15888_s4 + $0x8] ss:$16 sps:$4 sm:$0xff]  }
  0x3c   : > { %2349 = vmatprep.subr.bf16.mxu0 %v9939_v14  ;;  %8912 = vrot.lane.b32.xlu1 %v8321_v34, %s10597_s25  ;;  %v612_v14 = vmul.bf16 %v484_v10, %v352_v5  ;;  %v9945_v34 = vld [vmem:[%s15888_s4 + $0x24] ss:$16 sps:$4 sm:$0xff]  }
  0x3d   : > { %1112 = vmatmul.mubr.bf16.gmra.mxu0 %v9285_v9  ;;  %1465 = vmatmul.mubr.bf16.gmra.mxu1 %v9285_v9  ;;  %v483_v9 = vrot.slane %v351_v4, 4 }
  0x3e   : > { %1121 = vmatprep.mubr.bf16.mxu0 %v15893_v2  ;;  %1474 = vmatprep.mubr.bf16.mxu1 %v15893_v2 }
  0x3f   : > { %2350 = vmatpush1.bf16.msra.mxu0 %v9937_v19  ;;  %8918 = vrot.lane.b32.xlu0 %v8324_v35, %s10597_s25  ;;  %v611_v13 = vmul.bf16 %v483_v9, %v351_v4  ;;  %v8343_v35 = vld [vmem:[%s10770_s20 + $0x128] sm:$0xff]  ;;  %v8356_v4 = vld [vmem:[%s10770_s20 + $0x190] sm:$0xff]  ;;  %v363_v9 = vld [vmem:[%s10725_s14 + $0xe0] sm:$0xff] }
  0x40   : > { %2351 = vmatprep.subr.bf16.mxu0 %v9942_v44  ;;  %8916 = vrot.lane.b32.xlu1 %v8323_v39, %s10597_s25  ;;  %v358_v39 = vld [vmem:[%s10725_s14 + $0xb8] sm:$0xff]  ;;  %v9293_v44 = vcombine.low %v615_v40, %v616_v41 }
  0x41   : > { %v9291_v19 = vcombine.low %v611_v13, %v612_v14  ;;  %v490_v46 = vrot.slane %v358_v39, 4  ;;  %v495_v14 = vrot.slane %v363_v9, 4  ;;  %v9961_v41 = vld [vmem:[%s15888_s4 + $0x68] ss:$16 sps:$4 sm:$0xff]  }
  0x43   : > { %8922 = vrot.lane.b32.xlu0 %v8326_v42, %s10597_s25  ;;  %2352 = vmatpush1.bf16.msra.mxu0 %v9940_v43  ;;  %v8345_v42 = vld [vmem:[%s10770_s20 + $0x138] sm:$0xff]  ;;  %v8348_v43 = vld [vmem:[%s10770_s20 + $0x150] sm:$0xff]  ;;  %v618_v52 = vmul.bf16 %v490_v46, %v358_v39  ;;  %v623_v20 = vmul.bf16 %v495_v14, %v363_v9  ;;  %v375_v9 = vld [vmem:[%s10725_s14 + $0x140] sm:$0xff] }
  0x44   : > { %8920 = vrot.lane.b32.xlu1 %v8325_v47, %s10597_s25  ;;  %2353 = vmatprep.subr.bf16.mxu0 %v9945_v34  ;;  %v359_v47 = vld [vmem:[%s10725_s14 + $0xc0] sm:$0xff]  ;;  %v9958_v34 = vld [vmem:[%s15888_s4 + $0x88] ss:$16 sps:$4 sm:$0xff]   ;;  %v369_v46 = vld [vmem:[%s10725_s14 + $0x110] sm:$0xff] }
  0x45   : > { %1122 = vmatmul.mubr.bf16.gmra.mxu0 %v9286_v22  ;;  %1475 = vmatmul.mubr.bf16.gmra.mxu1 %v9286_v22  ;;  %v8339_v22 = vld [vmem:[%s10770_s20 + $0x108] sm:$0xff]  ;;  %v491_v53 = vrot.slane %v359_v47, 4  ;;  %v501_v50 = vrot.slane %v369_v46, 4 }
  0x46   : > { %1131 = vmatprep.mubr.bf16.mxu0 %v15893_v2  ;;  %1484 = vmatprep.mubr.bf16.mxu1 %v15893_v2 }
  0x47   : > { %8926 = vrot.lane.b32.xlu0 %v8328_v48, %s10597_s25  ;;  %2354 = vmatpush1.bf16.msra.mxu0 %v9943_v37  ;;  %v8347_v48 = vld [vmem:[%s10770_s20 + $0x148] sm:$0xff]  ;;  %v619_v0 = vmul.bf16 %v491_v53, %v359_v47  ;;  %v370_v47 = vld [vmem:[%s10725_s14 + $0x118] sm:$0xff] }
  0x48   : > { %8924 = vrot.lane.b32.xlu1 %v8327_v54, %s10597_s25  ;;  %v8349_v54 = vld [vmem:[%s10770_s20 + $0x158] sm:$0xff] }
  0x49   : > { %v9963_v37 = vld [vmem:[%s15888_s4 + $0x6c] ss:$16 sps:$4 sm:$0xff]  }
  0x4a   : > { %v9972_v53 = vld [vmem:[%s15888_s4 + $0xc] ss:$16 sps:$4 sm:$0xff]  }
  0x4b   : > { %8930 = vrot.lane.b32.xlu0 %v8330_v55, %s10597_s25  ;;  %v9294_v55 = vcombine.low %v617_v51, %v618_v52  ;;  %v502_v51 = vrot.slane %v370_v47, 4  ;;  %v9967_v52 = vld [vmem:[%s15888_s4 + $0x28] ss:$16 sps:$4 sm:$0xff]  }
  0x4c   : > { %8928 = vrot.lane.b32.xlu1 %v8329_v58, %s10597_s25  ;;  %v9946_v58 = vld [vmem:[%s15888_s4 + $0xe8] ss:$16 sps:$4 sm:$0xff]  }
  0x4d   : > { %1132 = vmatmul.mubr.bf16.gmra.mxu0 %v9287_v36  ;;  %1485 = vmatmul.mubr.bf16.gmra.mxu1 %v9287_v36  ;;  %v8346_v36 = vld [vmem:[%s10770_s20 + $0x140] sm:$0xff] }
  0x4e   : > { %1141 = vmatprep.mubr.bf16.mxu0 %v15893_v2  ;;  %1494 = vmatprep.mubr.bf16.mxu1 %v15893_v2 }
  0x4f   : > { %8934 = vrot.lane.b32.xlu0 %v8332_v59, %s10597_s25  ;;  %v9948_v59 = vld [vmem:[%s15888_s4 + $0xec] ss:$16 sps:$4 sm:$0xff]  }
  0x50   : > { %8932 = vrot.lane.b32.xlu1 %v8331_v63, %s10597_s25  ;;  %v8354_v63 = vld [vmem:[%s10770_s20 + $0x180] sm:$0xff]  ;;  %2694 = vmatprep.subr.bf16.mxu1 %v9948_v59 }
  0x51   : > { %2695 = vmatpush1.bf16.msra.mxu1 %v9946_v58  ;;  %v372_v58 = vld [vmem:[%s10725_s14 + $0x128] sm:$0xff] }
  0x53   : > { %8938 = vrot.lane.b32.xlu0 %v8334_v3, %s10597_s25  ;;  %v8353_v3 = vld [vmem:[%s10770_s20 + $0x178] sm:$0xff] }
  0x54   : > { %8936 = vrot.lane.b32.xlu1 %v8333_v6, %s10597_s25  ;;  %v494_v6 = vrot.slane %v362_v61, 4 }
  0x55   : > { %1142 = vmatmul.mubr.bf16.gmra.mxu0 %v9288_v49  ;;  %1495 = vmatmul.mubr.bf16.gmra.mxu1 %v9288_v49  ;;  %v8350_v49 = vld [vmem:[%s10770_s20 + $0x160] sm:$0xff] }
  0x56   : > { %1151 = vmatprep.mubr.bf16.mxu0 %v15893_v2  ;;  %1504 = vmatprep.mubr.bf16.mxu1 %v15893_v2 }
  0x57   : > { %8942 = vrot.lane.b32.xlu0 %v8336_v7, %s10597_s25  ;;  %v9295_v7 = vcombine.low %v619_v0, %v620_v1  ;;  %v373_v1 = vld [vmem:[%s10725_s14 + $0x130] sm:$0xff] }
  0x58   : > { %8940 = vrot.lane.b32.xlu1 %v8335_v11, %s10597_s25  ;;  %v622_v11 = vmul.bf16 %v494_v6, %v362_v61  ;;  %v504_v61 = vrot.slane %v372_v58, 4 }
  0x5a   : > { %v632_v0 = vmul.bf16 %v504_v61, %v372_v58  ;;  %v392_v58 = vld [vmem:[%s10725_s14 + $0x1c8] sm:$0xff] }
  0x5b   : > { %8946 = vrot.lane.b32.xlu0 %v8338_v12, %s10597_s25  ;;  %v364_v12 = vld [vmem:[%s10725_s14 + $0xe8] sm:$0xff] }
  0x5c   : > { %8944 = vrot.lane.b32.xlu1 %v8337_v17, %s10597_s25  ;;  %v496_v15 = vrot.slane %v364_v12, 4  ;;  %v9951_v17 = vld [vmem:[%s15888_s4 + $0x4] ss:$16 sps:$4 sm:$0xff]  }
  0x5d   : > { %1152 = vmatmul.mubr.bf16.gmra.mxu0 %v9289_v60  ;;  %1505 = vmatmul.mubr.bf16.gmra.mxu1 %v9289_v60  ;;  %v361_v60 = vld [vmem:[%s10725_s14 + $0xd0] sm:$0xff] }
  0x5e   : > { %1161 = vmatprep.mubr.bf16.mxu0 %v15893_v2  ;;  %1514 = vmatprep.mubr.bf16.mxu1 %v15893_v2  ;;  %v493_v5 = vrot.slane %v361_v60, 4  ;;  %v624_v21 = vmul.bf16 %v496_v15, %v364_v12  ;;  %v507_v12 = vrot.slane %v375_v9, 4 }
  0x5f   : > { %8950 = vrot.lane.b32.xlu0 %v8340_v18, %s10597_s25  ;;  %v9949_v18 = vld [vmem:[%s15888_s4] ss:$16 sps:$4 sm:$0xff]   ;;  %2355 = vmatprep.subr.bf16.mxu0 %v9951_v17  ;;  %v378_v17 = vld [vmem:[%s10725_s14 + $0x158] sm:$0xff] }
  0x60   : > { %8948 = vrot.lane.b32.xlu1 %v8339_v22, %s10597_s25  ;;  %v621_v10 = vmul.bf16 %v493_v5, %v361_v60  ;;  %v9952_v22 = vld [vmem:[%s15888_s4 + $0xc8] ss:$16 sps:$4 sm:$0xff]   ;;  %2356 = vmatpush1.bf16.msra.mxu0 %v9949_v18  ;;  %v9297_v26 = vcombine.low %v623_v20, %v624_v21  ;;  %v505_v5 = vrot.slane %v373_v1, 4  ;;  %v635_v14 = vmul.bf16 %v507_v12, %v375_v9 }
  0x61   : > { %v510_v20 = vrot.slane %v378_v17, 4  ;;  %v398_v9 = vld [vmem:[%s10725_s14 + $0x1f8] sm:$0xff] }
  0x62   : > { %v9296_v13 = vcombine.low %v621_v10, %v622_v11  ;;  %v376_v10 = vld [vmem:[%s10725_s14 + $0x148] sm:$0xff] }
  0x63   : > { %8954 = vrot.lane.b32.xlu0 %v8342_v27, %s10597_s25  ;;  %v497_v27 = vrot.slane %v365_v23, 4 }
  0x64   : > { %8952 = vrot.lane.b32.xlu1 %v8341_v28, %s10597_s25  ;;  %v498_v28 = vrot.slane %v366_v24, 4 }
  0x65   : > { %1162 = vmatmul.mubr.bf16.gmra.mxu0 %v9290_v8  ;;  %1515 = vmatmul.mubr.bf16.gmra.mxu1 %v9290_v8  ;;  %v8355_v8 = vld [vmem:[%s10770_s20 + $0x188] sm:$0xff]  ;;  %v625_v32 = vmul.bf16 %v497_v27, %v365_v23  ;;  %v379_v23 = vld [vmem:[%s10725_s14 + $0x160] sm:$0xff] }
  0x66   : > { %1171 = vmatprep.mubr.bf16.mxu0 %v15893_v2  ;;  %1524 = vmatprep.mubr.bf16.mxu1 %v15893_v2 }
  0x67   : > { %8958 = vrot.lane.b32.xlu0 %v8344_v33, %s10597_s25  ;;  %v626_v33 = vmul.bf16 %v498_v28, %v366_v24  ;;  %v380_v24 = vld [vmem:[%s10725_s14 + $0x168] sm:$0xff] }
  0x68   : > { %8956 = vrot.lane.b32.xlu1 %v8343_v35, %s10597_s25  ;;  %v367_v35 = vld [vmem:[%s10725_s14 + $0x100] sm:$0xff]  ;;  %v512_v27 = vrot.slane %v380_v24, 4 }
  0x69   : > { %v9298_v38 = vcombine.low %v625_v32, %v626_v33  ;;  %v499_v39 = vrot.slane %v367_v35, 4  ;;  %v382_v32 = vld [vmem:[%s10725_s14 + $0x178] sm:$0xff]  ;;  %v691_v33 = vlaneseq }
  0x6b   : > { %8962 = vrot.lane.b32.xlu0 %v8346_v36, %s10597_s25  ;;  %v368_v36 = vld [vmem:[%s10725_s14 + $0x108] sm:$0xff] }
  0x6c   : > { %8960 = vrot.lane.b32.xlu1 %v8345_v42, %s10597_s25  ;;  %v500_v40 = vrot.slane %v368_v36, 4  ;;  %v9966_v42 = vld [vmem:[%s15888_s4 + $0x4c] ss:$16 sps:$4 sm:$0xff]  }
  0x6d   : > { %1172 = vmatmul.mubr.bf16.gmra.mxu0 %v9291_v19  ;;  %1525 = vmatmul.mubr.bf16.gmra.mxu1 %v9291_v19  ;;  %v9954_v19 = vld [vmem:[%s15888_s4 + $0xcc] ss:$16 sps:$4 sm:$0xff]  }
  0x6e   : > { %1181 = vmatprep.mubr.bf16.mxu0 %v15893_v2  ;;  %1534 = vmatprep.mubr.bf16.mxu1 %v15893_v2 }
  0x6f   : > { %8966 = vrot.lane.b32.xlu0 %v8348_v43, %s10597_s25  ;;  %2696 = vmatprep.subr.bf16.mxu1 %v9954_v19  ;;  %v627_v43 = vmul.bf16 %v499_v39, %v367_v35  ;;  %v11062_v39 = vshrl.u32 %v691_v33, 7 }
  0x70   : > { %8964 = vrot.lane.b32.xlu1 %v8347_v48, %s10597_s25  ;;  %2697 = vmatpush1.bf16.msra.mxu1 %v9952_v22  ;;  %v9969_v48 = vld [vmem:[%s15888_s4 + $0x2c] ss:$16 sps:$4 sm:$0xff]   ;;  %v638_v22 = vmul.bf16 %v510_v20, %v378_v17 }
  0x71   : > { %2698 = vmatprep.subr.bf16.mxu1 %v9957_v25  ;;  %16100 = vst [vmem:[#allocation3_spill] sm:$0xff] %v11062_v39  ;;  %v6736_v61 = vsub.s32 2, %v11062_v39 }
  0x73   : > { %8970 = vrot.lane.b32.xlu0 %v8350_v49, %s10597_s25 }
  0x74   : > { %8968 = vrot.lane.b32.xlu1 %v8349_v54, %s10597_s25  ;;  %v629_v54 = vmul.bf16 %v501_v50, %v369_v46  ;;  %v385_v50 = vld [vmem:[%s10725_s14 + $0x190] sm:$0xff] }
  0x75   : > { %1182 = vmatmul.mubr.bf16.gmra.mxu0 %v9292_v30  ;;  %1535 = vmatmul.mubr.bf16.gmra.mxu1 %v9292_v30  ;;  %v9955_v30 = vld [vmem:[%s15888_s4 + $0xa8] ss:$16 sps:$4 sm:$0xff]  }
  0x76   : > { %1191 = vmatprep.mubr.bf16.mxu0 %v15893_v2  ;;  %1544 = vmatprep.mubr.bf16.mxu1 %v15893_v2 }
  0x77   : > { %8974 = vrot.lane.b32.xlu0 %v8352_v57, %s10597_s25  ;;  %2699 = vmatpush1.bf16.msra.mxu1 %v9955_v30  ;;  %v371_v57 = vld [vmem:[%s10725_s14 + $0x120] sm:$0xff]  ;;  %v640_v30 = vmul.bf16 %v512_v27, %v380_v24 }
  0x78   : > { %8972 = vrot.lane.b32.xlu1 %v8351_v62, %s10597_s25  ;;  %2700 = vmatprep.subr.bf16.mxu1 %v9960_v31  ;;  %v503_v60 = vrot.slane %v371_v57, 4  ;;  %v9975_v62 = vld [vmem:[%s15887_s3 + $0xe4] ss:$16 sps:$4 sm:$0xff]  }
  0x79   : > { %4151 = vmatprep.subr.bf16.mxu0 %v9975_v62  ;;  %v381_v31 = vld [vmem:[%s10725_s14 + $0x170] sm:$0xff] }
  0x7a   : > { %v513_v35 = vrot.slane %v381_v31, 4 }
  0x7b   : > { %8978 = vrot.lane.b32.xlu0 %v8354_v63, %s10597_s25  ;;  %2701 = vmatpush1.bf16.msra.mxu1 %v9958_v34  ;;  %v631_v63 = vmul.bf16 %v503_v60, %v371_v57  ;;  %v391_v57 = vld [vmem:[%s10725_s14 + $0x1c0] sm:$0xff] }
  0x7c   : > { %8976 = vrot.lane.b32.xlu1 %v8353_v3, %s10597_s25  ;;  %2702 = vmatprep.subr.bf16.mxu1 %v9963_v37  ;;  %v374_v3 = vld [vmem:[%s10725_s14 + $0x138] sm:$0xff]  ;;  %v383_v37 = vld [vmem:[%s10725_s14 + $0x180] sm:$0xff]  ;;  %v523_v12 = vrot.slane %v391_v57, 4 }
  0x7d   : > { %1192 = vmatmul.mubr.bf16.gmra.mxu0 %v9293_v44  ;;  %1545 = vmatmul.mubr.bf16.gmra.mxu1 %v9293_v44  ;;  %v628_v44 = vmul.bf16 %v500_v40, %v368_v36  ;;  %v506_v6 = vrot.slane %v374_v3, 4  ;;  %v514_v36 = vrot.slane %v382_v32, 4  ;;  %v515_v40 = vrot.slane %v383_v37, 4 }
  0x7e   : > { %1201 = vmatprep.mubr.bf16.mxu0 %v15893_v2  ;;  %1554 = vmatprep.mubr.bf16.mxu1 %v15893_v2 }
  0x7f   : > { %8982 = vrot.lane.b32.xlu0 %v8356_v4, %s10597_s25  ;;  %2703 = vmatpush1.bf16.msra.mxu1 %v9961_v41  ;;  %v9299_v49 = vcombine.low %v627_v43, %v628_v44  ;;  %v9301_v4 = vcombine.low %v631_v63, %v632_v0  ;;  %v642_v43 = vmul.bf16 %v514_v36, %v382_v32  ;;  %v399_v44 = vld [vmem:[%s15891_s7] sm:$0xff]  ;;  %v394_v0 = vld [vmem:[%s10725_s14 + $0x1d8] sm:$0xff] }
  0x80   : > { %8980 = vrot.lane.b32.xlu1 %v8355_v8, %s10597_s25  ;;  %2704 = vmatprep.subr.bf16.mxu1 %v9966_v42  ;;  %v634_v8 = vmul.bf16 %v506_v6, %v374_v3  ;;  %v641_v42 = vmul.bf16 %v513_v35, %v381_v31  ;;  %v643_v46 = vmul.bf16 %v515_v40, %v383_v37  ;;  %v396_v3 = vld [vmem:[%s10725_s14 + $0x1e8] sm:$0xff] }
  0x81   : > { %v528_v17 = vrot.slane %v396_v3, 4 }
  0x83   : > { %2705 = vmatpush1.bf16.msra.mxu1 %v9964_v45  ;;  %v693_v45 = vsub.s32 0, %v11062_v39  ;;  %v656_v35 = vmul.bf16 %v528_v17, %v396_v3 }
  0x84   : > { %8984 = vrot.lane.b32.xlu1 %v8357_v16, %s10597_s25  ;;  %2706 = vmatprep.subr.bf16.mxu1 %v9969_v48  ;;  %v377_v16 = vld [vmem:[%s10725_s14 + $0x150] sm:$0xff]  ;;  %v400_v48 = vld [vmem:[%s15891_s7 + $0x8] sm:$0xff] }
  0x85   : > { %1202 = vmatmul.mubr.bf16.gmra.mxu0 %v9294_v55  ;;  %1555 = vmatmul.mubr.bf16.gmra.mxu1 %v9294_v55  ;;  %v630_v55 = vmul.bf16 %v502_v51, %v370_v47  ;;  %v509_v19 = vrot.slane %v377_v16, 4  ;;  %v386_v51 = vld [vmem:[%s10725_s14 + $0x198] sm:$0xff]  ;;  %v11085_v60 = vrot.slane %v399_v44, %v693_v45  ;;  %v11088_v63 = vrot.slane %v400_v48, %v693_v45 }
  0x86   : > { %1211 = vmatprep.mubr.bf16.mxu0 %v15893_v2  ;;  %1564 = vmatprep.mubr.bf16.mxu1 %v15893_v2 }
  0x87   : > { %2707 = vmatpush1.bf16.msra.mxu1 %v9967_v52  ;;  %v9300_v59 = vcombine.low %v629_v54, %v630_v55  ;;  %v637_v21 = vmul.bf16 %v509_v19, %v377_v16  ;;  %v387_v52 = vld [vmem:[%s10725_s14 + $0x1a0] sm:$0xff]  ;;  %v389_v54 = vld [vmem:[%s10725_s14 + $0x1b0] sm:$0xff]  ;;  %v390_v55 = vld [vmem:[%s10725_s14 + $0x1b8] sm:$0xff] }
  0x88   : > { %2708 = vmatprep.subr.bf16.mxu1 %v9972_v53  ;;  %v388_v53 = vld [vmem:[%s10725_s14 + $0x1a8] sm:$0xff]  ;;  %v519_v6 = vrot.slane %v387_v52, 4 }
  0x89   : > { %v9304_v25 = vcombine.low %v637_v21, %v638_v22  ;;  %v530_v21 = vrot.slane %v398_v9, 4  ;;  %v402_v22 = vld [vmem:[%s15891_s7 + $0x18] sm:$0xff] }
  0x8a   : > { %v11106_v37 = vrot.slane %v402_v22, %v693_v45 }
  0x8b   : > { %2709 = vmatpush1.bf16.msra.mxu1 %v9970_v56  ;;  %v401_v56 = vld [vmem:[%s15891_s7 + $0x10] sm:$0xff]  ;;  %v658_v40 = vmul.bf16 %v530_v21, %v398_v9 }
  0x8c   : > { %v11099_v19 = vrot.slane %v401_v56, %v693_v45  ;;  %v11104_v36 = vrot.slane %v401_v56, %v6736_v61 }
  0x8d   : > { %1212 = vmatmul.mubr.bf16.gmra.mxu0 %v9295_v7  ;;  %1565 = vmatmul.mubr.bf16.gmra.mxu1 %v9295_v7  ;;  %v633_v7 = vmul.bf16 %v505_v5, %v373_v1  ;;  %v395_v1 = vld [vmem:[%s10725_s14 + $0x1e0] sm:$0xff]  ;;  %v518_v5 = vrot.slane %v386_v51, 4 }
  0x8e   : > { %1221 = vmatprep.mubr.bf16.mxu0 %v15893_v2  ;;  %1574 = vmatprep.mubr.bf16.mxu1 %v15893_v2  ;;  %v527_v16 = vrot.slane %v395_v1, 4 }
  0x8f   : > { %v9302_v11 = vcombine.low %v633_v7, %v634_v8  ;;  %v520_v7 = vrot.slane %v388_v53, 4  ;;  %v397_v8 = vld [vmem:[%s10725_s14 + $0x1f0] sm:$0xff]  ;;  %v646_v24 = vmul.bf16 %v518_v5, %v386_v51  ;;  %v10464_v5 = vld [vmem:[%s10725_s14 + $0x28] sm:$0xff] }
  0x90   : > { %v529_v20 = vrot.slane %v397_v8, 4 }
  0x95   : > { %1222 = vmatmul.mubr.bf16.gmra.mxu0 %v9296_v13  ;;  %1575 = vmatmul.mubr.bf16.gmra.mxu1 %v9296_v13  ;;  %v508_v13 = vrot.slane %v376_v10, 4 }
  0x96   : > { %1231 = vmatprep.mubr.bf16.mxu0 %v15893_v2  ;;  %1584 = vmatprep.mubr.bf16.mxu1 %v15893_v2 }
  0x97   : > { %v636_v15 = vmul.bf16 %v508_v13, %v376_v10  ;;  %v521_v10 = vrot.slane %v389_v54, 4  ;;  %v524_v13 = vrot.slane %v392_v58, 4 }
  0x99   : > { %v9303_v18 = vcombine.low %v635_v14, %v636_v15  ;;  %v526_v15 = vrot.slane %v394_v0, 4  ;;  %v649_v27 = vmul.bf16 %v521_v10, %v389_v54  ;;  %v652_v31 = vmul.bf16 %v524_v13, %v392_v58  ;;  %v10468_v13 = vld [vmem:[%s10725_s14 + $0x48] sm:$0xff] }
  0x9b   : > { %v654_v33 = vmul.bf16 %v526_v15, %v394_v0  ;;  %v10461_v0 = vld [vmem:[%s10725_s14 + $0x10] sm:$0xff] }
  0x9c   : > { %v10469_v15 = vld [vmem:[%s10725_s14 + $0x50] sm:$0xff] }
  0x9d   : > { %1232 = vmatmul.mubr.bf16.gmra.mxu0 %v9297_v26  ;;  %1585 = vmatmul.mubr.bf16.gmra.mxu1 %v9297_v26  ;;  %v511_v26 = vrot.slane %v379_v23, 4 }
  0x9e   : > { %1241 = vmatprep.mubr.bf16.mxu0 %v15893_v2  ;;  %1594 = vmatprep.mubr.bf16.mxu1 %v15893_v2 }
  0x9f   : > { %v639_v28 = vmul.bf16 %v511_v26, %v379_v23  ;;  %v648_v26 = vmul.bf16 %v520_v7, %v388_v53  ;;  %v10465_v7 = vld [vmem:[%s10725_s14 + $0x30] sm:$0xff] }
  0xa1   : > { %v9305_v34 = vcombine.low %v639_v28, %v640_v30  ;;  %v651_v30 = vmul.bf16 %v523_v12, %v391_v57  ;;  %v10467_v12 = vld [vmem:[%s10725_s14 + $0x40] sm:$0xff] }
  0xa5   : > { %1242 = vmatmul.mubr.bf16.gmra.mxu0 %v9298_v38  ;;  %1595 = vmatmul.mubr.bf16.gmra.mxu1 %v9298_v38  ;;  %v384_v38 = vld [vmem:[%s10725_s14 + $0x188] sm:$0xff] }
  0xa6   : > { %1251 = vmatprep.mubr.bf16.mxu0 %v15893_v2  ;;  %1604 = vmatprep.mubr.bf16.mxu1 %v15893_v2  ;;  %v516_v41 = vrot.slane %v384_v38, 4 }
  0xa8   : > { %v644_v47 = vmul.bf16 %v516_v41, %v384_v38  ;;  %v657_v38 = vmul.bf16 %v529_v20, %v397_v8  ;;  %v10466_v8 = vld [vmem:[%s10725_s14 + $0x38] sm:$0xff] }
  0xa9   : > { %v11143_v9 = vcombine.high %v10465_v7, %v10466_v8 }
  0xaa   : > { %v9307_v62 = vcombine.low %v643_v46, %v644_v47  ;;  %v11130_v58 = vcombine.low %v657_v38, %v658_v40 }
  0xab   : > { %16103 = vst [vmem:[#allocation6_spill] sm:$0xff] %v11143_v9 }
  0xad   : > { %1252 = vmatmul.mubr.bf16.gmra.mxu0 %v9299_v49  ;;  %1605 = vmatmul.mubr.bf16.gmra.mxu1 %v9299_v49  ;;  %v9306_v49 = vcombine.low %v641_v42, %v642_v43  ;;  %v11108_v43 = vrot.slane %v400_v48, %v6736_v61 }
  0xae   : > { %1261 = vmatprep.mubr.bf16.mxu0 %v15893_v2  ;;  %1614 = vmatprep.mubr.bf16.mxu1 %v15893_v2 }
  0xb5   : > { %1262 = vmatmul.mubr.bf16.gmra.mxu0 %v9300_v59  ;;  %1615 = vmatmul.mubr.bf16.gmra.mxu1 %v9300_v59  ;;  %v393_v59 = vld [vmem:[%s10725_s14 + $0x1d0] sm:$0xff] }
  0xb6   : > { %1271 = vmatprep.mubr.bf16.mxu0 %v15893_v2  ;;  %1624 = vmatprep.mubr.bf16.mxu1 %v15893_v2  ;;  %v525_v14 = vrot.slane %v393_v59, 4 }
  0xb8   : > { %v653_v32 = vmul.bf16 %v525_v14, %v393_v59  ;;  %v11147_v14 = vcombine.high %v10467_v12, %v10468_v13 }
  0xba   : > { %v11124_v53 = vcombine.low %v653_v32, %v654_v33  ;;  %16104 = vst [vmem:[#allocation7_spill] sm:$0xff] %v11147_v14 }
  0xbd   : > { %1272 = vmatmul.mubr.bf16.gmra.mxu0 %v9301_v4  ;;  %1625 = vmatmul.mubr.bf16.gmra.mxu1 %v9301_v4  ;;  %v517_v4 = vrot.slane %v385_v50, 4 }
  0xbe   : > { %1281 = vmatprep.mubr.bf16.mxu0 %v15893_v2  ;;  %1634 = vmatprep.mubr.bf16.mxu1 %v15893_v2 }
  0xbf   : > { %v645_v23 = vmul.bf16 %v517_v4, %v385_v50  ;;  %v10463_v4 = vld [vmem:[%s10725_s14 + $0x20] sm:$0xff] }
  0xc1   : > { %v9308_v46 = vcombine.low %v645_v23, %v646_v24  ;;  %v10471_v24 = vld [vmem:[%s10725_s14 + $0x60] sm:$0xff] }
  0xc5   : > { %1282 = vmatmul.mubr.bf16.gmra.mxu0 %v9302_v11  ;;  %1635 = vmatmul.mubr.bf16.gmra.mxu1 %v9302_v11  ;;  %v522_v11 = vrot.slane %v390_v55, 4 }
  0xc6   : > { %1291 = vmatprep.mubr.bf16.mxu0 %v15893_v2  ;;  %1644 = vmatprep.mubr.bf16.mxu1 %v15893_v2 }
  0xc7   : > { %v650_v28 = vmul.bf16 %v522_v11, %v390_v55 }
  0xc9   : > { %v11120_v51 = vcombine.low %v649_v27, %v650_v28  ;;  %v10473_v27 = vld [vmem:[%s10725_s14 + $0x70] sm:$0xff]  ;;  %v10474_v28 = vld [vmem:[%s10725_s14 + $0x78] sm:$0xff] }
  0xcd   : > { %1292 = vmatmul.mubr.bf16.gmra.mxu0 %v9303_v18  ;;  %1645 = vmatmul.mubr.bf16.gmra.mxu1 %v9303_v18  ;;  %v11097_v18 = vrot.slane %v399_v44, %v6736_v61  ;;  %v11110_v44 = vrot.slane %v402_v22, %v6736_v61 }
  0xce   : > { %1301 = vmatprep.mubr.bf16.mxu0 %v15893_v2  ;;  %1654 = vmatprep.mubr.bf16.mxu1 %v15893_v2 }
  0xd5   : > { %1302 = vmatmul.mubr.bf16.gmra.mxu0 %v9304_v25  ;;  %1655 = vmatmul.mubr.bf16.gmra.mxu1 %v9304_v25  ;;  %v647_v25 = vmul.bf16 %v519_v6, %v387_v52  ;;  %v11122_v52 = vcombine.low %v651_v30, %v652_v31  ;;  %v11139_v6 = vcombine.high %v10463_v4, %v10464_v5 }
  0xd6   : > { %1311 = vmatprep.mubr.bf16.mxu0 %v15893_v2  ;;  %1664 = vmatprep.mubr.bf16.mxu1 %v15893_v2  ;;  %v11161_v30 = vcombine.high %v10473_v27, %v10474_v28 }
  0xd7   : > { %v11118_v45 = vcombine.low %v647_v25, %v648_v26  ;;  %16102 = vst [vmem:[#allocation5_spill] sm:$0xff] %v11139_v6  ;;  %v10472_v25 = vld [vmem:[%s10725_s14 + $0x68] sm:$0xff] }
  0xd8   : > { %v11157_v26 = vcombine.high %v10471_v24, %v10472_v25  ;;  %16107 = vst [vmem:[#allocation10_spill] sm:$0xff] %v11161_v30 }
  0xda   : > { %16106 = vst [vmem:[#allocation9_spill] sm:$0xff] %v11157_v26 }
  0xdd   : > { %1312 = vmatmul.mubr.bf16.gmra.mxu0 %v9305_v34  ;;  %1665 = vmatmul.mubr.bf16.gmra.mxu1 %v9305_v34  ;;  %v655_v34 = vmul.bf16 %v527_v16, %v395_v1  ;;  %v10462_v1 = vld [vmem:[%s10725_s14 + $0x18] sm:$0xff] }
  0xde   : > { %1321 = vmatprep.mubr.bf16.mxu0 %v15893_v2  ;;  %1674 = vmatprep.mubr.bf16.mxu1 %v15893_v2  ;;  %v11135_v3 = vcombine.high %v10461_v0, %v10462_v1  ;;  %v10470_v16 = vld [vmem:[%s10725_s14 + $0x58] sm:$0xff] }
  0xdf   : > { %v11126_v54 = vcombine.low %v655_v34, %v656_v35  ;;  %v11151_v17 = vcombine.high %v10469_v15, %v10470_v16 }
  0xe0   : > { %16101 = vst [vmem:[#allocation4_spill] sm:$0xff] %v11135_v3 }
  0xe1   : > { %16105 = vst [vmem:[#allocation8_spill] sm:$0xff] %v11151_v17 }
  0xe5   : > { %1322 = vmatmul.mubr.bf16.gmra.mxu0 %v9306_v49  ;;  %1675 = vmatmul.mubr.bf16.gmra.mxu1 %v9306_v49 }
  0xe6   : > { %1331 = vmatprep.mubr.bf16.mxu0 %v15893_v2  ;;  %1684 = vmatprep.mubr.bf16.mxu1 %v15893_v2 }
  0xed   : > { %v1093_v41 = vpop.f32.mrf.mxu0  ;;  %1332 = vmatmul.mubr.bf16.gmra.mxu0 %v9307_v62  ;;  %v1446_v42 = vpop.f32.mrf.mxu1  ;;  %1685 = vmatmul.mubr.bf16.gmra.mxu1 %v9307_v62 }
  0xee   : > { %v1094_v47 = vadd.f32 %v1093_v41, %v11085_v60  ;;  %v11114_v49 = vadd.f32 %v1446_v42, %v11099_v19  ;;  %1341 = vmatprep.mubr.bf16.mxu0 %v15893_v2  ;;  %1694 = vmatprep.mubr.bf16.mxu1 %v15893_v2 }
  0xef   : > { %v1095_v50 = vpop.f32.mrf.mxu0  ;;  %v1448_v48 = vpop.f32.mrf.mxu1 }
  0xf0   : > { %v1765_v55 = vmax.f32 %v1094_v47, 0.0  ;;  %v1096_v56 = vadd.f32 %v1095_v50, %v11088_v63  ;;  %v1449_v57 = vadd.f32 %v1448_v48, %v11106_v37  ;;  %v1767_v59 = vmax.f32 %v11114_v49, 0.0 }
  0xf1   : > { %v1097_v61 = vpop.f32.mrf.mxu0  ;;  %v1450_v62 = vpop.f32.mrf.mxu1 }
  0xf2   : > { %v1766_v10 = vmax.f32 %v1096_v56, 0.0  ;;  %v1768_v11 = vmax.f32 %v1449_v57, 0.0  ;;  %v1098_v20 = vadd.f32 %v1097_v61, %v11085_v60  ;;  %v1451_v21 = vadd.f32 %v1450_v62, %v11099_v19 }
  0xf3   : > { %v1099_v22 = vpop.f32.mrf.mxu0  ;;  %v1452_v23 = vpop.f32.mrf.mxu1  ;;  %v6750_v31 = vmul.f32 %v11097_v18, %v1765_v55  ;;  %v6752_v35 = vmul.f32 %v11104_v36, %v1767_v59 }
  0xf4   : > { %v6751_v32 = vmul.f32 %v11108_v43, %v1766_v10  ;;  %v1100_v33 = vadd.f32 %v1099_v22, %v11088_v63  ;;  %v1453_v34 = vadd.f32 %v1452_v23, %v11106_v37  ;;  %v6753_v38 = vmul.f32 %v11110_v44, %v1768_v11 }
  0xf5   : > { %v1769_v40 = vmax.f32 %v1098_v20, 0.0  ;;  %v1771_v41 = vmax.f32 %v1451_v21, 0.0  ;;  %v1103_v42 = vpop.f32.mrf.mxu0  ;;  %1342 = vmatmul.mubr.bf16.gmra.mxu0 %v9308_v46  ;;  %v1456_v47 = vpop.f32.mrf.mxu1  ;;  %1695 = vmatmul.mubr.bf16.gmra.mxu1 %v9308_v46 }
  0xf6   : > { %v7006_v49 = vadd.f32 %v6751_v32, %v6750_v31  ;;  %v1770_v50 = vmax.f32 %v1100_v33, 0.0  ;;  %v1772_v48 = vmax.f32 %v1453_v34, 0.0  ;;  %v1104_v55 = vadd.f32 %v1103_v42, %v11085_v60  ;;  %1351 = vmatprep.mubr.bf16.mxu0 %v15893_v2  ;;  %1704 = vmatprep.mubr.bf16.mxu1 %v15893_v2 }
  0xf7   : > { %v6754_v56 = vmul.f32 %v11097_v18, %v1769_v40  ;;  %v11173_v57 = vpack.c.bf16 %v1771_v41, %v1767_v59  ;;  %v6756_v61 = vmul.f32 %v11104_v36, %v1771_v41  ;;  %v1457_v62 = vadd.f32 %v1456_v47, %v11099_v19  ;;  %v1105_v0 = vpop.f32.mrf.mxu0  ;;  %v1458_v1 = vpop.f32.mrf.mxu1  ;;  %v10475_v47 = vld [vmem:[%s10725_s14 + $0x80] sm:$0xff] }
  0xf8   : > { %v6755_v46 = vmul.f32 %v11108_v43, %v1770_v50  ;;  %v11178_v4 = vpack.c.bf16 %v1772_v48, %v1768_v11  ;;  %v1773_v5 = vmax.f32 %v1104_v55, 0.0  ;;  %v1106_v7 = vadd.f32 %v1105_v0, %v11088_v63 }
  0xf9   : > { %v1775_v8 = vmax.f32 %v1457_v62, 0.0  ;;  %v1459_v10 = vadd.f32 %v1458_v1, %v11106_v37  ;;  %v1107_v12 = vpop.f32.mrf.mxu0  ;;  %v1460_v13 = vpop.f32.mrf.mxu1  ;;  %v7007_v59 = vadd.f32 %v7006_v49, %v6752_v35  ;;  %v6757_v15 = vmul.f32 %v11110_v44, %v1772_v48  ;;  %v10476_v49 = vld [vmem:[%s10725_s14 + $0x88] sm:$0xff] }
  0xfa   : > { %v6758_v16 = vmul.f32 %v11097_v18, %v1773_v5  ;;  %v1774_v20 = vmax.f32 %v1106_v7, 0.0  ;;  %v1108_v21 = vadd.f32 %v1107_v12, %v11085_v60  ;;  %v1461_v22 = vadd.f32 %v1460_v13, %v11099_v19 }
  0xfb   : > { %v6760_v11 = vmul.f32 %v11104_v36, %v1775_v8  ;;  %v1776_v23 = vmax.f32 %v1459_v10, 0.0  ;;  %v1109_v24 = vpop.f32.mrf.mxu0  ;;  %v1462_v25 = vpop.f32.mrf.mxu1  ;;  %v7008_v27 = vadd.f32 %v7007_v59, %v6753_v38  ;;  %v7011_v28 = vadd.f32 %v6755_v46, %v6754_v56 }
  0xfc   : > { %v6759_v31 = vmul.f32 %v11108_v43, %v1774_v20  ;;  %v1777_v32 = vmax.f32 %v1108_v21, 0.0  ;;  %v1779_v33 = vmax.f32 %v1461_v22, 0.0  ;;  %v1110_v34 = vadd.f32 %v1109_v24, %v11088_v63 }
  0xfd   : > { %v1463_v35 = vadd.f32 %v1462_v25, %v11106_v37  ;;  %7009 = vadd.xlane.f32.xlu0 %v7008_v27  ;;  %v1113_v40 = vpop.f32.mrf.mxu0  ;;  %1352 = vmatmul.mubr.bf16.gmra.mxu0 %v11118_v45  ;;  %v1466_v41 = vpop.f32.mrf.mxu1  ;;  %v7012_v42 = vadd.f32 %v7011_v28, %v6756_v61  ;;  %v11193_v50 = vcombine.high %v10475_v47, %v10476_v49 }
  0xfe   : > { %v7016_v38 = vadd.f32 %v6759_v31, %v6758_v16  ;;  %v6761_v48 = vmul.f32 %v11110_v44, %v1776_v23  ;;  %v6762_v55 = vmul.f32 %v11097_v18, %v1777_v32  ;;  %v11197_v56 = vpack.c.bf16 %v1779_v33, %v1775_v8  ;;  %1705 = vmatmul.mubr.bf16.gmra.mxu1 %v11118_v45 }
  0xff   : > { %16108 = vst [vmem:[#allocation11_spill] sm:$0xff] %v11193_v50  ;;  %v1778_v62 = vmax.f32 %v1110_v34, 0.0  ;;  %v1780_v0 = vmax.f32 %v1463_v35, 0.0  ;;  %v1114_v1 = vadd.f32 %v1113_v40, %v11085_v60  ;;  %v1467_v46 = vadd.f32 %v1466_v41, %v11099_v19  ;;  %v1115_v61 = vpop.f32.mrf.mxu0  ;;  %v1468_v5 = vpop.f32.mrf.mxu1  ;;  %1361 = vmatprep.mubr.bf16.mxu0 %v15893_v2  ;;  %1714 = vmatprep.mubr.bf16.mxu1 %v15893_v2 }
 0x100   : > { %v1116_v7 = vadd.f32 %v1115_v61, %v11088_v63  ;;  %v1469_v10 = vadd.f32 %v1468_v5, %v11106_v37  ;;  %v7013_v8 = vadd.f32 %v7012_v42, %v6757_v15  ;;  %v7017_v12 = vadd.f32 %v7016_v38, %v6760_v11 }
 0x101   : > { %v6763_v45 = vmul.f32 %v11108_v43, %v1778_v62  ;;  %v11207_v13 = vpack.c.bf16 %v1780_v0, %v1776_v23  ;;  %v1781_v59 = vmax.f32 %v1114_v1, 0.0  ;;  %v1783_v16 = vmax.f32 %v1467_v46, 0.0  ;;  %v1117_v20 = vpop.f32.mrf.mxu0  ;;  %v1470_v21 = vpop.f32.mrf.mxu1 }
 0x102   : > { %v1782_v22 = vmax.f32 %v1116_v7, 0.0  ;;  %v1784_v24 = vmax.f32 %v1469_v10, 0.0  ;;  %7014 = vadd.xlane.f32.xlu0 %v7013_v8  ;;  %v1118_v25 = vadd.f32 %v1117_v20, %v11085_v60  ;;  %v1471_v27 = vadd.f32 %v1470_v21, %v11099_v19 }
 0x103   : > { %v6764_v28 = vmul.f32 %v11104_v36, %v1779_v33  ;;  %v6766_v15 = vmul.f32 %v11097_v18, %v1781_v59  ;;  %v6768_v11 = vmul.f32 %v11104_v36, %v1783_v16  ;;  %v1119_v31 = vpop.f32.mrf.mxu0  ;;  %v1472_v23 = vpop.f32.mrf.mxu1  ;;  %v7018_v32 = vadd.f32 %v7017_v12, %v6761_v48 }
 0x104   : > { %v6767_v34 = vmul.f32 %v11108_v43, %v1782_v22  ;;  %v1785_v35 = vmax.f32 %v1118_v25, 0.0  ;;  %v1787_v40 = vmax.f32 %v1471_v27, 0.0  ;;  %v6765_v41 = vmul.f32 %v11110_v44, %v1780_v0 }
 0x105   : > { %v1120_v42 = vadd.f32 %v1119_v31, %v11088_v63  ;;  %v1473_v47 = vadd.f32 %v1472_v23, %v11106_v37  ;;  %7019 = vadd.xlane.f32.xlu1 %v7018_v32  ;;  %v1123_v49 = vpop.f32.mrf.mxu0  ;;  %1362 = vmatmul.mubr.bf16.gmra.mxu0 %v11120_v51  ;;  %v1476_v33 = vpop.f32.mrf.mxu1  ;;  %v7021_v38 = vadd.f32 %v6763_v45, %v6762_v55 }
 0x106   : > { %v7026_v62 = vadd.f32 %v6767_v34, %v6766_v15  ;;  %v6769_v1 = vmul.f32 %v11110_v44, %v1784_v24  ;;  %v6770_v48 = vmul.f32 %v11097_v18, %v1785_v35  ;;  %v11221_v46 = vpack.c.bf16 %v1787_v40, %v1783_v16  ;;  %1715 = vmatmul.mubr.bf16.gmra.mxu1 %v11120_v51 }
 0x107   : > { %v1786_v0 = vmax.f32 %v1120_v42, 0.0  ;;  %v1788_v61 = vmax.f32 %v1473_v47, 0.0  ;;  %v1124_v5 = vadd.f32 %v1123_v49, %v11085_v60  ;;  %v1477_v7 = vadd.f32 %v1476_v33, %v11099_v19  ;;  %v1125_v10 = vpop.f32.mrf.mxu0  ;;  %v1478_v8 = vpop.f32.mrf.mxu1  ;;  %1371 = vmatprep.mubr.bf16.mxu0 %v15893_v2  ;;  %1724 = vmatprep.mubr.bf16.mxu1 %v15893_v2 }
 0x108   : > { %v1126_v55 = vadd.f32 %v1125_v10, %v11088_v63  ;;  %v1479_v12 = vadd.f32 %v1478_v8, %v11106_v37  ;;  %v7022_v45 = vadd.f32 %v7021_v38, %v6764_v28  ;;  %v7027_v59 = vadd.f32 %v7026_v62, %v6768_v11 }
 0x109   : > { %v6771_v51 = vmul.f32 %v11108_v43, %v1786_v0  ;;  %v11231_v16 = vpack.c.bf16 %v1788_v61, %v1784_v24  ;;  %v1789_v20 = vmax.f32 %v1124_v5, 0.0  ;;  %v1791_v21 = vmax.f32 %v1477_v7, 0.0  ;;  %v1127_v22 = vpop.f32.mrf.mxu0  ;;  %v1480_v25 = vpop.f32.mrf.mxu1 }
 0x10a   : > { %v1790_v27 = vmax.f32 %v1126_v55, 0.0  ;;  %v1792_v15 = vmax.f32 %v1479_v12, 0.0  ;;  %v7023_v31 = vadd.f32 %v7022_v45, %v6765_v41  ;;  %v1128_v23 = vadd.f32 %v1127_v22, %v11085_v60 }
 0x10b   : > { %v6772_v32 = vmul.f32 %v11104_v36, %v1787_v40  ;;  %v6774_v34 = vmul.f32 %v11097_v18, %v1789_v20  ;;  %v1481_v28 = vadd.f32 %v1480_v25, %v11099_v19  ;;  %v1129_v11 = vpop.f32.mrf.mxu0  ;;  %v1482_v35 = vpop.f32.mrf.mxu1  ;;  %v7028_v42 = vadd.f32 %v7027_v59, %v6769_v1 }
 0x10c   : > { %v6776_v24 = vmul.f32 %v11104_v36, %v1791_v21  ;;  %v6775_v47 = vmul.f32 %v11108_v43, %v1790_v27  ;;  %7024 = vadd.xlane.f32.xlu1 %v7023_v31  ;;  %v1793_v49 = vmax.f32 %v1128_v23, 0.0  ;;  %v1130_v33 = vadd.f32 %v1129_v11, %v11088_v63 }
 0x10d   : > { %v6777_v41 = vmul.f32 %v11110_v44, %v1792_v15  ;;  %v1795_v38 = vmax.f32 %v1481_v28, 0.0  ;;  %v1483_v40 = vadd.f32 %v1482_v35, %v11106_v37  ;;  %7029 = vadd.xlane.f32.xlu0 %v7028_v42  ;;  %v1133_v62 = vpop.f32.mrf.mxu0  ;;  %1372 = vmatmul.mubr.bf16.gmra.mxu0 %v11122_v52  ;;  %v1486_v0 = vpop.f32.mrf.mxu1  ;;  %v7031_v5 = vadd.f32 %v6771_v51, %v6770_v48 }
 0x10e   : > { %v7036_v1 = vadd.f32 %v6775_v47, %v6774_v34  ;;  %v1794_v7 = vmax.f32 %v1130_v33, 0.0  ;;  %v1134_v10 = vadd.f32 %v1133_v62, %v11085_v60  ;;  %1725 = vmatmul.mubr.bf16.gmra.mxu1 %v11122_v52  ;;  %v6773_v8 = vmul.f32 %v11110_v44, %v1788_v61  ;;  %1381 = vmatprep.mubr.bf16.mxu0 %v15893_v2 }
 0x10f   : > { %v6778_v55 = vmul.f32 %v11097_v18, %v1793_v49  ;;  %v11248_v12 = vpack.c.bf16 %v1795_v38, %v1791_v21  ;;  %v1796_v45 = vmax.f32 %v1483_v40, 0.0  ;;  %v1487_v59 = vadd.f32 %v1486_v0, %v11099_v19  ;;  %v1135_v20 = vpop.f32.mrf.mxu0  ;;  %v1488_v22 = vpop.f32.mrf.mxu1  ;;  %1734 = vmatprep.mubr.bf16.mxu1 %v15893_v2 }
 0x110   : > { %v6779_v48 = vmul.f32 %v11108_v43, %v1794_v7  ;;  %v1797_v51 = vmax.f32 %v1134_v10, 0.0  ;;  %v1136_v52 = vadd.f32 %v1135_v20, %v11088_v63  ;;  %v1489_v61 = vadd.f32 %v1488_v22, %v11106_v37 }
 0x111   : > { %v11255_v25 = vpack.c.bf16 %v1796_v45, %v1792_v15  ;;  %v1799_v27 = vmax.f32 %v1487_v59, 0.0  ;;  %v7032_v31 = vadd.f32 %v7031_v5, %v6772_v32  ;;  %v1137_v21 = vpop.f32.mrf.mxu0  ;;  %v1490_v23 = vpop.f32.mrf.mxu1  ;;  %v7037_v34 = vadd.f32 %v7036_v1, %v6776_v24 }
 0x112   : > { %v6780_v28 = vmul.f32 %v11104_v36, %v1795_v38  ;;  %v1798_v11 = vmax.f32 %v1136_v52, 0.0  ;;  %v1800_v35 = vmax.f32 %v1489_v61, 0.0  ;;  %v1138_v42 = vadd.f32 %v1137_v21, %v11085_v60 }
 0x113   : > { %v6782_v47 = vmul.f32 %v11097_v18, %v1797_v51  ;;  %v7033_v49 = vadd.f32 %v7032_v31, %v6773_v8  ;;  %v1491_v33 = vadd.f32 %v1490_v23, %v11099_v19  ;;  %v1139_v40 = vpop.f32.mrf.mxu0  ;;  %v1492_v62 = vpop.f32.mrf.mxu1  ;;  %v7038_v15 = vadd.f32 %v7037_v34, %v6777_v41 }
 0x114   : > { %v6784_v0 = vmul.f32 %v11104_v36, %v1799_v27  ;;  %v6783_v32 = vmul.f32 %v11108_v43, %v1798_v11  ;;  %v1801_v5 = vmax.f32 %v1138_v42, 0.0  ;;  %v1140_v24 = vadd.f32 %v1139_v40, %v11088_v63 }
 0x115   : > { %v6785_v38 = vmul.f32 %v11110_v44, %v1800_v35  ;;  %7034 = vadd.xlane.f32.xlu1 %v7033_v49  ;;  %v1803_v1 = vmax.f32 %v1491_v33, 0.0  ;;  %v1493_v7 = vadd.f32 %v1492_v62, %v11106_v37  ;;  %7039 = vadd.xlane.f32.xlu0 %v7038_v15  ;;  %v1143_v10 = vpop.f32.mrf.mxu0  ;;  %v1496_v8 = vpop.f32.mrf.mxu1  ;;  %v7041_v59 = vadd.f32 %v6779_v48, %v6778_v55 }
 0x116   : > { %v7046_v20 = vadd.f32 %v6783_v32, %v6782_v47  ;;  %v1802_v22 = vmax.f32 %v1140_v24, 0.0  ;;  %v1144_v41 = vadd.f32 %v1143_v10, %v11085_v60  ;;  %1382 = vmatmul.mubr.bf16.gmra.mxu0 %v11124_v53  ;;  %1735 = vmatmul.mubr.bf16.gmra.mxu1 %v11124_v53  ;;  %v6781_v51 = vmul.f32 %v11110_v44, %v1796_v45 }
 0x117   : > { %v6786_v52 = vmul.f32 %v11097_v18, %v1801_v5  ;;  %v11271_v61 = vpack.c.bf16 %v1803_v1, %v1799_v27  ;;  %v1804_v31 = vmax.f32 %v1493_v7, 0.0  ;;  %v1497_v21 = vadd.f32 %v1496_v8, %v11099_v19  ;;  %v1145_v23 = vpop.f32.mrf.mxu0  ;;  %v1498_v34 = vpop.f32.mrf.mxu1  ;;  %1391 = vmatprep.mubr.bf16.mxu0 %v15893_v2  ;;  %1744 = vmatprep.mubr.bf16.mxu1 %v15893_v2 }
 0x118   : > { %v6787_v55 = vmul.f32 %v11108_v43, %v1802_v22  ;;  %v1805_v48 = vmax.f32 %v1144_v41, 0.0  ;;  %v1146_v53 = vadd.f32 %v1145_v23, %v11088_v63  ;;  %v1499_v45 = vadd.f32 %v1498_v34, %v11106_v37 }
 0x119   : > { %16109 = vst [vmem:[#allocation12_spill] sm:$0xff] %v11271_v61  ;;  %v11279_v11 = vpack.c.bf16 %v1804_v31, %v1800_v35  ;;  %v1807_v27 = vmax.f32 %v1497_v21, 0.0  ;;  %v7042_v42 = vadd.f32 %v7041_v59, %v6780_v28  ;;  %v1147_v47 = vpop.f32.mrf.mxu0  ;;  %v1500_v49 = vpop.f32.mrf.mxu1  ;;  %v7047_v33 = vadd.f32 %v7046_v20, %v6784_v0 }
 0x11a   : > { %v6788_v40 = vmul.f32 %v11104_v36, %v1803_v1  ;;  %v1806_v62 = vmax.f32 %v1146_v53, 0.0  ;;  %v1808_v15 = vmax.f32 %v1499_v45, 0.0  ;;  %v1148_v32 = vadd.f32 %v1147_v47, %v11085_v60 }
 0x11b   : > { %v6790_v5 = vmul.f32 %v11097_v18, %v1805_v48  ;;  %v7043_v24 = vadd.f32 %v7042_v42, %v6781_v51  ;;  %v1501_v7 = vadd.f32 %v1500_v49, %v11099_v19  ;;  %v1149_v10 = vpop.f32.mrf.mxu0  ;;  %v1502_v8 = vpop.f32.mrf.mxu1  ;;  %v7048_v35 = vadd.f32 %v7047_v33, %v6785_v38 }
 0x11c   : > { %v6792_v22 = vmul.f32 %v11104_v36, %v1807_v27  ;;  %v6791_v28 = vmul.f32 %v11108_v43, %v1806_v62  ;;  %v1809_v59 = vmax.f32 %v1148_v32, 0.0  ;;  %v1150_v0 = vadd.f32 %v1149_v10, %v11088_v63 }
 0x11d   : > { %v6793_v1 = vmul.f32 %v11110_v44, %v1808_v15  ;;  %7044 = vadd.xlane.f32.xlu1 %v7043_v24  ;;  %v1811_v20 = vmax.f32 %v1501_v7, 0.0  ;;  %v1503_v41 = vadd.f32 %v1502_v8, %v11106_v37  ;;  %7049 = vadd.xlane.f32.xlu0 %v7048_v35  ;;  %v1153_v51 = vpop.f32.mrf.mxu0  ;;  %v1506_v21 = vpop.f32.mrf.mxu1  ;;  %v7051_v23 = vadd.f32 %v6787_v55, %v6786_v52 }
 0x11e   : > { %v7056_v34 = vadd.f32 %v6791_v28, %v6790_v5  ;;  %v1810_v48 = vmax.f32 %v1150_v0, 0.0  ;;  %v1154_v38 = vadd.f32 %v1153_v51, %v11085_v60  ;;  %1392 = vmatmul.mubr.bf16.gmra.mxu0 %v11126_v54  ;;  %1745 = vmatmul.mubr.bf16.gmra.mxu1 %v11126_v54  ;;  %v6789_v53 = vmul.f32 %v11110_v44, %v1804_v31 }
 0x11f   : > { %v6794_v45 = vmul.f32 %v11097_v18, %v1809_v59  ;;  %v11295_v42 = vpack.c.bf16 %v1811_v20, %v1807_v27  ;;  %v1812_v47 = vmax.f32 %v1503_v41, 0.0  ;;  %v1507_v49 = vadd.f32 %v1506_v21, %v11099_v19  ;;  %v1155_v33 = vpop.f32.mrf.mxu0  ;;  %v1508_v62 = vpop.f32.mrf.mxu1  ;;  %1401 = vmatprep.mubr.bf16.mxu0 %v15893_v2  ;;  %1754 = vmatprep.mubr.bf16.mxu1 %v15893_v2 }
 0x120   : > { %v6795_v52 = vmul.f32 %v11108_v43, %v1810_v48  ;;  %v1813_v55 = vmax.f32 %v1154_v38, 0.0  ;;  %v1156_v54 = vadd.f32 %v1155_v33, %v11088_v63  ;;  %v1509_v31 = vadd.f32 %v1508_v62, %v11106_v37 }
 0x121   : > { %16110 = vst [vmem:[#allocation13_spill] sm:$0xff] %v11295_v42  ;;  %v11303_v32 = vpack.c.bf16 %v1812_v47, %v1808_v15  ;;  %v1815_v27 = vmax.f32 %v1507_v49, 0.0  ;;  %v7052_v5 = vadd.f32 %v7051_v23, %v6788_v40  ;;  %v1157_v24 = vpop.f32.mrf.mxu0  ;;  %v1510_v7 = vpop.f32.mrf.mxu1  ;;  %v7057_v10 = vadd.f32 %v7056_v34, %v6792_v22 }
 0x122   : > { %v6796_v8 = vmul.f32 %v11104_v36, %v1811_v20  ;;  %v1814_v35 = vmax.f32 %v1156_v54, 0.0  ;;  %v1816_v28 = vmax.f32 %v1509_v31, 0.0  ;;  %v1158_v59 = vadd.f32 %v1157_v24, %v11085_v60 }
 0x123   : > { %16111 = vst [vmem:[#allocation14_spill] sm:$0xff] %v11303_v32  ;;  %v6798_v0 = vmul.f32 %v11097_v18, %v1813_v55  ;;  %v7053_v41 = vadd.f32 %v7052_v5, %v6789_v53  ;;  %v1511_v51 = vadd.f32 %v1510_v7, %v11099_v19  ;;  %v1159_v21 = vpop.f32.mrf.mxu0  ;;  %v1512_v48 = vpop.f32.mrf.mxu1  ;;  %v7058_v15 = vadd.f32 %v7057_v10, %v6793_v1 }
 0x124   : > { %v6800_v38 = vmul.f32 %v11104_v36, %v1815_v27  ;;  %v6799_v40 = vmul.f32 %v11108_v43, %v1814_v35  ;;  %v1817_v23 = vmax.f32 %v1158_v59, 0.0  ;;  %v1160_v22 = vadd.f32 %v1159_v21, %v11088_v63 }
 0x125   : > { %v6801_v20 = vmul.f32 %v11110_v44, %v1816_v28  ;;  %7054 = vadd.xlane.f32.xlu1 %v7053_v41  ;;  %v1819_v34 = vmax.f32 %v1511_v51, 0.0  ;;  %v1513_v49 = vadd.f32 %v1512_v48, %v11106_v37  ;;  %7059 = vadd.xlane.f32.xlu0 %v7058_v15  ;;  %v1163_v53 = vpop.f32.mrf.mxu0  ;;  %v1516_v33 = vpop.f32.mrf.mxu1  ;;  %v7061_v62 = vadd.f32 %v6795_v52, %v6794_v45 }
 0x126   : > { %v7066_v55 = vadd.f32 %v6799_v40, %v6798_v0  ;;  %v1818_v54 = vmax.f32 %v1160_v22, 0.0  ;;  %v1164_v1 = vadd.f32 %v1163_v53, %v11085_v60  ;;  %1402 = vmatmul.mubr.bf16.gmra.mxu0 %v11130_v58  ;;  %1755 = vmatmul.mubr.bf16.gmra.mxu1 %v11130_v58  ;;  %v6797_v31 = vmul.f32 %v11110_v44, %v1812_v47 }
 0x127   : > { %v6802_v5 = vmul.f32 %v11097_v18, %v1817_v23  ;;  %v11319_v24 = vpack.c.bf16 %v1819_v34, %v1815_v27  ;;  %v1820_v7 = vmax.f32 %v1513_v49, 0.0  ;;  %v1517_v10 = vadd.f32 %v1516_v33, %v11099_v19  ;;  %v1165_v35 = vpop.f32.mrf.mxu0  ;;  %v1518_v59 = vpop.f32.mrf.mxu1  ;;  %2373 = vmatprep.mubr.bf16.mxu0 %v15893_v2  ;;  %2726 = vmatprep.mubr.bf16.mxu1 %v15893_v2 }
 0x128   : > { %v6803_v45 = vmul.f32 %v11108_v43, %v1818_v54  ;;  %v1821_v52 = vmax.f32 %v1164_v1, 0.0  ;;  %v1166_v58 = vadd.f32 %v1165_v35, %v11088_v63  ;;  %v1519_v47 = vadd.f32 %v1518_v59, %v11106_v37 }
 0x129   : > { %16112 = vst [vmem:[#allocation15_spill] sm:$0xff] %v11319_v24  ;;  %v11327_v0 = vpack.c.bf16 %v1820_v7, %v1816_v28  ;;  %v1823_v27 = vmax.f32 %v1517_v10, 0.0  ;;  %v7062_v41 = vadd.f32 %v7061_v62, %v6796_v8  ;;  %v1167_v51 = vpop.f32.mrf.mxu0  ;;  %v1520_v21 = vpop.f32.mrf.mxu1  ;;  %v7067_v48 = vadd.f32 %v7066_v55, %v6800_v38  ;;  %v9973_v8 = vld [vmem:[%s15887_s3 + $0xe0] ss:$16 sps:$4 sm:$0xff]  }
 0x12a   : > { %v6804_v15 = vmul.f32 %v11104_v36, %v1819_v34  ;;  %v1822_v40 = vmax.f32 %v1166_v58, 0.0  ;;  %v1824_v23 = vmax.f32 %v1519_v47, 0.0  ;;  %v1168_v22 = vadd.f32 %v1167_v51, %v11085_v60 }
 0x12b   : > { %16113 = vst [vmem:[#allocation16_spill] sm:$0xff] %v11327_v0  ;;  %v6806_v49 = vmul.f32 %v11097_v18, %v1821_v52  ;;  %v7063_v53 = vadd.f32 %v7062_v41, %v6797_v31  ;;  %v1521_v33 = vadd.f32 %v1520_v21, %v11099_v19  ;;  %v1169_v54 = vpop.f32.mrf.mxu0  ;;  %v1522_v1 = vpop.f32.mrf.mxu1  ;;  %v7068_v28 = vadd.f32 %v7067_v48, %v6801_v20  ;;  %v9980_v31 = vld [vmem:[%s15887_s3 + $0xc4] ss:$16 sps:$4 sm:$0xff]  }
 0x12c   : > { %v6808_v38 = vmul.f32 %v11104_v36, %v1823_v27  ;;  %v6807_v34 = vmul.f32 %v11108_v43, %v1822_v40  ;;  %v1825_v62 = vmax.f32 %v1168_v22, 0.0  ;;  %v1170_v55 = vadd.f32 %v1169_v54, %v11088_v63 }
 0x12d   : > { %v6809_v10 = vmul.f32 %v11110_v44, %v1824_v23  ;;  %7064 = vadd.xlane.f32.xlu1 %v7063_v53  ;;  %v1827_v35 = vmax.f32 %v1521_v33, 0.0  ;;  %v11344_v20 = vadd.f32 %v1522_v1, %v11106_v37  ;;  %7069 = vadd.xlane.f32.xlu0 %v7068_v28  ;;  %v1173_v59 = vpop.f32.mrf.mxu0  ;;  %v1526_v52 = vpop.f32.mrf.mxu1  ;;  %v7071_v58 = vadd.f32 %v6803_v45, %v6802_v5  ;;  %v9985_v1 = vld [vmem:[%s15887_s3 + $0xa4] ss:$16 sps:$4 sm:$0xff]  }
 0x12e   : > { %v7076_v47 = vadd.f32 %v6807_v34, %v6806_v49  ;;  %v1826_v41 = vmax.f32 %v1170_v55, 0.0  ;;  %v1174_v51 = vadd.f32 %v1173_v59, %v11085_v60  ;;  %2374 = vmatmul.mubr.bf16.vlgmr.msra.gmra.mxu0 %v10741_v29  ;;  %2727 = vmatmul.mubr.bf16.vlgmr.msra.gmra.mxu1 %v10741_v29  ;;  %v6805_v21 = vmul.f32 %v11110_v44, %v1820_v7  ;;  %v9978_v49 = vld [vmem:[%s15887_s3 + $0xc0] ss:$16 sps:$4 sm:$0xff]  }
 0x12f   : > { %v6810_v48 = vmul.f32 %v11097_v18, %v1825_v62  ;;  %v11351_v40 = vpack.c.bf16 %v1827_v35, %v1823_v27  ;;  %v1828_v22 = vmax.f32 %v11344_v20, 0.0  ;;  %v1527_v53 = vadd.f32 %v1526_v52, %v11099_v19  ;;  %4152 = vmatpush1.bf16.msra.mxu0 %v9973_v8  ;;  %v1175_v5 = vpop.f32.mrf.mxu0  ;;  %v1528_v45 = vpop.f32.mrf.mxu1  ;;  %2383 = vmatprep.mubr.bf16.mxu0 %v15893_v2 }
 0x130   : > { %v6811_v33 = vmul.f32 %v11108_v43, %v1826_v41  ;;  %v1829_v7 = vmax.f32 %v1174_v51, 0.0  ;;  %v1176_v54 = vadd.f32 %v1175_v5, %v11088_v63  ;;  %v1529_v27 = vadd.f32 %v1528_v45, %v11106_v37  ;;  %2736 = vmatprep.mubr.bf16.mxu1 %v15893_v2  ;;  %4153 = vmatprep.subr.bf16.mxu0 %v9980_v31 }
 0x131   : > { %16114 = vst [vmem:[#allocation17_spill] sm:$0xff] %v11351_v40  ;;  %v11366_v28 = vpack.c.bf16 %v1828_v22, %v1824_v23  ;;  %v1831_v8 = vmax.f32 %v1527_v53, 0.0  ;;  %v7072_v34 = vadd.f32 %v7071_v58, %v6804_v15  ;;  %v1177_v62 = vpop.f32.mrf.mxu0  ;;  %v1530_v55 = vpop.f32.mrf.mxu1  ;;  %v7077_v20 = vadd.f32 %v7076_v47, %v6808_v38  ;;  %v9983_v47 = vld [vmem:[%s15887_s3 + $0xa0] ss:$16 sps:$4 sm:$0xff]  }
 0x132   : > { %v6812_v59 = vmul.f32 %v11104_v36, %v1827_v35  ;;  %v1830_v52 = vmax.f32 %v1176_v54, 0.0  ;;  %v1832_v41 = vmax.f32 %v1529_v27, 0.0  ;;  %v1178_v51 = vadd.f32 %v1177_v62, %v11085_v60 }
 0x133   : > { %16115 = vst [vmem:[#allocation18_spill] sm:$0xff] %v11366_v28  ;;  %v6814_v5 = vmul.f32 %v11097_v18, %v1829_v7  ;;  %v7073_v31 = vadd.f32 %v7072_v34, %v6805_v21  ;;  %v1531_v45 = vadd.f32 %v1530_v55, %v11099_v19  ;;  %v1179_v2 = vpop.f32.mrf.mxu0  ;;  %v1532_v29 = vpop.f32.mrf.mxu1  ;;  %v7078_v23 = vadd.f32 %v7077_v20, %v6809_v10 }
 0x134   : > { %4154 = vmatpush1.bf16.msra.mxu0 %v9978_v49  ;;  %v6816_v15 = vmul.f32 %v11104_v36, %v1831_v8  ;;  %v6815_v58 = vmul.f32 %v11108_v43, %v1830_v52  ;;  %v1833_v38 = vmax.f32 %v1178_v51, 0.0  ;;  %v1180_v35 = vadd.f32 %v1179_v2, %v11088_v63  ;;  %v9990_v2 = vld [vmem:[%s15887_s3 + $0x84] ss:$16 sps:$4 sm:$0xff]  }
 0x135   : > { %4155 = vmatprep.subr.bf16.mxu0 %v9985_v1  ;;  %v6817_v21 = vmul.f32 %v11110_v44, %v1832_v41  ;;  %7074 = vadd.xlane.f32.xlu1 %v7073_v31  ;;  %v1835_v53 = vmax.f32 %v1531_v45, 0.0  ;;  %v11380_v7 = vadd.f32 %v1532_v29, %v11106_v37  ;;  %v1183_v10 = vpop.f32.mrf.mxu0  ;;  %v1536_v49 = vpop.f32.mrf.mxu1  ;;  %v7081_v54 = vadd.f32 %v6811_v33, %v6810_v48 }
 0x136   : > { %7079 = vadd.xlane.f32.xlu0 %v7078_v23  ;;  %v7086_v27 = vadd.f32 %v6815_v58, %v6814_v5  ;;  %v1834_v34 = vmax.f32 %v1180_v35, 0.0  ;;  %v1184_v62 = vadd.f32 %v1183_v10, %v11085_v60  ;;  %2384 = vmatmul.mubr.bf16.gmra.mxu0 %v11135_v3  ;;  %v6813_v1 = vmul.f32 %v11110_v44, %v1828_v22 }
 0x137   : > { %2737 = vmatmul.mubr.bf16.gmra.mxu1 %v11135_v3  ;;  %v6818_v29 = vmul.f32 %v11097_v18, %v1833_v38  ;;  %v11390_v55 = vpack.c.bf16 %v1835_v53, %v1831_v8  ;;  %v1836_v48 = vmax.f32 %v11380_v7, 0.0  ;;  %v1537_v33 = vadd.f32 %v1536_v49, %v11099_v19  ;;  %v1185_v20 = vpop.f32.mrf.mxu0  ;;  %v1538_v52 = vpop.f32.mrf.mxu1  ;;  %v9988_v8 = vld [vmem:[%s15887_s3 + $0x80] ss:$16 sps:$4 sm:$0xff]  }
 0x138   : > { %v16117_v51 = vmov 0   ;;  %v6819_v5 = vmul.f32 %v11108_v43, %v1834_v34  ;;  %v1837_v31 = vmax.f32 %v1184_v62, 0.0  ;;  %v1186_v45 = vadd.f32 %v1185_v20, %v11088_v63  ;;  %4156 = vmatpush1.bf16.msra.mxu0 %v9983_v47 }
 0x139   : > { %16116 = vst [vmem:[#allocation19_spill] sm:$0xff] %v11390_v55  ;;  %2393 = vmatprep.mubr.bf16.mxu0 %v16117_v51  ;;  %2746 = vmatprep.mubr.bf16.mxu1 %v16117_v51  ;;  %v1539_v22 = vadd.f32 %v1538_v52, %v11106_v37  ;;  %v11402_v23 = vpack.c.bf16 %v1836_v48, %v1832_v41  ;;  %v1839_v58 = vmax.f32 %v1537_v33, 0.0  ;;  %v1187_v35 = vpop.f32.mrf.mxu0  ;;  %v1540_v7 = vpop.f32.mrf.mxu1 }
 0x13a   : > { %v7082_v38 = vadd.f32 %v7081_v54, %v6812_v59  ;;  %v7087_v10 = vadd.f32 %v7086_v27, %v6816_v15  ;;  %4157 = vmatprep.subr.bf16.mxu0 %v9990_v2  ;;  %v6820_v49 = vmul.f32 %v11104_v36, %v1835_v53  ;;  %v1838_v34 = vmax.f32 %v1186_v45, 0.0  ;;  %v9995_v53 = vld [vmem:[%s15887_s3 + $0x64] ss:$16 sps:$4 sm:$0xff]  }
 0x13b   : > { %16118 = vst [vmem:[#allocation20_spill] sm:$0xff] %v11402_v23  ;;  %v1840_v62 = vmax.f32 %v1539_v22, 0.0  ;;  %v1188_v20 = vadd.f32 %v1187_v35, %v11085_v60  ;;  %v6822_v47 = vmul.f32 %v11097_v18, %v1837_v31  ;;  %v1541_v3 = vadd.f32 %v1540_v7, %v11099_v19  ;;  %v1189_v39 = vpop.f32.mrf.mxu0  ;;  %v1542_v41 = vpop.f32.mrf.mxu1 }
 0x13c   : > { %v7083_v52 = vadd.f32 %v7082_v38, %v6813_v1  ;;  %v7088_v55 = vadd.f32 %v7087_v10, %v6817_v21  ;;  %v6824_v59 = vmul.f32 %v11104_v36, %v1839_v58  ;;  %v6823_v54 = vmul.f32 %v11108_v43, %v1838_v34  ;;  %4158 = vmatpush1.bf16.msra.mxu0 %v9988_v8 }
 0x13d   : > { %v1841_v15 = vmax.f32 %v1188_v20, 0.0  ;;  %v1190_v2 = vadd.f32 %v1189_v39, %v11088_v63  ;;  %v6825_v27 = vmul.f32 %v11110_v44, %v1840_v62  ;;  %v1843_v1 = vmax.f32 %v1541_v3, 0.0  ;;  %v1193_v21 = vpop.f32.mrf.mxu0  ;;  %v1546_v31 = vpop.f32.mrf.mxu1  ;;  %v9993_v39 = vld [vmem:[%s15887_s3 + $0x60] ss:$16 sps:$4 sm:$0xff]   ;;  %4159 = vmatprep.subr.bf16.mxu0 %v9995_v53 }
 0x13e   : > { %7084 = vadd.xlane.f32.xlu1 %v7083_v52  ;;  %v11416_v33 = vadd.f32 %v1542_v41, %v11106_v37  ;;  %7089 = vadd.xlane.f32.xlu0 %v7088_v55  ;;  %v7091_v45 = vadd.f32 %v6819_v5, %v6818_v29  ;;  %v7096_v22 = vadd.f32 %v6823_v54, %v6822_v47  ;;  %v10000_v55 = vld [vmem:[%s15887_s3 + $0x44] ss:$16 sps:$4 sm:$0xff]  }
 0x13f   : > { %v1842_v8 = vmax.f32 %v1190_v2, 0.0  ;;  %v1194_v38 = vadd.f32 %v1193_v21, %v11085_v60  ;;  %2394 = vmatmul.mubr.bf16.gmra.mxu0 %v11139_v6  ;;  %2747 = vmatmul.mubr.bf16.gmra.mxu1 %v11139_v6  ;;  %v6821_v3 = vmul.f32 %v11110_v44, %v1836_v48  ;;  %v6826_v29 = vmul.f32 %v11097_v18, %v1841_v15  ;;  %v1195_v10 = vpop.f32.mrf.mxu0  ;;  %v1548_v34 = vpop.f32.mrf.mxu1 }
 0x140   : > { %v11429_v5 = vpack.c.bf16 %v1843_v1, %v1839_v58  ;;  %v1844_v35 = vmax.f32 %v11416_v33, 0.0  ;;  %v1547_v7 = vadd.f32 %v1546_v31, %v11099_v19  ;;  %2403 = vmatprep.mubr.bf16.mxu0 %v16117_v51  ;;  %2756 = vmatprep.mubr.bf16.mxu1 %v16117_v51  ;;  %v1196_v47 = vadd.f32 %v1195_v10, %v11088_v63 }
 0x141   : > { %v6827_v48 = vmul.f32 %v11108_v43, %v1842_v8  ;;  %v1845_v20 = vmax.f32 %v1194_v38, 0.0  ;;  %v1549_v52 = vadd.f32 %v1548_v34, %v11106_v37  ;;  %v7092_v54 = vadd.f32 %v7091_v45, %v6820_v49  ;;  %v1197_v15 = vpop.f32.mrf.mxu0  ;;  %v1550_v2 = vpop.f32.mrf.mxu1  ;;  %4160 = vmatpush1.bf16.msra.mxu0 %v9993_v39  ;;  %v9998_v39 = vld [vmem:[%s15887_s3 + $0x40] ss:$16 sps:$4 sm:$0xff]  }
 0x142   : > { %16119 = vst [vmem:[#allocation21_spill] sm:$0xff] %v11429_v5  ;;  %v11438_v58 = vpack.c.bf16 %v1844_v35, %v1840_v62  ;;  %v1847_v41 = vmax.f32 %v1547_v7, 0.0  ;;  %v7097_v33 = vadd.f32 %v7096_v22, %v6824_v59  ;;  %v6828_v21 = vmul.f32 %v11104_v36, %v1843_v1  ;;  %4161 = vmatprep.subr.bf16.mxu0 %v10000_v55 }
 0x143   : > { %v1846_v31 = vmax.f32 %v1196_v47, 0.0  ;;  %v1848_v6 = vmax.f32 %v1549_v52, 0.0  ;;  %v1198_v8 = vadd.f32 %v1197_v15, %v11085_v60  ;;  %v6830_v38 = vmul.f32 %v11097_v18, %v1845_v20  ;;  %v1199_v62 = vpop.f32.mrf.mxu0  ;;  %v1552_v34 = vpop.f32.mrf.mxu1  ;;  %v10005_v52 = vld [vmem:[%s15887_s3 + $0x24] ss:$16 sps:$4 sm:$0xff]  }
 0x144   : > { %16120 = vst [vmem:[#allocation22_spill] sm:$0xff] %v11438_v58  ;;  %v7093_v10 = vadd.f32 %v7092_v54, %v6821_v3  ;;  %v1551_v53 = vadd.f32 %v1550_v2, %v11099_v19  ;;  %v7098_v7 = vadd.f32 %v7097_v33, %v6825_v27  ;;  %v6832_v49 = vmul.f32 %v11104_v36, %v1847_v41  ;;  %v10518_v58 = vld [vmem:[%s10725_s14 + $0x1d8] sm:$0xff] }
 0x145   : > { %v6831_v59 = vmul.f32 %v11108_v43, %v1846_v31  ;;  %v1849_v45 = vmax.f32 %v1198_v8, 0.0  ;;  %v1200_v1 = vadd.f32 %v1199_v62, %v11088_v63  ;;  %v6833_v22 = vmul.f32 %v11110_v44, %v1848_v6  ;;  %v1203_v27 = vpop.f32.mrf.mxu0  ;;  %v1556_v20 = vpop.f32.mrf.mxu1  ;;  %4162 = vmatpush1.bf16.msra.mxu0 %v9998_v39 }
 0x146   : > { %7094 = vadd.xlane.f32.xlu1 %v7093_v10  ;;  %v1851_v3 = vmax.f32 %v1551_v53, 0.0  ;;  %v11452_v55 = vadd.f32 %v1552_v34, %v11106_v37  ;;  %7099 = vadd.xlane.f32.xlu0 %v7098_v7  ;;  %v7101_v47 = vadd.f32 %v6827_v48, %v6826_v29  ;;  %v1204_v2 = vadd.f32 %v1203_v27, %v11085_v60 }
 0x147   : > { %v7106_v54 = vadd.f32 %v6831_v59, %v6830_v38  ;;  %v1850_v15 = vmax.f32 %v1200_v1, 0.0  ;;  %2404 = vmatmul.mubr.bf16.gmra.mxu0 %v11143_v9  ;;  %2757 = vmatmul.mubr.bf16.gmra.mxu1 %v11143_v9  ;;  %v6829_v33 = vmul.f32 %v11110_v44, %v1844_v35  ;;  %v6834_v31 = vmul.f32 %v11097_v18, %v1849_v45  ;;  %v1205_v10 = vpop.f32.mrf.mxu0  ;;  %v1558_v53 = vpop.f32.mrf.mxu1 }
 0x148   : > { %v11462_v8 = vpack.c.bf16 %v1851_v3, %v1847_v41  ;;  %v1852_v29 = vmax.f32 %v11452_v55, 0.0  ;;  %v1557_v48 = vadd.f32 %v1556_v20, %v11099_v19  ;;  %2413 = vmatprep.mubr.bf16.mxu0 %v16117_v51  ;;  %2766 = vmatprep.mubr.bf16.mxu1 %v16117_v51  ;;  %v1853_v62 = vmax.f32 %v1204_v2, 0.0  ;;  %v10003_v41 = vld [vmem:[%s15887_s3 + $0x20] ss:$16 sps:$4 sm:$0xff]  }
 0x149   : > { %v6835_v38 = vmul.f32 %v11108_v43, %v1850_v15  ;;  %v1206_v34 = vadd.f32 %v1205_v10, %v11088_v63  ;;  %v1559_v35 = vadd.f32 %v1558_v53, %v11106_v37  ;;  %v7102_v45 = vadd.f32 %v7101_v47, %v6828_v21  ;;  %v1207_v1 = vpop.f32.mrf.mxu0  ;;  %v1560_v55 = vpop.f32.mrf.mxu1  ;;  %4163 = vmatprep.subr.bf16.mxu0 %v10005_v52 }
 0x14a   : > { %16121 = vst [vmem:[#allocation23_spill] sm:$0xff] %v11462_v8  ;;  %v11474_v7 = vpack.c.bf16 %v1852_v29, %v1848_v6  ;;  %v1855_v59 = vmax.f32 %v1557_v48, 0.0  ;;  %v7107_v27 = vadd.f32 %v7106_v54, %v6832_v49  ;;  %v6836_v20 = vmul.f32 %v11104_v36, %v1851_v3  ;;  %4164 = vmatpush1.bf16.msra.mxu0 %v10003_v41  ;;  %v10010_v3 = vld [vmem:[%s15887_s3 + $0x4] ss:$16 sps:$4 sm:$0xff]  }
 0x14b   : > { %v1854_v15 = vmax.f32 %v1206_v34, 0.0  ;;  %v1856_v2 = vmax.f32 %v1559_v35, 0.0  ;;  %v1208_v10 = vadd.f32 %v1207_v1, %v11085_v60  ;;  %v6838_v39 = vmul.f32 %v11097_v18, %v1853_v62  ;;  %v1209_v8 = vpop.f32.mrf.mxu0  ;;  %v1562_v6 = vpop.f32.mrf.mxu1  ;;  %4165 = vmatprep.subr.bf16.mxu0 %v10010_v3 }
 0x14c   : > { %16122 = vst [vmem:[#allocation24_spill] sm:$0xff] %v11474_v7  ;;  %v7103_v53 = vadd.f32 %v7102_v45, %v6829_v33  ;;  %v1561_v9 = vadd.f32 %v1560_v55, %v11099_v19  ;;  %v7108_v7 = vadd.f32 %v7107_v27, %v6833_v22  ;;  %v6840_v21 = vmul.f32 %v11104_v36, %v1855_v59 }
 0x14d   : > { %v6839_v47 = vmul.f32 %v11108_v43, %v1854_v15  ;;  %v1857_v49 = vmax.f32 %v1208_v10, 0.0  ;;  %v1210_v52 = vadd.f32 %v1209_v8, %v11088_v63  ;;  %v6841_v54 = vmul.f32 %v11110_v44, %v1856_v2  ;;  %v1213_v22 = vpop.f32.mrf.mxu0  ;;  %v1566_v62 = vpop.f32.mrf.mxu1  ;;  %v10008_v8 = vld [vmem:[%s15887_s3] ss:$16 sps:$4 sm:$0xff]  }
 0x14e   : > { %7104 = vadd.xlane.f32.xlu1 %v7103_v53  ;;  %v1859_v33 = vmax.f32 %v1561_v9, 0.0  ;;  %v11488_v48 = vadd.f32 %v1562_v6, %v11106_v37  ;;  %7109 = vadd.xlane.f32.xlu0 %v7108_v7  ;;  %v7111_v34 = vadd.f32 %v6835_v38, %v6834_v31  ;;  %v1214_v45 = vadd.f32 %v1213_v22, %v11085_v60  ;;  %v10015_v7 = vld [vmem:[%s15887_s3 + $0x1e4] ss:$16 sps:$4 sm:$0xff]  }
 0x14f   : > { %v7116_v35 = vadd.f32 %v6839_v47, %v6838_v39  ;;  %v1858_v41 = vmax.f32 %v1210_v52, 0.0  ;;  %2414 = vmatmul.mubr.bf16.gmra.mxu0 %v11147_v14  ;;  %2767 = vmatmul.mubr.bf16.gmra.mxu1 %v11147_v14  ;;  %v6837_v9 = vmul.f32 %v11110_v44, %v1852_v29  ;;  %v6842_v31 = vmul.f32 %v11097_v18, %v1857_v49  ;;  %v1215_v27 = vpop.f32.mrf.mxu0  ;;  %v1568_v15 = vpop.f32.mrf.mxu1 }
 0x150   : > { %v11501_v38 = vpack.c.bf16 %v1859_v33, %v1855_v59  ;;  %v1860_v1 = vmax.f32 %v11488_v48, 0.0  ;;  %v1567_v55 = vadd.f32 %v1566_v62, %v11099_v19  ;;  %2423 = vmatprep.mubr.bf16.mxu0 %v16117_v51  ;;  %2776 = vmatprep.mubr.bf16.mxu1 %v16117_v51  ;;  %v1861_v10 = vmax.f32 %v1214_v45, 0.0 }
 0x151   : > { %v6843_v29 = vmul.f32 %v11108_v43, %v1858_v41  ;;  %v1216_v39 = vadd.f32 %v1215_v27, %v11088_v63  ;;  %v1569_v53 = vadd.f32 %v1568_v15, %v11106_v37  ;;  %v7112_v47 = vadd.f32 %v7111_v34, %v6836_v20  ;;  %v1217_v49 = vpop.f32.mrf.mxu0  ;;  %v1570_v52 = vpop.f32.mrf.mxu1  ;;  %4166 = vmatpush1.bf16.msra.mxu0 %v10008_v8  ;;  %v10013_v8 = vld [vmem:[%s15887_s3 + $0x1e0] ss:$16 sps:$4 sm:$0xff]  }
 0x152   : > { %16123 = vst [vmem:[#allocation25_spill] sm:$0xff] %v11501_v38  ;;  %v11510_v59 = vpack.c.bf16 %v1860_v1, %v1856_v2  ;;  %v1863_v6 = vmax.f32 %v1567_v55, 0.0  ;;  %v7117_v48 = vadd.f32 %v7116_v35, %v6840_v21  ;;  %v6844_v22 = vmul.f32 %v11104_v36, %v1859_v33  ;;  %4167 = vmatprep.subr.bf16.mxu0 %v10015_v7 }
 0x153   : > { %v1862_v62 = vmax.f32 %v1216_v39, 0.0  ;;  %v1864_v14 = vmax.f32 %v1569_v53, 0.0  ;;  %v1218_v41 = vadd.f32 %v1217_v49, %v11085_v60  ;;  %v6846_v45 = vmul.f32 %v11097_v18, %v1861_v10  ;;  %v1219_v2 = vpop.f32.mrf.mxu0  ;;  %v1572_v15 = vpop.f32.mrf.mxu1  ;;  %v10020_v53 = vld [vmem:[%s15887_s3 + $0x1c4] ss:$16 sps:$4 sm:$0xff]  }
 0x154   : > { %16124 = vst [vmem:[#allocation26_spill] sm:$0xff] %v11510_v59  ;;  %v7113_v27 = vadd.f32 %v7112_v47, %v6837_v9  ;;  %v1571_v3 = vadd.f32 %v1570_v52, %v11099_v19  ;;  %v7118_v55 = vadd.f32 %v7117_v48, %v6841_v54  ;;  %v6848_v20 = vmul.f32 %v11104_v36, %v1863_v6 }
 0x155   : > { %v6847_v21 = vmul.f32 %v11108_v43, %v1862_v62  ;;  %v1865_v34 = vmax.f32 %v1218_v41, 0.0  ;;  %v1220_v33 = vadd.f32 %v1219_v2, %v11088_v63  ;;  %v6849_v35 = vmul.f32 %v11110_v44, %v1864_v14  ;;  %v1223_v54 = vpop.f32.mrf.mxu0  ;;  %v1576_v10 = vpop.f32.mrf.mxu1  ;;  %4168 = vmatpush2.bf16.msra.mxu0 %v10013_v8 }
 0x156   : > { %7114 = vadd.xlane.f32.xlu1 %v7113_v27  ;;  %v1867_v9 = vmax.f32 %v1571_v3, 0.0  ;;  %v11524_v7 = vadd.f32 %v1572_v15, %v11106_v37  ;;  %7119 = vadd.xlane.f32.xlu0 %v7118_v55  ;;  %v7121_v39 = vadd.f32 %v6843_v29, %v6842_v31  ;;  %v1224_v52 = vadd.f32 %v1223_v54, %v11085_v60 }
 0x157   : > { %v7126_v47 = vadd.f32 %v6847_v21, %v6846_v45  ;;  %v1866_v49 = vmax.f32 %v1220_v33, 0.0  ;;  %2424 = vmatmul.mubr.bf16.gmra.mxu0 %v11151_v17  ;;  %2777 = vmatmul.mubr.bf16.gmra.mxu1 %v11151_v17  ;;  %v6845_v48 = vmul.f32 %v11110_v44, %v1860_v1  ;;  %v6850_v62 = vmul.f32 %v11097_v18, %v1865_v34  ;;  %v1225_v27 = vpop.f32.mrf.mxu0  ;;  %v1578_v3 = vpop.f32.mrf.mxu1 }
 0x158   : > { %v11534_v41 = vpack.c.bf16 %v1867_v9, %v1863_v6  ;;  %v1868_v31 = vmax.f32 %v11524_v7, 0.0  ;;  %v1577_v29 = vadd.f32 %v1576_v10, %v11099_v19  ;;  %2433 = vmatprep.mubr.bf16.mxu0 %v16117_v51  ;;  %2786 = vmatprep.mubr.bf16.mxu1 %v16117_v51  ;;  %v1869_v2 = vmax.f32 %v1224_v52, 0.0  ;;  %v10018_v6 = vld [vmem:[%s15887_s3 + $0x1c0] ss:$16 sps:$4 sm:$0xff]  }
 0x159   : > { %v6851_v45 = vmul.f32 %v11108_v43, %v1866_v49  ;;  %v1226_v15 = vadd.f32 %v1225_v27, %v11088_v63  ;;  %v1579_v1 = vadd.f32 %v1578_v3, %v11106_v37  ;;  %v7122_v34 = vadd.f32 %v7121_v39, %v6844_v22  ;;  %v1227_v33 = vpop.f32.mrf.mxu0  ;;  %v1580_v7 = vpop.f32.mrf.mxu1  ;;  %4169 = vmatprep.subr.bf16.mxu0 %v10020_v53 }
 0x15a   : > { %16125 = vst [vmem:[#allocation27_spill] sm:$0xff] %v11534_v41  ;;  %v11546_v55 = vpack.c.bf16 %v1868_v31, %v1864_v14  ;;  %v1871_v21 = vmax.f32 %v1577_v29, 0.0  ;;  %v7127_v54 = vadd.f32 %v7126_v47, %v6848_v20  ;;  %v6852_v10 = vmul.f32 %v11104_v36, %v1867_v9  ;;  %4170 = vmatpush2.bf16.msra.mxu0 %v10018_v6  ;;  %v10025_v9 = vld [vmem:[%s15887_s3 + $0x1a4] ss:$16 sps:$4 sm:$0xff]  }
 0x15b   : > { %v1870_v49 = vmax.f32 %v1226_v15, 0.0  ;;  %v1872_v52 = vmax.f32 %v1579_v1, 0.0  ;;  %v1228_v27 = vadd.f32 %v1227_v33, %v11085_v60  ;;  %v6854_v8 = vmul.f32 %v11097_v18, %v1869_v2  ;;  %v1229_v41 = vpop.f32.mrf.mxu0  ;;  %v1582_v14 = vpop.f32.mrf.mxu1  ;;  %v10023_v1 = vld [vmem:[%s15887_s3 + $0x1a0] ss:$16 sps:$4 sm:$0xff]   ;;  %4171 = vmatprep.subr.bf16.mxu0 %v10025_v9 }
 0x15c   : > { %16126 = vst [vmem:[#allocation28_spill] sm:$0xff] %v11546_v55  ;;  %v7123_v3 = vadd.f32 %v7122_v34, %v6845_v48  ;;  %v1581_v17 = vadd.f32 %v1580_v7, %v11099_v19  ;;  %v7128_v55 = vadd.f32 %v7127_v54, %v6849_v35  ;;  %v6856_v22 = vmul.f32 %v11104_v36, %v1871_v21 }
 0x15d   : > { %v6855_v39 = vmul.f32 %v11108_v43, %v1870_v49  ;;  %v1873_v20 = vmax.f32 %v1228_v27, 0.0  ;;  %v1230_v53 = vadd.f32 %v1229_v41, %v11088_v63  ;;  %v6857_v47 = vmul.f32 %v11110_v44, %v1872_v52  ;;  %v1233_v35 = vpop.f32.mrf.mxu0  ;;  %v1586_v2 = vpop.f32.mrf.mxu1 }
 0x15e   : > { %7124 = vadd.xlane.f32.xlu1 %v7123_v3  ;;  %v1875_v48 = vmax.f32 %v1581_v17, 0.0  ;;  %v1583_v29 = vadd.f32 %v1582_v14, %v11106_v37  ;;  %7129 = vadd.xlane.f32.xlu0 %v7128_v55  ;;  %v7131_v15 = vadd.f32 %v6851_v45, %v6850_v62  ;;  %v1234_v34 = vadd.f32 %v1233_v35, %v11085_v60 }
 0x15f   : > { %v7136_v41 = vadd.f32 %v6855_v39, %v6854_v8  ;;  %v1874_v6 = vmax.f32 %v1230_v53, 0.0  ;;  %2434 = vmatmul.mubr.bf16.gmra.mxu0 %v11157_v26  ;;  %2787 = vmatmul.mubr.bf16.gmra.mxu1 %v11157_v26  ;;  %v6853_v17 = vmul.f32 %v11110_v44, %v1868_v31  ;;  %v6858_v33 = vmul.f32 %v11097_v18, %v1873_v20  ;;  %v1235_v45 = vpop.f32.mrf.mxu0  ;;  %v1588_v54 = vpop.f32.mrf.mxu1 }
 0x160   : > { %v11568_v55 = vpack.c.bf16 %v1875_v48, %v1871_v21  ;;  %v1876_v7 = vmax.f32 %v1583_v29, 0.0  ;;  %v1587_v62 = vadd.f32 %v1586_v2, %v11099_v19  ;;  %2443 = vmatprep.mubr.bf16.mxu0 %v16117_v51  ;;  %2796 = vmatprep.mubr.bf16.mxu1 %v16117_v51  ;;  %v1877_v27 = vmax.f32 %v1234_v34, 0.0 }
 0x161   : > { %v6859_v49 = vmul.f32 %v11108_v43, %v1874_v6  ;;  %v1236_v8 = vadd.f32 %v1235_v45, %v11088_v63  ;;  %v1589_v31 = vadd.f32 %v1588_v54, %v11106_v37  ;;  %v7132_v14 = vadd.f32 %v7131_v15, %v6852_v10  ;;  %v1237_v39 = vpop.f32.mrf.mxu0  ;;  %v1590_v20 = vpop.f32.mrf.mxu1  ;;  %4172 = vmatpush2.bf16.msra.mxu0 %v10023_v1 }
 0x162   : > { %16127 = vst [vmem:[#allocation29_spill] sm:$0xff] %v11568_v55  ;;  %v11576_v3 = vpack.c.bf16 %v1876_v7, %v1872_v52  ;;  %v1879_v21 = vmax.f32 %v1587_v62, 0.0  ;;  %v7137_v53 = vadd.f32 %v7136_v41, %v6856_v22  ;;  %v6860_v29 = vmul.f32 %v11104_v36, %v1875_v48 }
 0x163   : > { %v1878_v35 = vmax.f32 %v1236_v8, 0.0  ;;  %v1880_v2 = vmax.f32 %v1589_v31, 0.0  ;;  %v1238_v6 = vadd.f32 %v1237_v39, %v11085_v60  ;;  %v6862_v34 = vmul.f32 %v11097_v18, %v1877_v27  ;;  %v1239_v9 = vpop.f32.mrf.mxu0  ;;  %v1592_v52 = vpop.f32.mrf.mxu1 }
 0x164   : > { %16128 = vst [vmem:[#allocation30_spill] sm:$0xff] %v11576_v3  ;;  %v7133_v45 = vadd.f32 %v7132_v14, %v6853_v17  ;;  %v1591_v54 = vadd.f32 %v1590_v20, %v11099_v19  ;;  %v7138_v26 = vadd.f32 %v7137_v53, %v6857_v47  ;;  %v6864_v10 = vmul.f32 %v11104_v36, %v1879_v21 }
 0x165   : > { %v6863_v15 = vmul.f32 %v11108_v43, %v1878_v35  ;;  %v1881_v22 = vmax.f32 %v1238_v6, 0.0  ;;  %v1240_v1 = vadd.f32 %v1239_v9, %v11088_v63  ;;  %v6865_v48 = vmul.f32 %v11110_v44, %v1880_v2  ;;  %v1243_v17 = vpop.f32.mrf.mxu0  ;;  %v1596_v27 = vpop.f32.mrf.mxu1 }
 0x166   : > { %7134 = vadd.xlane.f32.xlu1 %v7133_v45  ;;  %v1883_v41 = vmax.f32 %v1591_v54, 0.0  ;;  %v1593_v62 = vadd.f32 %v1592_v52, %v11106_v37  ;;  %7139 = vadd.xlane.f32.xlu0 %v7138_v26  ;;  %v7141_v8 = vadd.f32 %v6859_v49, %v6858_v33  ;;  %v1244_v47 = vadd.f32 %v1243_v17, %v11085_v60  ;;  %v10030_v54 = vld [vmem:[%s15887_s3 + $0x184] ss:$16 sps:$4 sm:$0xff]  }
 0x167   : > { %v7146_v31 = vadd.f32 %v6863_v15, %v6862_v34  ;;  %v1882_v14 = vmax.f32 %v1240_v1, 0.0  ;;  %2444 = vmatmul.mubr.bf16.gmra.mxu0 %v11161_v30  ;;  %2797 = vmatmul.mubr.bf16.gmra.mxu1 %v11161_v30  ;;  %v6861_v39 = vmul.f32 %v11110_v44, %v1876_v7  ;;  %v6866_v20 = vmul.f32 %v11097_v18, %v1881_v22  ;;  %v1245_v6 = vpop.f32.mrf.mxu0  ;;  %v1598_v45 = vpop.f32.mrf.mxu1 }
 0x168   : > { %v11592_v53 = vpack.c.bf16 %v1883_v41, %v1879_v21  ;;  %v1884_v35 = vmax.f32 %v1593_v62, 0.0  ;;  %v1597_v26 = vadd.f32 %v1596_v27, %v11099_v19  ;;  %2453 = vmatprep.mubr.bf16.mxu0 %v16117_v51  ;;  %2806 = vmatprep.mubr.bf16.mxu1 %v16117_v51  ;;  %v1885_v49 = vmax.f32 %v1244_v47, 0.0  ;;  %v10028_v21 = vld [vmem:[%s15887_s3 + $0x180] ss:$16 sps:$4 sm:$0xff]  }
 0x169   : > { %v6867_v33 = vmul.f32 %v11108_v43, %v1882_v14  ;;  %v1246_v34 = vadd.f32 %v1245_v6, %v11088_v63  ;;  %v1599_v7 = vadd.f32 %v1598_v45, %v11106_v37  ;;  %v7142_v15 = vadd.f32 %v7141_v8, %v6860_v29  ;;  %v1247_v22 = vpop.f32.mrf.mxu0  ;;  %v1600_v1 = vpop.f32.mrf.mxu1  ;;  %4173 = vmatprep.subr.bf16.mxu0 %v10030_v54 }
 0x16a   : > { %16129 = vst [vmem:[#allocation31_spill] sm:$0xff] %v11592_v53  ;;  %v11606_v9 = vpack.c.bf16 %v1884_v35, %v1880_v2  ;;  %v1887_v52 = vmax.f32 %v1597_v26, 0.0  ;;  %v7147_v62 = vadd.f32 %v7146_v31, %v6864_v10  ;;  %v6868_v17 = vmul.f32 %v11104_v36, %v1883_v41  ;;  %4174 = vmatpush2.bf16.msra.mxu0 %v10028_v21 }
 0x16b   : > { %v1886_v27 = vmax.f32 %v1246_v34, 0.0  ;;  %v1888_v14 = vmax.f32 %v1599_v7, 0.0  ;;  %v1248_v47 = vadd.f32 %v1247_v22, %v11085_v60  ;;  %v6870_v6 = vmul.f32 %v11097_v18, %v1885_v49  ;;  %v1249_v53 = vpop.f32.mrf.mxu0  ;;  %v1602_v2 = vpop.f32.mrf.mxu1 }
 0x16c   : > { %16130 = vst [vmem:[#allocation32_spill] sm:$0xff] %v11606_v9  ;;  %v7143_v45 = vadd.f32 %v7142_v15, %v6861_v39  ;;  %v1601_v30 = vadd.f32 %v1600_v1, %v11099_v19  ;;  %v7148_v9 = vadd.f32 %v7147_v62, %v6865_v48  ;;  %v6872_v29 = vmul.f32 %v11104_v36, %v1887_v52 }
 0x16d   : > { %v6871_v10 = vmul.f32 %v11108_v43, %v1886_v27  ;;  %v1889_v8 = vmax.f32 %v1248_v47, 0.0  ;;  %v1250_v41 = vadd.f32 %v1249_v53, %v11088_v63  ;;  %v6873_v31 = vmul.f32 %v11110_v44, %v1888_v14  ;;  %v1253_v39 = vpop.f32.mrf.mxu0  ;;  %v1606_v34 = vpop.f32.mrf.mxu1 }
 0x16e   : > { %7144 = vadd.xlane.f32.xlu1 %v7143_v45  ;;  %v1891_v26 = vmax.f32 %v1601_v30, 0.0  ;;  %v1603_v49 = vadd.f32 %v1602_v2, %v11106_v37  ;;  %7149 = vadd.xlane.f32.xlu0 %v7148_v9  ;;  %v7151_v7 = vadd.f32 %v6867_v33, %v6866_v20  ;;  %v1254_v21 = vadd.f32 %v1253_v39, %v11085_v60 }
 0x16f   : > { %v7156_v54 = vadd.f32 %v6871_v10, %v6870_v6  ;;  %v1890_v48 = vmax.f32 %v1250_v41, 0.0  ;;  %2454 = vmatmul.mubr.bf16.gmra.mxu0 %v11193_v50  ;;  %2807 = vmatmul.mubr.bf16.gmra.mxu1 %v11193_v50  ;;  %v6869_v53 = vmul.f32 %v11110_v44, %v1884_v35  ;;  %v11622_v15 = vmul.f32 %v11097_v18, %v1889_v8  ;;  %v1255_v1 = vpop.f32.mrf.mxu0  ;;  %v1608_v20 = vpop.f32.mrf.mxu1 }
 0x170   : > { %v11624_v30 = vpack.c.bf16 %v1891_v26, %v1887_v52  ;;  %v1892_v22 = vmax.f32 %v1603_v49, 0.0  ;;  %v1607_v9 = vadd.f32 %v1606_v34, %v11099_v19  ;;  %2463 = vmatprep.mubr.bf16.mxu0 %v16117_v51  ;;  %2816 = vmatprep.mubr.bf16.mxu1 %v16117_v51  ;;  %v11630_v33 = vmul.f32 %v11104_v36, %v1891_v26 }
 0x171   : > { %v1893_v62 = vmax.f32 %v1254_v21, 0.0  ;;  %v1256_v35 = vadd.f32 %v1255_v1, %v11088_v63  ;;  %v1609_v27 = vadd.f32 %v1608_v20, %v11106_v37  ;;  %v7152_v6 = vadd.f32 %v7151_v7, %v6868_v17  ;;  %v1257_v45 = vpop.f32.mrf.mxu0  ;;  %v1610_v2 = vpop.f32.mrf.mxu1 }
 0x172   : > { %16131 = vst [vmem:[#allocation33_spill] sm:$0xff] %v11624_v30  ;;  %v11634_v47 = vpack.c.bf16 %v1892_v22, %v1888_v14  ;;  %v1895_v52 = vmax.f32 %v1607_v9, 0.0  ;;  %v7157_v10 = vadd.f32 %v7156_v54, %v6872_v29  ;;  %v6875_v8 = vmul.f32 %v11108_v43, %v1890_v48 }
 0x173   : > { %v1894_v41 = vmax.f32 %v1256_v35, 0.0  ;;  %v1896_v49 = vmax.f32 %v1609_v27, 0.0  ;;  %v1258_v39 = vadd.f32 %v1257_v45, %v11085_v60  ;;  %v6878_v26 = vmul.f32 %v11097_v18, %v1893_v62  ;;  %v1259_v14 = vpop.f32.mrf.mxu0  ;;  %v1612_v1 = vpop.f32.mrf.mxu1  ;;  %v10477_v27 = vld [vmem:[%s10725_s14 + $0x90] sm:$0xff] }
 0x174   : > { %16132 = vst [vmem:[#allocation34_spill] sm:$0xff] %v11634_v47  ;;  %v7153_v34 = vadd.f32 %v7152_v6, %v6869_v53  ;;  %v1611_v21 = vadd.f32 %v1610_v2, %v11099_v19  ;;  %v7158_v9 = vadd.f32 %v7157_v10, %v6873_v31  ;;  %v6880_v17 = vmul.f32 %v11104_v36, %v1895_v52  ;;  %v10478_v6 = vld [vmem:[%s10725_s14 + $0x98] sm:$0xff]  ;;  %v10038_v45 = vld [vmem:[%s15887_s3 + $0x2e4] ss:$16 sps:$4 sm:$0xff]  }
 0x175   : > { %v6879_v29 = vmul.f32 %v11108_v43, %v1894_v41  ;;  %v1897_v7 = vmax.f32 %v1258_v39, 0.0  ;;  %v1260_v54 = vadd.f32 %v1259_v14, %v11088_v63  ;;  %v6881_v48 = vmul.f32 %v11110_v44, %v1896_v49  ;;  %v1263_v62 = vpop.f32.mrf.mxu0  ;;  %v1616_v35 = vpop.f32.mrf.mxu1  ;;  %4504 = vmatprep.subr.bf16.mxu1 %v10038_v45 }
 0x176   : > { %7154 = vadd.xlane.f32.xlu1 %v7153_v34  ;;  %v1899_v20 = vmax.f32 %v1611_v21, 0.0  ;;  %v11645_v53 = vadd.f32 %v1612_v1, %v11106_v37  ;;  %7159 = vadd.xlane.f32.xlu0 %v7158_v9  ;;  %v11649_v31 = vcombine.high %v10477_v27, %v10478_v6  ;;  %v1264_v41 = vadd.f32 %v1263_v62, %v11085_v60  ;;  %v10036_v34 = vld [vmem:[%s15887_s3 + $0x2e0] ss:$16 sps:$4 sm:$0xff]   ;;  %v10041_v27 = vld [vmem:[%s15887_s3 + $0x2c4] ss:$16 sps:$4 sm:$0xff]  }
 0x177   : > { %v7166_v2 = vadd.f32 %v6879_v29, %v6878_v26  ;;  %v1898_v10 = vmax.f32 %v1260_v54, 0.0  ;;  %v6877_v39 = vmul.f32 %v11110_v44, %v1892_v22  ;;  %v11660_v21 = vmul.f32 %v11097_v18, %v1897_v7  ;;  %v1265_v26 = vpop.f32.mrf.mxu0  ;;  %v1618_v29 = vpop.f32.mrf.mxu1  ;;  %v10033_v22 = vld [vmem:[%s15887_s3 + $0x160] ss:$16 sps:$4 sm:$0xff]   ;;  %v10035_v7 = vld [vmem:[%s15887_s3 + $0x164] ss:$16 sps:$4 sm:$0xff]   ;;  %4505 = vmatpush1.bf16.msra.mxu1 %v10036_v34 }
 0x178   : > { %16133 = vst [vmem:[#allocation35_spill] sm:$0xff] %v11649_v31  ;;  %v11662_v14 = vpack.c.bf16 %v1899_v20, %v1895_v52  ;;  %v15917_v1 = vmax.f32 %v11645_v53, 0.0  ;;  %v1617_v9 = vadd.f32 %v1616_v35, %v11099_v19  ;;  %2464 = vmatmul.mubr.bf16.gmra.mxu0 %v11649_v31  ;;  %2817 = vmatmul.mubr.bf16.gmra.mxu1 %v11649_v31  ;;  %v1901_v54 = vmax.f32 %v1264_v41, 0.0 }
 0x179   : > { %v11675_v52 = vmul.f32 %v11104_v36, %v1899_v20  ;;  %v1266_v62 = vadd.f32 %v1265_v26, %v11088_v63  ;;  %v1619_v35 = vadd.f32 %v1618_v29, %v11106_v37  ;;  %2473 = vmatprep.mubr.bf16.mxu0 %v16117_v51  ;;  %2826 = vmatprep.mubr.bf16.mxu1 %v16117_v51  ;;  %v1267_v41 = vpop.f32.mrf.mxu0  ;;  %v1620_v50 = vpop.f32.mrf.mxu1 }
 0x17a   : > { %16134 = vst [vmem:[#allocation36_spill] sm:$0xff] %v11662_v14  ;;  %v11686_v6 = vpack.c.bf16 %v15917_v1, %v1896_v49  ;;  %v1903_v31 = vmax.f32 %v1617_v9, 0.0  ;;  %v7161_v20 = vadd.f32 %v6875_v8, %v11622_v15  ;;  %v7167_v26 = vadd.f32 %v7166_v2, %v6880_v17  ;;  %4175 = vmatprep.subr.bf16.mxu0 %v10035_v7  ;;  %v10039_v49 = vld [vmem:[%s15887_s3 + $0x2c0] ss:$16 sps:$4 sm:$0xff]  }
 0x17b   : > { %v6883_v29 = vmul.f32 %v11108_v43, %v1898_v10  ;;  %v1902_v14 = vmax.f32 %v1266_v62, 0.0  ;;  %v1904_v30 = vmax.f32 %v1619_v35, 0.0  ;;  %v1268_v47 = vadd.f32 %v1267_v41, %v11085_v60  ;;  %4176 = vmatpush2.bf16.msra.mxu0 %v10033_v22  ;;  %v1269_v17 = vpop.f32.mrf.mxu0  ;;  %v1622_v45 = vpop.f32.mrf.mxu1  ;;  %4506 = vmatprep.subr.bf16.mxu1 %v10041_v27  ;;  %v10480_v41 = vld [vmem:[%s10725_s14 + $0xa8] sm:$0xff] }
 0x17c   : > { %16135 = vst [vmem:[#allocation37_spill] sm:$0xff] %v11686_v6  ;;  %v6886_v9 = vmul.f32 %v11097_v18, %v1901_v54  ;;  %v7162_v15 = vadd.f32 %v7161_v20, %v11630_v33  ;;  %v1621_v8 = vadd.f32 %v1620_v50, %v11099_v19  ;;  %v7168_v2 = vadd.f32 %v7167_v26, %v6881_v48  ;;  %v10479_v20 = vld [vmem:[%s10725_s14 + $0xa0] sm:$0xff] }
 0x17d   : > { %v6888_v10 = vmul.f32 %v11104_v36, %v1903_v31  ;;  %v6887_v34 = vmul.f32 %v11108_v43, %v1902_v14  ;;  %v1905_v22 = vmax.f32 %v1268_v47, 0.0  ;;  %v1270_v7 = vadd.f32 %v1269_v17, %v11088_v63  ;;  %v1273_v33 = vpop.f32.mrf.mxu0  ;;  %v1626_v50 = vpop.f32.mrf.mxu1  ;;  %v10045_v48 = vld [vmem:[%s15887_s3 + $0x2a4] ss:$16 sps:$4 sm:$0xff]   ;;  %4507 = vmatpush1.bf16.msra.mxu1 %v10039_v49  ;;  %v10043_v26 = vld [vmem:[%s15887_s3 + $0x2a0] ss:$16 sps:$4 sm:$0xff]  }
 0x17e   : > { %v7163_v62 = vadd.f32 %v7162_v15, %v6877_v39  ;;  %v1907_v35 = vmax.f32 %v1621_v8, 0.0  ;;  %v11701_v54 = vadd.f32 %v1622_v45, %v11106_v37  ;;  %7169 = vadd.xlane.f32.xlu0 %v7168_v2  ;;  %v11705_v1 = vcombine.high %v10479_v20, %v10480_v41  ;;  %v10048_v49 = vld [vmem:[%s15887_s3 + $0x284] ss:$16 sps:$4 sm:$0xff]   ;;  %4508 = vmatprep.subr.bf16.mxu1 %v10045_v48 }
 0x17f   : > { %v7176_v14 = vadd.f32 %v6887_v34, %v6886_v9  ;;  %v6889_v47 = vmul.f32 %v11110_v44, %v1904_v30  ;;  %v11712_v39 = vmul.f32 %v11097_v18, %v1905_v22  ;;  %v1274_v27 = vadd.f32 %v1273_v33, %v11085_v60  ;;  %v1275_v45 = vpop.f32.mrf.mxu0  ;;  %v1628_v2 = vpop.f32.mrf.mxu1 }
 0x180   : > { %16136 = vst [vmem:[#allocation38_spill] sm:$0xff] %v11705_v1  ;;  %7164 = vadd.xlane.f32.xlu1 %v7163_v62  ;;  %v11718_v15 = vpack.c.bf16 %v1907_v35, %v1903_v31  ;;  %v1906_v8 = vmax.f32 %v1270_v7, 0.0  ;;  %v15919_v17 = vmax.f32 %v11701_v54, 0.0  ;;  %v1627_v9 = vadd.f32 %v1626_v50, %v11099_v19  ;;  %2474 = vmatmul.mubr.bf16.gmra.mxu0 %v11705_v1 }
 0x181   : > { %v11727_v34 = vmul.f32 %v11104_v36, %v1907_v35  ;;  %v1909_v22 = vmax.f32 %v1274_v27, 0.0  ;;  %2827 = vmatmul.mubr.bf16.gmra.mxu1 %v11705_v1  ;;  %v1276_v31 = vadd.f32 %v1275_v45, %v11088_v63  ;;  %v1629_v7 = vadd.f32 %v1628_v2, %v11106_v37  ;;  %2483 = vmatprep.mubr.bf16.mxu0 %v16117_v51  ;;  %v1277_v20 = vpop.f32.mrf.mxu0  ;;  %v1630_v41 = vpop.f32.mrf.mxu1 }
 0x182   : > { %16137 = vst [vmem:[#allocation39_spill] sm:$0xff] %v11718_v15  ;;  %v11735_v62 = vpack.c.bf16 %v15919_v17, %v1904_v30  ;;  %v16139_v33 = vmax.f32 %v11645_v53, 0.0  ;;  %v7171_v35 = vadd.f32 %v6883_v29, %v11660_v21  ;;  %2836 = vmatprep.mubr.bf16.mxu1 %v16117_v51  ;;  %v1911_v27 = vmax.f32 %v1627_v9, 0.0  ;;  %4509 = vmatpush1.bf16.msra.mxu1 %v10043_v26  ;;  %v10046_v30 = vld [vmem:[%s15887_s3 + $0x280] ss:$16 sps:$4 sm:$0xff]  }
 0x183   : > { %v1910_v45 = vmax.f32 %v1276_v31, 0.0  ;;  %v1912_v2 = vmax.f32 %v1629_v7, 0.0  ;;  %v1278_v1 = vadd.f32 %v1277_v20, %v11085_v60  ;;  %v6891_v53 = vmul.f32 %v11108_v43, %v1906_v8  ;;  %v1279_v29 = vpop.f32.mrf.mxu0  ;;  %v1632_v17 = vpop.f32.mrf.mxu1  ;;  %4510 = vmatprep.subr.bf16.mxu1 %v10048_v49 }
 0x184   : > { %16138 = vst [vmem:[#allocation40_spill] sm:$0xff] %v11735_v62  ;;  %v6885_v50 = vmul.f32 %v11110_v44, %v16139_v33  ;;  %v7172_v33 = vadd.f32 %v7171_v35, %v11675_v52  ;;  %v1631_v21 = vadd.f32 %v1630_v41, %v11099_v19  ;;  %v7177_v15 = vadd.f32 %v7176_v14, %v6888_v10  ;;  %v10055_v10 = vld [vmem:[%s15887_s3 + $0x264] ss:$16 sps:$4 sm:$0xff]  }
 0x185   : > { %v6894_v48 = vmul.f32 %v11097_v18, %v1909_v22  ;;  %v6895_v9 = vmul.f32 %v11108_v43, %v1910_v45  ;;  %v1913_v31 = vmax.f32 %v1278_v1, 0.0  ;;  %v1280_v26 = vadd.f32 %v1279_v29, %v11088_v63  ;;  %v1283_v52 = vpop.f32.mrf.mxu0  ;;  %v1636_v35 = vpop.f32.mrf.mxu1  ;;  %v10482_v29 = vld [vmem:[%s10725_s14 + $0xb8] sm:$0xff] }
 0x186   : > { %v7173_v7 = vadd.f32 %v7172_v33, %v6885_v50  ;;  %v1915_v20 = vmax.f32 %v1631_v21, 0.0  ;;  %v11753_v62 = vadd.f32 %v1632_v17, %v11106_v37  ;;  %v7178_v8 = vadd.f32 %v7177_v15, %v6889_v47  ;;  %4511 = vmatpush1.bf16.msra.mxu1 %v10046_v30  ;;  %v10052_v33 = vld [vmem:[%s15887_s3 + $0x144] ss:$16 sps:$4 sm:$0xff]  }
 0x187   : > { %v6896_v14 = vmul.f32 %v11104_v36, %v1911_v27  ;;  %v7186_v49 = vadd.f32 %v6895_v9, %v6894_v48  ;;  %v6897_v1 = vmul.f32 %v11110_v44, %v1912_v2  ;;  %v1284_v22 = vadd.f32 %v1283_v52, %v11085_v60  ;;  %v1285_v41 = vpop.f32.mrf.mxu0  ;;  %v1638_v45 = vpop.f32.mrf.mxu1  ;;  %4512 = vmatprep.subr.bf16.mxu1 %v10055_v10 }
 0x188   : > { %7174 = vadd.xlane.f32.xlu1 %v7173_v7  ;;  %v11761_v17 = vpack.c.bf16 %v1915_v20, %v1911_v27  ;;  %v1914_v47 = vmax.f32 %v1280_v26, 0.0  ;;  %v15922_v15 = vmax.f32 %v11753_v62, 0.0  ;;  %7179 = vadd.xlane.f32.xlu0 %v7178_v8  ;;  %v1637_v50 = vadd.f32 %v1636_v35, %v11099_v19  ;;  %v10481_v27 = vld [vmem:[%s10725_s14 + $0xb0] sm:$0xff] }
 0x189   : > { %v11769_v21 = vmul.f32 %v11097_v18, %v1913_v31  ;;  %v11772_v30 = vmul.f32 %v11104_v36, %v1915_v20  ;;  %v11776_v48 = vcombine.high %v10481_v27, %v10482_v29  ;;  %v1286_v9 = vadd.f32 %v1285_v41, %v11088_v63  ;;  %v10050_v26 = vld [vmem:[%s15887_s3 + $0x140] ss:$16 sps:$4 sm:$0xff]   ;;  %v1287_v35 = vpop.f32.mrf.mxu0  ;;  %v1640_v27 = vpop.f32.mrf.mxu1  ;;  %4177 = vmatprep.subr.bf16.mxu0 %v10052_v33  ;;  %v10058_v41 = vld [vmem:[%s15887_s3 + $0x244] ss:$16 sps:$4 sm:$0xff]  }
 0x18a   : > { %16140 = vst [vmem:[#allocation41_spill] sm:$0xff] %v11761_v17  ;;  %v10053_v7 = vld [vmem:[%s15887_s3 + $0x260] ss:$16 sps:$4 sm:$0xff]   ;;  %v11787_v31 = vpack.c.bf16 %v15922_v15, %v1912_v2  ;;  %v1917_v20 = vmax.f32 %v1284_v22, 0.0  ;;  %v1919_v8 = vmax.f32 %v1637_v50, 0.0  ;;  %v1639_v52 = vadd.f32 %v1638_v45, %v11106_v37  ;;  %4178 = vmatpush2.bf16.msra.mxu0 %v10050_v26 }
 0x18b   : > { %16141 = vst [vmem:[#allocation42_spill] sm:$0xff] %v11776_v48  ;;  %2484 = vmatmul.mubr.bf16.gmra.mxu0 %v11776_v48  ;;  %2837 = vmatmul.mubr.bf16.gmra.mxu1 %v11776_v48  ;;  %v1918_v10 = vmax.f32 %v1286_v9, 0.0  ;;  %v16143_v29 = vmax.f32 %v11701_v54, 0.0  ;;  %v7181_v22 = vadd.f32 %v6891_v53, %v11712_v39  ;;  %v1288_v50 = vadd.f32 %v1287_v35, %v11085_v60  ;;  %v1289_v17 = vpop.f32.mrf.mxu0  ;;  %v1642_v39 = vpop.f32.mrf.mxu1 }
 0x18c   : > { %16142 = vst [vmem:[#allocation43_spill] sm:$0xff] %v11787_v31  ;;  %v6899_v45 = vmul.f32 %v11108_v43, %v1914_v47  ;;  %v1920_v33 = vmax.f32 %v1639_v52, 0.0  ;;  %v1641_v15 = vadd.f32 %v1640_v27, %v11099_v19  ;;  %2493 = vmatprep.mubr.bf16.mxu0 %v16117_v51  ;;  %2846 = vmatprep.mubr.bf16.mxu1 %v16117_v51  ;;  %v10484_v31 = vld [vmem:[%s10725_s14 + $0xc8] sm:$0xff] }
 0x18d   : > { %v6893_v2 = vmul.f32 %v11110_v44, %v16143_v29  ;;  %v7187_v48 = vadd.f32 %v7186_v49, %v6896_v14  ;;  %v6903_v9 = vmul.f32 %v11108_v43, %v1918_v10  ;;  %v7182_v54 = vadd.f32 %v7181_v22, %v11727_v34  ;;  %4513 = vmatpush1.bf16.msra.mxu1 %v10053_v7  ;;  %v1293_v27 = vpop.f32.mrf.mxu0  ;;  %v10056_v14 = vld [vmem:[%s15887_s3 + $0x240] ss:$16 sps:$4 sm:$0xff]   ;;  %v1646_v7 = vpop.f32.mrf.mxu1 }
 0x18e   : > { %v11807_v29 = vadd.f32 %v1289_v17, %v11088_v63  ;;  %v6902_v53 = vmul.f32 %v11097_v18, %v1917_v20  ;;  %v1923_v47 = vmax.f32 %v1641_v15, 0.0  ;;  %v11811_v52 = vadd.f32 %v1642_v39, %v11106_v37  ;;  %4514 = vmatprep.subr.bf16.mxu1 %v10058_v41  ;;  %v10483_v39 = vld [vmem:[%s10725_s14 + $0xc0] sm:$0xff] }
 0x18f   : > { %v7188_v35 = vadd.f32 %v7187_v48, %v6897_v1  ;;  %v6904_v34 = vmul.f32 %v11104_v36, %v1919_v8  ;;  %v6905_v49 = vmul.f32 %v11110_v44, %v1920_v33  ;;  %v7183_v17 = vadd.f32 %v7182_v54, %v6893_v2  ;;  %v1295_v10 = vpop.f32.mrf.mxu0 }
 0x190   : > { %v1921_v26 = vmax.f32 %v1288_v50, 0.0  ;;  %v7196_v15 = vadd.f32 %v6903_v9, %v6902_v53  ;;  %v11818_v20 = vpack.c.bf16 %v1923_v47, %v1919_v8  ;;  %v15927_v1 = vmax.f32 %v11811_v52, 0.0  ;;  %v1648_v50 = vpop.f32.mrf.mxu1  ;;  %v10062_v8 = vld [vmem:[%s15887_s3 + $0x224] ss:$16 sps:$4 sm:$0xff]  }
 0x191   : > { %7189 = vadd.xlane.f32.xlu0 %v7188_v35  ;;  %v1294_v48 = vadd.f32 %v1293_v27, %v11085_v60  ;;  %7184 = vadd.xlane.f32.xlu1 %v7183_v17  ;;  %v1922_v41 = vmax.f32 %v11807_v29, 0.0  ;;  %v1647_v22 = vadd.f32 %v1646_v7, %v11099_v19  ;;  %v11826_v6 = vcombine.high %v10483_v39, %v10484_v31  ;;  %v1297_v31 = vpop.f32.mrf.mxu0  ;;  %v10060_v27 = vld [vmem:[%s15887_s3 + $0x220] ss:$16 sps:$4 sm:$0xff]  }
 0x192   : > { %16144 = vst [vmem:[#allocation44_spill] sm:$0xff] %v11818_v20  ;;  %v1296_v2 = vadd.f32 %v1295_v10, %v11088_v63  ;;  %v11834_v9 = vpack.c.bf16 %v15927_v1, %v1920_v33  ;;  %v1649_v29 = vadd.f32 %v1648_v50, %v11106_v37  ;;  %v16147_v53 = vmax.f32 %v11753_v62, 0.0  ;;  %4515 = vmatpush1.bf16.msra.mxu1 %v10056_v14  ;;  %v1650_v10 = vpop.f32.mrf.mxu1  ;;  %v10065_v62 = vld [vmem:[%s15887_s3 + $0x204] ss:$16 sps:$4 sm:$0xff]  }
 0x193   : > { %16145 = vst [vmem:[#allocation45_spill] sm:$0xff] %v11826_v6  ;;  %v1925_v54 = vmax.f32 %v1294_v48, 0.0  ;;  %v1927_v17 = vmax.f32 %v1647_v22, 0.0  ;;  %2494 = vmatmul.mubr.bf16.gmra.mxu0 %v11826_v6  ;;  %2847 = vmatmul.mubr.bf16.gmra.mxu1 %v11826_v6  ;;  %v7191_v7 = vadd.f32 %v6899_v45, %v11769_v21  ;;  %v1298_v48 = vadd.f32 %v1297_v31, %v11085_v60  ;;  %v1299_v22 = vpop.f32.mrf.mxu0 }
 0x194   : > { %16146 = vst [vmem:[#allocation46_spill] sm:$0xff] %v11834_v9  ;;  %v6901_v35 = vmul.f32 %v11110_v44, %v16147_v53  ;;  %v1926_v33 = vmax.f32 %v1296_v2, 0.0  ;;  %v6906_v14 = vmul.f32 %v11097_v18, %v1921_v26  ;;  %v1928_v39 = vmax.f32 %v1649_v29, 0.0  ;;  %2503 = vmatprep.mubr.bf16.mxu0 %v16117_v51  ;;  %2856 = vmatprep.mubr.bf16.mxu1 %v16117_v51  ;;  %v1652_v1 = vpop.f32.mrf.mxu1 }
 0x195   : > { %v11852_v50 = vadd.f32 %v1650_v10, %v11099_v19  ;;  %v7197_v2 = vadd.f32 %v7196_v15, %v6904_v34  ;;  %v6908_v21 = vmul.f32 %v11104_v36, %v1923_v47  ;;  %v6910_v45 = vmul.f32 %v11097_v18, %v1925_v54  ;;  %4516 = vmatprep.subr.bf16.mxu1 %v10062_v8  ;;  %v1303_v20 = vpop.f32.mrf.mxu0  ;;  %v10063_v47 = vld [vmem:[%s15887_s3 + $0x200] ss:$16 sps:$4 sm:$0xff]  }
 0x196   : > { %v6911_v53 = vmul.f32 %v11108_v43, %v1926_v33  ;;  %v7192_v31 = vadd.f32 %v7191_v7, %v11772_v30  ;;  %v1929_v26 = vmax.f32 %v1298_v48, 0.0  ;;  %v1300_v10 = vadd.f32 %v1299_v22, %v11088_v63  ;;  %4517 = vmatpush1.bf16.msra.mxu1 %v10060_v27  ;;  %v1656_v54 = vpop.f32.mrf.mxu1 }
 0x197   : > { %v1931_v29 = vmax.f32 %v11852_v50, 0.0  ;;  %v11863_v6 = vadd.f32 %v1652_v1, %v11106_v37  ;;  %v6907_v34 = vmul.f32 %v11108_v43, %v1922_v41  ;;  %v6912_v30 = vmul.f32 %v11104_v36, %v1927_v17  ;;  %4518 = vmatprep.subr.bf16.mxu1 %v10065_v62  ;;  %v1305_v48 = vpop.f32.mrf.mxu0 }
 0x198   : > { %v7193_v15 = vadd.f32 %v7192_v31, %v6901_v35  ;;  %v7198_v8 = vadd.f32 %v7197_v2, %v6905_v49  ;;  %v7206_v33 = vadd.f32 %v6911_v53, %v6910_v45  ;;  %v11871_v1 = vmul.f32 %v11110_v44, %v1928_v39  ;;  %v10485_v35 = vld [vmem:[%s10725_s14 + $0xd0] sm:$0xff]  ;;  %v10486_v49 = vld [vmem:[%s10725_s14 + $0xd8] sm:$0xff]  ;;  %v1658_v62 = vpop.f32.mrf.mxu1 }
 0x199   : > { %v11873_v7 = vpack.c.bf16 %v1931_v29, %v1927_v17  ;;  %v15930_v27 = vmax.f32 %v11863_v6, 0.0  ;;  %v1930_v50 = vmax.f32 %v1300_v10, 0.0  ;;  %v1304_v41 = vadd.f32 %v1303_v20, %v11085_v60  ;;  %v10069_v17 = vld [vmem:[%s15887_s3 + $0x124] ss:$16 sps:$4 sm:$0xff]   ;;  %v1307_v10 = vpop.f32.mrf.mxu0 }
 0x19a   : > { %7194 = vadd.xlane.f32.xlu1 %v7193_v15  ;;  %7199 = vadd.xlane.f32.xlu0 %v7198_v8  ;;  %v1657_v22 = vadd.f32 %v1656_v54, %v11099_v19  ;;  %v11880_v2 = vcombine.high %v10485_v35, %v10486_v49  ;;  %v11886_v45 = vmul.f32 %v11097_v18, %v1929_v26  ;;  %v10067_v15 = vld [vmem:[%s15887_s3 + $0x120] ss:$16 sps:$4 sm:$0xff]   ;;  %v10072_v8 = vld [vmem:[%s15887_s3 + $0x3e4] ss:$16 sps:$4 sm:$0xff]  }
 0x19b   : > { %16148 = vst [vmem:[#allocation47_spill] sm:$0xff] %v11873_v7  ;;  %v11890_v53 = vpack.c.bf16 %v15930_v27, %v1928_v39  ;;  %v1306_v20 = vadd.f32 %v1305_v48, %v11088_v63  ;;  %v1659_v31 = vadd.f32 %v1658_v62, %v11106_v37  ;;  %4519 = vmatpush1.bf16.msra.mxu1 %v10063_v47  ;;  %v1933_v26 = vmax.f32 %v1304_v41, 0.0  ;;  %v1660_v47 = vpop.f32.mrf.mxu1  ;;  %v10070_v49 = vld [vmem:[%s15887_s3 + $0x3e0] ss:$16 sps:$4 sm:$0xff]  }
 0x19c   : > { %16149 = vst [vmem:[#allocation48_spill] sm:$0xff] %v11880_v2  ;;  %v1935_v54 = vmax.f32 %v1657_v22, 0.0  ;;  %2504 = vmatmul.mubr.bf16.gmra.mxu0 %v11880_v2  ;;  %2857 = vmatmul.mubr.bf16.gmra.mxu1 %v11880_v2  ;;  %v16151_v39 = vmax.f32 %v11811_v52, 0.0  ;;  %v7201_v35 = vadd.f32 %v6907_v34, %v6906_v14  ;;  %v1308_v7 = vadd.f32 %v1307_v10, %v11085_v60  ;;  %v1309_v22 = vpop.f32.mrf.mxu0  ;;  %v10075_v52 = vld [vmem:[%s15887_s3 + $0x3c4] ss:$16 sps:$4 sm:$0xff]  }
 0x19d   : > { %16150 = vst [vmem:[#allocation49_spill] sm:$0xff] %v11890_v53  ;;  %v1934_v62 = vmax.f32 %v1306_v20, 0.0  ;;  %v1936_v27 = vmax.f32 %v1659_v31, 0.0  ;;  %v1661_v41 = vadd.f32 %v1660_v47, %v11099_v19  ;;  %2513 = vmatprep.mubr.bf16.mxu0 %v16117_v51  ;;  %2866 = vmatprep.mubr.bf16.mxu1 %v16117_v51  ;;  %v6916_v14 = vmul.f32 %v11104_v36, %v1931_v29  ;;  %v1662_v31 = vpop.f32.mrf.mxu1 }
 0x19e   : > { %v6909_v48 = vmul.f32 %v11110_v44, %v16151_v39  ;;  %v6915_v34 = vmul.f32 %v11108_v43, %v1930_v50  ;;  %v7202_v39 = vadd.f32 %v7201_v35, %v6908_v21  ;;  %v1310_v20 = vadd.f32 %v1309_v22, %v11088_v63  ;;  %4179 = vmatprep.subr.bf16.mxu0 %v10069_v17  ;;  %v1313_v9 = vpop.f32.mrf.mxu0 }
 0x19f   : > { %v6918_v10 = vmul.f32 %v11097_v18, %v1933_v26  ;;  %v6919_v47 = vmul.f32 %v11108_v43, %v1934_v62  ;;  %v1937_v2 = vmax.f32 %v1308_v7, 0.0  ;;  %v1939_v53 = vmax.f32 %v1661_v41, 0.0  ;;  %4520 = vmatprep.subr.bf16.mxu1 %v10072_v8  ;;  %4180 = vmatpush2.bf16.msra.mxu0 %v10067_v15  ;;  %v1666_v35 = vpop.f32.mrf.mxu1  ;;  %v10073_v7 = vld [vmem:[%s15887_s3 + $0x3c0] ss:$16 sps:$4 sm:$0xff]  }
 0x1a0   : > { %v11921_v55 = vmul.f32 %v11104_v36, %v1935_v54  ;;  %v7203_v29 = vadd.f32 %v7202_v39, %v6909_v48  ;;  %v11924_v50 = vadd.f32 %v1662_v31, %v11106_v37  ;;  %v7207_v21 = vadd.f32 %v7206_v33, %v6912_v30  ;;  %4521 = vmatpush2.bf16.msra.mxu1 %v10070_v49  ;;  %v1315_v48 = vpop.f32.mrf.mxu0  ;;  %v10487_v39 = vld [vmem:[%s10725_s14 + $0xe0] sm:$0xff]  ;;  %v10488_v31 = vld [vmem:[%s10725_s14 + $0xe8] sm:$0xff] }
 0x1a1   : > { %v7216_v17 = vadd.f32 %v6919_v47, %v6918_v10  ;;  %v11930_v8 = vmul.f32 %v11110_v44, %v1936_v27  ;;  %v11932_v15 = vpack.c.bf16 %v1939_v53, %v1935_v54  ;;  %v1938_v26 = vmax.f32 %v1310_v20, 0.0  ;;  %4522 = vmatprep.subr.bf16.mxu1 %v10075_v52  ;;  %v1668_v41 = vpop.f32.mrf.mxu1  ;;  %v10079_v10 = vld [vmem:[%s15887_s3 + $0x3a4] ss:$16 sps:$4 sm:$0xff]  }
 0x1a2   : > { %7204 = vadd.xlane.f32.xlu1 %v7203_v29  ;;  %v11935_v30 = vmul.f32 %v11097_v18, %v1937_v2  ;;  %v15936_v33 = vmax.f32 %v11924_v50, 0.0  ;;  %v7208_v49 = vadd.f32 %v7207_v21, %v11871_v1  ;;  %v1314_v62 = vadd.f32 %v1313_v9, %v11085_v60  ;;  %v1317_v2 = vpop.f32.mrf.mxu0 }
 0x1a3   : > { %16152 = vst [vmem:[#allocation50_spill] sm:$0xff] %v11932_v15  ;;  %v1667_v22 = vadd.f32 %v1666_v35, %v11099_v19  ;;  %v11943_v54 = vcombine.high %v10487_v39, %v10488_v31  ;;  %v1316_v20 = vadd.f32 %v1315_v48, %v11088_v63  ;;  %v11947_v52 = vadd.f32 %v1668_v41, %v11106_v37  ;;  %v1670_v35 = vpop.f32.mrf.mxu1  ;;  %v10077_v48 = vld [vmem:[%s15887_s3 + $0x3a0] ss:$16 sps:$4 sm:$0xff]  }
 0x1a4   : > { %v11954_v9 = vpack.c.bf16 %v15936_v33, %v1936_v27  ;;  %7209 = vadd.xlane.f32.xlu0 %v7208_v49  ;;  %v1941_v1 = vmax.f32 %v1314_v62, 0.0  ;;  %v16155_v47 = vmax.f32 %v11863_v6, 0.0  ;;  %v7211_v21 = vadd.f32 %v6915_v34, %v11886_v45  ;;  %4523 = vmatpush2.bf16.msra.mxu1 %v10073_v7  ;;  %v1319_v62 = vpop.f32.mrf.mxu0  ;;  %v10082_v45 = vld [vmem:[%s15887_s3 + $0x384] ss:$16 sps:$4 sm:$0xff]  }
 0x1a5   : > { %16153 = vst [vmem:[#allocation51_spill] sm:$0xff] %v11943_v54  ;;  %v1943_v41 = vmax.f32 %v1667_v22, 0.0  ;;  %2514 = vmatmul.mubr.bf16.gmra.mxu0 %v11943_v54  ;;  %2867 = vmatmul.mubr.bf16.gmra.mxu1 %v11943_v54  ;;  %v1942_v27 = vmax.f32 %v1316_v20, 0.0  ;;  %v1944_v49 = vmax.f32 %v11947_v52, 0.0  ;;  %v1318_v6 = vadd.f32 %v1317_v2, %v11085_v60  ;;  %v1672_v31 = vpop.f32.mrf.mxu1 }
 0x1a6   : > { %16154 = vst [vmem:[#allocation52_spill] sm:$0xff] %v11954_v9  ;;  %v6917_v29 = vmul.f32 %v11110_v44, %v16155_v47  ;;  %v11971_v34 = vmul.f32 %v11104_v36, %v1939_v53  ;;  %v7212_v7 = vadd.f32 %v7211_v21, %v6916_v14  ;;  %v1671_v22 = vadd.f32 %v1670_v35, %v11099_v19  ;;  %v1323_v33 = vpop.f32.mrf.mxu0 }
 0x1a7   : > { %v1320_v39 = vadd.f32 %v1319_v62, %v11088_v63  ;;  %2523 = vmatprep.mubr.bf16.mxu0 %v16117_v51  ;;  %v6923_v20 = vmul.f32 %v11108_v43, %v1938_v26  ;;  %v6926_v52 = vmul.f32 %v11097_v18, %v1941_v1  ;;  %v6927_v2 = vmul.f32 %v11108_v43, %v1942_v27  ;;  %v1676_v62 = vpop.f32.mrf.mxu1  ;;  %v10080_v26 = vld [vmem:[%s15887_s3 + $0x380] ss:$16 sps:$4 sm:$0xff]  }
 0x1a8   : > { %v1945_v47 = vmax.f32 %v1318_v6, 0.0  ;;  %2876 = vmatprep.mubr.bf16.mxu1 %v16117_v51  ;;  %4524 = vmatprep.subr.bf16.mxu1 %v10079_v10  ;;  %v7213_v53 = vadd.f32 %v7212_v7, %v6917_v29  ;;  %v1947_v14 = vmax.f32 %v1671_v22, 0.0  ;;  %v1673_v35 = vadd.f32 %v1672_v31, %v11106_v37  ;;  %v1325_v6 = vpop.f32.mrf.mxu0 }
 0x1a9   : > { %v1946_v21 = vmax.f32 %v1320_v39, 0.0  ;;  %4525 = vmatpush2.bf16.msra.mxu1 %v10077_v48  ;;  %v6928_v1 = vmul.f32 %v11104_v36, %v1943_v41  ;;  %v11986_v27 = vmul.f32 %v11110_v44, %v1944_v49  ;;  %v7217_v10 = vadd.f32 %v7216_v17, %v11921_v55  ;;  %v10086_v48 = vld [vmem:[%s15887_s3 + $0x104] ss:$16 sps:$4 sm:$0xff]   ;;  %v1678_v54 = vpop.f32.mrf.mxu1 }
 0x1aa   : > { %v1324_v29 = vadd.f32 %v1323_v33, %v11085_v60  ;;  %4526 = vmatprep.subr.bf16.mxu1 %v10082_v45  ;;  %v7226_v7 = vadd.f32 %v6927_v2, %v6926_v52  ;;  %7214 = vadd.xlane.f32.xlu1 %v7213_v53  ;;  %v11993_v22 = vpack.c.bf16 %v1947_v14, %v1943_v41  ;;  %v1948_v31 = vmax.f32 %v1673_v35, 0.0  ;;  %v10489_v33 = vld [vmem:[%s10725_s14 + $0xf0] sm:$0xff]  ;;  %v10490_v45 = vld [vmem:[%s10725_s14 + $0xf8] sm:$0xff]  ;;  %v1327_v3 = vpop.f32.mrf.mxu0 }
 0x1ab   : > { %v6931_v39 = vmul.f32 %v11108_v43, %v1946_v21  ;;  %v6930_v15 = vmul.f32 %v11097_v18, %v1945_v47  ;;  %v7218_v55 = vadd.f32 %v7217_v10, %v11930_v8  ;;  %v1677_v17 = vadd.f32 %v1676_v62, %v11099_v19  ;;  %4181 = vmatprep.subr.bf16.mxu0 %v10086_v48  ;;  %v10089_v41 = vld [vmem:[%s15887_s3 + $0x364] ss:$16 sps:$4 sm:$0xff]   ;;  %v1680_v53 = vpop.f32.mrf.mxu1  ;;  %v10084_v21 = vld [vmem:[%s15887_s3 + $0x100] ss:$16 sps:$4 sm:$0xff]  }
 0x1ac   : > { %16156 = vst [vmem:[#allocation53_spill] sm:$0xff] %v11993_v22  ;;  %v12001_v9 = vcombine.high %v10489_v33, %v10490_v45  ;;  %v12007_v52 = vmul.f32 %v11104_v36, %v1947_v14  ;;  %v12009_v2 = vpack.c.bf16 %v1948_v31, %v1944_v49  ;;  %v1949_v47 = vmax.f32 %v1324_v29, 0.0  ;;  %v10087_v35 = vld [vmem:[%s15887_s3 + $0x360] ss:$16 sps:$4 sm:$0xff]   ;;  %4182 = vmatpush2.bf16.msra.mxu0 %v10084_v21 }
 0x1ad   : > { %v1326_v8 = vadd.f32 %v1325_v6, %v11088_v63  ;;  %4527 = vmatpush2.bf16.msra.mxu1 %v10080_v26  ;;  %v7231_v62 = vadd.f32 %v6931_v39, %v6930_v15  ;;  %7219 = vadd.xlane.f32.xlu0 %v7218_v55  ;;  %v1951_v10 = vmax.f32 %v1677_v17, 0.0  ;;  %v1679_v49 = vadd.f32 %v1678_v54, %v11106_v37  ;;  %v1329_v26 = vpop.f32.mrf.mxu0  ;;  %v10092_v6 = vld [vmem:[%s15887_s3 + $0x344] ss:$16 sps:$4 sm:$0xff]   ;;  %v1682_v17 = vpop.f32.mrf.mxu1 }
 0x1ae   : > { %16157 = vst [vmem:[#allocation54_spill] sm:$0xff] %v12001_v9  ;;  %16158 = vst [vmem:[#allocation55_spill] sm:$0xff] %v12009_v2  ;;  %2524 = vmatmul.mubr.bf16.gmra.mxu0 %v12001_v9  ;;  %v16159_v14 = vmax.f32 %v11924_v50, 0.0  ;;  %2877 = vmatmul.mubr.bf16.gmra.mxu1 %v12001_v9  ;;  %v7221_v15 = vadd.f32 %v6923_v20, %v11935_v30  ;;  %v1328_v39 = vadd.f32 %v1327_v3, %v11085_v60  ;;  %v10494_v2 = vld [vmem:[%s10725_s14 + $0x118] sm:$0xff] }
 0x1af   : > { %v1950_v48 = vmax.f32 %v1326_v8, 0.0  ;;  %v1681_v55 = vadd.f32 %v1680_v53, %v11099_v19  ;;  %2533 = vmatprep.mubr.bf16.mxu0 %v16117_v51  ;;  %v6933_v50 = vmul.f32 %v11110_v44, %v1948_v31  ;;  %v1952_v54 = vmax.f32 %v1679_v49, 0.0  ;;  %2886 = vmatprep.mubr.bf16.mxu1 %v16117_v51  ;;  %v1686_v53 = vpop.f32.mrf.mxu1 }
 0x1b0   : > { %v6925_v29 = vmul.f32 %v11110_v44, %v16159_v14  ;;  %v1330_v33 = vadd.f32 %v1329_v26, %v11088_v63  ;;  %v1683_v45 = vadd.f32 %v1682_v17, %v11106_v37  ;;  %v1333_v14 = vpop.f32.mrf.mxu0  ;;  %4528 = vmatprep.subr.bf16.mxu1 %v10089_v41  ;;  %v7222_v3 = vadd.f32 %v7221_v15, %v11971_v34  ;;  %v10090_v17 = vld [vmem:[%s15887_s3 + $0x340] ss:$16 sps:$4 sm:$0xff]  }
 0x1b1   : > { %v6935_v30 = vmul.f32 %v11108_v43, %v1950_v48  ;;  %v1953_v20 = vmax.f32 %v1328_v39, 0.0  ;;  %v1955_v8 = vmax.f32 %v1681_v55, 0.0  ;;  %4529 = vmatpush2.bf16.msra.mxu1 %v10087_v35  ;;  %v6934_v31 = vmul.f32 %v11097_v18, %v1949_v47  ;;  %v1688_v47 = vpop.f32.mrf.mxu1 }
 0x1b2   : > { %v1954_v49 = vmax.f32 %v1330_v33, 0.0  ;;  %v1956_v9 = vmax.f32 %v1683_v45, 0.0  ;;  %v7227_v26 = vadd.f32 %v7226_v7, %v6928_v1  ;;  %v1335_v22 = vpop.f32.mrf.mxu0  ;;  %4530 = vmatprep.subr.bf16.mxu1 %v10092_v6  ;;  %v6936_v34 = vmul.f32 %v11104_v36, %v1951_v10  ;;  %v10491_v45 = vld [vmem:[%s10725_s14 + $0x100] sm:$0xff] }
 0x1b3   : > { %v12043_v41 = vmul.f32 %v11110_v44, %v1952_v54  ;;  %v7223_v21 = vadd.f32 %v7222_v3, %v6925_v29  ;;  %v12045_v35 = vpack.c.bf16 %v1955_v8, %v1951_v10  ;;  %v7236_v48 = vadd.f32 %v6935_v30, %v6934_v31  ;;  %v10492_v29 = vld [vmem:[%s10725_s14 + $0x108] sm:$0xff]  ;;  %v1690_v3 = vpop.f32.mrf.mxu1  ;;  %v10096_v30 = vld [vmem:[%s15887_s3 + $0x324] ss:$16 sps:$4 sm:$0xff]  }
 0x1b4   : > { %v6938_v1 = vmul.f32 %v11097_v18, %v1953_v20  ;;  %v6939_v7 = vmul.f32 %v11108_v43, %v1954_v49  ;;  %v12049_v15 = vpack.c.bf16 %v1956_v9, %v1952_v54  ;;  %v1337_v39 = vpop.f32.mrf.mxu0  ;;  %v7228_v6 = vadd.f32 %v7227_v26, %v11986_v27 }
 0x1b5   : > { %16160 = vst [vmem:[#allocation56_spill] sm:$0xff] %v12045_v35  ;;  %7224 = vadd.xlane.f32.xlu1 %v7223_v21  ;;  %v1334_v55 = vadd.f32 %v1333_v14, %v11085_v60  ;;  %v1687_v33 = vadd.f32 %v1686_v53, %v11099_v19  ;;  %v12056_v10 = vcombine.high %v10491_v45, %v10492_v29  ;;  %v10094_v53 = vld [vmem:[%s15887_s3 + $0x320] ss:$16 sps:$4 sm:$0xff]   ;;  %v12081_v35 = vpop.permute.xlu1 %8884 }
 0x1b6   : > { %16161 = vst [vmem:[#allocation57_spill] sm:$0xff] %v12049_v15  ;;  %v12062_v54 = vmul.f32 %v11104_v36, %v1955_v8  ;;  %v1336_v20 = vadd.f32 %v1335_v22, %v11088_v63  ;;  %v1689_v27 = vadd.f32 %v1688_v47, %v11106_v37  ;;  %v7232_v14 = vadd.f32 %v7231_v62, %v12007_v52  ;;  %v1339_v31 = vpop.f32.mrf.mxu0  ;;  %v1692_v22 = vpop.f32.mrf.mxu1  ;;  %v10099_v52 = vld [vmem:[%s15887_s3 + $0x304] ss:$16 sps:$4 sm:$0xff]  }
 0x1b7   : > { %16162 = vst [vmem:[#allocation58_spill] sm:$0xff] %v12056_v10  ;;  %4531 = vmatpush2.bf16.msra.mxu1 %v10090_v17  ;;  %7229 = vadd.xlane.f32.xlu0 %v7228_v6  ;;  %v1957_v49 = vmax.f32 %v1334_v55, 0.0  ;;  %v1959_v26 = vmax.f32 %v1687_v33, 0.0  ;;  %v1338_v8 = vadd.f32 %v1337_v39, %v11085_v60  ;;  %v1691_v21 = vadd.f32 %v1690_v3, %v11099_v19  ;;  %v10493_v15 = vld [vmem:[%s10725_s14 + $0x110] sm:$0xff] }
 0x1b8   : > { %2534 = vmatmul.mubr.bf16.gmra.mxu0 %v12056_v10  ;;  %2887 = vmatmul.mubr.bf16.gmra.mxu1 %v12056_v10  ;;  %v1958_v62 = vmax.f32 %v1336_v20, 0.0  ;;  %v1960_v17 = vmax.f32 %v1689_v27, 0.0  ;;  %v7233_v47 = vadd.f32 %v7232_v14, %v6933_v50  ;;  %v1340_v6 = vadd.f32 %v1339_v31, %v11088_v63  ;;  %v1343_v55 = vpop.f32.mrf.mxu0  ;;  %v1696_v3 = vpop.f32.mrf.mxu1  ;;  %16163 = vst [vmem:[#allocation59_spill] sm:$0xff] %v12081_v35 }
 0x1b9   : > { %2543 = vmatprep.mubr.bf16.mxu0 %v16117_v51  ;;  %v7241_v33 = vadd.f32 %v6939_v7, %v6938_v1  ;;  %v6941_v39 = vmul.f32 %v11110_v44, %v1956_v9  ;;  %v1961_v45 = vmax.f32 %v1338_v8, 0.0  ;;  %v1963_v29 = vmax.f32 %v1691_v21, 0.0  ;;  %2896 = vmatprep.mubr.bf16.mxu1 %v16117_v51  ;;  %v10097_v9 = vld [vmem:[%s15887_s3 + $0x300] ss:$16 sps:$4 sm:$0xff]   ;;  %v10102_v1 = vld [vmem:[%s15887_s3 + $0xec] ss:$16 sps:$4 sm:$0xff]  }
 0x1ba   : > { %4532 = vmatprep.subr.bf16.mxu1 %v10096_v30  ;;  %v6942_v20 = vmul.f32 %v11097_v18, %v1957_v49  ;;  %v6943_v50 = vmul.f32 %v11108_v43, %v1958_v62  ;;  %7234 = vadd.xlane.f32.xlu1 %v7233_v47  ;;  %v1962_v27 = vmax.f32 %v1340_v6, 0.0  ;;  %v1693_v14 = vadd.f32 %v1692_v22, %v11106_v37  ;;  %v1345_v31 = vpop.f32.mrf.mxu0  ;;  %v1698_v21 = vpop.f32.mrf.mxu1 }
 0x1bb   : > { %4533 = vmatpush2.bf16.msra.mxu1 %v10094_v53  ;;  %v6944_v7 = vmul.f32 %v11104_v36, %v1959_v26  ;;  %v12094_v30 = vmul.f32 %v11110_v44, %v1960_v17  ;;  %v12096_v49 = vpack.c.bf16 %v1963_v29, %v1959_v26  ;;  %v7237_v8 = vadd.f32 %v7236_v48, %v6936_v34 }
 0x1bc   : > { %4534 = vmatprep.subr.bf16.mxu1 %v10099_v52  ;;  %v6946_v53 = vmul.f32 %v11097_v18, %v1961_v45  ;;  %v6947_v22 = vmul.f32 %v11108_v43, %v1962_v27  ;;  %v1964_v62 = vmax.f32 %v1693_v14, 0.0  ;;  %v1344_v47 = vadd.f32 %v1343_v55, %v11085_v60  ;;  %v1347_v6 = vpop.f32.mrf.mxu0  ;;  %4857 = vmatprep.subr.bf16.mxu0 %v10102_v1  ;;  %v1700_v48 = vpop.f32.mrf.mxu1 }
 0x1bd   : > { %16164 = vst [vmem:[#allocation60_spill] sm:$0xff] %v12096_v49  ;;  %v7238_v35 = vadd.f32 %v7237_v8, %v12043_v41  ;;  %v1697_v10 = vadd.f32 %v1696_v3, %v11099_v19  ;;  %v12105_v26 = vcombine.high %v10493_v15, %v10494_v2  ;;  %v1346_v34 = vadd.f32 %v1345_v31, %v11088_v63 }
 0x1be   : > { %v7246_v52 = vadd.f32 %v6943_v50, %v6942_v20  ;;  %v12109_v45 = vmul.f32 %v11104_v36, %v1963_v29  ;;  %v12111_v27 = vpack.c.bf16 %v1964_v62, %v1960_v17  ;;  %v1965_v55 = vmax.f32 %v1344_v47, 0.0  ;;  %v1349_v14 = vpop.f32.mrf.mxu0  ;;  %v1702_v31 = vpop.f32.mrf.mxu1 }
 0x1bf   : > { %16165 = vst [vmem:[#allocation61_spill] sm:$0xff] %v12105_v26  ;;  %4535 = vmatpush2.bf16.msra.mxu1 %v10097_v9  ;;  %7239 = vadd.xlane.f32.xlu0 %v7238_v35  ;;  %v1967_v41 = vmax.f32 %v1697_v10, 0.0  ;;  %v1966_v3 = vmax.f32 %v1346_v34, 0.0  ;;  %v1699_v2 = vadd.f32 %v1698_v21, %v11106_v37  ;;  %v7242_v15 = vadd.f32 %v7241_v33, %v12062_v54 }
 0x1c0   : > { %16166 = vst [vmem:[#allocation62_spill] sm:$0xff] %v12111_v27  ;;  %2544 = vmatmul.mubr.bf16.gmra.mxu0 %v12105_v26  ;;  %v7251_v1 = vadd.f32 %v6947_v22, %v6946_v53  ;;  %2897 = vmatmul.mubr.bf16.gmra.mxu1 %v12105_v26  ;;  %v1348_v29 = vadd.f32 %v1347_v6, %v11085_v60  ;;  %v1353_v50 = vpop.f32.mrf.mxu0  ;;  %v1706_v54 = vpop.f32.mrf.mxu1 }
 0x1c1   : > { %v1701_v17 = vadd.f32 %v1700_v48, %v11099_v19  ;;  %v1350_v20 = vadd.f32 %v1349_v14, %v11088_v63  ;;  %v6950_v35 = vmul.f32 %v11097_v18, %v1965_v55  ;;  %v6951_v10 = vmul.f32 %v11108_v43, %v1966_v3  ;;  %2553 = vmatprep.mubr.bf16.mxu0 %v16117_v51  ;;  %v12125_v6 = vpop.permute.xlu1 %8886 }
 0x1c2   : > { %v1968_v9 = vmax.f32 %v1699_v2, 0.0  ;;  %v7243_v8 = vadd.f32 %v7242_v15, %v6941_v39  ;;  %2906 = vmatprep.mubr.bf16.mxu1 %v16117_v51  ;;  %v1969_v33 = vmax.f32 %v1348_v29, 0.0  ;;  %v1703_v22 = vadd.f32 %v1702_v31, %v11106_v37  ;;  %v1355_v47 = vpop.f32.mrf.mxu0  ;;  %16167 = vst [vmem:[#allocation63_spill] sm:$0xff] %v12125_v6  ;;  %v1708_v14 = vpop.f32.mrf.mxu1 }
 0x1c3   : > { %v1971_v21 = vmax.f32 %v1701_v17, 0.0  ;;  %v1970_v53 = vmax.f32 %v1350_v20, 0.0  ;;  %v6949_v34 = vmul.f32 %v11110_v44, %v1964_v62  ;;  %v6952_v48 = vmul.f32 %v11104_v36, %v1967_v41 }
 0x1c4   : > { %7244 = vadd.xlane.f32.xlu1 %v7243_v8  ;;  %v7247_v39 = vadd.f32 %v7246_v52, %v6944_v7  ;;  %v1354_v55 = vadd.f32 %v1353_v50, %v11085_v60  ;;  %v7256_v3 = vadd.f32 %v6951_v10, %v6950_v35  ;;  %v6953_v2 = vmul.f32 %v11110_v44, %v1968_v9  ;;  %v1357_v29 = vpop.f32.mrf.mxu0  ;;  %v1710_v6 = vpop.f32.mrf.mxu1  ;;  %v10495_v52 = vld [vmem:[%s10725_s14 + $0x120] sm:$0xff]  ;;  %v10496_v50 = vld [vmem:[%s10725_s14 + $0x128] sm:$0xff] }
 0x1c5   : > { %v12131_v15 = vpack.c.bf16 %v1971_v21, %v1967_v41  ;;  %v6955_v31 = vmul.f32 %v11108_v43, %v1970_v53  ;;  %v6954_v17 = vmul.f32 %v11097_v18, %v1969_v33  ;;  %v1972_v62 = vmax.f32 %v1703_v22, 0.0  ;;  %v12143_v53 = vpop.permute.xlu0 %8882 }
 0x1c6   : > { %v7248_v20 = vadd.f32 %v7247_v39, %v12094_v30  ;;  %v1707_v8 = vadd.f32 %v1706_v54, %v11099_v19  ;;  %v1973_v7 = vmax.f32 %v1354_v55, 0.0  ;;  %v12139_v26 = vcombine.high %v10495_v52, %v10496_v50  ;;  %v1359_v10 = vpop.f32.mrf.mxu0  ;;  %16170 = vst [vmem:[#allocation66_spill] sm:$0xff] %v12143_v53  ;;  %v1712_v54 = vpop.f32.mrf.mxu1 }
 0x1c7   : > { %16168 = vst [vmem:[#allocation64_spill] sm:$0xff] %v12131_v15  ;;  %v1356_v35 = vadd.f32 %v1355_v47, %v11088_v63  ;;  %v1709_v41 = vadd.f32 %v1708_v14, %v11106_v37  ;;  %v6956_v33 = vmul.f32 %v11104_v36, %v1971_v21  ;;  %v7261_v22 = vadd.f32 %v6955_v31, %v6954_v17 }
 0x1c8   : > { %16169 = vst [vmem:[#allocation65_spill] sm:$0xff] %v12139_v26  ;;  %v12146_v15 = vpack.c.bf16 %v1972_v62, %v1968_v9  ;;  %7249 = vadd.xlane.f32.xlu0 %v7248_v20  ;;  %v1975_v30 = vmax.f32 %v1707_v8, 0.0  ;;  %2554 = vmatmul.mubr.bf16.gmra.mxu0 %v12139_v26  ;;  %v7252_v47 = vadd.f32 %v7251_v1, %v12109_v45  ;;  %v1363_v52 = vpop.f32.mrf.mxu0  ;;  %v1716_v17 = vpop.f32.mrf.mxu1 }
 0x1c9   : > { %2907 = vmatmul.mubr.bf16.gmra.mxu1 %v12139_v26  ;;  %v1974_v39 = vmax.f32 %v1356_v35, 0.0  ;;  %v1976_v55 = vmax.f32 %v1709_v41, 0.0  ;;  %v1358_v14 = vadd.f32 %v1357_v29, %v11085_v60  ;;  %v6957_v50 = vmul.f32 %v11110_v44, %v1972_v62  ;;  %2563 = vmatprep.mubr.bf16.mxu0 %v16117_v51 }
 0x1ca   : > { %16171 = vst [vmem:[#allocation67_spill] sm:$0xff] %v12146_v15  ;;  %v1711_v21 = vadd.f32 %v1710_v6, %v11099_v19  ;;  %v1360_v9 = vadd.f32 %v1359_v10, %v11088_v63  ;;  %v1713_v31 = vadd.f32 %v1712_v54, %v11106_v37  ;;  %v6958_v20 = vmul.f32 %v11097_v18, %v1973_v7  ;;  %v1365_v1 = vpop.f32.mrf.mxu0  ;;  %v1718_v53 = vpop.f32.mrf.mxu1  ;;  %v10497_v15 = vld [vmem:[%s10725_s14 + $0x130] sm:$0xff] }
 0x1cb   : > { %v6959_v8 = vmul.f32 %v11108_v43, %v1974_v39  ;;  %v7253_v35 = vadd.f32 %v7252_v47, %v6949_v34  ;;  %v1977_v45 = vmax.f32 %v1358_v14, 0.0  ;;  %2916 = vmatprep.mubr.bf16.mxu1 %v16117_v51  ;;  %v7257_v6 = vadd.f32 %v7256_v3, %v6952_v48  ;;  %v12160_v10 = vpop.permute.xlu1 %8888 }
 0x1cc   : > { %v1979_v29 = vmax.f32 %v1711_v21, 0.0  ;;  %v1978_v62 = vmax.f32 %v1360_v9, 0.0  ;;  %v1980_v41 = vmax.f32 %v1713_v31, 0.0  ;;  %16172 = vst [vmem:[#allocation68_spill] sm:$0xff] %v12160_v10  ;;  %v6960_v54 = vmul.f32 %v11104_v36, %v1975_v30  ;;  %v1367_v39 = vpop.f32.mrf.mxu0  ;;  %v1720_v21 = vpop.f32.mrf.mxu1 }
 0x1cd   : > { %v6961_v26 = vmul.f32 %v11110_v44, %v1976_v55  ;;  %7254 = vadd.xlane.f32.xlu1 %v7253_v35  ;;  %v1364_v34 = vadd.f32 %v1363_v52, %v11085_v60  ;;  %v1717_v7 = vadd.f32 %v1716_v17, %v11099_v19  ;;  %v7266_v47 = vadd.f32 %v6959_v8, %v6958_v20  ;;  %v10498_v20 = vld [vmem:[%s10725_s14 + $0x138] sm:$0xff] }
 0x1ce   : > { %v12166_v14 = vpack.c.bf16 %v1979_v29, %v1975_v30  ;;  %v6963_v48 = vmul.f32 %v11108_v43, %v1978_v62  ;;  %v12169_v3 = vpack.c.bf16 %v1980_v41, %v1976_v55  ;;  %v6962_v9 = vmul.f32 %v11097_v18, %v1977_v45  ;;  %v1369_v10 = vpop.f32.mrf.mxu0  ;;  %v1722_v62 = vpop.f32.mrf.mxu1 }
 0x1cf   : > { %v12173_v31 = vmul.f32 %v11104_v36, %v1979_v29  ;;  %v12176_v35 = vmul.f32 %v11110_v44, %v1980_v41  ;;  %v7258_v52 = vadd.f32 %v7257_v6, %v6953_v2  ;;  %v1981_v17 = vmax.f32 %v1364_v34, 0.0 }
 0x1d0   : > { %16173 = vst [vmem:[#allocation69_spill] sm:$0xff] %v12166_v14  ;;  %16174 = vst [vmem:[#allocation70_spill] sm:$0xff] %v12169_v3  ;;  %v12180_v30 = vcombine.high %v10497_v15, %v10498_v20  ;;  %v1366_v8 = vadd.f32 %v1365_v1, %v11088_v63  ;;  %v1719_v55 = vadd.f32 %v1718_v53, %v11106_v37  ;;  %v12184_v14 = vpop.permute.xlu0 %8890  ;;  %v1983_v29 = vmax.f32 %v1717_v7, 0.0  ;;  %v1373_v2 = vpop.f32.mrf.mxu0 }
 0x1d1   : > { %16176 = vst [vmem:[#allocation72_spill] sm:$0xff] %v12184_v14  ;;  %v7271_v45 = vadd.f32 %v6963_v48, %v6962_v9  ;;  %7259 = vadd.xlane.f32.xlu0 %v7258_v52  ;;  %v7262_v3 = vadd.f32 %v7261_v22, %v6956_v33  ;;  %v1368_v41 = vadd.f32 %v1367_v39, %v11085_v60  ;;  %v1726_v34 = vpop.f32.mrf.mxu1 }
 0x1d2   : > { %16175 = vst [vmem:[#allocation71_spill] sm:$0xff] %v12180_v30  ;;  %2564 = vmatmul.mubr.bf16.gmra.mxu0 %v12180_v30  ;;  %2917 = vmatmul.mubr.bf16.gmra.mxu1 %v12180_v30  ;;  %v1982_v15 = vmax.f32 %v1366_v8, 0.0  ;;  %v1984_v6 = vmax.f32 %v1719_v55, 0.0  ;;  %v1721_v1 = vadd.f32 %v1720_v21, %v11099_v19  ;;  %v1370_v53 = vadd.f32 %v1369_v10, %v11088_v63  ;;  %v1375_v22 = vpop.f32.mrf.mxu0  ;;  %v12196_v8 = vpop.permute.xlu1 %8892 }
 0x1d3   : > { %v7263_v20 = vadd.f32 %v7262_v3, %v6957_v50  ;;  %v1985_v14 = vmax.f32 %v1368_v41, 0.0  ;;  %v1723_v48 = vadd.f32 %v1722_v62, %v11106_v37  ;;  %2573 = vmatprep.mubr.bf16.mxu0 %v16117_v51  ;;  %2926 = vmatprep.mubr.bf16.mxu1 %v16117_v51  ;;  %v7267_v33 = vadd.f32 %v7266_v47, %v6960_v54  ;;  %v1728_v21 = vpop.f32.mrf.mxu1 }
 0x1d4   : > { %v6966_v7 = vmul.f32 %v11097_v18, %v1981_v17  ;;  %v6967_v39 = vmul.f32 %v11108_v43, %v1982_v15  ;;  %v1987_v9 = vmax.f32 %v1721_v1, 0.0  ;;  %v1986_v52 = vmax.f32 %v1370_v53, 0.0  ;;  %16177 = vst [vmem:[#allocation73_spill] sm:$0xff] %v12196_v8  ;;  %v1377_v54 = vpop.f32.mrf.mxu0  ;;  %v12204_v1 = vpop.permute.xlu0 %8894 }
 0x1d5   : > { %v6968_v50 = vmul.f32 %v11104_v36, %v1983_v29  ;;  %7264 = vadd.xlane.f32.xlu1 %v7263_v20  ;;  %v1988_v10 = vmax.f32 %v1723_v48, 0.0  ;;  %v7268_v3 = vadd.f32 %v7267_v33, %v6961_v26  ;;  %v1374_v55 = vadd.f32 %v1373_v2, %v11085_v60  ;;  %v1730_v15 = vpop.f32.mrf.mxu1  ;;  %16179 = vst [vmem:[#allocation75_spill] sm:$0xff] %v12204_v1 }
 0x1d6   : > { %v7276_v47 = vadd.f32 %v6967_v39, %v6966_v7  ;;  %v6969_v17 = vmul.f32 %v11110_v44, %v1984_v6  ;;  %v6970_v62 = vmul.f32 %v11097_v18, %v1985_v14  ;;  %v12202_v41 = vpack.c.bf16 %v1987_v9, %v1983_v29  ;;  %v1379_v48 = vpop.f32.mrf.mxu0  ;;  %v10499_v7 = vld [vmem:[%s10725_s14 + $0x140] sm:$0xff]  ;;  %v10500_v39 = vld [vmem:[%s10725_s14 + $0x148] sm:$0xff] }
 0x1d7   : > { %v12207_v53 = vmul.f32 %v11104_v36, %v1987_v9  ;;  %v6971_v26 = vmul.f32 %v11108_v43, %v1986_v52  ;;  %v12210_v20 = vpack.c.bf16 %v1988_v10, %v1984_v6  ;;  %7269 = vadd.xlane.f32.xlu0 %v7268_v3  ;;  %v1727_v2 = vadd.f32 %v1726_v34, %v11099_v19  ;;  %v1732_v1 = vpop.f32.mrf.mxu1 }
 0x1d8   : > { %16178 = vst [vmem:[#allocation74_spill] sm:$0xff] %v12202_v41  ;;  %v1989_v33 = vmax.f32 %v1374_v55, 0.0  ;;  %v12215_v14 = vcombine.high %v10499_v7, %v10500_v39  ;;  %v1376_v29 = vadd.f32 %v1375_v22, %v11088_v63  ;;  %v1729_v8 = vadd.f32 %v1728_v21, %v11106_v37  ;;  %v1383_v7 = vpop.f32.mrf.mxu0 }
 0x1d9   : > { %16180 = vst [vmem:[#allocation76_spill] sm:$0xff] %v12210_v20  ;;  %v6973_v9 = vmul.f32 %v11110_v44, %v1988_v10  ;;  %v1991_v30 = vmax.f32 %v1727_v2, 0.0  ;;  %v7272_v6 = vadd.f32 %v7271_v45, %v12173_v31  ;;  %v1378_v52 = vadd.f32 %v1377_v54, %v11085_v60  ;;  %v1736_v31 = vpop.f32.mrf.mxu1 }
 0x1da   : > { %16181 = vst [vmem:[#allocation77_spill] sm:$0xff] %v12215_v14  ;;  %2574 = vmatmul.mubr.bf16.gmra.mxu0 %v12215_v14  ;;  %2927 = vmatmul.mubr.bf16.gmra.mxu1 %v12215_v14  ;;  %v1990_v34 = vmax.f32 %v1376_v29, 0.0  ;;  %v1992_v3 = vmax.f32 %v1729_v8, 0.0  ;;  %v1731_v55 = vadd.f32 %v1730_v15, %v11099_v19  ;;  %v1380_v22 = vadd.f32 %v1379_v48, %v11088_v63  ;;  %v1385_v29 = vpop.f32.mrf.mxu0  ;;  %v12232_v48 = vpop.permute.xlu1 %8896 }
 0x1db   : > { %v7281_v21 = vadd.f32 %v6971_v26, %v6970_v62  ;;  %v7273_v39 = vadd.f32 %v7272_v6, %v12176_v35  ;;  %v1993_v10 = vmax.f32 %v1378_v52, 0.0  ;;  %v1733_v2 = vadd.f32 %v1732_v1, %v11106_v37  ;;  %2583 = vmatprep.mubr.bf16.mxu0 %v16117_v51  ;;  %2936 = vmatprep.mubr.bf16.mxu1 %v16117_v51  ;;  %v1738_v6 = vpop.f32.mrf.mxu1 }
 0x1dc   : > { %v6974_v45 = vmul.f32 %v11097_v18, %v1989_v33  ;;  %v6975_v8 = vmul.f32 %v11108_v43, %v1990_v34  ;;  %v1995_v54 = vmax.f32 %v1731_v55, 0.0  ;;  %v1994_v15 = vmax.f32 %v1380_v22, 0.0  ;;  %16182 = vst [vmem:[#allocation78_spill] sm:$0xff] %v12232_v48  ;;  %v1387_v22 = vpop.f32.mrf.mxu0 }
 0x1dd   : > { %v6976_v62 = vmul.f32 %v11104_v36, %v1991_v30  ;;  %7274 = vadd.xlane.f32.xlu1 %v7273_v39  ;;  %v1996_v35 = vmax.f32 %v1733_v2, 0.0  ;;  %v7277_v1 = vadd.f32 %v7276_v47, %v6968_v50  ;;  %v1384_v26 = vadd.f32 %v1383_v7, %v11085_v60  ;;  %v1740_v47 = vpop.f32.mrf.mxu1 }
 0x1de   : > { %v7286_v52 = vadd.f32 %v6975_v8, %v6974_v45  ;;  %v6977_v33 = vmul.f32 %v11110_v44, %v1992_v3  ;;  %v6978_v34 = vmul.f32 %v11097_v18, %v1993_v10  ;;  %v12238_v55 = vpack.c.bf16 %v1995_v54, %v1991_v30  ;;  %v10501_v45 = vld [vmem:[%s10725_s14 + $0x150] sm:$0xff]  ;;  %v10502_v8 = vld [vmem:[%s10725_s14 + $0x158] sm:$0xff]  ;;  %v1389_v10 = vpop.f32.mrf.mxu0 }
 0x1df   : > { %v12241_v48 = vmul.f32 %v11104_v36, %v1995_v54  ;;  %v6979_v39 = vmul.f32 %v11108_v43, %v1994_v15  ;;  %v12244_v2 = vpack.c.bf16 %v1996_v35, %v1992_v3  ;;  %v7278_v50 = vadd.f32 %v7277_v1, %v6969_v17 }
 0x1e0   : > { %16183 = vst [vmem:[#allocation79_spill] sm:$0xff] %v12238_v55  ;;  %v1997_v14 = vmax.f32 %v1384_v26, 0.0  ;;  %v1737_v7 = vadd.f32 %v1736_v31, %v11099_v19  ;;  %v12249_v41 = vcombine.high %v10501_v45, %v10502_v8  ;;  %v1386_v30 = vadd.f32 %v1385_v29, %v11088_v63  ;;  %v12252_v55 = vpop.permute.xlu0 %8898  ;;  %v1742_v31 = vpop.f32.mrf.mxu1 }
 0x1e1   : > { %16184 = vst [vmem:[#allocation80_spill] sm:$0xff] %v12244_v2  ;;  %16186 = vst [vmem:[#allocation82_spill] sm:$0xff] %v12252_v55  ;;  %v12255_v54 = vmul.f32 %v11110_v44, %v1996_v35  ;;  %7279 = vadd.xlane.f32.xlu0 %v7278_v50  ;;  %v1739_v3 = vadd.f32 %v1738_v6, %v11106_v37  ;;  %v7282_v17 = vadd.f32 %v7281_v21, %v12207_v53  ;;  %v1393_v35 = vpop.f32.mrf.mxu0 }
 0x1e2   : > { %16185 = vst [vmem:[#allocation81_spill] sm:$0xff] %v12249_v41  ;;  %v1388_v15 = vadd.f32 %v1387_v22, %v11085_v60  ;;  %v1999_v1 = vmax.f32 %v1737_v7, 0.0  ;;  %2584 = vmatmul.mubr.bf16.gmra.mxu0 %v12249_v41  ;;  %2937 = vmatmul.mubr.bf16.gmra.mxu1 %v12249_v41  ;;  %v1998_v29 = vmax.f32 %v1386_v30, 0.0  ;;  %v1741_v26 = vadd.f32 %v1740_v47, %v11099_v19  ;;  %v1746_v53 = vpop.f32.mrf.mxu1  ;;  %v12269_v41 = vpop.permute.xlu1 %8900 }
 0x1e3   : > { %v1390_v45 = vadd.f32 %v1389_v10, %v11088_v63  ;;  %v2000_v8 = vmax.f32 %v1739_v3, 0.0  ;;  %v7283_v50 = vadd.f32 %v7282_v17, %v6973_v9  ;;  %v1743_v6 = vadd.f32 %v1742_v31, %v11106_v37  ;;  %2593 = vmatprep.mubr.bf16.mxu0 %v16117_v51  ;;  %2946 = vmatprep.mubr.bf16.mxu1 %v16117_v51  ;;  %v1395_v47 = vpop.f32.mrf.mxu0 }
 0x1e4   : > { %v2001_v55 = vmax.f32 %v1388_v15, 0.0  ;;  %v6982_v21 = vmul.f32 %v11097_v18, %v1997_v14  ;;  %v6983_v22 = vmul.f32 %v11108_v43, %v1998_v29  ;;  %v2003_v7 = vmax.f32 %v1741_v26, 0.0  ;;  %16187 = vst [vmem:[#allocation83_spill] sm:$0xff] %v12269_v41  ;;  %v1748_v15 = vpop.f32.mrf.mxu1 }
 0x1e5   : > { %v2002_v30 = vmax.f32 %v1390_v45, 0.0  ;;  %v7291_v10 = vadd.f32 %v6979_v39, %v6978_v34  ;;  %v6984_v9 = vmul.f32 %v11104_v36, %v1999_v1  ;;  %7284 = vadd.xlane.f32.xlu1 %v7283_v50  ;;  %v2004_v3 = vmax.f32 %v1743_v6, 0.0  ;;  %v1397_v26 = vpop.f32.mrf.mxu0 }
 0x1e6   : > { %v7287_v17 = vadd.f32 %v7286_v52, %v6976_v62  ;;  %v7296_v31 = vadd.f32 %v6983_v22, %v6982_v21  ;;  %v6985_v2 = vmul.f32 %v11110_v44, %v2000_v8  ;;  %v6986_v14 = vmul.f32 %v11097_v18, %v2001_v55  ;;  %v1750_v6 = vpop.f32.mrf.mxu1  ;;  %v10503_v21 = vld [vmem:[%s10725_s14 + $0x160] sm:$0xff]  ;;  %v10504_v22 = vld [vmem:[%s10725_s14 + $0x168] sm:$0xff] }
 0x1e7   : > { %v12274_v29 = vpack.c.bf16 %v2003_v7, %v1999_v1  ;;  %v12277_v45 = vmul.f32 %v11104_v36, %v2003_v7  ;;  %v12279_v34 = vpack.c.bf16 %v2004_v3, %v2000_v8  ;;  %v1394_v50 = vadd.f32 %v1393_v35, %v11085_v60  ;;  %v1399_v1 = vpop.f32.mrf.mxu0 }
 0x1e8   : > { %v7288_v39 = vadd.f32 %v7287_v17, %v6977_v33  ;;  %v6987_v62 = vmul.f32 %v11108_v43, %v2002_v30  ;;  %v1747_v52 = vadd.f32 %v1746_v53, %v11099_v19  ;;  %v12286_v41 = vcombine.high %v10503_v21, %v10504_v22  ;;  %v1752_v30 = vpop.f32.mrf.mxu1 }
 0x1e9   : > { %16188 = vst [vmem:[#allocation84_spill] sm:$0xff] %v12274_v29  ;;  %16189 = vst [vmem:[#allocation85_spill] sm:$0xff] %v12279_v34  ;;  %v1396_v55 = vadd.f32 %v1395_v47, %v11088_v63  ;;  %v12289_v29 = vpop.permute.xlu0 %8902  ;;  %v2005_v8 = vmax.f32 %v1394_v50, 0.0  ;;  %v1749_v33 = vadd.f32 %v1748_v15, %v11106_v37  ;;  %v7292_v35 = vadd.f32 %v7291_v10, %v12241_v48  ;;  %v1403_v22 = vpop.f32.mrf.mxu0 }
 0x1ea   : > { %16190 = vst [vmem:[#allocation86_spill] sm:$0xff] %v12286_v41  ;;  %16191 = vst [vmem:[#allocation87_spill] sm:$0xff] %v12289_v29  ;;  %7289 = vadd.xlane.f32.xlu0 %v7288_v39  ;;  %v1398_v7 = vadd.f32 %v1397_v26, %v11085_v60  ;;  %v2007_v17 = vmax.f32 %v1747_v52, 0.0  ;;  %2594 = vmatmul.mubr.bf16.gmra.mxu0 %v12286_v41  ;;  %v1751_v47 = vadd.f32 %v1750_v6, %v11099_v19  ;;  %v1756_v10 = vpop.f32.mrf.mxu1 }
 0x1eb   : > { %2947 = vmatmul.mubr.bf16.gmra.mxu1 %v12286_v41  ;;  %v2006_v53 = vmax.f32 %v1396_v55, 0.0  ;;  %v1400_v21 = vadd.f32 %v1399_v1, %v11088_v63  ;;  %v6989_v39 = vmul.f32 %v11110_v44, %v2004_v3  ;;  %v2008_v50 = vmax.f32 %v1749_v33, 0.0  ;;  %2603 = vmatprep.mubr.bf16.mxu0 %v16117_v51  ;;  %v1405_v6 = vpop.f32.mrf.mxu0  ;;  %v12303_v41 = vpop.permute.xlu1 %8904 }
 0x1ec   : > { %v7293_v15 = vadd.f32 %v7292_v35, %v12255_v54  ;;  %v2009_v48 = vmax.f32 %v1398_v7, 0.0  ;;  %2956 = vmatprep.mubr.bf16.mxu1 %v16117_v51  ;;  %v7301_v26 = vadd.f32 %v6987_v62, %v6986_v14  ;;  %v2011_v55 = vmax.f32 %v1751_v47, 0.0  ;;  %16192 = vst [vmem:[#allocation88_spill] sm:$0xff] %v12303_v41  ;;  %v1758_v35 = vpop.f32.mrf.mxu1 }
 0x1ed   : > { %v6991_v52 = vmul.f32 %v11108_v43, %v2006_v53  ;;  %v2010_v29 = vmax.f32 %v1400_v21, 0.0  ;;  %v6990_v1 = vmul.f32 %v11097_v18, %v2005_v8  ;;  %v6992_v3 = vmul.f32 %v11104_v36, %v2007_v17  ;;  %v1407_v47 = vpop.f32.mrf.mxu0 }
 0x1ee   : > { %7294 = vadd.xlane.f32.xlu1 %v7293_v15  ;;  %v1753_v54 = vadd.f32 %v1752_v30, %v11106_v37  ;;  %v7297_v33 = vadd.f32 %v7296_v31, %v6984_v9  ;;  %v12309_v14 = vmul.f32 %v11110_v44, %v2008_v50  ;;  %v6994_v62 = vmul.f32 %v11097_v18, %v2009_v48  ;;  %v1760_v34 = vpop.f32.mrf.mxu1  ;;  %v10505_v9 = vld [vmem:[%s10725_s14 + $0x170] sm:$0xff]  ;;  %v10506_v31 = vld [vmem:[%s10725_s14 + $0x178] sm:$0xff] }
 0x1ef   : > { %v12312_v7 = vpack.c.bf16 %v2011_v55, %v2007_v17  ;;  %v6995_v53 = vmul.f32 %v11108_v43, %v2010_v29  ;;  %v1404_v41 = vadd.f32 %v1403_v22, %v11085_v60  ;;  %v1757_v15 = vadd.f32 %v1756_v10, %v11099_v19  ;;  %v1409_v48 = vpop.f32.mrf.mxu0 }
 0x1f0   : > { %v2012_v8 = vmax.f32 %v1753_v54, 0.0  ;;  %v7298_v21 = vadd.f32 %v7297_v33, %v6985_v2  ;;  %v7306_v30 = vadd.f32 %v6991_v52, %v6990_v1  ;;  %v12319_v20 = vcombine.high %v10505_v9, %v10506_v31  ;;  %v1762_v10 = vpop.f32.mrf.mxu1 }
 0x1f1   : > { %16193 = vst [vmem:[#allocation89_spill] sm:$0xff] %v12312_v7  ;;  %v1406_v49 = vadd.f32 %v1405_v6, %v11088_v63  ;;  %v1759_v17 = vadd.f32 %v1758_v35, %v11106_v37  ;;  %v12323_v7 = vpop.permute.xlu0 %8906  ;;  %v6996_v29 = vmul.f32 %v11104_v36, %v2011_v55  ;;  %v7311_v2 = vadd.f32 %v6995_v53, %v6994_v62  ;;  %v12332_v35 = vpop.f32.mrf.mxu0 }
 0x1f2   : > { %16194 = vst [vmem:[#allocation90_spill] sm:$0xff] %v12319_v20  ;;  %16195 = vst [vmem:[#allocation91_spill] sm:$0xff] %v12323_v7  ;;  %v12326_v54 = vpack.c.bf16 %v2012_v8, %v2008_v50  ;;  %7299 = vadd.xlane.f32.xlu0 %v7298_v21  ;;  %v2013_v22 = vmax.f32 %v1404_v41, 0.0  ;;  %v2015_v52 = vmax.f32 %v1757_v15, 0.0  ;;  %2604 = vmatmul.mubr.bf16.gmra.mxu0 %v12319_v20  ;;  %v12338_v53 = vpop.f32.mrf.mxu1  ;;  %v12340_v21 = vpop.permute.xlu1 %8908 }
 0x1f3   : > { %2957 = vmatmul.mubr.bf16.gmra.mxu1 %v12319_v20  ;;  %v2014_v1 = vmax.f32 %v1406_v49, 0.0  ;;  %v7302_v6 = vadd.f32 %v7301_v26, %v12277_v45  ;;  %v1408_v33 = vadd.f32 %v1407_v47, %v11085_v60  ;;  %v6997_v55 = vmul.f32 %v11110_v44, %v2012_v8  ;;  %2613 = vmatprep.mubr.bf16.mxu0 %v16117_v51  ;;  %v12345_v47 = vpop.f32.mrf.mxu0  ;;  %v10515_v20 = vld [vmem:[%s10725_s14 + $0x1c0] sm:$0xff] }
 0x1f4   : > { %16196 = vst [vmem:[#allocation92_spill] sm:$0xff] %v12326_v54  ;;  %v2016_v62 = vmax.f32 %v1759_v17, 0.0  ;;  %v1761_v50 = vadd.f32 %v1760_v34, %v11099_v19  ;;  %v1410_v41 = vadd.f32 %v1409_v48, %v11088_v63  ;;  %16197 = vst [vmem:[#allocation93_spill] sm:$0xff] %v12340_v21  ;;  %v6998_v49 = vmul.f32 %v11097_v18, %v2013_v22  ;;  %v12348_v15 = vpop.f32.mrf.mxu1  ;;  %v10507_v17 = vld [vmem:[%s10725_s14 + $0x180] sm:$0xff]  ;;  %v10508_v48 = vld [vmem:[%s10725_s14 + $0x188] sm:$0xff] }
 0x1f5   : > { %v6999_v60 = vmul.f32 %v11108_v43, %v2014_v1  ;;  %v7303_v45 = vadd.f32 %v7302_v6, %v6989_v39  ;;  %v2017_v26 = vmax.f32 %v1408_v33, 0.0  ;;  %2966 = vmatprep.mubr.bf16.mxu1 %v16117_v51  ;;  %v1763_v34 = vadd.f32 %v1762_v10, %v11106_v37  ;;  %v12355_v1 = vpop.f32.mrf.mxu0 }
 0x1f6   : > { %v2019_v19 = vmax.f32 %v1761_v50, 0.0  ;;  %v2018_v63 = vmax.f32 %v1410_v41, 0.0  ;;  %v7307_v8 = vadd.f32 %v7306_v30, %v6992_v3  ;;  %v7000_v9 = vmul.f32 %v11104_v36, %v2015_v52  ;;  %v12361_v30 = vpop.f32.mrf.mxu1 }
 0x1f7   : > { %v7316_v31 = vadd.f32 %v6999_v60, %v6998_v49  ;;  %7304 = vadd.xlane.f32.xlu1 %v7303_v45  ;;  %v12353_v22 = vcombine.high %v10507_v17, %v10508_v48  ;;  %v7312_v39 = vadd.f32 %v7311_v2, %v6996_v29  ;;  %v7002_v6 = vmul.f32 %v11097_v18, %v2017_v26  ;;  %v12365_v49 = vpop.f32.mrf.mxu0  ;;  %v12367_v60 = vpop.permute.xlu0 %8910 }
 0x1f8   : > { %v12358_v33 = vpack.c.bf16 %v2019_v19, %v2015_v52  ;;  %v7003_v37 = vmul.f32 %v11108_v43, %v2018_v63  ;;  %v2020_v3 = vmax.f32 %v1763_v34, 0.0  ;;  %v7004_v10 = vmul.f32 %v11104_v36, %v2019_v19  ;;  %16200 = vst [vmem:[#allocation96_spill] sm:$0xff] %v12367_v60  ;;  %v12372_v52 = vpop.f32.mrf.mxu1  ;;  %v12374_v43 = vpop.permute.xlu1 %8912  ;;  %v10509_v63 = vld [vmem:[%s10725_s14 + $0x190] sm:$0xff]  ;;  %v10510_v34 = vld [vmem:[%s10725_s14 + $0x198] sm:$0xff] }
 0x1f9   : > { %16198 = vst [vmem:[#allocation94_spill] sm:$0xff] %v12353_v22  ;;  %v7308_v50 = vadd.f32 %v7307_v8, %v12309_v14  ;;  %v7313_v41 = vadd.f32 %v7312_v39, %v6997_v55  ;;  %v7001_v29 = vmul.f32 %v11110_v44, %v2016_v62  ;;  %16202 = vst [vmem:[#allocation98_spill] sm:$0xff] %v12374_v43  ;;  %v12378_v14 = vpop.f32.mrf.mxu0 }
 0x1fa   : > { %16199 = vst [vmem:[#allocation95_spill] sm:$0xff] %v12358_v33  ;;  %v7321_v2 = vadd.f32 %v7003_v37, %v7002_v6  ;;  %v12370_v18 = vpack.c.bf16 %v2020_v3, %v2016_v62  ;;  %v7005_v36 = vmul.f32 %v11110_v44, %v2020_v3  ;;  %2614 = vmatmul.mubr.bf16.gmra.mxu0 %v12353_v22  ;;  %v12381_v45 = vpop.f32.mrf.mxu1  ;;  %v10516_v33 = vld [vmem:[%s10725_s14 + $0x1c8] sm:$0xff] }
 0x1fb   : > { %7309 = vadd.xlane.f32.xlu0 %v7308_v50  ;;  %2967 = vmatmul.mubr.bf16.gmra.mxu1 %v12353_v22  ;;  %v7317_v55 = vadd.f32 %v7316_v31, %v7000_v9  ;;  %v12385_v62 = vpop.f32.mrf.mxu0  ;;  %v12391_v8 = vcombine.high %v10509_v63, %v10510_v34  ;;  %v12395_v9 = vpop.permute.xlu0 %8914 }
 0x1fc   : > { %16201 = vst [vmem:[#allocation97_spill] sm:$0xff] %v12370_v18  ;;  %7314 = vadd.xlane.f32.xlu1 %v7313_v41  ;;  %2623 = vmatprep.mubr.bf16.mxu0 %v16117_v51  ;;  %v7322_v26 = vadd.f32 %v7321_v2, %v7004_v10  ;;  %v12387_v44 = vpop.f32.mrf.mxu1  ;;  %16204 = vst [vmem:[#allocation100_spill] sm:$0xff] %v12395_v9  ;;  %v12399_v39 = vpop.permute.xlu1 %8916  ;;  %v10512_v2 = vld [vmem:[%s10725_s14 + $0x1a8] sm:$0xff]  ;;  %v10514_v9 = vld [vmem:[%s10725_s14 + $0x1b8] sm:$0xff]  ;;  %v12467_v18 = vcombine.high %v10515_v20, %v10516_v33 }
 0x1fd   : > { %2976 = vmatprep.mubr.bf16.mxu1 %v16117_v51  ;;  %v7318_v19 = vadd.f32 %v7317_v55, %v7001_v29  ;;  %16203 = vst [vmem:[#allocation99_spill] sm:$0xff] %v12391_v8  ;;  %v12393_v48 = vpop.f32.mrf.mxu0  ;;  %16205 = vst [vmem:[#allocation101_spill] sm:$0xff] %v12399_v39  ;;  %v10511_v29 = vld [vmem:[%s10725_s14 + $0x1a0] sm:$0xff]  ;;  %v10513_v39 = vld [vmem:[%s10725_s14 + $0x1b0] sm:$0xff] }
 0x1fe   : > { %v7323_v17 = vadd.f32 %v7322_v26, %v7005_v36  ;;  %v12397_v31 = vpop.f32.mrf.mxu1  ;;  %v12419_v36 = vcombine.high %v10511_v29, %v10512_v2  ;;  %v12443_v21 = vcombine.high %v10513_v39, %v10514_v9  ;;  %16208 = vst [vmem:[#allocation104_spill] sm:$0xff] %v12467_v18  ;;  %v10517_v33 = vld [vmem:[%s10725_s14 + $0x1d0] sm:$0xff] }
 0x1ff   : > { %7319 = vadd.xlane.f32.xlu0 %v7318_v19  ;;  %v12401_v6 = vpop.f32.mrf.mxu0  ;;  %v12489_v23 = vcombine.high %v10517_v33, %v10518_v58  ;;  %v10519_v33 = vld [vmem:[%s10725_s14 + $0x1e0] sm:$0xff] }
 0x200   : > { %7324 = vadd.xlane.f32.xlu1 %v7323_v17  ;;  %v12403_v37 = vpop.f32.mrf.mxu1  ;;  %16206 = vst [vmem:[#allocation102_spill] sm:$0xff] %v12419_v36  ;;  %16207 = vst [vmem:[#allocation103_spill] sm:$0xff] %v12443_v21 }
 0x201   : > { %v12406_v3 = vpop.f32.mrf.mxu0  ;;  %16211 = vst [vmem:[#allocation107_spill] sm:$0xff] %v12489_v23 }
 0x202   : > { %2624 = vmatmul.mubr.bf16.gmra.mxu0 %v12391_v8  ;;  %v12410_v10 = vpop.f32.mrf.mxu1 }
 0x203   : > { %2977 = vmatmul.mubr.bf16.gmra.mxu1 %v12391_v8  ;;  %2633 = vmatprep.mubr.bf16.mxu0 %v16117_v51  ;;  %v12413_v50 = vpop.f32.mrf.mxu0 }
 0x204   : > { %2986 = vmatprep.mubr.bf16.mxu1 %v16117_v51  ;;  %v12415_v41 = vpop.f32.mrf.mxu1 }
 0x205   : > { %v12421_v55 = vpop.f32.mrf.mxu0 }
 0x206   : > { %v12423_v26 = vpop.f32.mrf.mxu1 }
 0x207   : > { %v12425_v19 = vpop.f32.mrf.mxu0 }
 0x208   : > { %v12427_v63 = vpop.f32.mrf.mxu1 }
 0x209   : > { %v12430_v34 = vpop.f32.mrf.mxu0 }
 0x20a   : > { %2634 = vmatmul.mubr.bf16.gmra.mxu0 %v12419_v36  ;;  %v12434_v17 = vpop.f32.mrf.mxu1 }
 0x20b   : > { %2987 = vmatmul.mubr.bf16.gmra.mxu1 %v12419_v36  ;;  %2643 = vmatprep.mubr.bf16.mxu0 %v16117_v51  ;;  %v12437_v29 = vpop.f32.mrf.mxu0 }
 0x20c   : > { %2996 = vmatprep.mubr.bf16.mxu1 %v16117_v51  ;;  %v12439_v2 = vpop.f32.mrf.mxu1 }
 0x20d   : > { %v12445_v7 = vpop.f32.mrf.mxu0 }
 0x20e   : > { %v12447_v43 = vpop.f32.mrf.mxu1 }
 0x20f   : > { %v12449_v60 = vpop.f32.mrf.mxu0 }
 0x210   : > { %v12451_v36 = vpop.f32.mrf.mxu1 }
 0x211   : > { %v12454_v8 = vpop.f32.mrf.mxu0 }
 0x212   : > { %2644 = vmatmul.mubr.bf16.gmra.mxu0 %v12443_v21  ;;  %v12458_v22 = vpop.f32.mrf.mxu1 }
 0x213   : > { %2997 = vmatmul.mubr.bf16.gmra.mxu1 %v12443_v21  ;;  %2653 = vmatprep.mubr.bf16.mxu0 %v16117_v51  ;;  %v12461_v9 = vpop.f32.mrf.mxu0 }
 0x214   : > { %3006 = vmatprep.mubr.bf16.mxu1 %v16117_v51  ;;  %v12463_v39 = vpop.f32.mrf.mxu1 }
 0x215   : > { %v12469_v54 = vpop.f32.mrf.mxu0 }
 0x216   : > { %v12471_v27 = vpop.f32.mrf.mxu1 }
 0x217   : > { %v12473_v21 = vpop.f32.mrf.mxu0 }
 0x218   : > { %v12475_v38 = vpop.f32.mrf.mxu1 }
 0x219   : > { %v12480_v59 = vpop.f32.mrf.mxu0 }
 0x21a   : > { %2654 = vmatmul.mubr.bf16.gmra.mxu0 %v12467_v18  ;;  %16209 = vst [vmem:[#allocation105_spill] sm:$0xff] %v12480_v59  ;;  %v12482_v5 = vpop.f32.mrf.mxu1 }
 0x21b   : > { %3007 = vmatmul.mubr.bf16.gmra.mxu1 %v12467_v18  ;;  %2663 = vmatprep.mubr.bf16.mxu0 %v16117_v51  ;;  %16210 = vst [vmem:[#allocation106_spill] sm:$0xff] %v12482_v5  ;;  %v12485_v20 = vpop.f32.mrf.mxu0  ;;  %v10520_v5 = vld [vmem:[%s10725_s14 + $0x1e8] sm:$0xff] }
 0x21c   : > { %3016 = vmatprep.mubr.bf16.mxu1 %v16117_v51  ;;  %v12491_v40 = vpop.f32.mrf.mxu1 }
 0x21d   : > { %v12493_v28 = vpop.f32.mrf.mxu0 }
 0x21e   : > { %16212 = vst [vmem:[#allocation108_spill] sm:$0xff] %v12493_v28  ;;  %v12495_v18 = vpop.f32.mrf.mxu1 }
 0x21f   : > { %16213 = vst [vmem:[#allocation109_spill] sm:$0xff] %v12495_v18  ;;  %v12497_v24 = vpop.f32.mrf.mxu0  ;;  %v12511_v18 = vcombine.high %v10519_v33, %v10520_v5 }
 0x220   : > { %v12500_v0 = vpop.f32.mrf.mxu1 }
 0x221   : > { %v12504_v42 = vpop.f32.mrf.mxu0  ;;  %16216 = vst [vmem:[#allocation112_spill] sm:$0xff] %v12511_v18 }
 0x222   : > { %2664 = vmatmul.mubr.bf16.gmra.mxu0 %v12489_v23  ;;  %16214 = vst [vmem:[#allocation110_spill] sm:$0xff] %v12504_v42  ;;  %v12507_v58 = vpop.f32.mrf.mxu1 }
 0x223   : > { %3017 = vmatmul.mubr.bf16.gmra.mxu1 %v12489_v23  ;;  %2673 = vmatprep.mubr.bf16.mxu0 %v16117_v51  ;;  %16215 = vst [vmem:[#allocation111_spill] sm:$0xff] %v12507_v58  ;;  %v12513_v28 = vpop.f32.mrf.mxu0  ;;  %v3048_v58 = vpack.c.bf16 %v12365_v49, %v12345_v47 }
 0x224   : > { %3026 = vmatprep.mubr.bf16.mxu1 %v16117_v51  ;;  %16217 = vst [vmem:[#allocation113_spill] sm:$0xff] %v12513_v28  ;;  %v12515_v59 = vpop.f32.mrf.mxu1 }
 0x225   : > { %16218 = vst [vmem:[#allocation114_spill] sm:$0xff] %v12515_v59  ;;  %v12517_v32 = vpop.f32.mrf.mxu0  ;;  %v10522_v59 = vld [vmem:[%s10725_s14 + $0x1f8] sm:$0xff] }
 0x226   : > { %16219 = vst [vmem:[#allocation115_spill] sm:$0xff] %v12517_v32  ;;  %v12519_v23 = vpop.f32.mrf.mxu1  ;;  %v10521_v32 = vld [vmem:[%s10725_s14 + $0x1f0] sm:$0xff] }
 0x227   : > { %16220 = vst [vmem:[#allocation116_spill] sm:$0xff] %v12519_v23  ;;  %v12522_v42 = vpop.f32.mrf.mxu0  ;;  %v3050_v23 = vpack.c.bf16 %v12372_v52, %v12348_v15 }
 0x228   : > { %16221 = vst [vmem:[#allocation117_spill] sm:$0xff] %v12522_v42  ;;  %v12524_v61 = vpop.f32.mrf.mxu1  ;;  %v12539_v42 = vcombine.high %v10521_v32, %v10522_v59  ;;  %v3047_v59 = vpack.c.bf16 %v12355_v1, %v12332_v35  ;;  %v10100_v1 = vld [vmem:[%s15887_s3 + $0xe8] ss:$16 sps:$4 sm:$0xff]  }
 0x229   : > { %16222 = vst [vmem:[#allocation118_spill] sm:$0xff] %v12524_v61  ;;  %v12529_v5 = vpop.f32.mrf.mxu0  ;;  %v12553_v47 = vmul.bf16 %v11178_v4, %v3050_v23  ;;  %v3052_v23 = vpack.c.bf16 %v12401_v6, %v12385_v62 }
 0x22a   : > { %2674 = vmatmul.mubr.bf16.gmra.mxu0 %v12511_v18  ;;  %v12531_v33 = vpop.f32.mrf.mxu1  ;;  %16224 = vst [vmem:[#allocation120_spill] sm:$0xff] %v12539_v42  ;;  %v12580_v35 = vmul.bf16 %v11173_v57, %v3047_v59  ;;  %v3051_v59 = vpack.c.bf16 %v12393_v48, %v12378_v14  ;;  %v10108_v14 = vld [vmem:[%s15887_s3 + $0xac] ss:$16 sps:$4 sm:$0xff]   ;;  %v3058_v48 = vpack.c.bf16 %v12427_v63, %v12415_v41 }
 0x22b   : > { %3027 = vmatmul.mubr.bf16.gmra.mxu1 %v12511_v18  ;;  %2683 = vmatprep.mubr.bf16.mxu0 %v16117_v51  ;;  %16223 = vst [vmem:[#allocation119_spill] sm:$0xff] %v12531_v33  ;;  %v12541_v61 = vpop.f32.mrf.mxu0  ;;  %v12550_v33 = vmul.bf16 %v11178_v4, %v3048_v58  ;;  %16226 = vst [vmem:[#allocation122_spill] sm:$0xff] %v12553_v47  ;;  %v3049_v4 = vpack.c.bf16 %v12361_v30, %v12338_v53  ;;  %v10111_v63 = vld [vmem:[%s15887_s3 + $0x8c] ss:$16 sps:$4 sm:$0xff]  }
 0x22c   : > { %3036 = vmatprep.mubr.bf16.mxu1 %v16117_v51  ;;  %v12543_v18 = vpop.f32.mrf.mxu1  ;;  %v3054_v58 = vpack.c.bf16 %v12403_v37, %v12387_v44  ;;  %16227 = vst [vmem:[#allocation123_spill] sm:$0xff] %v12580_v35  ;;  %v12591_v30 = vmul.bf16 %v11207_v13, %v3052_v23  ;;  %v10105_v44 = vld [vmem:[%s15887_s3 + $0xcc] ss:$16 sps:$4 sm:$0xff]   ;;  %v3053_v23 = vpack.c.bf16 %v12397_v31, %v12381_v45  ;;  %v10106_v31 = vld [vmem:[%s15887_s3 + $0xa8] ss:$16 sps:$4 sm:$0xff]  }
 0x22d   : > { %v12545_v28 = vpop.f32.mrf.mxu0  ;;  %16225 = vst [vmem:[#allocation121_spill] sm:$0xff] %v12550_v33  ;;  %v12588_v53 = vmul.bf16 %v11173_v57, %v3049_v4 }
 0x22e   : > { %v12547_v51 = vpop.f32.mrf.mxu1  ;;  %16229 = vst [vmem:[#allocation125_spill] sm:$0xff] %v12591_v30  ;;  %v12599_v6 = vmul.bf16 %v11207_v13, %v3054_v58  ;;  %v10103_v13 = vld [vmem:[%s15887_s3 + $0xc8] ss:$16 sps:$4 sm:$0xff]   ;;  %v3056_v58 = vpack.c.bf16 %v12425_v19, %v12413_v50  ;;  %v12640_v50 = vmul.bf16 %v11197_v56, %v3053_v23 }
 0x22f   : > { %v12556_v15 = vpop.f32.mrf.mxu0  ;;  %16228 = vst [vmem:[#allocation124_spill] sm:$0xff] %v12588_v53 }
 0x230   : > { %v12558_v32 = vpop.f32.mrf.mxu1  ;;  %16230 = vst [vmem:[#allocation126_spill] sm:$0xff] %v12599_v6  ;;  %16232 = vst [vmem:[#allocation128_spill] sm:$0xff] %v12640_v50  ;;  %v12643_v19 = vmul.bf16 %v11231_v16, %v3056_v58  ;;  %v3057_v58 = vpack.c.bf16 %v12423_v26, %v12410_v10 }
 0x231   : > { %v12565_v49 = vpop.f32.mrf.mxu0 }
 0x232   : > { %2684 = vmatmul.mubr.bf16.gmra.mxu0 %v12539_v42  ;;  %v12567_v52 = vpop.f32.mrf.mxu1  ;;  %16233 = vst [vmem:[#allocation129_spill] sm:$0xff] %v12643_v19  ;;  %v12692_v26 = vmul.bf16 %v11221_v46, %v3057_v58  ;;  %v3061_v58 = vpack.c.bf16 %v12447_v43, %v12434_v17 }
 0x233   : > { %3037 = vmatmul.mubr.bf16.gmra.mxu1 %v12539_v42  ;;  %4183 = vmatprep.mubr.bf16.mxu0 %v12550_v33  ;;  %v12575_v42 = vpop.f32.mrf.mxu0 }
 0x234   : > { %4536 = vmatprep.mubr.bf16.mxu1 %v12553_v47  ;;  %v12577_v33 = vpop.f32.mrf.mxu1  ;;  %16236 = vst [vmem:[#allocation132_spill] sm:$0xff] %v12692_v26  ;;  %v12742_v17 = vmul.bf16 %v11248_v12, %v3061_v58 }
 0x235   : > { %v12585_v47 = vpop.f32.mrf.mxu0 }
 0x236   : > { %v12593_v62 = vpop.f32.mrf.mxu1  ;;  %16240 = vst [vmem:[#allocation136_spill] sm:$0xff] %v12742_v17 }
 0x237   : > { %v12602_v37 = vpop.f32.mrf.mxu0 }
 0x238   : > { %v12606_v57 = vpop.f32.mrf.mxu1 }
 0x239   : > { %v12611_v4 = vpop.f32.mrf.mxu0 }
 0x23a   : > { %4184 = vmatmul.mubr.bf16.vlgmr.msra.gmra.mxu0 %v12580_v35 }
 0x23b   : > { %4537 = vmatmul.mubr.bf16.vlgmr.msra.gmra.mxu1 %v12588_v53  ;;  %4193 = vmatprep.mubr.bf16.mxu0 %v12591_v30  ;;  %v12620_v30 = vpop.f32.mrf.mxu1  ;;  %v12632_v53 = vmul.bf16 %v11197_v56, %v3051_v59 }
 0x23c   : > { %4546 = vmatprep.mubr.bf16.mxu1 %v12599_v6  ;;  %4858 = vmatpush1.bf16.msra.mxu0 %v10100_v1  ;;  %v12627_v1 = vpop.f32.mrf.mxu0 }
 0x23d   : > { %4859 = vmatprep.subr.bf16.mxu0 %v10105_v44  ;;  %v12629_v6 = vpop.f32.mrf.mxu1  ;;  %16231 = vst [vmem:[#allocation127_spill] sm:$0xff] %v12632_v53  ;;  %v12651_v44 = vmul.bf16 %v11231_v16, %v3058_v48  ;;  %v10109_v16 = vld [vmem:[%s15887_s3 + $0x88] ss:$16 sps:$4 sm:$0xff]  }
 0x23e   : > { %v12634_v45 = vpop.f32.mrf.mxu0 }
 0x23f   : > { %v12645_v41 = vpop.f32.mrf.mxu1  ;;  %16234 = vst [vmem:[#allocation130_spill] sm:$0xff] %v12651_v44 }
 0x240   : > { %4860 = vmatpush1.bf16.msra.mxu0 %v10103_v13  ;;  %v12654_v59 = vpop.f32.mrf.mxu0  ;;  %v3055_v13 = vpack.c.bf16 %v12421_v55, %v12406_v3  ;;  %v10114_v3 = vld [vmem:[%s15887_s3 + $0x6c] ss:$16 sps:$4 sm:$0xff]   ;;  %v3062_v55 = vpack.c.bf16 %v12451_v36, %v12439_v2 }
 0x241   : > { %4861 = vmatprep.subr.bf16.mxu0 %v10108_v14  ;;  %v12658_v56 = vpop.f32.mrf.mxu1  ;;  %v3060_v14 = vpack.c.bf16 %v12449_v60, %v12437_v29  ;;  %v10112_v60 = vld [vmem:[%s15887_s3 + $0x68] ss:$16 sps:$4 sm:$0xff]   ;;  %v10117_v2 = vld [vmem:[%s15887_s3 + $0x4c] ss:$16 sps:$4 sm:$0xff]  }
 0x242   : > { %4194 = vmatmul.mubr.bf16.gmra.mxu0 %v12632_v53  ;;  %v12663_v23 = vpop.f32.mrf.mxu0  ;;  %v16258_v53 = vld [vmem:[#allocation13_spill] sm:$0xff] }
 0x243   : > { %4547 = vmatmul.mubr.bf16.gmra.mxu1 %v12640_v50  ;;  %4203 = vmatprep.mubr.bf16.mxu0 %v12643_v19  ;;  %v12672_v48 = vpop.f32.mrf.mxu1  ;;  %v12684_v19 = vmul.bf16 %v11221_v46, %v3055_v13  ;;  %v12695_v29 = vmul.bf16 %v11255_v25, %v3060_v14  ;;  %v3064_v14 = vpack.c.bf16 %v12473_v21, %v12461_v9  ;;  %v10118_v21 = vld [vmem:[%s15887_s3 + $0x28] ss:$16 sps:$4 sm:$0xff]   ;;  %v10123_v9 = vld [vmem:[%s15887_s3 + $0xc] ss:$16 sps:$4 sm:$0xff]  }
 0x244   : > { %4556 = vmatprep.mubr.bf16.mxu1 %v12651_v44  ;;  %4862 = vmatpush1.bf16.msra.mxu0 %v10106_v31  ;;  %v12679_v31 = vpop.f32.mrf.mxu0 }
 0x245   : > { %4863 = vmatprep.subr.bf16.mxu0 %v10111_v63  ;;  %v12681_v44 = vpop.f32.mrf.mxu1  ;;  %16235 = vst [vmem:[#allocation131_spill] sm:$0xff] %v12684_v19  ;;  %16237 = vst [vmem:[#allocation133_spill] sm:$0xff] %v12695_v29  ;;  %v12703_v63 = vmul.bf16 %v11255_v25, %v3062_v55  ;;  %v10115_v25 = vld [vmem:[%s15887_s3 + $0x48] ss:$16 sps:$4 sm:$0xff]  }
 0x246   : > { %v12686_v10 = vpop.f32.mrf.mxu0 }
 0x247   : > { %v12697_v36 = vpop.f32.mrf.mxu1  ;;  %16238 = vst [vmem:[#allocation134_spill] sm:$0xff] %v12703_v63 }
 0x248   : > { %4864 = vmatpush1.bf16.msra.mxu0 %v10109_v16  ;;  %v12706_v13 = vpop.f32.mrf.mxu0  ;;  %v3059_v16 = vpack.c.bf16 %v12445_v7, %v12430_v34  ;;  %v3066_v7 = vpack.c.bf16 %v12475_v38, %v12463_v39  ;;  %v12745_v38 = vmul.bf16 %v11279_v11, %v3064_v14  ;;  %v3065_v14 = vpack.c.bf16 %v12471_v27, %v12458_v22  ;;  %v16246_v22 = vld [vmem:[#allocation14_spill] sm:$0xff] }
 0x249   : > { %4865 = vmatprep.subr.bf16.mxu0 %v10114_v3  ;;  %v12710_v46 = vpop.f32.mrf.mxu1  ;;  %v10120_v3 = vld [vmem:[%s15887_s3 + $0x2c] ss:$16 sps:$4 sm:$0xff]  }
 0x24a   : > { %4204 = vmatmul.mubr.bf16.gmra.mxu0 %v12684_v19  ;;  %16241 = vst [vmem:[#allocation137_spill] sm:$0xff] %v12745_v38  ;;  %v12751_v39 = vmul.bf16 %v11279_v11, %v3066_v7  ;;  %v10121_v11 = vld [vmem:[%s15887_s3 + $0x8] ss:$16 sps:$4 sm:$0xff]  }
 0x24b   : > { %4557 = vmatmul.mubr.bf16.gmra.mxu1 %v12692_v26  ;;  %4213 = vmatprep.mubr.bf16.mxu0 %v12695_v29  ;;  %v12727_v34 = vpop.f32.mrf.mxu0  ;;  %v12729_v55 = vpop.f32.mrf.mxu1  ;;  %v16254_v29 = vld [vmem:[#allocation117_spill] sm:$0xff] }
 0x24c   : > { %4566 = vmatprep.mubr.bf16.mxu1 %v12703_v63  ;;  %4866 = vmatpush1.bf16.msra.mxu0 %v10112_v60  ;;  %v12732_v60 = vmul.bf16 %v11248_v12, %v3059_v16  ;;  %16242 = vst [vmem:[#allocation138_spill] sm:$0xff] %v12751_v39  ;;  %v3063_v12 = vpack.c.bf16 %v12469_v54, %v12454_v8  ;;  %v10126_v54 = vld [vmem:[%s15887_s3 + $0x1ec] ss:$16 sps:$4 sm:$0xff]  }
 0x24d   : > { %4867 = vmatprep.subr.bf16.mxu0 %v10117_v2  ;;  %v12734_v63 = vpop.f32.mrf.mxu0  ;;  %v12736_v43 = vpop.f32.mrf.mxu1  ;;  %v3070_v8 = vpack.c.bf16 %v12500_v0, %v12491_v40  ;;  %v10129_v40 = vld [vmem:[%s15887_s3 + $0x1cc] ss:$16 sps:$4 sm:$0xff]  }
 0x24e   : > { %16239 = vst [vmem:[#allocation135_spill] sm:$0xff] %v12732_v60 }
 0x24f   : > { %v12754_v2 = vpop.f32.mrf.mxu0  ;;  %v12756_v16 = vpop.f32.mrf.mxu1 }
 0x250   : > { %4868 = vmatpush1.bf16.msra.mxu0 %v10115_v25 }
 0x251   : > { %4869 = vmatprep.subr.bf16.mxu0 %v10120_v3  ;;  %v12763_v25 = vpop.f32.mrf.mxu0  ;;  %v12765_v58 = vpop.f32.mrf.mxu1  ;;  %v3068_v3 = vpack.c.bf16 %v12497_v24, %v12485_v20  ;;  %v10124_v24 = vld [vmem:[%s15887_s3 + $0x1e8] ss:$16 sps:$4 sm:$0xff]  }
 0x252   : > { %4214 = vmatmul.mubr.bf16.gmra.mxu0 %v12732_v60 }
 0x253   : > { %4567 = vmatmul.mubr.bf16.gmra.mxu1 %v12742_v17  ;;  %4223 = vmatprep.mubr.bf16.mxu0 %v12745_v38  ;;  %v12779_v7 = vpop.f32.mrf.mxu0  ;;  %v12795_v20 = vmul.bf16 %v16246_v22, %v3068_v3 }
 0x254   : > { %4576 = vmatprep.mubr.bf16.mxu1 %v12751_v39  ;;  %4870 = vmatpush1.bf16.msra.mxu0 %v10118_v21  ;;  %v12781_v21 = vpop.f32.mrf.mxu1  ;;  %v16243_v39 = vld [vmem:[#allocation12_spill] sm:$0xff] }
 0x255   : > { %4871 = vmatprep.subr.bf16.mxu0 %v10123_v9  ;;  %v12784_v38 = vmul.bf16 %v16243_v39, %v3063_v12  ;;  %v12786_v17 = vpop.f32.mrf.mxu0  ;;  %v12792_v27 = vmul.bf16 %v16243_v39, %v3065_v14  ;;  %16247 = vst [vmem:[#allocation14_spill] sm:$0xff] %v12795_v20  ;;  %v12803_v9 = vmul.bf16 %v16246_v22, %v3070_v8  ;;  %v16250_v14 = vld [vmem:[#allocation108_spill] sm:$0xff]  ;;  %v10127_v8 = vld [vmem:[%s15887_s3 + $0x1c8] ss:$16 sps:$4 sm:$0xff]   ;;  %v16251_v22 = vld [vmem:[#allocation106_spill] sm:$0xff] }
 0x256   : > { %v12797_v0 = vpop.f32.mrf.mxu1 }
 0x257   : > { %16244 = vst [vmem:[#allocation12_spill] sm:$0xff] %v12784_v38  ;;  %16245 = vst [vmem:[#allocation139_spill] sm:$0xff] %v12792_v27  ;;  %v12806_v12 = vpop.f32.mrf.mxu0 }
 0x258   : > { %4872 = vmatpush1.bf16.msra.mxu0 %v10121_v11  ;;  %16248 = vst [vmem:[#allocation140_spill] sm:$0xff] %v12803_v9  ;;  %v12810_v39 = vpop.f32.mrf.mxu1  ;;  %v16249_v11 = vld [vmem:[#allocation105_spill] sm:$0xff] }
 0x259   : > { %4873 = vmatprep.subr.bf16.mxu0 %v10126_v54  ;;  %v3067_v3 = vpack.c.bf16 %v16250_v14, %v16249_v11  ;;  %v12815_v54 = vpop.f32.mrf.mxu0  ;;  %v10132_v11 = vld [vmem:[%s15887_s3 + $0x1ac] ss:$16 sps:$4 sm:$0xff]   ;;  %v16255_v14 = vld [vmem:[#allocation114_spill] sm:$0xff] }
 0x25a   : > { %4224 = vmatmul.mubr.bf16.gmra.mxu0 %v12784_v38  ;;  %v16252_v38 = vld [vmem:[#allocation109_spill] sm:$0xff]  ;;  %v12824_v26 = vpop.f32.mrf.mxu1 }
 0x25b   : > { %4577 = vmatmul.mubr.bf16.gmra.mxu1 %v12792_v27  ;;  %4233 = vmatprep.mubr.bf16.mxu0 %v12795_v20  ;;  %v3069_v60 = vpack.c.bf16 %v16252_v38, %v16251_v22  ;;  %v16253_v27 = vld [vmem:[#allocation113_spill] sm:$0xff]  ;;  %v12836_v35 = vmul.bf16 %v16258_v53, %v3067_v3 }
 0x25c   : > { %4586 = vmatprep.mubr.bf16.mxu1 %v12803_v9  ;;  %4874 = vmatpush2.bf16.msra.mxu0 %v10124_v24  ;;  %v3072_v20 = vpack.c.bf16 %v16254_v29, %v16253_v27  ;;  %v16256_v9 = vld [vmem:[#allocation118_spill] sm:$0xff]  ;;  %v12831_v19 = vpop.f32.mrf.mxu0  ;;  %v12833_v50 = vpop.f32.mrf.mxu1  ;;  %v10130_v29 = vld [vmem:[%s15887_s3 + $0x1a8] ss:$16 sps:$4 sm:$0xff]  }
 0x25d   : > { %4875 = vmatprep.subr.bf16.mxu0 %v10129_v40  ;;  %v3074_v24 = vpack.c.bf16 %v16256_v9, %v16255_v14  ;;  %16257 = vst [vmem:[#allocation105_spill] sm:$0xff] %v12833_v50  ;;  %16259 = vst [vmem:[#allocation108_spill] sm:$0xff] %v12836_v35  ;;  %v12844_v27 = vmul.bf16 %v16258_v53, %v3069_v60  ;;  %v16261_v40 = vld [vmem:[#allocation16_spill] sm:$0xff]  ;;  %v16266_v53 = vld [vmem:[#allocation110_spill] sm:$0xff] }
 0x25e   : > { %v12838_v38 = vpop.f32.mrf.mxu0  ;;  %v12847_v22 = vmul.bf16 %v16261_v40, %v3072_v20  ;;  %v12849_v9 = vpop.f32.mrf.mxu1  ;;  %v16267_v60 = vld [vmem:[#allocation115_spill] sm:$0xff] }
 0x25f   : > { %16260 = vst [vmem:[#allocation106_spill] sm:$0xff] %v12844_v27  ;;  %v12852_v14 = vmul.bf16 %v16261_v40, %v3074_v24  ;;  %v3071_v20 = vpack.c.bf16 %v16267_v60, %v16266_v53  ;;  %v16269_v24 = vld [vmem:[#allocation116_spill] sm:$0xff]  ;;  %v16271_v53 = vld [vmem:[#allocation15_spill] sm:$0xff] }
 0x260   : > { %4876 = vmatpush2.bf16.msra.mxu0 %v10127_v8  ;;  %16262 = vst [vmem:[#allocation109_spill] sm:$0xff] %v12847_v22  ;;  %v12855_v3 = vpop.f32.mrf.mxu0  ;;  %v12859_v8 = vpop.f32.mrf.mxu1 }
 0x261   : > { %4877 = vmatprep.subr.bf16.mxu0 %v10132_v11  ;;  %16263 = vst [vmem:[#allocation113_spill] sm:$0xff] %v12852_v14  ;;  %16264 = vst [vmem:[#allocation117_spill] sm:$0xff] %v12855_v3  ;;  %v16268_v11 = vld [vmem:[#allocation111_spill] sm:$0xff]  ;;  %v12879_v60 = vmul.bf16 %v16271_v53, %v3071_v20 }
 0x262   : > { %4234 = vmatmul.mubr.bf16.gmra.mxu0 %v12836_v35  ;;  %16265 = vst [vmem:[#allocation114_spill] sm:$0xff] %v12859_v8  ;;  %v12864_v50 = vpop.f32.mrf.mxu0  ;;  %v3073_v40 = vpack.c.bf16 %v16269_v24, %v16268_v11  ;;  %v3076_v35 = vpack.c.bf16 %v12556_v15, %v12541_v61  ;;  %v12870_v3 = vpop.f32.mrf.mxu1  ;;  %v16278_v20 = vld [vmem:[#allocation119_spill] sm:$0xff] }
 0x263   : > { %4587 = vmatmul.mubr.bf16.gmra.mxu1 %v12844_v27  ;;  %4243 = vmatprep.mubr.bf16.mxu0 %v12847_v22  ;;  %v3078_v22 = vpack.c.bf16 %v12558_v32, %v12543_v18  ;;  %16272 = vst [vmem:[#allocation13_spill] sm:$0xff] %v12879_v60 }
 0x264   : > { %4596 = vmatprep.mubr.bf16.mxu1 %v12852_v14  ;;  %4878 = vmatpush2.bf16.msra.mxu0 %v10130_v29  ;;  %v12882_v29 = vmul.bf16 %v16271_v53, %v3073_v40  ;;  %v16274_v14 = vld [vmem:[#allocation18_spill] sm:$0xff]  ;;  %v3077_v40 = vpack.c.bf16 %v12547_v51, %v16278_v20  ;;  %v3080_v53 = vpack.c.bf16 %v12602_v37, %v12575_v42  ;;  %v16282_v42 = vld [vmem:[#allocation20_spill] sm:$0xff] }
 0x265   : > { %v12874_v27 = vpop.f32.mrf.mxu0  ;;  %v12876_v8 = vpop.f32.mrf.mxu1  ;;  %v12885_v11 = vmul.bf16 %v16274_v14, %v3076_v35  ;;  %v12892_v15 = vmul.bf16 %v16274_v14, %v3078_v22  ;;  %v3075_v35 = vpack.c.bf16 %v12545_v28, %v12529_v5  ;;  %v10133_v22 = vld [vmem:[%s15887_s3 + $0x188] ss:$16 sps:$4 sm:$0xff]   ;;  %v10135_v14 = vld [vmem:[%s15887_s3 + $0x18c] ss:$16 sps:$4 sm:$0xff]   ;;  %v3082_v28 = vpack.c.bf16 %v12606_v57, %v12577_v33 }
 0x266   : > { %16270 = vst [vmem:[#allocation118_spill] sm:$0xff] %v12876_v8  ;;  %16273 = vst [vmem:[#allocation16_spill] sm:$0xff] %v12882_v29  ;;  %4879 = vmatprep.subr.bf16.mxu0 %v10135_v14  ;;  %v12931_v37 = vmul.bf16 %v16282_v42, %v3080_v53  ;;  %v3084_v14 = vpack.c.bf16 %v12654_v59, %v12627_v1  ;;  %v3086_v53 = vpack.c.bf16 %v12658_v56, %v12629_v6  ;;  %v10141_v1 = vld [vmem:[%s15887_s3 + $0x2ec] ss:$16 sps:$4 sm:$0xff]   ;;  %v10139_v56 = vld [vmem:[%s15887_s3 + $0x2e8] ss:$16 sps:$4 sm:$0xff]  }
 0x267   : > { %16275 = vst [vmem:[#allocation110_spill] sm:$0xff] %v12885_v11  ;;  %v12887_v24 = vpop.f32.mrf.mxu0  ;;  %v12889_v61 = vpop.f32.mrf.mxu1  ;;  %16276 = vst [vmem:[#allocation115_spill] sm:$0xff] %v12892_v15  ;;  %v12936_v8 = vmul.bf16 %v16282_v42, %v3082_v28  ;;  %v16285_v42 = vld [vmem:[#allocation19_spill] sm:$0xff]  ;;  %5210 = vmatprep.subr.bf16.mxu1 %v10141_v1 }
 0x268   : > { %4880 = vmatpush2.bf16.msra.mxu0 %v10133_v22  ;;  %16283 = vst [vmem:[#allocation18_spill] sm:$0xff] %v12931_v37  ;;  %v3081_v22 = vpack.c.bf16 %v12593_v62, %v12567_v52  ;;  %5211 = vmatpush1.bf16.msra.mxu1 %v10139_v56  ;;  %v10142_v1 = vld [vmem:[%s15887_s3 + $0x2c8] ss:$16 sps:$4 sm:$0xff]  }
 0x269   : > { %v12897_v18 = vpop.f32.mrf.mxu0  ;;  %v12899_v32 = vpop.f32.mrf.mxu1  ;;  %16284 = vst [vmem:[#allocation119_spill] sm:$0xff] %v12936_v8 }
 0x26a   : > { %4244 = vmatmul.mubr.bf16.gmra.mxu0 %v12879_v60  ;;  %16277 = vst [vmem:[#allocation111_spill] sm:$0xff] %v12899_v32 }
 0x26b   : > { %4597 = vmatmul.mubr.bf16.gmra.mxu1 %v12882_v29  ;;  %4253 = vmatprep.mubr.bf16.mxu0 %v12885_v11  ;;  %v12914_v11 = vpop.f32.mrf.mxu0  ;;  %v12916_v29 = vpop.f32.mrf.mxu1 }
 0x26c   : > { %4606 = vmatprep.mubr.bf16.mxu1 %v12892_v15  ;;  %v16279_v15 = vld [vmem:[#allocation17_spill] sm:$0xff] }
 0x26d   : > { %v12923_v60 = vmul.bf16 %v16279_v15, %v3075_v35  ;;  %v12928_v51 = vmul.bf16 %v16279_v15, %v3077_v40  ;;  %v3079_v15 = vpack.c.bf16 %v12585_v47, %v12565_v49  ;;  %v12966_v49 = vmul.bf16 %v16285_v42, %v3081_v22 }
 0x26e   : > { %v12920_v5 = vpop.f32.mrf.mxu0  ;;  %v12925_v32 = vpop.f32.mrf.mxu1  ;;  %v3083_v22 = vpack.c.bf16 %v12634_v45, %v12611_v4  ;;  %v3090_v4 = vpack.c.bf16 %v12710_v46, %v12681_v44  ;;  %v10136_v46 = vld [vmem:[%s15887_s3 + $0x168] ss:$16 sps:$4 sm:$0xff]  }
 0x26f   : > { %16280 = vst [vmem:[#allocation116_spill] sm:$0xff] %v12923_v60  ;;  %16281 = vst [vmem:[#allocation15_spill] sm:$0xff] %v12928_v51 }
 0x270   : > { %v12933_v20 = vpop.f32.mrf.mxu0  ;;  %v12939_v33 = vpop.f32.mrf.mxu1  ;;  %16287 = vst [vmem:[#allocation20_spill] sm:$0xff] %v12966_v49 }
 0x272   : > { %4254 = vmatmul.mubr.bf16.gmra.mxu0 %v12923_v60  ;;  %v12943_v57 = vpop.f32.mrf.mxu0  ;;  %v12948_v35 = vpop.f32.mrf.mxu1  ;;  %v3103_v60 = vpack.c.bf16 %v12897_v18, %v12874_v27 }
 0x273   : > { %4607 = vmatmul.mubr.bf16.gmra.mxu1 %v12928_v51  ;;  %4263 = vmatprep.mubr.bf16.mxu0 %v12931_v37  ;;  %v12961_v37 = vmul.bf16 %v16285_v42, %v3079_v15 }
 0x274   : > { %4616 = vmatprep.mubr.bf16.mxu1 %v12936_v8  ;;  %v12954_v40 = vpop.f32.mrf.mxu0  ;;  %v12958_v28 = vpop.f32.mrf.mxu1  ;;  %v16288_v8 = vld [vmem:[#allocation22_spill] sm:$0xff] }
 0x275   : > { %16286 = vst [vmem:[#allocation17_spill] sm:$0xff] %v12961_v37  ;;  %v12969_v52 = vmul.bf16 %v16288_v8, %v3084_v14  ;;  %v12977_v6 = vmul.bf16 %v16288_v8, %v3086_v53  ;;  %v3085_v14 = vpack.c.bf16 %v12645_v41, %v12620_v30  ;;  %v3088_v53 = vpack.c.bf16 %v12706_v13, %v12679_v31  ;;  %v16291_v41 = vld [vmem:[#allocation21_spill] sm:$0xff] }
 0x276   : > { %v13013_v31 = vmul.bf16 %v16291_v41, %v3083_v22  ;;  %v10147_v22 = vld [vmem:[%s15887_s3 + $0x2ac] ss:$16 sps:$4 sm:$0xff]   ;;  %v3110_v27 = vpack.c.bf16 %v12958_v28, %v12939_v33  ;;  %v16331_v33 = vld [vmem:[#allocation34_spill] sm:$0xff] }
 0x277   : > { %16289 = vst [vmem:[#allocation19_spill] sm:$0xff] %v12969_v52  ;;  %16290 = vst [vmem:[#allocation22_spill] sm:$0xff] %v12977_v6  ;;  %v13018_v56 = vmul.bf16 %v16291_v41, %v3085_v14  ;;  %v10145_v41 = vld [vmem:[%s15887_s3 + $0x2a8] ss:$16 sps:$4 sm:$0xff]  }
 0x278   : > { %v12963_v47 = vpop.f32.mrf.mxu0  ;;  %v12971_v62 = vpop.f32.mrf.mxu1  ;;  %16292 = vst [vmem:[#allocation21_spill] sm:$0xff] %v13013_v31 }
 0x279   : > { %16293 = vst [vmem:[#allocation141_spill] sm:$0xff] %v13018_v56 }
 0x27a   : > { %4264 = vmatmul.mubr.bf16.gmra.mxu0 %v12961_v37  ;;  %v12980_v59 = vpop.f32.mrf.mxu0  ;;  %v12987_v15 = vpop.f32.mrf.mxu1  ;;  %v3087_v37 = vpack.c.bf16 %v12686_v10, %v12663_v23  ;;  %v3094_v23 = vpack.c.bf16 %v12765_v58, %v12736_v43 }
 0x27b   : > { %4617 = vmatmul.mubr.bf16.gmra.mxu1 %v12966_v49  ;;  %4273 = vmatprep.mubr.bf16.mxu0 %v12969_v52  ;;  %v10144_v52 = vld [vmem:[%s15887_s3 + $0x2cc] ss:$16 sps:$4 sm:$0xff]  }
 0x27c   : > { %4626 = vmatprep.mubr.bf16.mxu1 %v12977_v6  ;;  %v12992_v8 = vpop.f32.mrf.mxu0  ;;  %v12998_v42 = vpop.f32.mrf.mxu1  ;;  %5212 = vmatprep.subr.bf16.mxu1 %v10144_v52  ;;  %v16294_v6 = vld [vmem:[#allocation24_spill] sm:$0xff]  ;;  %v10138_v52 = vld [vmem:[%s15887_s3 + $0x16c] ss:$16 sps:$4 sm:$0xff]  }
 0x27d   : > { %v13021_v49 = vmul.bf16 %v16294_v6, %v3088_v53  ;;  %5213 = vmatpush1.bf16.msra.mxu1 %v10142_v1  ;;  %v13035_v14 = vmul.bf16 %v16294_v6, %v3090_v4  ;;  %4881 = vmatprep.subr.bf16.mxu0 %v10138_v52  ;;  %v3089_v4 = vpack.c.bf16 %v12697_v36, %v12672_v48  ;;  %v10148_v48 = vld [vmem:[%s15887_s3 + $0x288] ss:$16 sps:$4 sm:$0xff]   ;;  %v16300_v52 = vld [vmem:[#allocation26_spill] sm:$0xff] }
 0x27e   : > { %v13005_v45 = vpop.f32.mrf.mxu0  ;;  %v13010_v30 = vpop.f32.mrf.mxu1  ;;  %4882 = vmatpush2.bf16.msra.mxu0 %v10136_v46  ;;  %5214 = vmatprep.subr.bf16.mxu1 %v10147_v22 }
 0x27f   : > { %16295 = vst [vmem:[#allocation24_spill] sm:$0xff] %v13021_v49  ;;  %16296 = vst [vmem:[#allocation142_spill] sm:$0xff] %v13035_v14 }
 0x280   : > { %v13015_v13 = vpop.f32.mrf.mxu0  ;;  %v13023_v44 = vpop.f32.mrf.mxu1 }
 0x281   : > { %5215 = vmatpush1.bf16.msra.mxu1 %v10145_v41  ;;  %v10156_v41 = vld [vmem:[%s15887_s3 + $0x26c] ss:$16 sps:$4 sm:$0xff]  }
 0x282   : > { %4274 = vmatmul.mubr.bf16.gmra.mxu0 %v13013_v31  ;;  %v13038_v53 = vpop.f32.mrf.mxu0  ;;  %v13045_v1 = vpop.f32.mrf.mxu1  ;;  %v3092_v31 = vpack.c.bf16 %v12763_v25, %v12734_v63  ;;  %v16297_v63 = vld [vmem:[#allocation23_spill] sm:$0xff] }
 0x283   : > { %4627 = vmatmul.mubr.bf16.gmra.mxu1 %v13018_v56  ;;  %4283 = vmatprep.mubr.bf16.mxu0 %v13021_v49  ;;  %v10150_v49 = vld [vmem:[%s15887_s3 + $0x28c] ss:$16 sps:$4 sm:$0xff]   ;;  %v13071_v25 = vmul.bf16 %v16297_v63, %v3087_v37  ;;  %v13074_v46 = vmul.bf16 %v16297_v63, %v3089_v4  ;;  %v10154_v37 = vld [vmem:[%s15887_s3 + $0x268] ss:$16 sps:$4 sm:$0xff]   ;;  %v3091_v4 = vpack.c.bf16 %v12754_v2, %v12727_v34 }
 0x284   : > { %4636 = vmatprep.mubr.bf16.mxu1 %v13035_v14  ;;  %v13050_v6 = vpop.f32.mrf.mxu0  ;;  %v13056_v51 = vpop.f32.mrf.mxu1  ;;  %5216 = vmatprep.subr.bf16.mxu1 %v10150_v49  ;;  %v13077_v22 = vmul.bf16 %v16300_v52, %v3092_v31  ;;  %v13087_v14 = vmul.bf16 %v16300_v52, %v3094_v23  ;;  %v3093_v23 = vpack.c.bf16 %v12756_v16, %v12729_v55  ;;  %v10157_v2 = vld [vmem:[%s15887_s3 + $0x248] ss:$16 sps:$4 sm:$0xff]  }
 0x285   : > { %16298 = vst [vmem:[#allocation23_spill] sm:$0xff] %v13071_v25  ;;  %16299 = vst [vmem:[#allocation143_spill] sm:$0xff] %v13074_v46  ;;  %5217 = vmatpush1.bf16.msra.mxu1 %v10148_v48  ;;  %v3096_v48 = vpack.c.bf16 %v12815_v54, %v12786_v17  ;;  %v3098_v34 = vpack.c.bf16 %v12824_v26, %v12797_v0  ;;  %v16303_v17 = vld [vmem:[#allocation25_spill] sm:$0xff] }
 0x286   : > { %v13063_v10 = vpop.f32.mrf.mxu0  ;;  %v13068_v36 = vpop.f32.mrf.mxu1  ;;  %16301 = vst [vmem:[#allocation26_spill] sm:$0xff] %v13077_v22  ;;  %16302 = vst [vmem:[#allocation144_spill] sm:$0xff] %v13087_v14  ;;  %5218 = vmatprep.subr.bf16.mxu1 %v10156_v41  ;;  %v13123_v54 = vmul.bf16 %v16303_v17, %v3091_v4  ;;  %v13126_v41 = vmul.bf16 %v16303_v17, %v3093_v23  ;;  %v10151_v26 = vld [vmem:[%s15887_s3 + $0x148] ss:$16 sps:$4 sm:$0xff]   ;;  %v10153_v0 = vld [vmem:[%s15887_s3 + $0x14c] ss:$16 sps:$4 sm:$0xff]   ;;  %v3095_v17 = vpack.c.bf16 %v12806_v12, %v12779_v7 }
 0x287   : > { %4883 = vmatprep.subr.bf16.mxu0 %v10153_v0  ;;  %v3102_v7 = vpack.c.bf16 %v12870_v3, %v12849_v9  ;;  %v16312_v9 = vld [vmem:[#allocation30_spill] sm:$0xff] }
 0x288   : > { %v13079_v43 = vpop.f32.mrf.mxu0  ;;  %16304 = vst [vmem:[#allocation25_spill] sm:$0xff] %v13123_v54  ;;  %16305 = vst [vmem:[#allocation145_spill] sm:$0xff] %v13126_v41  ;;  %4884 = vmatpush2.bf16.msra.mxu0 %v10151_v26 }
 0x289   : > { %v13081_v58 = vpop.f32.mrf.mxu1  ;;  %5219 = vmatpush1.bf16.msra.mxu1 %v10154_v37 }
 0x28a   : > { %4284 = vmatmul.mubr.bf16.gmra.mxu0 %v13071_v25  ;;  %v13095_v49 = vpop.f32.mrf.mxu0  ;;  %v3104_v25 = vpack.c.bf16 %v12914_v11, %v12887_v24 }
 0x28b   : > { %4637 = vmatmul.mubr.bf16.gmra.mxu1 %v13074_v46  ;;  %4293 = vmatprep.mubr.bf16.mxu0 %v13077_v22  ;;  %v13097_v31 = vpop.f32.mrf.mxu1  ;;  %v10159_v22 = vld [vmem:[%s15887_s3 + $0x24c] ss:$16 sps:$4 sm:$0xff]  }
 0x28c   : > { %4646 = vmatprep.mubr.bf16.mxu1 %v13087_v14  ;;  %v13106_v63 = vpop.f32.mrf.mxu0  ;;  %5220 = vmatprep.subr.bf16.mxu1 %v10159_v22  ;;  %v16306_v14 = vld [vmem:[#allocation28_spill] sm:$0xff]  ;;  %v10162_v22 = vld [vmem:[%s15887_s3 + $0x22c] ss:$16 sps:$4 sm:$0xff]  }
 0x28d   : > { %v13108_v52 = vpop.f32.mrf.mxu1  ;;  %v13129_v46 = vmul.bf16 %v16306_v14, %v3096_v48  ;;  %v13141_v37 = vmul.bf16 %v16306_v14, %v3098_v34  ;;  %5221 = vmatpush1.bf16.msra.mxu1 %v10157_v2  ;;  %v10160_v48 = vld [vmem:[%s15887_s3 + $0x228] ss:$16 sps:$4 sm:$0xff]   ;;  %v3097_v2 = vpack.c.bf16 %v12810_v39, %v12781_v21 }
 0x28e   : > { %v13118_v55 = vpop.f32.mrf.mxu0  ;;  %5222 = vmatprep.subr.bf16.mxu1 %v10162_v22  ;;  %v10163_v21 = vld [vmem:[%s15887_s3 + $0x208] ss:$16 sps:$4 sm:$0xff]   ;;  %v10171_v22 = vld [vmem:[%s15887_s3 + $0x3ec] ss:$16 sps:$4 sm:$0xff]  }
 0x28f   : > { %v13120_v16 = vpop.f32.mrf.mxu1  ;;  %16307 = vst [vmem:[#allocation28_spill] sm:$0xff] %v13129_v46  ;;  %16308 = vst [vmem:[#allocation146_spill] sm:$0xff] %v13141_v37 }
 0x291   : > { %5223 = vmatpush1.bf16.msra.mxu1 %v10160_v48  ;;  %v13193_v48 = vmul.bf16 %v16312_v9, %v3102_v7 }
 0x292   : > { %v13143_v4 = vpop.f32.mrf.mxu0  ;;  %v13145_v23 = vpop.f32.mrf.mxu1  ;;  %4294 = vmatmul.mubr.bf16.gmra.mxu0 %v13123_v54  ;;  %v3100_v54 = vpack.c.bf16 %v12864_v50, %v12838_v38  ;;  %v16309_v50 = vld [vmem:[#allocation27_spill] sm:$0xff] }
 0x293   : > { %4647 = vmatmul.mubr.bf16.gmra.mxu1 %v13126_v41  ;;  %4303 = vmatprep.mubr.bf16.mxu0 %v13129_v46  ;;  %v10165_v46 = vld [vmem:[%s15887_s3 + $0x20c] ss:$16 sps:$4 sm:$0xff]   ;;  %v13177_v39 = vmul.bf16 %v16309_v50, %v3095_v17  ;;  %v13184_v0 = vmul.bf16 %v16309_v50, %v3097_v2  ;;  %16314 = vst [vmem:[#allocation148_spill] sm:$0xff] %v13193_v48  ;;  %v10169_v2 = vld [vmem:[%s15887_s3 + $0x3e8] ss:$16 sps:$4 sm:$0xff]  }
 0x294   : > { %4656 = vmatprep.mubr.bf16.mxu1 %v13141_v37  ;;  %v13156_v14 = vpop.f32.mrf.mxu0  ;;  %v13158_v34 = vpop.f32.mrf.mxu1  ;;  %5224 = vmatprep.subr.bf16.mxu1 %v10165_v46  ;;  %v13187_v3 = vmul.bf16 %v16312_v9, %v3100_v54  ;;  %v16315_v54 = vld [vmem:[#allocation117_spill] sm:$0xff] }
 0x295   : > { %16310 = vst [vmem:[#allocation27_spill] sm:$0xff] %v13177_v39  ;;  %16311 = vst [vmem:[#allocation147_spill] sm:$0xff] %v13184_v0  ;;  %5225 = vmatpush1.bf16.msra.mxu1 %v10163_v21  ;;  %v3099_v50 = vpack.c.bf16 %v16315_v54, %v12831_v19  ;;  %v16317_v21 = vld [vmem:[#allocation114_spill] sm:$0xff]  ;;  %v3106_v19 = vpack.c.bf16 %v12916_v29, %v12889_v61  ;;  %v16321_v29 = vld [vmem:[#allocation32_spill] sm:$0xff] }
 0x296   : > { %v13169_v12 = vpop.f32.mrf.mxu0  ;;  %v13171_v37 = vpop.f32.mrf.mxu1  ;;  %16313 = vst [vmem:[#allocation30_spill] sm:$0xff] %v13187_v3  ;;  %5226 = vmatprep.subr.bf16.mxu1 %v10171_v22  ;;  %v10172_v22 = vld [vmem:[%s15887_s3 + $0x3c8] ss:$16 sps:$4 sm:$0xff]   ;;  %v13239_v61 = vmul.bf16 %v16321_v29, %v3104_v25 }
 0x297   : > { %v13251_v56 = vmul.bf16 %v16321_v29, %v3106_v19  ;;  %v10175_v25 = vld [vmem:[%s15887_s3 + $0x3a8] ss:$16 sps:$4 sm:$0xff]  }
 0x298   : > { %v13179_v38 = vpop.f32.mrf.mxu0  ;;  %v13181_v26 = vpop.f32.mrf.mxu1  ;;  %16322 = vst [vmem:[#allocation114_spill] sm:$0xff] %v13239_v61 }
 0x299   : > { %5227 = vmatpush2.bf16.msra.mxu1 %v10169_v2  ;;  %v10166_v2 = vld [vmem:[%s15887_s3 + $0x128] ss:$16 sps:$4 sm:$0xff]  }
 0x29a   : > { %v13195_v46 = vpop.f32.mrf.mxu0  ;;  %v13197_v17 = vpop.f32.mrf.mxu1  ;;  %4304 = vmatmul.mubr.bf16.gmra.mxu0 %v13177_v39  ;;  %v16316_v39 = vld [vmem:[#allocation105_spill] sm:$0xff] }
 0x29b   : > { %4657 = vmatmul.mubr.bf16.gmra.mxu1 %v13184_v0  ;;  %4313 = vmatprep.mubr.bf16.mxu0 %v13187_v3  ;;  %v3101_v41 = vpack.c.bf16 %v16317_v21, %v16316_v39  ;;  %v10174_v3 = vld [vmem:[%s15887_s3 + $0x3cc] ss:$16 sps:$4 sm:$0xff]  }
 0x29c   : > { %4666 = vmatprep.mubr.bf16.mxu1 %v13193_v48  ;;  %v13208_v7 = vpop.f32.mrf.mxu0  ;;  %v13210_v9 = vpop.f32.mrf.mxu1  ;;  %5228 = vmatprep.subr.bf16.mxu1 %v10174_v3  ;;  %v16318_v39 = vld [vmem:[#allocation29_spill] sm:$0xff] }
 0x29d   : > { %v13229_v21 = vmul.bf16 %v16318_v39, %v3099_v50  ;;  %v13236_v0 = vmul.bf16 %v16318_v39, %v3101_v41  ;;  %v10168_v3 = vld [vmem:[%s15887_s3 + $0x12c] ss:$16 sps:$4 sm:$0xff]   ;;  %16323 = vst [vmem:[#allocation29_spill] sm:$0xff] %v13251_v56  ;;  %5229 = vmatpush2.bf16.msra.mxu1 %v10172_v22 }
 0x29e   : > { %v13221_v54 = vpop.f32.mrf.mxu0  ;;  %v13223_v48 = vpop.f32.mrf.mxu1  ;;  %v10177_v50 = vld [vmem:[%s15887_s3 + $0x3ac] ss:$16 sps:$4 sm:$0xff]   ;;  %4885 = vmatprep.subr.bf16.mxu0 %v10168_v3 }
 0x29f   : > { %16319 = vst [vmem:[#allocation117_spill] sm:$0xff] %v13229_v21  ;;  %16320 = vst [vmem:[#allocation105_spill] sm:$0xff] %v13236_v0  ;;  %v16327_v22 = vld [vmem:[#allocation111_spill] sm:$0xff]  ;;  %4886 = vmatpush2.bf16.msra.mxu0 %v10166_v2  ;;  %5230 = vmatprep.subr.bf16.mxu1 %v10177_v50 }
 0x2a0   : > { %v13231_v11 = vpop.f32.mrf.mxu0  ;;  %v13233_v24 = vpop.f32.mrf.mxu1 }
 0x2a1   : > { %5231 = vmatpush2.bf16.msra.mxu1 %v10175_v25  ;;  %v10186_v25 = vld [vmem:[%s15887_s3 + $0x36c] ss:$16 sps:$4 sm:$0xff]  }
 0x2a2   : > { %v13253_v41 = vpop.f32.mrf.mxu0  ;;  %v13255_v39 = vpop.f32.mrf.mxu1  ;;  %4314 = vmatmul.mubr.bf16.gmra.mxu0 %v13229_v21  ;;  %v16326_v21 = vld [vmem:[#allocation118_spill] sm:$0xff] }
 0x2a3   : > { %16324 = vst [vmem:[#allocation32_spill] sm:$0xff] %v13253_v41  ;;  %16325 = vst [vmem:[#allocation149_spill] sm:$0xff] %v13255_v39  ;;  %4667 = vmatmul.mubr.bf16.gmra.mxu1 %v13236_v0  ;;  %4323 = vmatprep.mubr.bf16.mxu0 %v13239_v61  ;;  %v3105_v39 = vpack.c.bf16 %v16327_v22, %v16326_v21  ;;  %v3108_v41 = vpack.c.bf16 %v12954_v40, %v12933_v20  ;;  %v10180_v61 = vld [vmem:[%s15887_s3 + $0x38c] ss:$16 sps:$4 sm:$0xff]   ;;  %v10178_v21 = vld [vmem:[%s15887_s3 + $0x388] ss:$16 sps:$4 sm:$0xff]  }
 0x2a4   : > { %4676 = vmatprep.mubr.bf16.mxu1 %v13251_v56  ;;  %v13266_v19 = vpop.f32.mrf.mxu0  ;;  %v13268_v29 = vpop.f32.mrf.mxu1  ;;  %5232 = vmatprep.subr.bf16.mxu1 %v10180_v61  ;;  %v16328_v20 = vld [vmem:[#allocation31_spill] sm:$0xff]  ;;  %v13303_v22 = vmul.bf16 %v16331_v33, %v3110_v27  ;;  %v3116_v0 = vpack.c.bf16 %v13063_v10, %v13038_v53 }
 0x2a5   : > { %v13287_v40 = vmul.bf16 %v16328_v20, %v3103_v60  ;;  %v13294_v50 = vmul.bf16 %v16328_v20, %v3105_v39  ;;  %v13297_v28 = vmul.bf16 %v16331_v33, %v3108_v41  ;;  %5233 = vmatpush2.bf16.msra.mxu1 %v10178_v21  ;;  %v10184_v39 = vld [vmem:[%s15887_s3 + $0x368] ss:$16 sps:$4 sm:$0xff]   ;;  %v3107_v41 = vpack.c.bf16 %v12943_v57, %v12920_v5 }
 0x2a6   : > { %v13279_v18 = vpop.f32.mrf.mxu0  ;;  %v13281_v56 = vpop.f32.mrf.mxu1  ;;  %16333 = vst [vmem:[#allocation34_spill] sm:$0xff] %v13303_v22  ;;  %5234 = vmatprep.subr.bf16.mxu1 %v10186_v25  ;;  %v3109_v21 = vpack.c.bf16 %v12948_v35, %v12925_v32  ;;  %v3112_v33 = vpack.c.bf16 %v13005_v45, %v12980_v59  ;;  %v3114_v5 = vpack.c.bf16 %v13010_v30, %v12987_v15  ;;  %v10187_v25 = vld [vmem:[%s15887_s3 + $0x348] ss:$16 sps:$4 sm:$0xff]  }
 0x2a7   : > { %16329 = vst [vmem:[#allocation118_spill] sm:$0xff] %v13287_v40  ;;  %16330 = vst [vmem:[#allocation111_spill] sm:$0xff] %v13294_v50  ;;  %v16334_v32 = vld [vmem:[#allocation33_spill] sm:$0xff] }
 0x2a8   : > { %v13289_v2 = vpop.f32.mrf.mxu0  ;;  %v13291_v3 = vpop.f32.mrf.mxu1  ;;  %16332 = vst [vmem:[#allocation31_spill] sm:$0xff] %v13297_v28  ;;  %v13339_v35 = vmul.bf16 %v16334_v32, %v3107_v41  ;;  %v16337_v15 = vld [vmem:[#allocation37_spill] sm:$0xff] }
 0x2a9   : > { %5235 = vmatpush2.bf16.msra.mxu1 %v10184_v39  ;;  %v13349_v30 = vmul.bf16 %v16337_v15, %v3112_v33  ;;  %v10192_v39 = vld [vmem:[%s15887_s3 + $0x32c] ss:$16 sps:$4 sm:$0xff]  }
 0x2aa   : > { %v13305_v61 = vpop.f32.mrf.mxu0  ;;  %4324 = vmatmul.mubr.bf16.gmra.mxu0 %v13287_v40  ;;  %16335 = vst [vmem:[#allocation33_spill] sm:$0xff] %v13339_v35  ;;  %v13355_v40 = vmul.bf16 %v16337_v15, %v3114_v5  ;;  %v10183_v33 = vld [vmem:[%s15887_s3 + $0x10c] ss:$16 sps:$4 sm:$0xff]   ;;  %v10190_v5 = vld [vmem:[%s15887_s3 + $0x328] ss:$16 sps:$4 sm:$0xff]  }
 0x2ab   : > { %v13307_v60 = vpop.f32.mrf.mxu1  ;;  %4677 = vmatmul.mubr.bf16.gmra.mxu1 %v13294_v50  ;;  %4333 = vmatprep.mubr.bf16.mxu0 %v13297_v28  ;;  %v10189_v28 = vld [vmem:[%s15887_s3 + $0x34c] ss:$16 sps:$4 sm:$0xff]   ;;  %v13346_v50 = vmul.bf16 %v16334_v32, %v3109_v21  ;;  %16338 = vst [vmem:[#allocation37_spill] sm:$0xff] %v13349_v30  ;;  %v10181_v21 = vld [vmem:[%s15887_s3 + $0x108] ss:$16 sps:$4 sm:$0xff]   ;;  %v3111_v32 = vpack.c.bf16 %v12992_v8, %v12963_v47 }
 0x2ac   : > { %4686 = vmatprep.mubr.bf16.mxu1 %v13303_v22  ;;  %v13318_v27 = vpop.f32.mrf.mxu0  ;;  %5236 = vmatprep.subr.bf16.mxu1 %v10189_v28  ;;  %16339 = vst [vmem:[#allocation151_spill] sm:$0xff] %v13355_v40  ;;  %v3118_v47 = vpack.c.bf16 %v13068_v36, %v13045_v1  ;;  %v16343_v1 = vld [vmem:[#allocation40_spill] sm:$0xff] }
 0x2ad   : > { %v13320_v20 = vpop.f32.mrf.mxu1  ;;  %16336 = vst [vmem:[#allocation150_spill] sm:$0xff] %v13346_v50  ;;  %5237 = vmatpush2.bf16.msra.mxu1 %v10187_v25  ;;  %4887 = vmatprep.subr.bf16.mxu0 %v10183_v33  ;;  %v3113_v25 = vpack.c.bf16 %v12998_v42, %v12971_v62  ;;  %v10193_v62 = vld [vmem:[%s15887_s3 + $0x308] ss:$16 sps:$4 sm:$0xff]   ;;  %v16340_v42 = vld [vmem:[#allocation36_spill] sm:$0xff]  ;;  %v13407_v36 = vmul.bf16 %v16343_v1, %v3116_v0 }
 0x2ae   : > { %v13331_v57 = vpop.f32.mrf.mxu0  ;;  %4888 = vmatpush2.bf16.msra.mxu0 %v10181_v21  ;;  %5238 = vmatprep.subr.bf16.mxu1 %v10192_v39  ;;  %v13397_v53 = vmul.bf16 %v16340_v42, %v3111_v32  ;;  %v13410_v33 = vmul.bf16 %v16343_v1, %v3118_v47  ;;  %v3115_v32 = vpack.c.bf16 %v13050_v6, %v13015_v13  ;;  %v16346_v13 = vld [vmem:[#allocation39_spill] sm:$0xff] }
 0x2af   : > { %v13333_v22 = vpop.f32.mrf.mxu1  ;;  %v13404_v21 = vmul.bf16 %v16340_v42, %v3113_v25  ;;  %16344 = vst [vmem:[#allocation40_spill] sm:$0xff] %v13407_v36  ;;  %v3117_v25 = vpack.c.bf16 %v13056_v51, %v13023_v44  ;;  %v3120_v47 = vpack.c.bf16 %v13118_v55, %v13095_v49  ;;  %v3122_v42 = vpack.c.bf16 %v13120_v16, %v13097_v31  ;;  %v16349_v51 = vld [vmem:[#allocation43_spill] sm:$0xff]  ;;  %v13452_v31 = vld [vmem:[%s15889_s5 + $0x38] sm:$0xff]  }
 0x2b0   : > { %v13341_v59 = vpop.f32.mrf.mxu0  ;;  %16341 = vst [vmem:[#allocation36_spill] sm:$0xff] %v13397_v53  ;;  %16345 = vst [vmem:[#allocation153_spill] sm:$0xff] %v13410_v33  ;;  %v13437_v6 = vmul.bf16 %v16346_v13, %v3115_v32  ;;  %9720 = vmatprep.subr.bf16.mxu0 %v13452_v31 }
 0x2b1   : > { %v13343_v45 = vpop.f32.mrf.mxu1  ;;  %5239 = vmatpush2.bf16.msra.mxu1 %v10190_v5  ;;  %16342 = vst [vmem:[#allocation152_spill] sm:$0xff] %v13404_v21  ;;  %v13445_v44 = vmul.bf16 %v16349_v51, %v3120_v47  ;;  %16351 = vst [vmem:[#allocation155_spill] sm:$0xff] %v13452_v31  ;;  %v13455_v55 = vmul.bf16 %v16349_v51, %v3122_v42  ;;  %v3121_v42 = vpack.c.bf16 %v13108_v52, %v13081_v58  ;;  %v16356_v58 = vld [vmem:[#allocation46_spill] sm:$0xff] }
 0x2b2   : > { %v13357_v28 = vpop.f32.mrf.mxu0  ;;  %4334 = vmatmul.mubr.bf16.gmra.mxu0 %v13339_v35  ;;  %16347 = vst [vmem:[#allocation39_spill] sm:$0xff] %v13437_v6 }
 0x2b3   : > { %v13359_v41 = vpop.f32.mrf.mxu1  ;;  %4687 = vmatmul.mubr.bf16.gmra.mxu1 %v13346_v50  ;;  %4343 = vmatprep.mubr.bf16.mxu0 %v13349_v30  ;;  %v10195_v30 = vld [vmem:[%s15887_s3 + $0x30c] ss:$16 sps:$4 sm:$0xff]   ;;  %16350 = vst [vmem:[#allocation43_spill] sm:$0xff] %v13445_v44  ;;  %16352 = vst [vmem:[#allocation156_spill] sm:$0xff] %v13455_v55 }
 0x2b4   : > { %4696 = vmatprep.mubr.bf16.mxu1 %v13355_v40  ;;  %v13376_v15 = vpop.f32.mrf.mxu0  ;;  %5240 = vmatprep.subr.bf16.mxu1 %v10195_v30 }
 0x2b5   : > { %v13378_v35 = vpop.f32.mrf.mxu1  ;;  %5241 = vmatpush2.bf16.msra.mxu1 %v10193_v62 }
 0x2b6   : > { %v13389_v8 = vpop.f32.mrf.mxu0 }
 0x2b7   : > { %v13391_v40 = vpop.f32.mrf.mxu1 }
 0x2b8   : > { %v13399_v10 = vpop.f32.mrf.mxu0 }
 0x2b9   : > { %v13401_v39 = vpop.f32.mrf.mxu1 }
 0x2ba   : > { %v13412_v5 = vpop.f32.mrf.mxu0  ;;  %4344 = vmatmul.mubr.bf16.gmra.mxu0 %v13397_v53 }
 0x2bb   : > { %v13415_v30 = vpop.f32.mrf.mxu1  ;;  %4697 = vmatmul.mubr.bf16.gmra.mxu1 %v13404_v21  ;;  %4353 = vmatprep.mubr.bf16.mxu0 %v13407_v36  ;;  %v13442_v21 = vmul.bf16 %v16346_v13, %v3117_v25  ;;  %v3119_v25 = vpack.c.bf16 %v13106_v63, %v13079_v43  ;;  %v3124_v13 = vpack.c.bf16 %v13179_v38, %v13156_v14  ;;  %v16353_v63 = vld [vmem:[#allocation41_spill] sm:$0xff] }
 0x2bc   : > { %4706 = vmatprep.mubr.bf16.mxu1 %v13410_v33  ;;  %v13422_v0 = vpop.f32.mrf.mxu0  ;;  %v13488_v53 = vmul.bf16 %v16353_v63, %v3121_v42 }
 0x2bd   : > { %v13428_v62 = vpop.f32.mrf.mxu1  ;;  %16348 = vst [vmem:[#allocation154_spill] sm:$0xff] %v13442_v21  ;;  %v13491_v52 = vmul.bf16 %v16356_v58, %v3124_v13  ;;  %v3128_v13 = vpack.c.bf16 %v13231_v11, %v13208_v7 }
 0x2be   : > { %v13432_v1 = vpop.f32.mrf.mxu0  ;;  %16355 = vst [vmem:[#allocation157_spill] sm:$0xff] %v13488_v53 }
 0x2bf   : > { %v13434_v36 = vpop.f32.mrf.mxu1  ;;  %16357 = vst [vmem:[#allocation46_spill] sm:$0xff] %v13491_v52 }
 0x2c0   : > { %v13439_v33 = vpop.f32.mrf.mxu0 }
 0x2c1   : > { %v13447_v49 = vpop.f32.mrf.mxu1 }
 0x2c2   : > { %v13457_v16 = vpop.f32.mrf.mxu0  ;;  %4354 = vmatmul.mubr.bf16.gmra.mxu0 %v13437_v6 }
 0x2c3   : > { %v13460_v32 = vpop.f32.mrf.mxu1  ;;  %4707 = vmatmul.mubr.bf16.gmra.mxu1 %v13442_v21  ;;  %4363 = vmatprep.mubr.bf16.mxu0 %v13445_v44  ;;  %v3126_v44 = vpack.c.bf16 %v13181_v26, %v13158_v34 }
 0x2c4   : > { %4716 = vmatprep.mubr.bf16.mxu1 %v13455_v55  ;;  %v13467_v47 = vpop.f32.mrf.mxu0  ;;  %v13483_v55 = vmul.bf16 %v16353_v63, %v3119_v25  ;;  %v3123_v25 = vpack.c.bf16 %v13169_v12, %v13143_v4  ;;  %v16359_v4 = vld [vmem:[#allocation44_spill] sm:$0xff] }
 0x2c5   : > { %v13474_v51 = vpop.f32.mrf.mxu1  ;;  %v13496_v38 = vmul.bf16 %v16356_v58, %v3126_v44  ;;  %v3125_v44 = vpack.c.bf16 %v13171_v37, %v13145_v23  ;;  %v3130_v58 = vpack.c.bf16 %v13233_v24, %v13210_v9  ;;  %v16362_v37 = vld [vmem:[#allocation49_spill] sm:$0xff] }
 0x2c6   : > { %v13478_v21 = vpop.f32.mrf.mxu0  ;;  %16354 = vst [vmem:[#allocation41_spill] sm:$0xff] %v13483_v55  ;;  %v13523_v12 = vmul.bf16 %v16359_v4, %v3123_v25  ;;  %v13531_v23 = vmul.bf16 %v16362_v37, %v3128_v13  ;;  %v3127_v25 = vpack.c.bf16 %v13221_v54, %v13195_v46  ;;  %v3129_v13 = vpack.c.bf16 %v13223_v48, %v13197_v17  ;;  %v16365_v46 = vld [vmem:[#allocation47_spill] sm:$0xff]  ;;  %v16368_v48 = vld [vmem:[#allocation52_spill] sm:$0xff] }
 0x2c7   : > { %v13480_v43 = vpop.f32.mrf.mxu1  ;;  %16358 = vst [vmem:[#allocation158_spill] sm:$0xff] %v13496_v38  ;;  %v13536_v11 = vmul.bf16 %v16362_v37, %v3130_v58  ;;  %v3132_v58 = vpack.c.bf16 %v13289_v2, %v13266_v19  ;;  %v3134_v37 = vpack.c.bf16 %v13291_v3, %v13268_v29 }
 0x2c8   : > { %v13485_v6 = vpop.f32.mrf.mxu0  ;;  %16360 = vst [vmem:[#allocation44_spill] sm:$0xff] %v13523_v12  ;;  %16363 = vst [vmem:[#allocation49_spill] sm:$0xff] %v13531_v23  ;;  %v13563_v54 = vmul.bf16 %v16365_v46, %v3127_v25  ;;  %v16371_v25 = vld [vmem:[#allocation32_spill] sm:$0xff] }
 0x2c9   : > { %v13493_v14 = vpop.f32.mrf.mxu1  ;;  %16364 = vst [vmem:[#allocation160_spill] sm:$0xff] %v13536_v11  ;;  %v13571_v17 = vmul.bf16 %v16368_v48, %v3132_v58  ;;  %v13576_v2 = vmul.bf16 %v16368_v48, %v3134_v37  ;;  %v3136_v48 = vpack.c.bf16 %v13341_v59, %v13318_v27 }
 0x2ca   : > { %v13498_v34 = vpop.f32.mrf.mxu0  ;;  %4364 = vmatmul.mubr.bf16.gmra.mxu0 %v13483_v55  ;;  %v13528_v55 = vmul.bf16 %v16359_v4, %v3125_v44  ;;  %16366 = vst [vmem:[#allocation47_spill] sm:$0xff] %v13563_v54 }
 0x2cb   : > { %v13501_v26 = vpop.f32.mrf.mxu1  ;;  %4717 = vmatmul.mubr.bf16.gmra.mxu1 %v13488_v53  ;;  %4373 = vmatprep.mubr.bf16.mxu0 %v13491_v52  ;;  %16369 = vst [vmem:[#allocation52_spill] sm:$0xff] %v13571_v17  ;;  %16370 = vst [vmem:[#allocation162_spill] sm:$0xff] %v13576_v2 }
 0x2cc   : > { %4726 = vmatprep.mubr.bf16.mxu1 %v13496_v38  ;;  %v13508_v42 = vpop.f32.mrf.mxu0  ;;  %16361 = vst [vmem:[#allocation159_spill] sm:$0xff] %v13528_v55 }
 0x2cd   : > { %v13514_v63 = vpop.f32.mrf.mxu1 }
 0x2ce   : > { %v13518_v53 = vpop.f32.mrf.mxu0 }
 0x2cf   : > { %v13520_v52 = vpop.f32.mrf.mxu1 }
 0x2d0   : > { %v13525_v38 = vpop.f32.mrf.mxu0 }
 0x2d1   : > { %v13533_v7 = vpop.f32.mrf.mxu1 }
 0x2d2   : > { %v13538_v9 = vpop.f32.mrf.mxu0  ;;  %4374 = vmatmul.mubr.bf16.gmra.mxu0 %v13523_v12  ;;  %v13568_v12 = vmul.bf16 %v16365_v46, %v3129_v13  ;;  %v3131_v13 = vpack.c.bf16 %v13279_v18, %v16371_v25  ;;  %v16372_v46 = vld [vmem:[#allocation149_spill] sm:$0xff]  ;;  %v16373_v18 = vld [vmem:[#allocation50_spill] sm:$0xff] }
 0x2d3   : > { %v13541_v24 = vpop.f32.mrf.mxu1  ;;  %4727 = vmatmul.mubr.bf16.gmra.mxu1 %v13528_v55  ;;  %4383 = vmatprep.mubr.bf16.mxu0 %v13531_v23  ;;  %v3133_v37 = vpack.c.bf16 %v13281_v56, %v16372_v46  ;;  %v16376_v56 = vld [vmem:[#allocation55_spill] sm:$0xff] }
 0x2d4   : > { %4736 = vmatprep.mubr.bf16.mxu1 %v13536_v11  ;;  %v13548_v44 = vpop.f32.mrf.mxu0  ;;  %16367 = vst [vmem:[#allocation161_spill] sm:$0xff] %v13568_v12  ;;  %v13603_v25 = vmul.bf16 %v16373_v18, %v3131_v13  ;;  %v13611_v46 = vmul.bf16 %v16376_v56, %v3136_v48  ;;  %v3135_v13 = vpack.c.bf16 %v13331_v57, %v13305_v61  ;;  %v16379_v61 = vld [vmem:[#allocation53_spill] sm:$0xff] }
 0x2d5   : > { %v13554_v4 = vpop.f32.mrf.mxu1  ;;  %v13608_v31 = vmul.bf16 %v16373_v18, %v3133_v37  ;;  %v3140_v48 = vpack.c.bf16 %v13399_v10, %v13376_v15 }
 0x2d6   : > { %v13558_v55 = vpop.f32.mrf.mxu0  ;;  %16374 = vst [vmem:[#allocation32_spill] sm:$0xff] %v13603_v25  ;;  %16377 = vst [vmem:[#allocation50_spill] sm:$0xff] %v13611_v46  ;;  %v13643_v57 = vmul.bf16 %v16379_v61, %v3135_v13  ;;  %v3139_v13 = vpack.c.bf16 %v13389_v8, %v13357_v28  ;;  %v16385_v28 = vld [vmem:[#allocation56_spill] sm:$0xff] }
 0x2d7   : > { %v13560_v23 = vpop.f32.mrf.mxu1  ;;  %16375 = vst [vmem:[#allocation149_spill] sm:$0xff] %v13608_v31 }
 0x2d8   : > { %v13565_v11 = vpop.f32.mrf.mxu0  ;;  %16380 = vst [vmem:[#allocation53_spill] sm:$0xff] %v13643_v57  ;;  %v13683_v8 = vmul.bf16 %v16385_v28, %v3139_v13  ;;  %v16393_v13 = vld [vmem:[#allocation3_spill] sm:$0xff] }
 0x2d9   : > { %v13573_v19 = vpop.f32.mrf.mxu1 }
 0x2da   : > { %v13578_v29 = vpop.f32.mrf.mxu0  ;;  %4384 = vmatmul.mubr.bf16.gmra.mxu0 %v13563_v54  ;;  %16386 = vst [vmem:[#allocation56_spill] sm:$0xff] %v13683_v8 }
 0x2db   : > { %v13581_v3 = vpop.f32.mrf.mxu1  ;;  %4737 = vmatmul.mubr.bf16.gmra.mxu1 %v13568_v12  ;;  %4393 = vmatprep.mubr.bf16.mxu0 %v13571_v17  ;;  %v3138_v12 = vpack.c.bf16 %v13343_v45, %v13320_v20 }
 0x2dc   : > { %4746 = vmatprep.mubr.bf16.mxu1 %v13576_v2  ;;  %v13588_v58 = vpop.f32.mrf.mxu0 }
 0x2dd   : > { %v13594_v54 = vpop.f32.mrf.mxu1  ;;  %v13616_v59 = vmul.bf16 %v16376_v56, %v3138_v12  ;;  %v3137_v12 = vpack.c.bf16 %v13333_v22, %v13307_v60  ;;  %v3142_v56 = vpack.c.bf16 %v13401_v39, %v13378_v35  ;;  %v16382_v22 = vld [vmem:[#allocation57_spill] sm:$0xff] }
 0x2de   : > { %v13598_v50 = vpop.f32.mrf.mxu0  ;;  %v13651_v60 = vmul.bf16 %v16382_v22, %v3140_v48  ;;  %v3141_v48 = vpack.c.bf16 %v13391_v40, %v13359_v41  ;;  %v16388_v40 = vld [vmem:[#allocation62_spill] sm:$0xff] }
 0x2df   : > { %v13600_v17 = vpop.f32.mrf.mxu1  ;;  %16378 = vst [vmem:[#allocation55_spill] sm:$0xff] %v13616_v59  ;;  %v13656_v10 = vmul.bf16 %v16382_v22, %v3142_v56  ;;  %v3144_v56 = vpack.c.bf16 %v13439_v33, %v13422_v0  ;;  %v3146_v22 = vpack.c.bf16 %v13447_v49, %v13428_v62 }
 0x2e0   : > { %v13605_v2 = vpop.f32.mrf.mxu0  ;;  %16383 = vst [vmem:[#allocation57_spill] sm:$0xff] %v13651_v60 }
 0x2e1   : > { %v13613_v27 = vpop.f32.mrf.mxu1  ;;  %16384 = vst [vmem:[#allocation164_spill] sm:$0xff] %v13656_v10  ;;  %v13691_v41 = vmul.bf16 %v16388_v40, %v3144_v56  ;;  %v13696_v0 = vmul.bf16 %v16388_v40, %v3146_v22  ;;  %v3143_v56 = vpack.c.bf16 %v13432_v1, %v13412_v5  ;;  %v3148_v40 = vpack.c.bf16 %v13485_v6, %v13467_v47  ;;  %v10523_v5 = vld [vmem:[%s15891_s7] sm:$0xff] }
 0x2e2   : > { %v13618_v20 = vpop.f32.mrf.mxu0  ;;  %4394 = vmatmul.mubr.bf16.gmra.mxu0 %v13603_v25  ;;  %v13648_v25 = vmul.bf16 %v16379_v61, %v3137_v12 }
 0x2e3   : > { %v13621_v45 = vpop.f32.mrf.mxu1  ;;  %4747 = vmatmul.mubr.bf16.gmra.mxu1 %v13608_v31  ;;  %4403 = vmatprep.mubr.bf16.mxu0 %v13611_v46  ;;  %16389 = vst [vmem:[#allocation62_spill] sm:$0xff] %v13691_v41  ;;  %16390 = vst [vmem:[#allocation166_spill] sm:$0xff] %v13696_v0 }
 0x2e4   : > { %4756 = vmatprep.mubr.bf16.mxu1 %v13616_v59  ;;  %v13628_v37 = vpop.f32.mrf.mxu0  ;;  %16381 = vst [vmem:[#allocation163_spill] sm:$0xff] %v13648_v25 }
 0x2e5   : > { %v13634_v18 = vpop.f32.mrf.mxu1 }
 0x2e6   : > { %v13638_v31 = vpop.f32.mrf.mxu0 }
 0x2e7   : > { %v13640_v46 = vpop.f32.mrf.mxu1 }
 0x2e8   : > { %v13645_v59 = vpop.f32.mrf.mxu0 }
 0x2e9   : > { %v13653_v15 = vpop.f32.mrf.mxu1 }
 0x2ea   : > { %v13658_v35 = vpop.f32.mrf.mxu0  ;;  %4404 = vmatmul.mubr.bf16.gmra.mxu0 %v13643_v57  ;;  %v13688_v57 = vmul.bf16 %v16385_v28, %v3141_v48  ;;  %v13706_v48 = vsub.s32 1, %v16393_v13  ;;  %v3145_v28 = vpack.c.bf16 %v13434_v36, %v13415_v30  ;;  %v16398_v36 = vld [vmem:[#allocation60_spill] sm:$0xff] }
 0x2eb   : > { %v13661_v39 = vpop.f32.mrf.mxu1  ;;  %4757 = vmatmul.mubr.bf16.gmra.mxu1 %v13648_v25  ;;  %4413 = vmatprep.mubr.bf16.mxu0 %v13651_v60  ;;  %v13732_v30 = vmul.bf16 %v16398_v36, %v3143_v56 }
 0x2ec   : > { %4766 = vmatprep.mubr.bf16.mxu1 %v13656_v10  ;;  %v13668_v12 = vpop.f32.mrf.mxu0  ;;  %16387 = vst [vmem:[#allocation165_spill] sm:$0xff] %v13688_v57  ;;  %16394 = vst [vmem:[#allocation169_spill] sm:$0xff] %v13706_v48  ;;  %v13729_v1 = vrot.slane %v10523_v5, %v13706_v48  ;;  %v13737_v47 = vmul.bf16 %v16398_v36, %v3145_v28  ;;  %v13755_v28 = vsub.s32 3, %v16393_v13 }
 0x2ed   : > { %v13674_v61 = vpop.f32.mrf.mxu1  ;;  %16399 = vst [vmem:[#allocation60_spill] sm:$0xff] %v13732_v30  ;;  %v3152_v13 = vpack.c.bf16 %v13525_v38, %v13508_v42  ;;  %v16406_v38 = vld [vmem:[#allocation64_spill] sm:$0xff] }
 0x2ee   : > { %v13678_v25 = vpop.f32.mrf.mxu0  ;;  %16400 = vst [vmem:[#allocation173_spill] sm:$0xff] %v13737_v47  ;;  %16405 = vst [vmem:[#allocation176_spill] sm:$0xff] %v13755_v28 }
 0x2ef   : > { %v13680_v60 = vpop.f32.mrf.mxu1 }
 0x2f0   : > { %v13685_v10 = vpop.f32.mrf.mxu0 }
 0x2f1   : > { %v13693_v33 = vpop.f32.mrf.mxu1 }
 0x2f2   : > { %v13698_v62 = vpop.f32.mrf.mxu0  ;;  %4414 = vmatmul.mubr.bf16.gmra.mxu0 %v13683_v8 }
 0x2f3   : > { %16391 = vst [vmem:[#allocation167_spill] sm:$0xff] %v13698_v62  ;;  %v13701_v49 = vpop.f32.mrf.mxu1  ;;  %4767 = vmatmul.mubr.bf16.gmra.mxu1 %v13688_v57  ;;  %4423 = vmatprep.mubr.bf16.mxu0 %v13691_v41  ;;  %v3150_v41 = vpack.c.bf16 %v13493_v14, %v13474_v51  ;;  %v16401_v51 = vld [vmem:[#allocation67_spill] sm:$0xff] }
 0x2f4   : > { %16392 = vst [vmem:[#allocation168_spill] sm:$0xff] %v13701_v49  ;;  %4776 = vmatprep.mubr.bf16.mxu1 %v13696_v0  ;;  %v13711_v22 = vpop.f32.mrf.mxu0  ;;  %v13740_v14 = vmul.bf16 %v16401_v51, %v3148_v40 }
 0x2f5   : > { %v13717_v8 = vpop.f32.mrf.mxu1  ;;  %v13751_v56 = vmul.bf16 %v16401_v51, %v3150_v41  ;;  %v3149_v41 = vpack.c.bf16 %v13480_v43, %v13460_v32 }
 0x2f6   : > { %16395 = vst [vmem:[#allocation170_spill] sm:$0xff] %v13717_v8  ;;  %v13721_v57 = vpop.f32.mrf.mxu0  ;;  %16402 = vst [vmem:[#allocation67_spill] sm:$0xff] %v13740_v14 }
 0x2f7   : > { %16396 = vst [vmem:[#allocation171_spill] sm:$0xff] %v13721_v57  ;;  %v13723_v49 = vpop.f32.mrf.mxu1  ;;  %16404 = vst [vmem:[#allocation175_spill] sm:$0xff] %v13751_v56 }
 0x2f8   : > { %16397 = vst [vmem:[#allocation172_spill] sm:$0xff] %v13723_v49  ;;  %v13734_v6 = vpop.f32.mrf.mxu0  ;;  %v10524_v49 = vld [vmem:[%s15891_s7 + $0x8] sm:$0xff] }
 0x2f9   : > { %v13742_v0 = vpop.f32.mrf.mxu1  ;;  %v13748_v57 = vrot.slane %v10524_v49, %v13706_v48  ;;  %v3147_v48 = vpack.c.bf16 %v13478_v21, %v13457_v16  ;;  %v13774_v32 = vrot.slane %v10524_v49, %v13755_v28 }
 0x2fa   : > { %16403 = vst [vmem:[#allocation174_spill] sm:$0xff] %v13742_v0  ;;  %v4185_v62 = vpop.f32.mrf.mxu0  ;;  %4424 = vmatmul.mubr.bf16.gmra.mxu0 %v13732_v30 }
 0x2fb   : > { %v4186_v40 = vadd.f32 %v4185_v62, %v13729_v1  ;;  %v4538_v36 = vpop.f32.mrf.mxu1  ;;  %4777 = vmatmul.mubr.bf16.gmra.mxu1 %v13737_v47  ;;  %4433 = vmatprep.mubr.bf16.mxu0 %v13740_v14  ;;  %v3154_v47 = vpack.c.bf16 %v13533_v7, %v13514_v63  ;;  %v13771_v14 = vrot.slane %v10523_v5, %v13755_v28  ;;  %v16407_v63 = vld [vmem:[#allocation70_spill] sm:$0xff] }
 0x2fc   : > { %4786 = vmatprep.mubr.bf16.mxu1 %v13751_v56  ;;  %v4187_v51 = vpop.f32.mrf.mxu0  ;;  %v13778_v42 = vmul.bf16 %v16406_v38, %v3147_v48  ;;  %v13784_v7 = vmul.bf16 %v16407_v63, %v3152_v13 }
 0x2fd   : > { %v4539_v30 = vadd.f32 %v4538_v36, %v4186_v40  ;;  %v4188_v62 = vadd.f32 %v4187_v51, %v13748_v57  ;;  %v4540_v0 = vpop.f32.mrf.mxu1  ;;  %v13781_v40 = vmul.bf16 %v16406_v38, %v3149_v41  ;;  %v13788_v49 = vmul.bf16 %v16407_v63, %v3154_v47 }
 0x2fe   : > { %v4189_v21 = vpop.f32.mrf.mxu0  ;;  %v3153_v47 = vpack.c.bf16 %v13520_v52, %v13501_v26 }
 0x2ff   : > { %v5563_v16 = vmax.f32 %v4539_v30, 0.0  ;;  %v4541_v8 = vadd.f32 %v4540_v0, %v4188_v62  ;;  %v4190_v43 = vadd.f32 %v4189_v21, %v13729_v1  ;;  %v4542_v56 = vpop.f32.mrf.mxu1 }
 0x300   : > { %v4191_v36 = vpop.f32.mrf.mxu0 }
 0x301   : > { %v5564_v5 = vmax.f32 %v4541_v8, 0.0  ;;  %v4543_v51 = vadd.f32 %v4542_v56, %v4190_v43  ;;  %v4192_v0 = vadd.f32 %v4191_v36, %v13748_v57  ;;  %v4544_v30 = vpop.f32.mrf.mxu1  ;;  %v7342_v62 = vmul.f32 %v13771_v14, %v5563_v16 }
 0x302   : > { %v4195_v21 = vpop.f32.mrf.mxu0  ;;  %4434 = vmatmul.mubr.bf16.gmra.mxu0 %v13778_v42  ;;  %v3151_v8 = vpack.c.bf16 %v13518_v53, %v13498_v34  ;;  %v3156_v16 = vpack.c.bf16 %v13565_v11, %v13548_v44 }
 0x303   : > { %v7343_v48 = vmul.f32 %v13774_v32, %v5564_v5  ;;  %v5567_v41 = vmax.f32 %v4543_v51, 0.0  ;;  %v4545_v38 = vadd.f32 %v4544_v30, %v4192_v0  ;;  %v4196_v13 = vadd.f32 %v4195_v21, %v13729_v1  ;;  %v4548_v28 = vpop.f32.mrf.mxu1  ;;  %4787 = vmatmul.mubr.bf16.gmra.mxu1 %v13781_v40  ;;  %4443 = vmatprep.mubr.bf16.mxu0 %v13784_v7  ;;  %v16408_v21 = vld [vmem:[#allocation69_spill] sm:$0xff] }
 0x304   : > { %4796 = vmatprep.mubr.bf16.mxu1 %v13788_v49  ;;  %v4197_v56 = vpop.f32.mrf.mxu0  ;;  %v3158_v51 = vpack.c.bf16 %v13573_v19, %v13554_v4  ;;  %v13812_v11 = vmul.bf16 %v16408_v21, %v3151_v8  ;;  %v13815_v44 = vmul.bf16 %v16408_v21, %v3153_v47  ;;  %v16409_v4 = vld [vmem:[#allocation76_spill] sm:$0xff] }
 0x305   : > { %v13803_v43 = vadd.f32 %v7343_v48, %v7342_v62  ;;  %v5568_v36 = vmax.f32 %v4545_v38, 0.0  ;;  %v4549_v63 = vadd.f32 %v4548_v28, %v4196_v13  ;;  %v4550_v5 = vpop.f32.mrf.mxu1  ;;  %v4198_v0 = vadd.f32 %v4197_v56, %v13748_v57 }
 0x306   : > { %v4199_v53 = vpop.f32.mrf.mxu0  ;;  %v7346_v34 = vmul.f32 %v13771_v14, %v5567_v41  ;;  %v13818_v19 = vmul.bf16 %v16409_v4, %v3156_v16  ;;  %v3155_v16 = vpack.c.bf16 %v13558_v55, %v13538_v9  ;;  %v3162_v55 = vpack.c.bf16 %v13613_v27, %v13594_v54  ;;  %v16411_v54 = vld [vmem:[#allocation80_spill] sm:$0xff] }
 0x307   : > { %v7347_v52 = vmul.f32 %v13774_v32, %v5568_v36  ;;  %v4200_v26 = vadd.f32 %v4199_v53, %v13729_v1  ;;  %v4552_v30 = vpop.f32.mrf.mxu1  ;;  %v5571_v28 = vmax.f32 %v4549_v63, 0.0  ;;  %v4551_v62 = vadd.f32 %v4550_v5, %v4198_v0 }
 0x308   : > { %v4201_v48 = vpop.f32.mrf.mxu0  ;;  %v13824_v36 = vmul.bf16 %v16409_v4, %v3158_v51  ;;  %v3157_v51 = vpack.c.bf16 %v13560_v23, %v13541_v24 }
 0x309   : > { %v13820_v38 = vadd.f32 %v7347_v52, %v7346_v34  ;;  %v4553_v41 = vadd.f32 %v4552_v30, %v4200_v26  ;;  %v4202_v13 = vadd.f32 %v4201_v48, %v13748_v57  ;;  %v4554_v56 = vpop.f32.mrf.mxu1  ;;  %v5572_v8 = vmax.f32 %v4551_v62, 0.0 }
 0x30a   : > { %v4205_v53 = vpop.f32.mrf.mxu0  ;;  %4444 = vmatmul.mubr.bf16.gmra.mxu0 %v13812_v11  ;;  %v7350_v34 = vmul.f32 %v13771_v14, %v5571_v28  ;;  %v3160_v30 = vpack.c.bf16 %v13605_v2, %v13588_v58  ;;  %v16410_v58 = vld [vmem:[#allocation74_spill] sm:$0xff] }
 0x30b   : > { %v5575_v47 = vmax.f32 %v4553_v41, 0.0  ;;  %v4555_v63 = vadd.f32 %v4554_v56, %v4202_v13  ;;  %v4206_v5 = vadd.f32 %v4205_v53, %v13729_v1  ;;  %v4558_v0 = vpop.f32.mrf.mxu1  ;;  %4797 = vmatmul.mubr.bf16.gmra.mxu1 %v13815_v44  ;;  %4453 = vmatprep.mubr.bf16.mxu0 %v13818_v19  ;;  %v7351_v52 = vmul.f32 %v13774_v32, %v5572_v8 }
 0x30c   : > { %4806 = vmatprep.mubr.bf16.mxu1 %v13824_v36  ;;  %v4207_v26 = vpop.f32.mrf.mxu0  ;;  %v13848_v8 = vmul.bf16 %v16410_v58, %v3155_v16  ;;  %v13851_v53 = vmul.bf16 %v16410_v58, %v3157_v51  ;;  %v13854_v27 = vmul.bf16 %v16411_v54, %v3160_v30 }
 0x30d   : > { %v5576_v21 = vmax.f32 %v4555_v63, 0.0  ;;  %v4559_v62 = vadd.f32 %v4558_v0, %v4206_v5  ;;  %v4208_v48 = vadd.f32 %v4207_v26, %v13748_v57  ;;  %v4560_v4 = vpop.f32.mrf.mxu1  ;;  %v13842_v9 = vadd.f32 %v7351_v52, %v7350_v34 }
 0x30e   : > { %v7354_v23 = vmul.f32 %v13771_v14, %v5575_v47  ;;  %v4209_v24 = vpop.f32.mrf.mxu0  ;;  %v13859_v52 = vmul.bf16 %v16411_v54, %v3162_v55 }
 0x30f   : > { %v7355_v28 = vmul.f32 %v13774_v32, %v5576_v21  ;;  %v5579_v41 = vmax.f32 %v4559_v62, 0.0  ;;  %v4561_v13 = vadd.f32 %v4560_v4, %v4208_v48  ;;  %v4210_v56 = vadd.f32 %v4209_v24, %v13729_v1  ;;  %v4562_v2 = vpop.f32.mrf.mxu1 }
 0x310   : > { %v4211_v63 = vpop.f32.mrf.mxu0  ;;  %v3159_v48 = vpack.c.bf16 %v13598_v50, %v13578_v29  ;;  %v3161_v4 = vpack.c.bf16 %v13600_v17, %v13581_v3  ;;  %v3166_v50 = vpack.c.bf16 %v13653_v15, %v13634_v18 }
 0x311   : > { %v13856_v5 = vadd.f32 %v7355_v28, %v7354_v23  ;;  %v5580_v47 = vmax.f32 %v4561_v13, 0.0  ;;  %v4563_v0 = vadd.f32 %v4562_v2, %v4210_v56  ;;  %v4564_v34 = vpop.f32.mrf.mxu1  ;;  %v4212_v26 = vadd.f32 %v4211_v63, %v13748_v57 }
 0x312   : > { %v4215_v21 = vpop.f32.mrf.mxu0  ;;  %4454 = vmatmul.mubr.bf16.gmra.mxu0 %v13848_v8  ;;  %v7358_v16 = vmul.f32 %v13771_v14, %v5579_v41  ;;  %v3164_v28 = vpack.c.bf16 %v13645_v59, %v13628_v37 }
 0x313   : > { %v7359_v51 = vmul.f32 %v13774_v32, %v5580_v47  ;;  %v4216_v30 = vadd.f32 %v4215_v21, %v13729_v1  ;;  %v4568_v62 = vpop.f32.mrf.mxu1  ;;  %4807 = vmatmul.mubr.bf16.gmra.mxu1 %v13851_v53  ;;  %4463 = vmatprep.mubr.bf16.mxu0 %v13854_v27  ;;  %v5583_v55 = vmax.f32 %v4563_v0, 0.0  ;;  %v4565_v23 = vadd.f32 %v4564_v34, %v4212_v26  ;;  %v16412_v47 = vld [vmem:[#allocation79_spill] sm:$0xff]  ;;  %v16413_v21 = vld [vmem:[#allocation85_spill] sm:$0xff] }
 0x314   : > { %4816 = vmatprep.mubr.bf16.mxu1 %v13859_v52  ;;  %v4217_v24 = vpop.f32.mrf.mxu0  ;;  %v13882_v0 = vmul.bf16 %v16412_v47, %v3159_v48  ;;  %v13885_v59 = vmul.bf16 %v16412_v47, %v3161_v4  ;;  %v13890_v18 = vmul.bf16 %v16413_v21, %v3164_v28  ;;  %v3170_v47 = vpack.c.bf16 %v13693_v33, %v13674_v61  ;;  %v16415_v61 = vld [vmem:[#allocation92_spill] sm:$0xff] }
 0x315   : > { %v13875_v41 = vadd.f32 %v7359_v51, %v7358_v16  ;;  %v4569_v13 = vadd.f32 %v4568_v62, %v4216_v30  ;;  %v4218_v56 = vadd.f32 %v4217_v24, %v13748_v57  ;;  %v4570_v2 = vpop.f32.mrf.mxu1  ;;  %v5584_v29 = vmax.f32 %v4565_v23, 0.0 }
 0x316   : > { %v4219_v58 = vpop.f32.mrf.mxu0  ;;  %v7362_v37 = vmul.f32 %v13771_v14, %v5583_v55  ;;  %v13894_v62 = vmul.bf16 %v16413_v21, %v3166_v50  ;;  %v3165_v50 = vpack.c.bf16 %v13640_v46, %v13621_v45 }
 0x317   : > { %v5587_v17 = vmax.f32 %v4569_v13, 0.0  ;;  %v4571_v3 = vadd.f32 %v4570_v2, %v4218_v56  ;;  %v4220_v63 = vadd.f32 %v4219_v58, %v13729_v1  ;;  %v4572_v54 = vpop.f32.mrf.mxu1  ;;  %v7363_v34 = vmul.f32 %v13774_v32, %v5584_v29 }
 0x318   : > { %v4221_v26 = vpop.f32.mrf.mxu0  ;;  %v3163_v2 = vpack.c.bf16 %v13638_v31, %v13618_v20  ;;  %v3168_v58 = vpack.c.bf16 %v13685_v10, %v13668_v12 }
 0x319   : > { %v5588_v15 = vmax.f32 %v4571_v3, 0.0  ;;  %v4573_v16 = vadd.f32 %v4572_v54, %v4220_v63  ;;  %v4222_v51 = vadd.f32 %v4221_v26, %v13748_v57  ;;  %v4574_v30 = vpop.f32.mrf.mxu1  ;;  %v13896_v48 = vadd.f32 %v7363_v34, %v7362_v37  ;;  %v16414_v26 = vld [vmem:[#allocation84_spill] sm:$0xff] }
 0x31a   : > { %v7366_v4 = vmul.f32 %v13771_v14, %v5587_v17  ;;  %v4225_v23 = vpop.f32.mrf.mxu0  ;;  %4464 = vmatmul.mubr.bf16.gmra.mxu0 %v13882_v0  ;;  %v13920_v10 = vmul.bf16 %v16414_v26, %v3163_v2  ;;  %v13923_v12 = vmul.bf16 %v16414_v26, %v3165_v50  ;;  %v13926_v33 = vmul.bf16 %v16415_v61, %v3168_v58 }
 0x31b   : > { %v7367_v55 = vmul.f32 %v13774_v32, %v5588_v15  ;;  %v5591_v24 = vmax.f32 %v4573_v16, 0.0  ;;  %v4575_v28 = vadd.f32 %v4574_v30, %v4222_v51  ;;  %v4226_v13 = vadd.f32 %v4225_v23, %v13729_v1  ;;  %v4578_v56 = vpop.f32.mrf.mxu1  ;;  %4817 = vmatmul.mubr.bf16.gmra.mxu1 %v13885_v59  ;;  %4473 = vmatprep.mubr.bf16.mxu0 %v13890_v18 }
 0x31c   : > { %4826 = vmatprep.mubr.bf16.mxu1 %v13894_v62  ;;  %v4227_v29 = vpop.f32.mrf.mxu0  ;;  %v3169_v58 = vpack.c.bf16 %v13680_v60, %v13661_v39 }
 0x31d   : > { %v13911_v17 = vadd.f32 %v7367_v55, %v7366_v4  ;;  %v5592_v3 = vmax.f32 %v4575_v28, 0.0  ;;  %v4579_v63 = vadd.f32 %v4578_v56, %v4226_v13  ;;  %v4580_v54 = vpop.f32.mrf.mxu1  ;;  %v4228_v37 = vadd.f32 %v4227_v29, %v13748_v57 }
 0x31e   : > { %v4229_v31 = vpop.f32.mrf.mxu0  ;;  %v7370_v20 = vmul.f32 %v13771_v14, %v5591_v24  ;;  %v13932_v55 = vmul.bf16 %v16415_v61, %v3170_v47  ;;  %v3167_v29 = vpack.c.bf16 %v13678_v25, %v13658_v35  ;;  %v3172_v47 = vpack.c.bf16 %v13734_v6, %v13711_v22  ;;  %v16417_v25 = vld [vmem:[#allocation174_spill] sm:$0xff]  ;;  %v16418_v6 = vld [vmem:[#allocation89_spill] sm:$0xff] }
 0x31f   : > { %v7371_v46 = vmul.f32 %v13774_v32, %v5592_v3  ;;  %v4230_v45 = vadd.f32 %v4229_v31, %v13729_v1  ;;  %v4582_v34 = vpop.f32.mrf.mxu1  ;;  %v5595_v21 = vmax.f32 %v4579_v63, 0.0  ;;  %v4581_v15 = vadd.f32 %v4580_v54, %v4228_v37 }
 0x320   : > { %v4231_v16 = vpop.f32.mrf.mxu0  ;;  %v13956_v61 = vmul.bf16 %v16418_v6, %v3167_v29 }
 0x321   : > { %v13928_v51 = vadd.f32 %v7371_v46, %v7370_v20  ;;  %v4583_v30 = vadd.f32 %v4582_v34, %v4230_v45  ;;  %v4232_v4 = vadd.f32 %v4231_v16, %v13748_v57  ;;  %v4584_v23 = vpop.f32.mrf.mxu1  ;;  %v5596_v24 = vmax.f32 %v4581_v15, 0.0  ;;  %v16416_v45 = vld [vmem:[#allocation170_spill] sm:$0xff] }
 0x322   : > { %v4235_v28 = vpop.f32.mrf.mxu0  ;;  %4474 = vmatmul.mubr.bf16.gmra.mxu0 %v13920_v10  ;;  %v7374_v3 = vmul.f32 %v13771_v14, %v5595_v21  ;;  %v3174_v35 = vpack.c.bf16 %v16417_v25, %v16416_v45 }
 0x323   : > { %v5599_v13 = vmax.f32 %v4583_v30, 0.0  ;;  %v4585_v56 = vadd.f32 %v4584_v23, %v4232_v4  ;;  %v4236_v2 = vadd.f32 %v4235_v28, %v13729_v1  ;;  %v4588_v50 = vpop.f32.mrf.mxu1  ;;  %4827 = vmatmul.mubr.bf16.gmra.mxu1 %v13923_v12  ;;  %4483 = vmatprep.mubr.bf16.mxu0 %v13926_v33  ;;  %v7375_v63 = vmul.f32 %v13774_v32, %v5596_v24  ;;  %v16419_v23 = vld [vmem:[#allocation97_spill] sm:$0xff] }
 0x324   : > { %4836 = vmatprep.mubr.bf16.mxu1 %v13932_v55  ;;  %v4237_v54 = vpop.f32.mrf.mxu0  ;;  %v13959_v30 = vmul.bf16 %v16418_v6, %v3169_v58  ;;  %v13962_v24 = vmul.bf16 %v16419_v23, %v3172_v47 }
 0x325   : > { %v5600_v37 = vmax.f32 %v4585_v56, 0.0  ;;  %v4589_v31 = vadd.f32 %v4588_v50, %v4236_v2  ;;  %v4238_v20 = vadd.f32 %v4237_v54, %v13748_v57  ;;  %v4590_v46 = vpop.f32.mrf.mxu1  ;;  %v13950_v34 = vadd.f32 %v7375_v63, %v7374_v3 }
 0x326   : > { %v7378_v60 = vmul.f32 %v13771_v14, %v5599_v13  ;;  %v4239_v39 = vpop.f32.mrf.mxu0  ;;  %v13967_v50 = vmul.bf16 %v16419_v23, %v3174_v35  ;;  %v16422_v35 = vld [vmem:[#allocation168_spill] sm:$0xff] }
 0x327   : > { %v7379_v26 = vmul.f32 %v13774_v32, %v5600_v37  ;;  %v5603_v21 = vmax.f32 %v4589_v31, 0.0  ;;  %v4591_v15 = vadd.f32 %v4590_v46, %v4238_v20  ;;  %v4240_v16 = vadd.f32 %v4239_v39, %v13729_v1  ;;  %v4592_v22 = vpop.f32.mrf.mxu1  ;;  %v16420_v37 = vld [vmem:[#allocation167_spill] sm:$0xff] }
 0x328   : > { %v4241_v4 = vpop.f32.mrf.mxu0  ;;  %v16421_v31 = vld [vmem:[#allocation171_spill] sm:$0xff] }
 0x329   : > { %v13964_v28 = vadd.f32 %v7379_v26, %v7378_v60  ;;  %v5604_v13 = vmax.f32 %v4591_v15, 0.0  ;;  %v4593_v56 = vadd.f32 %v4592_v22, %v4240_v16  ;;  %v4594_v2 = vpop.f32.mrf.mxu1  ;;  %v4242_v3 = vadd.f32 %v4241_v4, %v13748_v57  ;;  %v16423_v60 = vld [vmem:[#allocation172_spill] sm:$0xff] }
 0x32a   : > { %v4245_v63 = vpop.f32.mrf.mxu0  ;;  %4484 = vmatmul.mubr.bf16.gmra.mxu0 %v13956_v61  ;;  %v7382_v29 = vmul.f32 %v13771_v14, %v5603_v21  ;;  %v3171_v20 = vpack.c.bf16 %v16421_v31, %v16420_v37  ;;  %v3173_v39 = vpack.c.bf16 %v16423_v60, %v16422_v35 }
 0x32b   : > { %v7383_v58 = vmul.f32 %v13774_v32, %v5604_v13  ;;  %v4246_v54 = vadd.f32 %v4245_v63, %v13729_v1  ;;  %v4598_v47 = vpop.f32.mrf.mxu1  ;;  %4837 = vmatmul.mubr.bf16.gmra.mxu1 %v13959_v30  ;;  %4493 = vmatprep.mubr.bf16.mxu0 %v13962_v24  ;;  %v5607_v46 = vmax.f32 %v4593_v56, 0.0  ;;  %v4595_v45 = vadd.f32 %v4594_v2, %v4242_v3  ;;  %v16424_v2 = vld [vmem:[#allocation95_spill] sm:$0xff] }
 0x32c   : > { %4846 = vmatprep.mubr.bf16.mxu1 %v13967_v50  ;;  %v4247_v25 = vpop.f32.mrf.mxu0  ;;  %v13986_v3 = vmul.bf16 %v16424_v2, %v3171_v20 }
 0x32d   : > { %v13981_v26 = vadd.f32 %v7383_v58, %v7382_v29  ;;  %v4599_v21 = vadd.f32 %v4598_v47, %v4246_v54  ;;  %v4248_v15 = vadd.f32 %v4247_v25, %v13748_v57  ;;  %v4600_v16 = vpop.f32.mrf.mxu1  ;;  %v5608_v22 = vmax.f32 %v4595_v45, 0.0 }
 0x32e   : > { %v4249_v6 = vpop.f32.mrf.mxu0  ;;  %v7386_v63 = vmul.f32 %v13771_v14, %v5607_v46  ;;  %v13991_v58 = vmul.bf16 %v16424_v2, %v3173_v39 }
 0x32f   : > { %v5611_v4 = vmax.f32 %v4599_v21, 0.0  ;;  %v4601_v23 = vadd.f32 %v4600_v16, %v4248_v15  ;;  %v4250_v13 = vadd.f32 %v4249_v6, %v13729_v1  ;;  %v4602_v56 = vpop.f32.mrf.mxu1  ;;  %v7387_v37 = vmul.f32 %v13774_v32, %v5608_v22  ;;  %v16426_v16 = vld [vmem:[#allocation121_spill] sm:$0xff]  ;;  %v16427_v22 = vld [vmem:[#allocation122_spill] sm:$0xff] }
 0x330   : > { %v4251_v29 = vpop.f32.mrf.mxu0  ;;  %16425 = vst [vmem:[#allocation64_spill] sm:$0xff] %v13991_v58 }
 0x331   : > { %v5612_v54 = vmax.f32 %v4601_v23, 0.0  ;;  %v4603_v47 = vadd.f32 %v4602_v56, %v4250_v13  ;;  %v4252_v31 = vadd.f32 %v4251_v29, %v13748_v57  ;;  %v4604_v45 = vpop.f32.mrf.mxu1  ;;  %v13994_v25 = vadd.f32 %v7387_v37, %v7386_v63 }
 0x332   : > { %v7390_v35 = vmul.f32 %v13771_v14, %v5611_v4  ;;  %v4255_v60 = vpop.f32.mrf.mxu0  ;;  %4494 = vmatmul.mubr.bf16.gmra.mxu0 %v13986_v3 }
 0x333   : > { %v7391_v20 = vmul.f32 %v13774_v32, %v5612_v54  ;;  %v5615_v46 = vmax.f32 %v4603_v47, 0.0  ;;  %v4605_v21 = vadd.f32 %v4604_v45, %v4252_v31  ;;  %v4256_v15 = vadd.f32 %v4255_v60, %v13729_v1  ;;  %v4608_v39 = vpop.f32.mrf.mxu1  ;;  %4847 = vmatmul.mubr.bf16.gmra.mxu1 %v13991_v58  ;;  %4889 = vmatprep.mubr.bf16.mxu0 %v16426_v16 }
 0x334   : > { %5242 = vmatprep.mubr.bf16.mxu1 %v16427_v22  ;;  %v4257_v6 = vpop.f32.mrf.mxu0  ;;  %v16429_v22 = vld [vmem:[#allocation123_spill] sm:$0xff] }
 0x335   : > { %v14003_v23 = vadd.f32 %v7391_v20, %v7390_v35  ;;  %v5616_v4 = vmax.f32 %v4605_v21, 0.0  ;;  %v4609_v13 = vadd.f32 %v4608_v39, %v4256_v15  ;;  %v4610_v56 = vpop.f32.mrf.mxu1  ;;  %v4258_v2 = vadd.f32 %v4257_v6, %v13748_v57  ;;  %v10197_v15 = vld [vmem:[%s15889_s5 + $0x30] sm:$0xff]  }
 0x336   : > { %v4259_v63 = vpop.f32.mrf.mxu0  ;;  %v7394_v37 = vmul.f32 %v13771_v14, %v5615_v46 }
 0x337   : > { %v7395_v29 = vmul.f32 %v13774_v32, %v5616_v4  ;;  %v4260_v54 = vadd.f32 %v4259_v63, %v13729_v1  ;;  %v4612_v47 = vpop.f32.mrf.mxu1  ;;  %v5619_v31 = vmax.f32 %v4609_v13, 0.0  ;;  %v4611_v45 = vadd.f32 %v4610_v56, %v4258_v2  ;;  %v16430_v2 = vld [vmem:[#allocation124_spill] sm:$0xff]  ;;  %v16431_v63 = vld [vmem:[#allocation125_spill] sm:$0xff] }
 0x338   : > { %v4261_v60 = vpop.f32.mrf.mxu0 }
 0x339   : > { %v14009_v16 = vadd.f32 %v7395_v29, %v7394_v37  ;;  %v4613_v35 = vadd.f32 %v4612_v47, %v4260_v54  ;;  %v4262_v20 = vadd.f32 %v4261_v60, %v13748_v57  ;;  %v4614_v21 = vpop.f32.mrf.mxu1  ;;  %v5620_v39 = vmax.f32 %v4611_v45, 0.0  ;;  %v16432_v54 = vld [vmem:[#allocation126_spill] sm:$0xff]  ;;  %v16433_v47 = vld [vmem:[#allocation155_spill] sm:$0xff] }
 0x33a   : > { %v4265_v46 = vpop.f32.mrf.mxu0  ;;  %4890 = vmatmul.mubr.bf16.vlgmr.msra.gmra.mxu0 %v16429_v22  ;;  %v7398_v37 = vmul.f32 %v13771_v14, %v5619_v31 }
 0x33b   : > { %16428 = vst [vmem:[#allocation70_spill] sm:$0xff] %v14009_v16  ;;  %v5623_v6 = vmax.f32 %v4613_v35, 0.0  ;;  %v4615_v4 = vadd.f32 %v4614_v21, %v4262_v20  ;;  %v4266_v13 = vadd.f32 %v4265_v46, %v13729_v1  ;;  %v4618_v56 = vpop.f32.mrf.mxu1  ;;  %5243 = vmatmul.mubr.bf16.vlgmr.msra.gmra.mxu1 %v16430_v2  ;;  %4899 = vmatprep.mubr.bf16.mxu0 %v16431_v63  ;;  %v10198_v21 = vld [vmem:[%s15889_s5 + $0x28] sm:$0xff]  }
 0x33c   : > { %v7399_v29 = vmul.f32 %v13774_v32, %v5620_v39  ;;  %5252 = vmatprep.mubr.bf16.mxu1 %v16432_v54  ;;  %9721 = vmatpush3.bf16.msra.mxu0 %v16433_v47  ;;  %v4267_v45 = vpop.f32.mrf.mxu0 }
 0x33d   : > { %v5624_v60 = vmax.f32 %v4615_v4, 0.0  ;;  %v4619_v22 = vadd.f32 %v4618_v56, %v4266_v13  ;;  %v4268_v35 = vadd.f32 %v4267_v45, %v13748_v57  ;;  %v4620_v20 = vpop.f32.mrf.mxu1  ;;  %9722 = vmatprep.subr.bf16.mxu0 %v10197_v15  ;;  %v7402_v31 = vmul.f32 %v13771_v14, %v5623_v6  ;;  %v10199_v6 = vld [vmem:[%s15889_s5 + $0x20] sm:$0xff]  }
 0x33e   : > { %v14027_v46 = vadd.f32 %v7399_v29, %v7398_v37  ;;  %v4269_v39 = vpop.f32.mrf.mxu0 }
 0x33f   : > { %v7403_v2 = vmul.f32 %v13774_v32, %v5624_v60  ;;  %v5627_v63 = vmax.f32 %v4619_v22, 0.0  ;;  %v4621_v54 = vadd.f32 %v4620_v20, %v4268_v35  ;;  %v4270_v4 = vadd.f32 %v4269_v39, %v13729_v1  ;;  %v4622_v13 = vpop.f32.mrf.mxu1  ;;  %v16436_v60 = vld [vmem:[#allocation127_spill] sm:$0xff]  ;;  %v16438_v39 = vld [vmem:[#allocation129_spill] sm:$0xff] }
 0x340   : > { %16434 = vst [vmem:[#allocation69_spill] sm:$0xff] %v14027_v46  ;;  %v4271_v56 = vpop.f32.mrf.mxu0  ;;  %9723 = vmatpush3.bf16.msra.mxu0 %v10197_v15 }
 0x341   : > { %v14032_v47 = vadd.f32 %v7403_v2, %v7402_v31  ;;  %v5628_v45 = vmax.f32 %v4621_v54, 0.0  ;;  %v4623_v16 = vadd.f32 %v4622_v13, %v4270_v4  ;;  %v4624_v58 = vpop.f32.mrf.mxu1  ;;  %9724 = vmatprep.subr.bf16.mxu0 %v10198_v21  ;;  %v4272_v37 = vadd.f32 %v4271_v56, %v13748_v57  ;;  %v16437_v31 = vld [vmem:[#allocation128_spill] sm:$0xff]  ;;  %v16439_v4 = vld [vmem:[#allocation130_spill] sm:$0xff] }
 0x342   : > { %v4275_v29 = vpop.f32.mrf.mxu0  ;;  %4900 = vmatmul.mubr.bf16.gmra.mxu0 %v16436_v60  ;;  %v7406_v22 = vmul.f32 %v13771_v14, %v5627_v63 }
 0x343   : > { %16435 = vst [vmem:[#allocation76_spill] sm:$0xff] %v14032_v47  ;;  %v7407_v35 = vmul.f32 %v13774_v32, %v5628_v45  ;;  %v4276_v15 = vadd.f32 %v4275_v29, %v13729_v1  ;;  %v4628_v20 = vpop.f32.mrf.mxu1  ;;  %5253 = vmatmul.mubr.bf16.gmra.mxu1 %v16437_v31  ;;  %4909 = vmatprep.mubr.bf16.mxu0 %v16438_v39  ;;  %v5631_v2 = vmax.f32 %v4623_v16, 0.0  ;;  %v10200_v45 = vld [vmem:[%s15889_s5 + $0x18] sm:$0xff]  }
 0x344   : > { %v4625_v54 = vadd.f32 %v4624_v58, %v4272_v37  ;;  %5262 = vmatprep.mubr.bf16.mxu1 %v16439_v4  ;;  %v4277_v13 = vpop.f32.mrf.mxu0  ;;  %9725 = vmatpush3.bf16.msra.mxu0 %v10198_v21 }
 0x345   : > { %v14045_v56 = vadd.f32 %v7407_v35, %v7406_v22  ;;  %v4629_v60 = vadd.f32 %v4628_v20, %v4276_v15  ;;  %v4278_v63 = vadd.f32 %v4277_v13, %v13748_v57  ;;  %v4630_v47 = vpop.f32.mrf.mxu1  ;;  %9726 = vmatprep.subr.bf16.mxu0 %v10199_v6  ;;  %v7410_v21 = vmul.f32 %v13771_v14, %v5631_v2 }
 0x346   : > { %v5632_v29 = vmax.f32 %v4625_v54, 0.0  ;;  %v4279_v31 = vpop.f32.mrf.mxu0 }
 0x347   : > { %16440 = vst [vmem:[#allocation74_spill] sm:$0xff] %v14045_v56  ;;  %v5635_v39 = vmax.f32 %v4629_v60, 0.0  ;;  %v4631_v16 = vadd.f32 %v4630_v47, %v4278_v63  ;;  %v4280_v58 = vadd.f32 %v4279_v31, %v13729_v1  ;;  %v4632_v37 = vpop.f32.mrf.mxu1  ;;  %v16442_v60 = vld [vmem:[#allocation131_spill] sm:$0xff] }
 0x348   : > { %v7411_v22 = vmul.f32 %v13774_v32, %v5632_v29  ;;  %v4281_v35 = vpop.f32.mrf.mxu0  ;;  %9727 = vmatpush3.bf16.msra.mxu0 %v10199_v6 }
 0x349   : > { %v5636_v15 = vmax.f32 %v4631_v16, 0.0  ;;  %v4633_v20 = vadd.f32 %v4632_v37, %v4280_v58  ;;  %v4282_v4 = vadd.f32 %v4281_v35, %v13748_v57  ;;  %v4634_v13 = vpop.f32.mrf.mxu1  ;;  %9728 = vmatprep.subr.bf16.mxu0 %v10200_v45  ;;  %v7414_v54 = vmul.f32 %v13771_v14, %v5635_v39  ;;  %v16443_v16 = vld [vmem:[#allocation132_spill] sm:$0xff]  ;;  %v16444_v58 = vld [vmem:[#allocation133_spill] sm:$0xff]  ;;  %v16445_v37 = vld [vmem:[#allocation134_spill] sm:$0xff] }
 0x34a   : > { %v14055_v56 = vadd.f32 %v7411_v22, %v7410_v21  ;;  %v4285_v47 = vpop.f32.mrf.mxu0  ;;  %4910 = vmatmul.mubr.bf16.gmra.mxu0 %v16442_v60 }
 0x34b   : > { %v7415_v63 = vmul.f32 %v13774_v32, %v5636_v15  ;;  %v5639_v2 = vmax.f32 %v4633_v20, 0.0  ;;  %v4635_v31 = vadd.f32 %v4634_v13, %v4282_v4  ;;  %v4286_v29 = vadd.f32 %v4285_v47, %v13729_v1  ;;  %v4638_v6 = vpop.f32.mrf.mxu1  ;;  %5263 = vmatmul.mubr.bf16.gmra.mxu1 %v16443_v16  ;;  %4919 = vmatprep.mubr.bf16.mxu0 %v16444_v58 }
 0x34c   : > { %16441 = vst [vmem:[#allocation80_spill] sm:$0xff] %v14055_v56  ;;  %5272 = vmatprep.mubr.bf16.mxu1 %v16445_v37  ;;  %v4287_v21 = vpop.f32.mrf.mxu0  ;;  %9729 = vmatpush3.bf16.msra.mxu0 %v10200_v45 }
 0x34d   : > { %v14064_v22 = vadd.f32 %v7415_v63, %v7414_v54  ;;  %v5640_v39 = vmax.f32 %v4635_v31, 0.0  ;;  %v4639_v35 = vadd.f32 %v4638_v6, %v4286_v29  ;;  %v4640_v60 = vpop.f32.mrf.mxu1  ;;  %v4288_v15 = vadd.f32 %v4287_v21, %v13748_v57  ;;  %v16448_v6 = vld [vmem:[#allocation135_spill] sm:$0xff] }
 0x34e   : > { %v4289_v20 = vpop.f32.mrf.mxu0  ;;  %v7418_v4 = vmul.f32 %v13771_v14, %v5639_v2 }
 0x34f   : > { %16446 = vst [vmem:[#allocation79_spill] sm:$0xff] %v14064_v22  ;;  %v7419_v13 = vmul.f32 %v13774_v32, %v5640_v39  ;;  %v4290_v47 = vadd.f32 %v4289_v20, %v13729_v1  ;;  %v4642_v16 = vpop.f32.mrf.mxu1  ;;  %v5643_v58 = vmax.f32 %v4639_v35, 0.0  ;;  %v4641_v56 = vadd.f32 %v4640_v60, %v4288_v15  ;;  %v16449_v20 = vld [vmem:[#allocation136_spill] sm:$0xff]  ;;  %v16450_v35 = vld [vmem:[#allocation137_spill] sm:$0xff] }
 0x350   : > { %v4291_v37 = vpop.f32.mrf.mxu0 }
 0x351   : > { %v14070_v46 = vadd.f32 %v7419_v13, %v7418_v4  ;;  %v4643_v45 = vadd.f32 %v4642_v16, %v4290_v47  ;;  %v4292_v54 = vadd.f32 %v4291_v37, %v13748_v57  ;;  %v4644_v63 = vpop.f32.mrf.mxu1  ;;  %v5644_v31 = vmax.f32 %v4641_v56, 0.0  ;;  %v16451_v4 = vld [vmem:[#allocation138_spill] sm:$0xff] }
 0x352   : > { %v4295_v29 = vpop.f32.mrf.mxu0  ;;  %4920 = vmatmul.mubr.bf16.gmra.mxu0 %v16448_v6  ;;  %v7422_v60 = vmul.f32 %v13771_v14, %v5643_v58 }
 0x353   : > { %16447 = vst [vmem:[#allocation85_spill] sm:$0xff] %v14070_v46  ;;  %v5647_v21 = vmax.f32 %v4643_v45, 0.0  ;;  %v4645_v2 = vadd.f32 %v4644_v63, %v4292_v54  ;;  %v4296_v39 = vadd.f32 %v4295_v29, %v13729_v1  ;;  %v4648_v22 = vpop.f32.mrf.mxu1  ;;  %5273 = vmatmul.mubr.bf16.gmra.mxu1 %v16449_v20  ;;  %4929 = vmatprep.mubr.bf16.mxu0 %v16450_v35 }
 0x354   : > { %v7423_v15 = vmul.f32 %v13774_v32, %v5644_v31  ;;  %5282 = vmatprep.mubr.bf16.mxu1 %v16451_v4  ;;  %v4297_v13 = vpop.f32.mrf.mxu0 }
 0x355   : > { %v5648_v56 = vmax.f32 %v4645_v2, 0.0  ;;  %v4649_v47 = vadd.f32 %v4648_v22, %v4296_v39  ;;  %v4298_v16 = vadd.f32 %v4297_v13, %v13748_v57  ;;  %v4650_v37 = vpop.f32.mrf.mxu1  ;;  %v7426_v54 = vmul.f32 %v13771_v14, %v5647_v21 }
 0x356   : > { %v14081_v45 = vadd.f32 %v7423_v15, %v7422_v60  ;;  %v4299_v63 = vpop.f32.mrf.mxu0  ;;  %v16454_v15 = vld [vmem:[#allocation12_spill] sm:$0xff] }
 0x357   : > { %v7427_v29 = vmul.f32 %v13774_v32, %v5648_v56  ;;  %v5651_v6 = vmax.f32 %v4649_v47, 0.0  ;;  %v4651_v20 = vadd.f32 %v4650_v37, %v4298_v16  ;;  %v4300_v58 = vadd.f32 %v4299_v63, %v13729_v1  ;;  %v4652_v31 = vpop.f32.mrf.mxu1  ;;  %v16455_v37 = vld [vmem:[#allocation139_spill] sm:$0xff]  ;;  %v16456_v63 = vld [vmem:[#allocation14_spill] sm:$0xff] }
 0x358   : > { %16452 = vst [vmem:[#allocation84_spill] sm:$0xff] %v14081_v45  ;;  %v4301_v35 = vpop.f32.mrf.mxu0 }
 0x359   : > { %v14086_v4 = vadd.f32 %v7427_v29, %v7426_v54  ;;  %v5652_v2 = vmax.f32 %v4651_v20, 0.0  ;;  %v4653_v22 = vadd.f32 %v4652_v31, %v4300_v58  ;;  %v4654_v39 = vpop.f32.mrf.mxu1  ;;  %v4302_v13 = vadd.f32 %v4301_v35, %v13748_v57  ;;  %v16457_v20 = vld [vmem:[#allocation140_spill] sm:$0xff] }
 0x35a   : > { %v4305_v60 = vpop.f32.mrf.mxu0  ;;  %4930 = vmatmul.mubr.bf16.gmra.mxu0 %v16454_v15  ;;  %v7430_v21 = vmul.f32 %v13771_v14, %v5651_v6 }
 0x35b   : > { %16453 = vst [vmem:[#allocation92_spill] sm:$0xff] %v14086_v4  ;;  %v7431_v56 = vmul.f32 %v13774_v32, %v5652_v2  ;;  %v4306_v47 = vadd.f32 %v4305_v60, %v13729_v1  ;;  %v4658_v16 = vpop.f32.mrf.mxu1  ;;  %5283 = vmatmul.mubr.bf16.gmra.mxu1 %v16455_v37  ;;  %4939 = vmatprep.mubr.bf16.mxu0 %v16456_v63  ;;  %v5655_v54 = vmax.f32 %v4653_v22, 0.0 }
 0x35c   : > { %v4655_v29 = vadd.f32 %v4654_v39, %v4302_v13  ;;  %5292 = vmatprep.mubr.bf16.mxu1 %v16457_v20  ;;  %v4307_v58 = vpop.f32.mrf.mxu0 }
 0x35d   : > { %v14096_v31 = vadd.f32 %v7431_v56, %v7430_v21  ;;  %v4659_v35 = vadd.f32 %v4658_v16, %v4306_v47  ;;  %v4308_v15 = vadd.f32 %v4307_v58, %v13748_v57  ;;  %v4660_v6 = vpop.f32.mrf.mxu1  ;;  %v7434_v63 = vmul.f32 %v13771_v14, %v5655_v54  ;;  %v10201_v47 = vld [vmem:[%s15889_s5 + $0x10] sm:$0xff]  }
 0x35e   : > { %v5656_v4 = vmax.f32 %v4655_v29, 0.0  ;;  %v4309_v2 = vpop.f32.mrf.mxu0  ;;  %9730 = vmatprep.subr.bf16.mxu0 %v10201_v47 }
 0x35f   : > { %16458 = vst [vmem:[#allocation170_spill] sm:$0xff] %v14096_v31  ;;  %v5659_v45 = vmax.f32 %v4659_v35, 0.0  ;;  %v4661_v60 = vadd.f32 %v4660_v6, %v4308_v15  ;;  %v4310_v46 = vadd.f32 %v4309_v2, %v13729_v1  ;;  %v4662_v37 = vpop.f32.mrf.mxu1  ;;  %v16460_v35 = vld [vmem:[#allocation108_spill] sm:$0xff]  ;;  %v16461_v2 = vld [vmem:[#allocation106_spill] sm:$0xff]  ;;  %9731 = vmatpush3.bf16.msra.mxu0 %v10201_v47 }
 0x360   : > { %v7435_v22 = vmul.f32 %v13774_v32, %v5656_v4  ;;  %v4311_v39 = vpop.f32.mrf.mxu0 }
 0x361   : > { %v5660_v13 = vmax.f32 %v4661_v60, 0.0  ;;  %v4663_v20 = vadd.f32 %v4662_v37, %v4310_v46  ;;  %v4312_v21 = vadd.f32 %v4311_v39, %v13748_v57  ;;  %v4664_v56 = vpop.f32.mrf.mxu1  ;;  %v7438_v29 = vmul.f32 %v13771_v14, %v5659_v45  ;;  %v16462_v60 = vld [vmem:[#allocation109_spill] sm:$0xff] }
 0x362   : > { %v14106_v16 = vadd.f32 %v7435_v22, %v7434_v63  ;;  %v4315_v58 = vpop.f32.mrf.mxu0  ;;  %4940 = vmatmul.mubr.bf16.gmra.mxu0 %v16460_v35  ;;  %v16463_v37 = vld [vmem:[#allocation113_spill] sm:$0xff] }
 0x363   : > { %v7439_v54 = vmul.f32 %v13774_v32, %v5660_v13  ;;  %v5663_v4 = vmax.f32 %v4663_v20, 0.0  ;;  %v4665_v15 = vadd.f32 %v4664_v56, %v4312_v21  ;;  %v4316_v46 = vadd.f32 %v4315_v58, %v13729_v1  ;;  %v4668_v6 = vpop.f32.mrf.mxu1  ;;  %5293 = vmatmul.mubr.bf16.gmra.mxu1 %v16461_v2  ;;  %4949 = vmatprep.mubr.bf16.mxu0 %v16462_v60 }
 0x364   : > { %16459 = vst [vmem:[#allocation174_spill] sm:$0xff] %v14106_v16  ;;  %5302 = vmatprep.mubr.bf16.mxu1 %v16463_v37  ;;  %v4317_v63 = vpop.f32.mrf.mxu0 }
 0x365   : > { %v14115_v22 = vadd.f32 %v7439_v54, %v7438_v29  ;;  %v5664_v45 = vmax.f32 %v4665_v15, 0.0  ;;  %v4669_v39 = vadd.f32 %v4668_v6, %v4316_v46  ;;  %v4670_v35 = vpop.f32.mrf.mxu1  ;;  %v4318_v13 = vadd.f32 %v4317_v63, %v13748_v57  ;;  %v16466_v6 = vld [vmem:[#allocation13_spill] sm:$0xff] }
 0x366   : > { %v4319_v20 = vpop.f32.mrf.mxu0  ;;  %v7442_v21 = vmul.f32 %v13771_v14, %v5663_v4 }
 0x367   : > { %16464 = vst [vmem:[#allocation89_spill] sm:$0xff] %v14115_v22  ;;  %v7443_v56 = vmul.f32 %v13774_v32, %v5664_v45  ;;  %v4320_v58 = vadd.f32 %v4319_v20, %v13729_v1  ;;  %v4672_v2 = vpop.f32.mrf.mxu1  ;;  %v5667_v60 = vmax.f32 %v4669_v39, 0.0  ;;  %v4671_v37 = vadd.f32 %v4670_v35, %v4318_v13  ;;  %v16467_v20 = vld [vmem:[#allocation16_spill] sm:$0xff]  ;;  %v16468_v39 = vld [vmem:[#allocation110_spill] sm:$0xff] }
 0x368   : > { %v4321_v16 = vpop.f32.mrf.mxu0 }
 0x369   : > { %v14121_v31 = vadd.f32 %v7443_v56, %v7442_v21  ;;  %v4673_v29 = vadd.f32 %v4672_v2, %v4320_v58  ;;  %v4322_v54 = vadd.f32 %v4321_v16, %v13748_v57  ;;  %v4674_v15 = vpop.f32.mrf.mxu1  ;;  %v5668_v47 = vmax.f32 %v4671_v37, 0.0  ;;  %v16469_v21 = vld [vmem:[#allocation115_spill] sm:$0xff] }
 0x36a   : > { %v4325_v46 = vpop.f32.mrf.mxu0  ;;  %4950 = vmatmul.mubr.bf16.gmra.mxu0 %v16466_v6  ;;  %v7446_v35 = vmul.f32 %v13771_v14, %v5667_v60 }
 0x36b   : > { %16465 = vst [vmem:[#allocation97_spill] sm:$0xff] %v14121_v31  ;;  %v5671_v63 = vmax.f32 %v4673_v29, 0.0  ;;  %v4675_v4 = vadd.f32 %v4674_v15, %v4322_v54  ;;  %v4326_v45 = vadd.f32 %v4325_v46, %v13729_v1  ;;  %v4678_v22 = vpop.f32.mrf.mxu1  ;;  %5303 = vmatmul.mubr.bf16.gmra.mxu1 %v16467_v20  ;;  %4959 = vmatprep.mubr.bf16.mxu0 %v16468_v39 }
 0x36c   : > { %v7447_v13 = vmul.f32 %v13774_v32, %v5668_v47  ;;  %5312 = vmatprep.mubr.bf16.mxu1 %v16469_v21  ;;  %v4327_v16 = vpop.f32.mrf.mxu0 }
 0x36d   : > { %v5672_v56 = vmax.f32 %v4675_v4, 0.0  ;;  %v4679_v58 = vadd.f32 %v4678_v22, %v4326_v45  ;;  %v4328_v2 = vadd.f32 %v4327_v16, %v13748_v57  ;;  %v4680_v37 = vpop.f32.mrf.mxu1  ;;  %v7450_v54 = vmul.f32 %v13771_v14, %v5671_v63 }
 0x36e   : > { %v14132_v29 = vadd.f32 %v7447_v13, %v7446_v35  ;;  %v4329_v15 = vpop.f32.mrf.mxu0  ;;  %v16472_v13 = vld [vmem:[#allocation116_spill] sm:$0xff] }
 0x36f   : > { %v7451_v46 = vmul.f32 %v13774_v32, %v5672_v56  ;;  %v5675_v6 = vmax.f32 %v4679_v58, 0.0  ;;  %v4681_v20 = vadd.f32 %v4680_v37, %v4328_v2  ;;  %v4330_v60 = vadd.f32 %v4329_v15, %v13729_v1  ;;  %v4682_v47 = vpop.f32.mrf.mxu1  ;;  %v16473_v37 = vld [vmem:[#allocation15_spill] sm:$0xff]  ;;  %v16474_v15 = vld [vmem:[#allocation18_spill] sm:$0xff] }
 0x370   : > { %16470 = vst [vmem:[#allocation167_spill] sm:$0xff] %v14132_v29  ;;  %v4331_v39 = vpop.f32.mrf.mxu0 }
 0x371   : > { %v14137_v21 = vadd.f32 %v7451_v46, %v7450_v54  ;;  %v5676_v4 = vmax.f32 %v4681_v20, 0.0  ;;  %v4683_v22 = vadd.f32 %v4682_v47, %v4330_v60  ;;  %v4684_v45 = vpop.f32.mrf.mxu1  ;;  %v4332_v16 = vadd.f32 %v4331_v39, %v13748_v57  ;;  %v16475_v20 = vld [vmem:[#allocation119_spill] sm:$0xff] }
 0x372   : > { %v4335_v35 = vpop.f32.mrf.mxu0  ;;  %4960 = vmatmul.mubr.bf16.gmra.mxu0 %v16472_v13  ;;  %v7454_v63 = vmul.f32 %v13771_v14, %v5675_v6 }
 0x373   : > { %16471 = vst [vmem:[#allocation171_spill] sm:$0xff] %v14137_v21  ;;  %v7455_v56 = vmul.f32 %v13774_v32, %v5676_v4  ;;  %v4336_v58 = vadd.f32 %v4335_v35, %v13729_v1  ;;  %v4688_v2 = vpop.f32.mrf.mxu1  ;;  %5313 = vmatmul.mubr.bf16.gmra.mxu1 %v16473_v37  ;;  %4969 = vmatprep.mubr.bf16.mxu0 %v16474_v15  ;;  %v5679_v54 = vmax.f32 %v4683_v22, 0.0 }
 0x374   : > { %v4685_v46 = vadd.f32 %v4684_v45, %v4332_v16  ;;  %5322 = vmatprep.mubr.bf16.mxu1 %v16475_v20  ;;  %v4337_v60 = vpop.f32.mrf.mxu0 }
 0x375   : > { %v14147_v47 = vadd.f32 %v7455_v56, %v7454_v63  ;;  %v4689_v39 = vadd.f32 %v4688_v2, %v4336_v58  ;;  %v4338_v13 = vadd.f32 %v4337_v60, %v13748_v57  ;;  %v4690_v6 = vpop.f32.mrf.mxu1  ;;  %v7458_v15 = vmul.f32 %v13771_v14, %v5679_v54  ;;  %v16478_v60 = vld [vmem:[#allocation17_spill] sm:$0xff] }
 0x376   : > { %v5680_v21 = vmax.f32 %v4685_v46, 0.0  ;;  %v4339_v4 = vpop.f32.mrf.mxu0 }
 0x377   : > { %16476 = vst [vmem:[#allocation168_spill] sm:$0xff] %v14147_v47  ;;  %v5683_v29 = vmax.f32 %v4689_v39, 0.0  ;;  %v4691_v35 = vadd.f32 %v4690_v6, %v4338_v13  ;;  %v4340_v31 = vadd.f32 %v4339_v4, %v13729_v1  ;;  %v4692_v37 = vpop.f32.mrf.mxu1  ;;  %v16479_v4 = vld [vmem:[#allocation20_spill] sm:$0xff] }
 0x378   : > { %v7459_v22 = vmul.f32 %v13774_v32, %v5680_v21  ;;  %v4341_v45 = vpop.f32.mrf.mxu0 }
 0x379   : > { %v5684_v16 = vmax.f32 %v4691_v35, 0.0  ;;  %v4693_v20 = vadd.f32 %v4692_v37, %v4340_v31  ;;  %v4342_v63 = vadd.f32 %v4341_v45, %v13748_v57  ;;  %v4694_v56 = vpop.f32.mrf.mxu1  ;;  %v7462_v2 = vmul.f32 %v13771_v14, %v5683_v29  ;;  %v16480_v31 = vld [vmem:[#allocation19_spill] sm:$0xff]  ;;  %v16481_v35 = vld [vmem:[#allocation22_spill] sm:$0xff] }
 0x37a   : > { %v14154_v58 = vadd.f32 %v7459_v22, %v7458_v15  ;;  %v4345_v46 = vpop.f32.mrf.mxu0  ;;  %4970 = vmatmul.mubr.bf16.gmra.mxu0 %v16478_v60 }
 0x37b   : > { %v7463_v39 = vmul.f32 %v13774_v32, %v5684_v16  ;;  %v5687_v13 = vmax.f32 %v4693_v20, 0.0  ;;  %v4695_v6 = vadd.f32 %v4694_v56, %v4342_v63  ;;  %v4346_v54 = vadd.f32 %v4345_v46, %v13729_v1  ;;  %v4698_v21 = vpop.f32.mrf.mxu1  ;;  %5323 = vmatmul.mubr.bf16.gmra.mxu1 %v16479_v4  ;;  %4979 = vmatprep.mubr.bf16.mxu0 %v16480_v31 }
 0x37c   : > { %16477 = vst [vmem:[#allocation172_spill] sm:$0xff] %v14154_v58  ;;  %5332 = vmatprep.mubr.bf16.mxu1 %v16481_v35  ;;  %v4347_v37 = vpop.f32.mrf.mxu0 }
 0x37d   : > { %v14163_v15 = vadd.f32 %v7463_v39, %v7462_v2  ;;  %v5688_v29 = vmax.f32 %v4695_v6, 0.0  ;;  %v4699_v22 = vadd.f32 %v4698_v21, %v4346_v54  ;;  %v4700_v45 = vpop.f32.mrf.mxu1  ;;  %v4348_v60 = vadd.f32 %v4347_v37, %v13748_v57  ;;  %v16484_v37 = vld [vmem:[#allocation21_spill] sm:$0xff] }
 0x37e   : > { %v4349_v16 = vpop.f32.mrf.mxu0  ;;  %v7466_v20 = vmul.f32 %v13771_v14, %v5687_v13 }
 0x37f   : > { %16482 = vst [vmem:[#allocation95_spill] sm:$0xff] %v14163_v15  ;;  %v7467_v63 = vmul.f32 %v13774_v32, %v5688_v29  ;;  %v4350_v56 = vadd.f32 %v4349_v16, %v13729_v1  ;;  %v4702_v46 = vpop.f32.mrf.mxu1  ;;  %v5691_v4 = vmax.f32 %v4699_v22, 0.0  ;;  %v4701_v31 = vadd.f32 %v4700_v45, %v4348_v60  ;;  %v16485_v16 = vld [vmem:[#allocation141_spill] sm:$0xff]  ;;  %v16486_v22 = vld [vmem:[#allocation24_spill] sm:$0xff]  ;;  %v10202_v45 = vld [vmem:[%s15889_s5 + $0x8] sm:$0xff]  }
 0x380   : > { %v4351_v58 = vpop.f32.mrf.mxu0  ;;  %9732 = vmatprep.subr.bf16.mxu0 %v10202_v45 }
 0x381   : > { %v14169_v35 = vadd.f32 %v7467_v63, %v7466_v20  ;;  %v4703_v2 = vadd.f32 %v4702_v46, %v4350_v56  ;;  %v4352_v39 = vadd.f32 %v4351_v58, %v13748_v57  ;;  %v4704_v6 = vpop.f32.mrf.mxu1  ;;  %v5692_v54 = vmax.f32 %v4701_v31, 0.0  ;;  %v16487_v20 = vld [vmem:[#allocation142_spill] sm:$0xff]  ;;  %9733 = vmatpush3.bf16.msra.mxu0 %v10202_v45 }
 0x382   : > { %v4355_v21 = vpop.f32.mrf.mxu0  ;;  %4980 = vmatmul.mubr.bf16.gmra.mxu0 %v16484_v37  ;;  %v7470_v58 = vmul.f32 %v13771_v14, %v5691_v4 }
 0x383   : > { %16483 = vst [vmem:[#allocation121_spill] sm:$0xff] %v14169_v35  ;;  %v5695_v15 = vmax.f32 %v4703_v2, 0.0  ;;  %v4705_v13 = vadd.f32 %v4704_v6, %v4352_v39  ;;  %v4356_v29 = vadd.f32 %v4355_v21, %v13729_v1  ;;  %v4708_v47 = vpop.f32.mrf.mxu1  ;;  %5333 = vmatmul.mubr.bf16.gmra.mxu1 %v16485_v16  ;;  %4989 = vmatprep.mubr.bf16.mxu0 %v16486_v22 }
 0x384   : > { %v7471_v60 = vmul.f32 %v13774_v32, %v5692_v54  ;;  %5342 = vmatprep.mubr.bf16.mxu1 %v16487_v20  ;;  %v4357_v63 = vpop.f32.mrf.mxu0 }
 0x385   : > { %v5696_v56 = vmax.f32 %v4705_v13, 0.0  ;;  %v4709_v46 = vadd.f32 %v4708_v47, %v4356_v29  ;;  %v4358_v31 = vadd.f32 %v4357_v63, %v13748_v57  ;;  %v4710_v2 = vpop.f32.mrf.mxu1  ;;  %v7474_v6 = vmul.f32 %v13771_v14, %v5695_v15 }
 0x386   : > { %v14183_v39 = vadd.f32 %v7471_v60, %v7470_v58  ;;  %v4359_v21 = vpop.f32.mrf.mxu0 }
 0x387   : > { %v7475_v37 = vmul.f32 %v13774_v32, %v5696_v56  ;;  %v5699_v4 = vmax.f32 %v4709_v46, 0.0  ;;  %v4711_v16 = vadd.f32 %v4710_v2, %v4358_v31  ;;  %v4360_v54 = vadd.f32 %v4359_v21, %v13729_v1  ;;  %v4712_v22 = vpop.f32.mrf.mxu1  ;;  %v16491_v31 = vld [vmem:[#allocation143_spill] sm:$0xff]  ;;  %v16492_v2 = vld [vmem:[#allocation26_spill] sm:$0xff] }
 0x388   : > { %16488 = vst [vmem:[#allocation122_spill] sm:$0xff] %v14183_v39  ;;  %v4361_v20 = vpop.f32.mrf.mxu0  ;;  %v16490_v39 = vld [vmem:[#allocation23_spill] sm:$0xff] }
 0x389   : > { %v14188_v13 = vadd.f32 %v7475_v37, %v7474_v6  ;;  %v5700_v47 = vmax.f32 %v4711_v16, 0.0  ;;  %v4713_v29 = vadd.f32 %v4712_v22, %v4360_v54  ;;  %v4714_v63 = vpop.f32.mrf.mxu1  ;;  %v4362_v58 = vadd.f32 %v4361_v20, %v13748_v57  ;;  %v16493_v37 = vld [vmem:[#allocation144_spill] sm:$0xff] }
 0x38a   : > { %v4365_v60 = vpop.f32.mrf.mxu0  ;;  %4990 = vmatmul.mubr.bf16.gmra.mxu0 %v16490_v39  ;;  %v7478_v15 = vmul.f32 %v13771_v14, %v5699_v4 }
 0x38b   : > { %16489 = vst [vmem:[#allocation123_spill] sm:$0xff] %v14188_v13  ;;  %v7479_v45 = vmul.f32 %v13774_v32, %v5700_v47  ;;  %v4366_v56 = vadd.f32 %v4365_v60, %v13729_v1  ;;  %v4718_v46 = vpop.f32.mrf.mxu1  ;;  %5343 = vmatmul.mubr.bf16.gmra.mxu1 %v16491_v31  ;;  %4999 = vmatprep.mubr.bf16.mxu0 %v16492_v2  ;;  %v5703_v6 = vmax.f32 %v4713_v29, 0.0  ;;  %v10203_v29 = vld [vmem:[%s15890_s6] sm:$0xff]  }
 0x38c   : > { %v4715_v21 = vadd.f32 %v4714_v63, %v4362_v58  ;;  %5352 = vmatprep.mubr.bf16.mxu1 %v16493_v37  ;;  %v4367_v16 = vpop.f32.mrf.mxu0  ;;  %9800 = vmatprep.subr.bf16.mxu1 %v10203_v29 }
 0x38d   : > { %v14198_v54 = vadd.f32 %v7479_v45, %v7478_v15  ;;  %v4719_v22 = vadd.f32 %v4718_v46, %v4366_v56  ;;  %v4368_v39 = vadd.f32 %v4367_v16, %v13748_v57  ;;  %v4720_v4 = vpop.f32.mrf.mxu1  ;;  %v7482_v63 = vmul.f32 %v13771_v14, %v5703_v6  ;;  %9801 = vmatpush3.bf16.msra.mxu1 %v10203_v29 }
 0x38e   : > { %v5704_v20 = vmax.f32 %v4715_v21, 0.0  ;;  %v4369_v47 = vpop.f32.mrf.mxu0 }
 0x38f   : > { %16494 = vst [vmem:[#allocation124_spill] sm:$0xff] %v14198_v54  ;;  %v5707_v13 = vmax.f32 %v4719_v22, 0.0  ;;  %v4721_v60 = vadd.f32 %v4720_v4, %v4368_v39  ;;  %v4370_v35 = vadd.f32 %v4369_v47, %v13729_v1  ;;  %v4722_v31 = vpop.f32.mrf.mxu1  ;;  %v16496_v22 = vld [vmem:[#allocation25_spill] sm:$0xff] }
 0x390   : > { %v7483_v58 = vmul.f32 %v13774_v32, %v5704_v20  ;;  %v4371_v15 = vpop.f32.mrf.mxu0 }
 0x391   : > { %v5708_v45 = vmax.f32 %v4721_v60, 0.0  ;;  %v4723_v56 = vadd.f32 %v4722_v31, %v4370_v35  ;;  %v4372_v46 = vadd.f32 %v4371_v15, %v13748_v57  ;;  %v4724_v2 = vpop.f32.mrf.mxu1  ;;  %v7486_v37 = vmul.f32 %v13771_v14, %v5707_v13  ;;  %v16497_v35 = vld [vmem:[#allocation145_spill] sm:$0xff]  ;;  %v16498_v60 = vld [vmem:[#allocation28_spill] sm:$0xff]  ;;  %v16499_v31 = vld [vmem:[#allocation146_spill] sm:$0xff] }
 0x392   : > { %v14208_v21 = vadd.f32 %v7483_v58, %v7482_v63  ;;  %v4375_v16 = vpop.f32.mrf.mxu0  ;;  %5000 = vmatmul.mubr.bf16.gmra.mxu0 %v16496_v22 }
 0x393   : > { %v7487_v39 = vmul.f32 %v13774_v32, %v5708_v45  ;;  %v5711_v6 = vmax.f32 %v4723_v56, 0.0  ;;  %v4725_v4 = vadd.f32 %v4724_v2, %v4372_v46  ;;  %v4376_v20 = vadd.f32 %v4375_v16, %v13729_v1  ;;  %v4728_v47 = vpop.f32.mrf.mxu1  ;;  %5353 = vmatmul.mubr.bf16.gmra.mxu1 %v16497_v35  ;;  %5009 = vmatprep.mubr.bf16.mxu0 %v16498_v60 }
 0x394   : > { %16495 = vst [vmem:[#allocation125_spill] sm:$0xff] %v14208_v21  ;;  %5362 = vmatprep.mubr.bf16.mxu1 %v16499_v31  ;;  %v4377_v63 = vpop.f32.mrf.mxu0 }
 0x395   : > { %v14217_v58 = vadd.f32 %v7487_v39, %v7486_v37  ;;  %v5712_v13 = vmax.f32 %v4725_v4, 0.0  ;;  %v4729_v15 = vadd.f32 %v4728_v47, %v4376_v20  ;;  %v4730_v22 = vpop.f32.mrf.mxu1  ;;  %v4378_v29 = vadd.f32 %v4377_v63, %v13748_v57  ;;  %v16502_v63 = vld [vmem:[#allocation27_spill] sm:$0xff] }
 0x396   : > { %v4379_v45 = vpop.f32.mrf.mxu0  ;;  %v7490_v56 = vmul.f32 %v13771_v14, %v5711_v6 }
 0x397   : > { %16500 = vst [vmem:[#allocation126_spill] sm:$0xff] %v14217_v58  ;;  %v7491_v46 = vmul.f32 %v13774_v32, %v5712_v13  ;;  %v4380_v2 = vadd.f32 %v4379_v45, %v13729_v1  ;;  %v4732_v16 = vpop.f32.mrf.mxu1  ;;  %v5715_v35 = vmax.f32 %v4729_v15, 0.0  ;;  %v4731_v60 = vadd.f32 %v4730_v22, %v4378_v29  ;;  %v16503_v45 = vld [vmem:[#allocation147_spill] sm:$0xff]  ;;  %v16504_v15 = vld [vmem:[#allocation30_spill] sm:$0xff] }
 0x398   : > { %v4381_v21 = vpop.f32.mrf.mxu0 }
 0x399   : > { %v14223_v31 = vadd.f32 %v7491_v46, %v7490_v56  ;;  %v4733_v37 = vadd.f32 %v4732_v16, %v4380_v2  ;;  %v4382_v39 = vadd.f32 %v4381_v21, %v13748_v57  ;;  %v4734_v4 = vpop.f32.mrf.mxu1  ;;  %v5716_v20 = vmax.f32 %v4731_v60, 0.0  ;;  %v16505_v56 = vld [vmem:[#allocation148_spill] sm:$0xff] }
 0x39a   : > { %v4385_v47 = vpop.f32.mrf.mxu0  ;;  %5010 = vmatmul.mubr.bf16.gmra.mxu0 %v16502_v63  ;;  %v7494_v22 = vmul.f32 %v13771_v14, %v5715_v35 }
 0x39b   : > { %16501 = vst [vmem:[#allocation155_spill] sm:$0xff] %v14223_v31  ;;  %v5719_v58 = vmax.f32 %v4733_v37, 0.0  ;;  %v4735_v6 = vadd.f32 %v4734_v4, %v4382_v39  ;;  %v4386_v13 = vadd.f32 %v4385_v47, %v13729_v1  ;;  %v4738_v54 = vpop.f32.mrf.mxu1  ;;  %5363 = vmatmul.mubr.bf16.gmra.mxu1 %v16503_v45  ;;  %5019 = vmatprep.mubr.bf16.mxu0 %v16504_v15 }
 0x39c   : > { %v7495_v29 = vmul.f32 %v13774_v32, %v5716_v20  ;;  %5372 = vmatprep.mubr.bf16.mxu1 %v16505_v56  ;;  %v4387_v21 = vpop.f32.mrf.mxu0 }
 0x39d   : > { %v5720_v46 = vmax.f32 %v4735_v6, 0.0  ;;  %v4739_v2 = vadd.f32 %v4738_v54, %v4386_v13  ;;  %v4388_v16 = vadd.f32 %v4387_v21, %v13748_v57  ;;  %v4740_v60 = vpop.f32.mrf.mxu1  ;;  %v7498_v39 = vmul.f32 %v13771_v14, %v5719_v58 }
 0x39e   : > { %v14234_v37 = vadd.f32 %v7495_v29, %v7494_v22  ;;  %v4389_v4 = vpop.f32.mrf.mxu0  ;;  %v16508_v29 = vld [vmem:[#allocation117_spill] sm:$0xff] }
 0x39f   : > { %v7499_v47 = vmul.f32 %v13774_v32, %v5720_v46  ;;  %v5723_v63 = vmax.f32 %v4739_v2, 0.0  ;;  %v4741_v45 = vadd.f32 %v4740_v60, %v4388_v16  ;;  %v4390_v35 = vadd.f32 %v4389_v4, %v13729_v1  ;;  %v4742_v20 = vpop.f32.mrf.mxu1  ;;  %v16509_v60 = vld [vmem:[#allocation105_spill] sm:$0xff]  ;;  %v16510_v4 = vld [vmem:[#allocation114_spill] sm:$0xff] }
 0x3a0   : > { %16506 = vst [vmem:[#allocation127_spill] sm:$0xff] %v14234_v37  ;;  %v4391_v15 = vpop.f32.mrf.mxu0 }
 0x3a1   : > { %v14239_v56 = vadd.f32 %v7499_v47, %v7498_v39  ;;  %v5724_v6 = vmax.f32 %v4741_v45, 0.0  ;;  %v4743_v54 = vadd.f32 %v4742_v20, %v4390_v35  ;;  %v4744_v13 = vpop.f32.mrf.mxu1  ;;  %v4392_v21 = vadd.f32 %v4391_v15, %v13748_v57  ;;  %v10204_v39 = vld [vmem:[%s15889_s5] sm:$0xff]   ;;  %v16511_v35 = vld [vmem:[#allocation29_spill] sm:$0xff] }
 0x3a2   : > { %v4395_v22 = vpop.f32.mrf.mxu0  ;;  %5020 = vmatmul.mubr.bf16.gmra.mxu0 %v16508_v29  ;;  %v7502_v58 = vmul.f32 %v13771_v14, %v5723_v63  ;;  %9734 = vmatprep.subr.bf16.mxu0 %v10204_v39 }
 0x3a3   : > { %16507 = vst [vmem:[#allocation128_spill] sm:$0xff] %v14239_v56  ;;  %v7503_v46 = vmul.f32 %v13774_v32, %v5724_v6  ;;  %v4396_v2 = vadd.f32 %v4395_v22, %v13729_v1  ;;  %v4748_v16 = vpop.f32.mrf.mxu1  ;;  %5373 = vmatmul.mubr.bf16.gmra.mxu1 %v16509_v60  ;;  %5029 = vmatprep.mubr.bf16.mxu0 %v16510_v4  ;;  %v5727_v47 = vmax.f32 %v4743_v54, 0.0 }
 0x3a4   : > { %v4745_v45 = vadd.f32 %v4744_v13, %v4392_v21  ;;  %5382 = vmatprep.mubr.bf16.mxu1 %v16511_v35  ;;  %v4397_v20 = vpop.f32.mrf.mxu0  ;;  %9735 = vmatpush3.bf16.msra.mxu0 %v10204_v39 }
 0x3a5   : > { %v14252_v15 = vadd.f32 %v7503_v46, %v7502_v58  ;;  %v4749_v63 = vadd.f32 %v4748_v16, %v4396_v2  ;;  %v4398_v6 = vadd.f32 %v4397_v20, %v13748_v57  ;;  %v4750_v22 = vpop.f32.mrf.mxu1  ;;  %v7506_v54 = vmul.f32 %v13771_v14, %v5727_v47  ;;  %v16514_v20 = vld [vmem:[#allocation118_spill] sm:$0xff] }
 0x3a6   : > { %v5728_v29 = vmax.f32 %v4745_v45, 0.0  ;;  %v4399_v60 = vpop.f32.mrf.mxu0 }
 0x3a7   : > { %16512 = vst [vmem:[#allocation129_spill] sm:$0xff] %v14252_v15  ;;  %v5731_v4 = vmax.f32 %v4749_v63, 0.0  ;;  %v4751_v56 = vadd.f32 %v4750_v22, %v4398_v6  ;;  %v4400_v37 = vadd.f32 %v4399_v60, %v13729_v1  ;;  %v4752_v31 = vpop.f32.mrf.mxu1  ;;  %v16515_v60 = vld [vmem:[#allocation111_spill] sm:$0xff] }
 0x3a8   : > { %v7507_v13 = vmul.f32 %v13774_v32, %v5728_v29  ;;  %v4401_v21 = vpop.f32.mrf.mxu0 }
 0x3a9   : > { %v5732_v58 = vmax.f32 %v4751_v56, 0.0  ;;  %v4753_v46 = vadd.f32 %v4752_v31, %v4400_v37  ;;  %v4402_v2 = vadd.f32 %v4401_v21, %v13748_v57  ;;  %v4754_v16 = vpop.f32.mrf.mxu1  ;;  %v7510_v45 = vmul.f32 %v13771_v14, %v5731_v4  ;;  %v16516_v31 = vld [vmem:[#allocation31_spill] sm:$0xff]  ;;  %v16517_v37 = vld [vmem:[#allocation34_spill] sm:$0xff] }
 0x3aa   : > { %v14259_v35 = vadd.f32 %v7507_v13, %v7506_v54  ;;  %v4405_v39 = vpop.f32.mrf.mxu0  ;;  %5030 = vmatmul.mubr.bf16.gmra.mxu0 %v16514_v20 }
 0x3ab   : > { %v7511_v63 = vmul.f32 %v13774_v32, %v5732_v58  ;;  %v5735_v6 = vmax.f32 %v4753_v46, 0.0  ;;  %v4755_v22 = vadd.f32 %v4754_v16, %v4402_v2  ;;  %v4406_v47 = vadd.f32 %v4405_v39, %v13729_v1  ;;  %v4758_v29 = vpop.f32.mrf.mxu1  ;;  %5383 = vmatmul.mubr.bf16.gmra.mxu1 %v16515_v60  ;;  %5039 = vmatprep.mubr.bf16.mxu0 %v16516_v31 }
 0x3ac   : > { %16513 = vst [vmem:[#allocation130_spill] sm:$0xff] %v14259_v35  ;;  %5392 = vmatprep.mubr.bf16.mxu1 %v16517_v37  ;;  %v4407_v56 = vpop.f32.mrf.mxu0 }
 0x3ad   : > { %v14268_v54 = vadd.f32 %v7511_v63, %v7510_v45  ;;  %v5736_v4 = vmax.f32 %v4755_v22, 0.0  ;;  %v4759_v13 = vadd.f32 %v4758_v29, %v4406_v47  ;;  %v4760_v21 = vpop.f32.mrf.mxu1  ;;  %v4408_v20 = vadd.f32 %v4407_v56, %v13748_v57  ;;  %v16520_v56 = vld [vmem:[#allocation33_spill] sm:$0xff] }
 0x3ae   : > { %v4409_v58 = vpop.f32.mrf.mxu0  ;;  %v7514_v46 = vmul.f32 %v13771_v14, %v5735_v6 }
 0x3af   : > { %16518 = vst [vmem:[#allocation131_spill] sm:$0xff] %v14268_v54  ;;  %v7515_v2 = vmul.f32 %v13774_v32, %v5736_v4  ;;  %v4410_v16 = vadd.f32 %v4409_v58, %v13729_v1  ;;  %v4762_v39 = vpop.f32.mrf.mxu1  ;;  %v5739_v60 = vmax.f32 %v4759_v13, 0.0  ;;  %v4761_v31 = vadd.f32 %v4760_v21, %v4408_v20  ;;  %v16521_v58 = vld [vmem:[#allocation150_spill] sm:$0xff]  ;;  %v16522_v13 = vld [vmem:[#allocation37_spill] sm:$0xff] }
 0x3b0   : > { %v4411_v35 = vpop.f32.mrf.mxu0 }
 0x3b1   : > { %v14274_v37 = vadd.f32 %v7515_v2, %v7514_v46  ;;  %v4763_v45 = vadd.f32 %v4762_v39, %v4410_v16  ;;  %v4412_v63 = vadd.f32 %v4411_v35, %v13748_v57  ;;  %v4764_v22 = vpop.f32.mrf.mxu1  ;;  %v5740_v47 = vmax.f32 %v4761_v31, 0.0  ;;  %v16523_v46 = vld [vmem:[#allocation151_spill] sm:$0xff] }
 0x3b2   : > { %v4415_v29 = vpop.f32.mrf.mxu0  ;;  %5040 = vmatmul.mubr.bf16.gmra.mxu0 %v16520_v56  ;;  %v7518_v21 = vmul.f32 %v13771_v14, %v5739_v60 }
 0x3b3   : > { %16519 = vst [vmem:[#allocation132_spill] sm:$0xff] %v14274_v37  ;;  %v5743_v54 = vmax.f32 %v4763_v45, 0.0  ;;  %v4765_v6 = vadd.f32 %v4764_v22, %v4412_v63  ;;  %v4416_v4 = vadd.f32 %v4415_v29, %v13729_v1  ;;  %v4768_v15 = vpop.f32.mrf.mxu1  ;;  %5393 = vmatmul.mubr.bf16.gmra.mxu1 %v16521_v58  ;;  %5049 = vmatprep.mubr.bf16.mxu0 %v16522_v13 }
 0x3b4   : > { %v7519_v20 = vmul.f32 %v13774_v32, %v5740_v47  ;;  %5402 = vmatprep.mubr.bf16.mxu1 %v16523_v46  ;;  %v4417_v35 = vpop.f32.mrf.mxu0 }
 0x3b5   : > { %v5744_v2 = vmax.f32 %v4765_v6, 0.0  ;;  %v4769_v16 = vadd.f32 %v4768_v15, %v4416_v4  ;;  %v4418_v39 = vadd.f32 %v4417_v35, %v13748_v57  ;;  %v4770_v31 = vpop.f32.mrf.mxu1  ;;  %v7522_v63 = vmul.f32 %v13771_v14, %v5743_v54 }
 0x3b6   : > { %v14285_v45 = vadd.f32 %v7519_v20, %v7518_v21  ;;  %v4419_v22 = vpop.f32.mrf.mxu0  ;;  %v16526_v20 = vld [vmem:[#allocation36_spill] sm:$0xff] }
 0x3b7   : > { %v7523_v29 = vmul.f32 %v13774_v32, %v5744_v2  ;;  %v5747_v56 = vmax.f32 %v4769_v16, 0.0  ;;  %v4771_v58 = vadd.f32 %v4770_v31, %v4418_v39  ;;  %v4420_v60 = vadd.f32 %v4419_v22, %v13729_v1  ;;  %v4772_v47 = vpop.f32.mrf.mxu1  ;;  %v16527_v31 = vld [vmem:[#allocation152_spill] sm:$0xff] }
 0x3b8   : > { %16524 = vst [vmem:[#allocation133_spill] sm:$0xff] %v14285_v45  ;;  %v4421_v13 = vpop.f32.mrf.mxu0  ;;  %v16528_v22 = vld [vmem:[#allocation40_spill] sm:$0xff] }
 0x3b9   : > { %v14290_v46 = vadd.f32 %v7523_v29, %v7522_v63  ;;  %v5748_v6 = vmax.f32 %v4771_v58, 0.0  ;;  %v4773_v15 = vadd.f32 %v4772_v47, %v4420_v60  ;;  %v4774_v4 = vpop.f32.mrf.mxu1  ;;  %v4422_v35 = vadd.f32 %v4421_v13, %v13748_v57  ;;  %v16529_v58 = vld [vmem:[#allocation153_spill] sm:$0xff] }
 0x3ba   : > { %v4425_v21 = vpop.f32.mrf.mxu0  ;;  %5050 = vmatmul.mubr.bf16.gmra.mxu0 %v16526_v20  ;;  %v7526_v54 = vmul.f32 %v13771_v14, %v5747_v56 }
 0x3bb   : > { %16525 = vst [vmem:[#allocation134_spill] sm:$0xff] %v14290_v46  ;;  %v7527_v2 = vmul.f32 %v13774_v32, %v5748_v6  ;;  %v4426_v16 = vadd.f32 %v4425_v21, %v13729_v1  ;;  %v4778_v39 = vpop.f32.mrf.mxu1  ;;  %5403 = vmatmul.mubr.bf16.gmra.mxu1 %v16527_v31  ;;  %5059 = vmatprep.mubr.bf16.mxu0 %v16528_v22  ;;  %v5751_v63 = vmax.f32 %v4773_v15, 0.0 }
 0x3bc   : > { %v4775_v29 = vadd.f32 %v4774_v4, %v4422_v35  ;;  %5412 = vmatprep.mubr.bf16.mxu1 %v16529_v58  ;;  %v4427_v60 = vpop.f32.mrf.mxu0 }
 0x3bd   : > { %v14300_v47 = vadd.f32 %v7527_v2, %v7526_v54  ;;  %v4779_v13 = vadd.f32 %v4778_v39, %v4426_v16  ;;  %v4428_v20 = vadd.f32 %v4427_v60, %v13748_v57  ;;  %v4780_v56 = vpop.f32.mrf.mxu1  ;;  %v7530_v22 = vmul.f32 %v13771_v14, %v5751_v63  ;;  %v16532_v60 = vld [vmem:[#allocation39_spill] sm:$0xff] }
 0x3be   : > { %v5752_v46 = vmax.f32 %v4775_v29, 0.0  ;;  %v4429_v6 = vpop.f32.mrf.mxu0 }
 0x3bf   : > { %16530 = vst [vmem:[#allocation135_spill] sm:$0xff] %v14300_v47  ;;  %v5755_v45 = vmax.f32 %v4779_v13, 0.0  ;;  %v4781_v21 = vadd.f32 %v4780_v56, %v4428_v20  ;;  %v4430_v37 = vadd.f32 %v4429_v6, %v13729_v1  ;;  %v4782_v31 = vpop.f32.mrf.mxu1  ;;  %v16533_v6 = vld [vmem:[#allocation154_spill] sm:$0xff] }
 0x3c0   : > { %v7531_v15 = vmul.f32 %v13774_v32, %v5752_v46  ;;  %v4431_v4 = vpop.f32.mrf.mxu0 }
 0x3c1   : > { %v5756_v35 = vmax.f32 %v4781_v21, 0.0  ;;  %v4783_v58 = vadd.f32 %v4782_v31, %v4430_v37  ;;  %v4432_v54 = vadd.f32 %v4431_v4, %v13748_v57  ;;  %v4784_v2 = vpop.f32.mrf.mxu1  ;;  %v7534_v39 = vmul.f32 %v13771_v14, %v5755_v45  ;;  %v16534_v37 = vld [vmem:[#allocation43_spill] sm:$0xff]  ;;  %v16535_v21 = vld [vmem:[#allocation156_spill] sm:$0xff] }
 0x3c2   : > { %v14307_v16 = vadd.f32 %v7531_v15, %v7530_v22  ;;  %v4435_v29 = vpop.f32.mrf.mxu0  ;;  %5060 = vmatmul.mubr.bf16.gmra.mxu0 %v16532_v60 }
 0x3c3   : > { %v7535_v13 = vmul.f32 %v13774_v32, %v5756_v35  ;;  %v5759_v20 = vmax.f32 %v4783_v58, 0.0  ;;  %v4785_v56 = vadd.f32 %v4784_v2, %v4432_v54  ;;  %v4436_v63 = vadd.f32 %v4435_v29, %v13729_v1  ;;  %v4788_v46 = vpop.f32.mrf.mxu1  ;;  %5413 = vmatmul.mubr.bf16.gmra.mxu1 %v16533_v6  ;;  %5069 = vmatprep.mubr.bf16.mxu0 %v16534_v37 }
 0x3c4   : > { %16531 = vst [vmem:[#allocation136_spill] sm:$0xff] %v14307_v16  ;;  %5422 = vmatprep.mubr.bf16.mxu1 %v16535_v21  ;;  %v4437_v31 = vpop.f32.mrf.mxu0 }
 0x3c5   : > { %v14316_v22 = vadd.f32 %v7535_v13, %v7534_v39  ;;  %v5760_v45 = vmax.f32 %v4785_v56, 0.0  ;;  %v4789_v15 = vadd.f32 %v4788_v46, %v4436_v63  ;;  %v4790_v4 = vpop.f32.mrf.mxu1  ;;  %v4438_v60 = vadd.f32 %v4437_v31, %v13748_v57  ;;  %v16538_v31 = vld [vmem:[#allocation41_spill] sm:$0xff] }
 0x3c6   : > { %v4439_v35 = vpop.f32.mrf.mxu0  ;;  %v7538_v58 = vmul.f32 %v13771_v14, %v5759_v20 }
 0x3c7   : > { %16536 = vst [vmem:[#allocation137_spill] sm:$0xff] %v14316_v22  ;;  %v7539_v54 = vmul.f32 %v13774_v32, %v5760_v45  ;;  %v4440_v2 = vadd.f32 %v4439_v35, %v13729_v1  ;;  %v4792_v29 = vpop.f32.mrf.mxu1  ;;  %v5763_v6 = vmax.f32 %v4789_v15, 0.0  ;;  %v4791_v37 = vadd.f32 %v4790_v4, %v4438_v60  ;;  %v16539_v35 = vld [vmem:[#allocation157_spill] sm:$0xff]  ;;  %v16540_v15 = vld [vmem:[#allocation46_spill] sm:$0xff] }
 0x3c8   : > { %v4441_v16 = vpop.f32.mrf.mxu0 }
 0x3c9   : > { %v14322_v21 = vadd.f32 %v7539_v54, %v7538_v58  ;;  %v4793_v39 = vadd.f32 %v4792_v29, %v4440_v2  ;;  %v4442_v13 = vadd.f32 %v4441_v16, %v13748_v57  ;;  %v4794_v56 = vpop.f32.mrf.mxu1  ;;  %v5764_v63 = vmax.f32 %v4791_v37, 0.0  ;;  %v16541_v58 = vld [vmem:[#allocation158_spill] sm:$0xff] }
 0x3ca   : > { %v4445_v46 = vpop.f32.mrf.mxu0  ;;  %5070 = vmatmul.mubr.bf16.gmra.mxu0 %v16538_v31  ;;  %v7542_v4 = vmul.f32 %v13771_v14, %v5763_v6 }
 0x3cb   : > { %16537 = vst [vmem:[#allocation138_spill] sm:$0xff] %v14322_v21  ;;  %v5767_v22 = vmax.f32 %v4793_v39, 0.0  ;;  %v4795_v20 = vadd.f32 %v4794_v56, %v4442_v13  ;;  %v4446_v45 = vadd.f32 %v4445_v46, %v13729_v1  ;;  %v4798_v47 = vpop.f32.mrf.mxu1  ;;  %5423 = vmatmul.mubr.bf16.gmra.mxu1 %v16539_v35  ;;  %5079 = vmatprep.mubr.bf16.mxu0 %v16540_v15 }
 0x3cc   : > { %v7543_v60 = vmul.f32 %v13774_v32, %v5764_v63  ;;  %5432 = vmatprep.mubr.bf16.mxu1 %v16541_v58  ;;  %v4447_v16 = vpop.f32.mrf.mxu0 }
 0x3cd   : > { %v5768_v54 = vmax.f32 %v4795_v20, 0.0  ;;  %v4799_v2 = vadd.f32 %v4798_v47, %v4446_v45  ;;  %v4448_v29 = vadd.f32 %v4447_v16, %v13748_v57  ;;  %v4800_v37 = vpop.f32.mrf.mxu1  ;;  %v7546_v13 = vmul.f32 %v13771_v14, %v5767_v22 }
 0x3ce   : > { %v14333_v39 = vadd.f32 %v7543_v60, %v7542_v4  ;;  %v4449_v56 = vpop.f32.mrf.mxu0  ;;  %v16544_v60 = vld [vmem:[#allocation44_spill] sm:$0xff] }
 0x3cf   : > { %v7547_v46 = vmul.f32 %v13774_v32, %v5768_v54  ;;  %v5771_v31 = vmax.f32 %v4799_v2, 0.0  ;;  %v4801_v35 = vadd.f32 %v4800_v37, %v4448_v29  ;;  %v4450_v6 = vadd.f32 %v4449_v56, %v13729_v1  ;;  %v4802_v63 = vpop.f32.mrf.mxu1  ;;  %v16545_v37 = vld [vmem:[#allocation159_spill] sm:$0xff]  ;;  %v16546_v56 = vld [vmem:[#allocation49_spill] sm:$0xff] }
 0x3d0   : > { %16542 = vst [vmem:[#allocation12_spill] sm:$0xff] %v14333_v39  ;;  %v4451_v15 = vpop.f32.mrf.mxu0 }
 0x3d1   : > { %v14338_v58 = vadd.f32 %v7547_v46, %v7546_v13  ;;  %v5772_v20 = vmax.f32 %v4801_v35, 0.0  ;;  %v4803_v47 = vadd.f32 %v4802_v63, %v4450_v6  ;;  %v4804_v45 = vpop.f32.mrf.mxu1  ;;  %v4452_v16 = vadd.f32 %v4451_v15, %v13748_v57  ;;  %v16547_v35 = vld [vmem:[#allocation160_spill] sm:$0xff] }
 0x3d2   : > { %v4455_v4 = vpop.f32.mrf.mxu0  ;;  %5080 = vmatmul.mubr.bf16.gmra.mxu0 %v16544_v60  ;;  %v7550_v22 = vmul.f32 %v13771_v14, %v5771_v31 }
 0x3d3   : > { %16543 = vst [vmem:[#allocation139_spill] sm:$0xff] %v14338_v58  ;;  %v7551_v54 = vmul.f32 %v13774_v32, %v5772_v20  ;;  %v4456_v2 = vadd.f32 %v4455_v4, %v13729_v1  ;;  %v4808_v29 = vpop.f32.mrf.mxu1  ;;  %5433 = vmatmul.mubr.bf16.gmra.mxu1 %v16545_v37  ;;  %5089 = vmatprep.mubr.bf16.mxu0 %v16546_v56  ;;  %v5775_v13 = vmax.f32 %v4803_v47, 0.0 }
 0x3d4   : > { %v4805_v46 = vadd.f32 %v4804_v45, %v4452_v16  ;;  %5442 = vmatprep.mubr.bf16.mxu1 %v16547_v35  ;;  %v4457_v6 = vpop.f32.mrf.mxu0 }
 0x3d5   : > { %v14348_v63 = vadd.f32 %v7551_v54, %v7550_v22  ;;  %v4809_v15 = vadd.f32 %v4808_v29, %v4456_v2  ;;  %v4458_v60 = vadd.f32 %v4457_v6, %v13748_v57  ;;  %v4810_v31 = vpop.f32.mrf.mxu1  ;;  %v7554_v56 = vmul.f32 %v13771_v14, %v5775_v13  ;;  %v16550_v6 = vld [vmem:[#allocation47_spill] sm:$0xff] }
 0x3d6   : > { %v5776_v58 = vmax.f32 %v4805_v46, 0.0  ;;  %v4459_v20 = vpop.f32.mrf.mxu0 }
 0x3d7   : > { %16548 = vst [vmem:[#allocation14_spill] sm:$0xff] %v14348_v63  ;;  %v5779_v39 = vmax.f32 %v4809_v15, 0.0  ;;  %v4811_v4 = vadd.f32 %v4810_v31, %v4458_v60  ;;  %v4460_v21 = vadd.f32 %v4459_v20, %v13729_v1  ;;  %v4812_v37 = vpop.f32.mrf.mxu1  ;;  %v16551_v20 = vld [vmem:[#allocation161_spill] sm:$0xff] }
 0x3d8   : > { %v7555_v47 = vmul.f32 %v13774_v32, %v5776_v58  ;;  %v4461_v45 = vpop.f32.mrf.mxu0 }
 0x3d9   : > { %v5780_v16 = vmax.f32 %v4811_v4, 0.0  ;;  %v4813_v35 = vadd.f32 %v4812_v37, %v4460_v21  ;;  %v4462_v22 = vadd.f32 %v4461_v45, %v13748_v57  ;;  %v4814_v54 = vpop.f32.mrf.mxu1  ;;  %v7558_v29 = vmul.f32 %v13771_v14, %v5779_v39  ;;  %v16552_v21 = vld [vmem:[#allocation52_spill] sm:$0xff]  ;;  %v16553_v4 = vld [vmem:[#allocation162_spill] sm:$0xff] }
 0x3da   : > { %v14355_v2 = vadd.f32 %v7555_v47, %v7554_v56  ;;  %v4465_v46 = vpop.f32.mrf.mxu0  ;;  %5090 = vmatmul.mubr.bf16.gmra.mxu0 %v16550_v6 }
 0x3db   : > { %v7559_v15 = vmul.f32 %v13774_v32, %v5780_v16  ;;  %v5783_v60 = vmax.f32 %v4813_v35, 0.0  ;;  %v4815_v31 = vadd.f32 %v4814_v54, %v4462_v22  ;;  %v4466_v13 = vadd.f32 %v4465_v46, %v13729_v1  ;;  %v4818_v58 = vpop.f32.mrf.mxu1  ;;  %5443 = vmatmul.mubr.bf16.gmra.mxu1 %v16551_v20  ;;  %5099 = vmatprep.mubr.bf16.mxu0 %v16552_v21 }
 0x3dc   : > { %16549 = vst [vmem:[#allocation140_spill] sm:$0xff] %v14355_v2  ;;  %5452 = vmatprep.mubr.bf16.mxu1 %v16553_v4  ;;  %v4467_v37 = vpop.f32.mrf.mxu0 }
 0x3dd   : > { %v14364_v56 = vadd.f32 %v7559_v15, %v7558_v29  ;;  %v5784_v39 = vmax.f32 %v4815_v31, 0.0  ;;  %v4819_v47 = vadd.f32 %v4818_v58, %v4466_v13  ;;  %v4820_v45 = vpop.f32.mrf.mxu1  ;;  %v4468_v6 = vadd.f32 %v4467_v37, %v13748_v57  ;;  %v16556_v37 = vld [vmem:[#allocation32_spill] sm:$0xff] }
 0x3de   : > { %v4469_v16 = vpop.f32.mrf.mxu0  ;;  %v7562_v35 = vmul.f32 %v13771_v14, %v5783_v60 }
 0x3df   : > { %16554 = vst [vmem:[#allocation108_spill] sm:$0xff] %v14364_v56  ;;  %v7563_v22 = vmul.f32 %v13774_v32, %v5784_v39  ;;  %v4470_v54 = vadd.f32 %v4469_v16, %v13729_v1  ;;  %v4822_v46 = vpop.f32.mrf.mxu1  ;;  %v5787_v20 = vmax.f32 %v4819_v47, 0.0  ;;  %v4821_v21 = vadd.f32 %v4820_v45, %v4468_v6  ;;  %v16557_v16 = vld [vmem:[#allocation149_spill] sm:$0xff]  ;;  %v16558_v47 = vld [vmem:[#allocation50_spill] sm:$0xff] }
 0x3e0   : > { %v4471_v2 = vpop.f32.mrf.mxu0 }
 0x3e1   : > { %v14370_v4 = vadd.f32 %v7563_v22, %v7562_v35  ;;  %v4823_v29 = vadd.f32 %v4822_v46, %v4470_v54  ;;  %v4472_v15 = vadd.f32 %v4471_v2, %v13748_v57  ;;  %v4824_v31 = vpop.f32.mrf.mxu1  ;;  %v5788_v13 = vmax.f32 %v4821_v21, 0.0  ;;  %v16559_v35 = vld [vmem:[#allocation55_spill] sm:$0xff] }
 0x3e2   : > { %v4475_v58 = vpop.f32.mrf.mxu0  ;;  %5100 = vmatmul.mubr.bf16.gmra.mxu0 %v16556_v37  ;;  %v7566_v45 = vmul.f32 %v13771_v14, %v5787_v20 }
 0x3e3   : > { %16555 = vst [vmem:[#allocation106_spill] sm:$0xff] %v14370_v4  ;;  %v5791_v56 = vmax.f32 %v4823_v29, 0.0  ;;  %v4825_v60 = vadd.f32 %v4824_v31, %v4472_v15  ;;  %v4476_v39 = vadd.f32 %v4475_v58, %v13729_v1  ;;  %v4828_v63 = vpop.f32.mrf.mxu1  ;;  %5453 = vmatmul.mubr.bf16.gmra.mxu1 %v16557_v16  ;;  %5109 = vmatprep.mubr.bf16.mxu0 %v16558_v47 }
 0x3e4   : > { %v7567_v6 = vmul.f32 %v13774_v32, %v5788_v13  ;;  %5462 = vmatprep.mubr.bf16.mxu1 %v16559_v35  ;;  %v4477_v2 = vpop.f32.mrf.mxu0 }
 0x3e5   : > { %v5792_v22 = vmax.f32 %v4825_v60, 0.0  ;;  %v4829_v54 = vadd.f32 %v4828_v63, %v4476_v39  ;;  %v4478_v46 = vadd.f32 %v4477_v2, %v13748_v57  ;;  %v4830_v21 = vpop.f32.mrf.mxu1  ;;  %v7570_v15 = vmul.f32 %v13771_v14, %v5791_v56 }
 0x3e6   : > { %v14381_v29 = vadd.f32 %v7567_v6, %v7566_v45  ;;  %v4479_v31 = vpop.f32.mrf.mxu0  ;;  %v16562_v6 = vld [vmem:[#allocation53_spill] sm:$0xff] }
 0x3e7   : > { %v7571_v58 = vmul.f32 %v13774_v32, %v5792_v22  ;;  %v5795_v37 = vmax.f32 %v4829_v54, 0.0  ;;  %v4831_v16 = vadd.f32 %v4830_v21, %v4478_v46  ;;  %v4480_v20 = vadd.f32 %v4479_v31, %v13729_v1  ;;  %v4832_v13 = vpop.f32.mrf.mxu1  ;;  %v16563_v21 = vld [vmem:[#allocation163_spill] sm:$0xff]  ;;  %v16564_v31 = vld [vmem:[#allocation57_spill] sm:$0xff] }
 0x3e8   : > { %16560 = vst [vmem:[#allocation109_spill] sm:$0xff] %v14381_v29  ;;  %v4481_v47 = vpop.f32.mrf.mxu0 }
 0x3e9   : > { %v14386_v35 = vadd.f32 %v7571_v58, %v7570_v15  ;;  %v5796_v60 = vmax.f32 %v4831_v16, 0.0  ;;  %v4833_v63 = vadd.f32 %v4832_v13, %v4480_v20  ;;  %v4834_v39 = vpop.f32.mrf.mxu1  ;;  %v4482_v2 = vadd.f32 %v4481_v47, %v13748_v57  ;;  %v16565_v16 = vld [vmem:[#allocation164_spill] sm:$0xff] }
 0x3ea   : > { %v4485_v45 = vpop.f32.mrf.mxu0  ;;  %5110 = vmatmul.mubr.bf16.gmra.mxu0 %v16562_v6  ;;  %v7574_v56 = vmul.f32 %v13771_v14, %v5795_v37 }
 0x3eb   : > { %16561 = vst [vmem:[#allocation113_spill] sm:$0xff] %v14386_v35  ;;  %v7575_v22 = vmul.f32 %v13774_v32, %v5796_v60  ;;  %v4486_v54 = vadd.f32 %v4485_v45, %v13729_v1  ;;  %v4838_v46 = vpop.f32.mrf.mxu1  ;;  %5463 = vmatmul.mubr.bf16.gmra.mxu1 %v16563_v21  ;;  %5119 = vmatprep.mubr.bf16.mxu0 %v16564_v31  ;;  %v5799_v15 = vmax.f32 %v4833_v63, 0.0 }
 0x3ec   : > { %v4835_v58 = vadd.f32 %v4834_v39, %v4482_v2  ;;  %5472 = vmatprep.mubr.bf16.mxu1 %v16565_v16  ;;  %v4487_v20 = vpop.f32.mrf.mxu0 }
 0x3ed   : > { %v14396_v13 = vadd.f32 %v7575_v22, %v7574_v56  ;;  %v4839_v47 = vadd.f32 %v4838_v46, %v4486_v54  ;;  %v4488_v6 = vadd.f32 %v4487_v20, %v13748_v57  ;;  %v4840_v37 = vpop.f32.mrf.mxu1  ;;  %v7578_v31 = vmul.f32 %v13771_v14, %v5799_v15  ;;  %v16568_v20 = vld [vmem:[#allocation56_spill] sm:$0xff] }
 0x3ee   : > { %v5800_v35 = vmax.f32 %v4835_v58, 0.0  ;;  %v4489_v60 = vpop.f32.mrf.mxu0 }
 0x3ef   : > { %16566 = vst [vmem:[#allocation13_spill] sm:$0xff] %v14396_v13  ;;  %v5803_v29 = vmax.f32 %v4839_v47, 0.0  ;;  %v4841_v45 = vadd.f32 %v4840_v37, %v4488_v6  ;;  %v4490_v4 = vadd.f32 %v4489_v60, %v13729_v1  ;;  %v4842_v21 = vpop.f32.mrf.mxu1  ;;  %v16569_v60 = vld [vmem:[#allocation165_spill] sm:$0xff]  ;;  %v16579_v13 = vld [vmem:[#allocation176_spill] sm:$0xff] }
 0x3f0   : > { %v7579_v63 = vmul.f32 %v13774_v32, %v5800_v35  ;;  %v4491_v39 = vpop.f32.mrf.mxu0 }
 0x3f1   : > { %v5804_v2 = vmax.f32 %v4841_v45, 0.0  ;;  %v4843_v16 = vadd.f32 %v4842_v21, %v4490_v4  ;;  %v4492_v56 = vadd.f32 %v4491_v39, %v13748_v57  ;;  %v4844_v22 = vpop.f32.mrf.mxu1  ;;  %v7582_v46 = vmul.f32 %v13771_v14, %v5803_v29  ;;  %v16570_v4 = vld [vmem:[#allocation62_spill] sm:$0xff] }
 0x3f2   : > { %v14403_v54 = vadd.f32 %v7579_v63, %v7578_v31  ;;  %v4495_v58 = vpop.f32.mrf.mxu0  ;;  %5120 = vmatmul.mubr.bf16.gmra.mxu0 %v16568_v20  ;;  %v16571_v45 = vld [vmem:[#allocation166_spill] sm:$0xff] }
 0x3f3   : > { %v7583_v47 = vmul.f32 %v13774_v32, %v5804_v2  ;;  %v5807_v6 = vmax.f32 %v4843_v16, 0.0  ;;  %v4845_v37 = vadd.f32 %v4844_v22, %v4492_v56  ;;  %v4496_v15 = vadd.f32 %v4495_v58, %v13729_v1  ;;  %v4848_v35 = vpop.f32.mrf.mxu1  ;;  %5473 = vmatmul.mubr.bf16.gmra.mxu1 %v16569_v60  ;;  %5129 = vmatprep.mubr.bf16.mxu0 %v16570_v4  ;;  %v10525_v60 = vld [vmem:[%s15891_s7 + $0x10] sm:$0xff]  ;;  %v16573_v4 = vld [vmem:[#allocation169_spill] sm:$0xff] }
 0x3f4   : > { %16567 = vst [vmem:[#allocation16_spill] sm:$0xff] %v14403_v54  ;;  %5482 = vmatprep.mubr.bf16.mxu1 %v16571_v45  ;;  %v4497_v21 = vpop.f32.mrf.mxu0  ;;  %v16575_v54 = vld [vmem:[#allocation60_spill] sm:$0xff] }
 0x3f5   : > { %v14412_v31 = vadd.f32 %v7583_v47, %v7582_v46  ;;  %v5808_v29 = vmax.f32 %v4845_v37, 0.0  ;;  %v4849_v63 = vadd.f32 %v4848_v35, %v4496_v15  ;;  %v4850_v39 = vpop.f32.mrf.mxu1  ;;  %v4498_v20 = vadd.f32 %v4497_v21, %v13748_v57 }
 0x3f6   : > { %v4499_v2 = vpop.f32.mrf.mxu0  ;;  %v7586_v16 = vmul.f32 %v13771_v14, %v5807_v6  ;;  %v14422_v46 = vrot.slane %v10525_v60, %v16573_v4 }
 0x3f7   : > { %16572 = vst [vmem:[#allocation110_spill] sm:$0xff] %v14412_v31  ;;  %v7587_v56 = vmul.f32 %v13774_v32, %v5808_v29  ;;  %v4500_v22 = vadd.f32 %v4499_v2, %v13729_v1  ;;  %v4852_v58 = vpop.f32.mrf.mxu1  ;;  %v5811_v47 = vmax.f32 %v4849_v63, 0.0  ;;  %v4851_v37 = vadd.f32 %v4850_v39, %v4498_v20  ;;  %v10526_v1 = vld [vmem:[%s15891_s7 + $0x18] sm:$0xff] }
 0x3f8   : > { %v4501_v15 = vpop.f32.mrf.mxu0  ;;  %v14431_v29 = vrot.slane %v10526_v1, %v16573_v4 }
 0x3f9   : > { %v14424_v35 = vadd.f32 %v7587_v56, %v7586_v16  ;;  %v4853_v45 = vadd.f32 %v4852_v58, %v4500_v22  ;;  %v4502_v6 = vadd.f32 %v4501_v15, %v13748_v57  ;;  %v4854_v21 = vpop.f32.mrf.mxu1  ;;  %v5812_v2 = vmax.f32 %v4851_v37, 0.0  ;;  %v16576_v56 = vld [vmem:[#allocation173_spill] sm:$0xff]  ;;  %v16577_v57 = vld [vmem:[#allocation67_spill] sm:$0xff] }
 0x3fa   : > { %v4891_v31 = vpop.f32.mrf.mxu0  ;;  %5130 = vmatmul.mubr.bf16.gmra.mxu0 %v16575_v54  ;;  %v7590_v22 = vmul.f32 %v13771_v14, %v5811_v47  ;;  %v16578_v15 = vld [vmem:[#allocation175_spill] sm:$0xff]  ;;  %v14441_v54 = vrot.slane %v10525_v60, %v16579_v13 }
 0x3fb   : > { %16574 = vst [vmem:[#allocation115_spill] sm:$0xff] %v14424_v35  ;;  %v5815_v63 = vmax.f32 %v4853_v45, 0.0  ;;  %v4855_v39 = vadd.f32 %v4854_v21, %v4502_v6  ;;  %v4892_v20 = vadd.f32 %v4891_v31, %v14422_v46  ;;  %v5244_v16 = vpop.f32.mrf.mxu1  ;;  %5483 = vmatmul.mubr.bf16.gmra.mxu1 %v16576_v56  ;;  %5139 = vmatprep.mubr.bf16.mxu0 %v16577_v57 }
 0x3fc   : > { %v7591_v58 = vmul.f32 %v13774_v32, %v5812_v2  ;;  %5492 = vmatprep.mubr.bf16.mxu1 %v16578_v15  ;;  %v4893_v4 = vpop.f32.mrf.mxu0  ;;  %v14448_v56 = vrot.slane %v10526_v1, %v16579_v13 }
 0x3fd   : > { %v5816_v37 = vmax.f32 %v4855_v39, 0.0  ;;  %v5245_v35 = vadd.f32 %v5244_v16, %v4892_v20  ;;  %v4894_v45 = vadd.f32 %v4893_v4, %v14431_v29  ;;  %v5246_v31 = vpop.f32.mrf.mxu1  ;;  %v7594_v21 = vmul.f32 %v13771_v14, %v5815_v63 }
 0x3fe   : > { %v14444_v6 = vadd.f32 %v7591_v58, %v7590_v22  ;;  %v4895_v47 = vpop.f32.mrf.mxu0 }
 0x3ff   : > { %v7595_v2 = vmul.f32 %v13774_v32, %v5816_v37  ;;  %v5565_v57 = vmax.f32 %v5245_v35, 0.0  ;;  %v5247_v15 = vadd.f32 %v5246_v31, %v4894_v45  ;;  %v4896_v39 = vadd.f32 %v4895_v47, %v14422_v46  ;;  %v5248_v20 = vpop.f32.mrf.mxu1 }
 0x400   : > { %16580 = vst [vmem:[#allocation116_spill] sm:$0xff] %v14444_v6  ;;  %v4897_v60 = vpop.f32.mrf.mxu0 }
 0x401   : > { %v14452_v16 = vadd.f32 %v7595_v2, %v7594_v21  ;;  %v7344_v4 = vmul.f32 %v14441_v54, %v5565_v57  ;;  %v5566_v22 = vmax.f32 %v5247_v15, 0.0  ;;  %v5249_v58 = vadd.f32 %v5248_v20, %v4896_v39  ;;  %v5250_v6 = vpop.f32.mrf.mxu1  ;;  %v14465_v39 = vpop.permute.xlu0 %8918 }
 0x402   : > { %v4898_v14 = vadd.f32 %v4897_v60, %v14431_v29  ;;  %v4901_v13 = vpop.f32.mrf.mxu0  ;;  %5140 = vmatmul.mubr.bf16.gmra.mxu0 %v13778_v42  ;;  %16581 = vst [vmem:[#allocation15_spill] sm:$0xff] %v14465_v39 }
 0x403   : > { %v7599_v32 = vadd.f32 %v13803_v43, %v7344_v4  ;;  %v7345_v35 = vmul.f32 %v14448_v56, %v5566_v22  ;;  %v5569_v1 = vmax.f32 %v5249_v58, 0.0  ;;  %v4902_v63 = vadd.f32 %v4901_v13, %v14422_v46  ;;  %v5254_v37 = vpop.f32.mrf.mxu1  ;;  %5493 = vmatmul.mubr.bf16.gmra.mxu1 %v13781_v40  ;;  %5149 = vmatprep.mubr.bf16.mxu0 %v13784_v7 }
 0x404   : > { %v5251_v45 = vadd.f32 %v5250_v6, %v4898_v14  ;;  %5502 = vmatprep.mubr.bf16.mxu1 %v13788_v49  ;;  %v4903_v31 = vpop.f32.mrf.mxu0 }
 0x405   : > { %v7348_v21 = vmul.f32 %v14441_v54, %v5569_v1  ;;  %v5255_v47 = vadd.f32 %v5254_v37, %v4902_v63  ;;  %v4904_v42 = vadd.f32 %v4903_v31, %v14431_v29  ;;  %v5256_v43 = vpop.f32.mrf.mxu1  ;;  %v7600_v2 = vadd.f32 %v7599_v32, %v7345_v35 }
 0x406   : > { %v5570_v57 = vmax.f32 %v5251_v45, 0.0  ;;  %v4905_v15 = vpop.f32.mrf.mxu0 }
 0x407   : > { %v7604_v20 = vadd.f32 %v13820_v38, %v7348_v21  ;;  %v5573_v40 = vmax.f32 %v5255_v47, 0.0  ;;  %v5257_v60 = vadd.f32 %v5256_v43, %v4904_v42  ;;  %v4906_v7 = vadd.f32 %v4905_v15, %v14422_v46  ;;  %v5258_v6 = vpop.f32.mrf.mxu1  ;;  %7601 = vadd.xlane.f32.xlu0 %v7600_v2  ;;  %v14477_v21 = vpop.permute.xlu1 %8920 }
 0x408   : > { %v7349_v49 = vmul.f32 %v14448_v56, %v5570_v57  ;;  %v4907_v4 = vpop.f32.mrf.mxu0  ;;  %16582 = vst [vmem:[#allocation18_spill] sm:$0xff] %v14477_v21 }
 0x409   : > { %v7352_v22 = vmul.f32 %v14441_v54, %v5573_v40  ;;  %v5574_v58 = vmax.f32 %v5257_v60, 0.0  ;;  %v5259_v14 = vadd.f32 %v5258_v6, %v4906_v7  ;;  %v4908_v13 = vadd.f32 %v4907_v4, %v14431_v29  ;;  %v5260_v32 = vpop.f32.mrf.mxu1 }
 0x40a   : > { %v4911_v35 = vpop.f32.mrf.mxu0  ;;  %5150 = vmatmul.mubr.bf16.gmra.mxu0 %v13812_v11  ;;  %v7605_v38 = vadd.f32 %v7604_v20, %v7349_v49 }
 0x40b   : > { %v7609_v1 = vadd.f32 %v13842_v9, %v7352_v22  ;;  %v7353_v63 = vmul.f32 %v14448_v56, %v5574_v58  ;;  %v5577_v37 = vmax.f32 %v5259_v14, 0.0  ;;  %v5261_v45 = vadd.f32 %v5260_v32, %v4908_v13  ;;  %v5264_v31 = vpop.f32.mrf.mxu1  ;;  %5503 = vmatmul.mubr.bf16.gmra.mxu1 %v13815_v44  ;;  %5159 = vmatprep.mubr.bf16.mxu0 %v13818_v19  ;;  %v14483_v44 = vpop.permute.xlu0 %8922 }
 0x40c   : > { %v4912_v47 = vadd.f32 %v4911_v35, %v14422_v46  ;;  %5512 = vmatprep.mubr.bf16.mxu1 %v13824_v36  ;;  %7606 = vadd.xlane.f32.xlu1 %v7605_v38  ;;  %v4913_v11 = vpop.f32.mrf.mxu0  ;;  %16583 = vst [vmem:[#allocation119_spill] sm:$0xff] %v14483_v44 }
 0x40d   : > { %v7356_v42 = vmul.f32 %v14441_v54, %v5577_v37  ;;  %v5578_v9 = vmax.f32 %v5261_v45, 0.0  ;;  %v4914_v43 = vadd.f32 %v4913_v11, %v14431_v29  ;;  %v5266_v2 = vpop.f32.mrf.mxu1  ;;  %v7610_v57 = vadd.f32 %v7609_v1, %v7353_v63  ;;  %v14495_v45 = vpop.permute.xlu1 %8924 }
 0x40e   : > { %v5265_v15 = vadd.f32 %v5264_v31, %v4912_v47  ;;  %v4915_v20 = vpop.f32.mrf.mxu0  ;;  %16584 = vst [vmem:[#allocation17_spill] sm:$0xff] %v14495_v45 }
 0x40f   : > { %v7614_v19 = vadd.f32 %v13856_v5, %v7356_v42  ;;  %v7357_v40 = vmul.f32 %v14448_v56, %v5578_v9  ;;  %v5267_v60 = vadd.f32 %v5266_v2, %v4914_v43  ;;  %v4916_v36 = vadd.f32 %v4915_v20, %v14422_v46  ;;  %v5268_v7 = vpop.f32.mrf.mxu1  ;;  %7611 = vadd.xlane.f32.xlu0 %v7610_v57 }
 0x410   : > { %v5581_v6 = vmax.f32 %v5265_v15, 0.0  ;;  %v4917_v49 = vpop.f32.mrf.mxu0 }
 0x411   : > { %v5582_v4 = vmax.f32 %v5267_v60, 0.0  ;;  %v5269_v22 = vadd.f32 %v5268_v7, %v4916_v36  ;;  %v4918_v58 = vadd.f32 %v4917_v49, %v14431_v29  ;;  %v5270_v14 = vpop.f32.mrf.mxu1  ;;  %v7615_v13 = vadd.f32 %v7614_v19, %v7357_v40  ;;  %v14503_v19 = vpop.permute.xlu0 %8926 }
 0x412   : > { %v7360_v32 = vmul.f32 %v14441_v54, %v5581_v6  ;;  %v4921_v35 = vpop.f32.mrf.mxu0  ;;  %5160 = vmatmul.mubr.bf16.gmra.mxu0 %v13848_v8  ;;  %16585 = vst [vmem:[#allocation20_spill] sm:$0xff] %v14503_v19 }
 0x413   : > { %v7361_v5 = vmul.f32 %v14448_v56, %v5582_v4  ;;  %v5585_v38 = vmax.f32 %v5269_v22, 0.0  ;;  %v5271_v1 = vadd.f32 %v5270_v14, %v4918_v58  ;;  %v4922_v63 = vadd.f32 %v4921_v35, %v14422_v46  ;;  %v5274_v37 = vpop.f32.mrf.mxu1  ;;  %5513 = vmatmul.mubr.bf16.gmra.mxu1 %v13851_v53  ;;  %5169 = vmatprep.mubr.bf16.mxu0 %v13854_v27 }
 0x414   : > { %v7619_v31 = vadd.f32 %v13875_v41, %v7360_v32  ;;  %5522 = vmatprep.mubr.bf16.mxu1 %v13859_v52  ;;  %7616 = vadd.xlane.f32.xlu1 %v7615_v13  ;;  %v4923_v47 = vpop.f32.mrf.mxu0 }
 0x415   : > { %v7364_v8 = vmul.f32 %v14441_v54, %v5585_v38  ;;  %v5586_v11 = vmax.f32 %v5271_v1, 0.0  ;;  %v5275_v42 = vadd.f32 %v5274_v37, %v4922_v63  ;;  %v4924_v9 = vadd.f32 %v4923_v47, %v14431_v29  ;;  %v5276_v43 = vpop.f32.mrf.mxu1  ;;  %v14515_v38 = vpop.permute.xlu1 %8928 }
 0x416   : > { %v4925_v2 = vpop.f32.mrf.mxu0  ;;  %v7620_v57 = vadd.f32 %v7619_v31, %v7361_v5  ;;  %16586 = vst [vmem:[#allocation19_spill] sm:$0xff] %v14515_v38 }
 0x417   : > { %v7624_v53 = vadd.f32 %v13896_v48, %v7364_v8  ;;  %v7365_v27 = vmul.f32 %v14448_v56, %v5586_v11  ;;  %v5589_v15 = vmax.f32 %v5275_v42, 0.0  ;;  %v5277_v20 = vadd.f32 %v5276_v43, %v4924_v9  ;;  %v5278_v41 = vpop.f32.mrf.mxu1  ;;  %v14519_v8 = vpop.permute.xlu0 %8930 }
 0x418   : > { %v4926_v52 = vadd.f32 %v4925_v2, %v14422_v46  ;;  %7621 = vadd.xlane.f32.xlu0 %v7620_v57  ;;  %v4927_v40 = vpop.f32.mrf.mxu0  ;;  %16587 = vst [vmem:[#allocation22_spill] sm:$0xff] %v14519_v8 }
 0x419   : > { %v7368_v60 = vmul.f32 %v14441_v54, %v5589_v15  ;;  %v5590_v36 = vmax.f32 %v5277_v20, 0.0  ;;  %v4928_v7 = vadd.f32 %v4927_v40, %v14431_v29  ;;  %v5280_v6 = vpop.f32.mrf.mxu1  ;;  %v7625_v49 = vadd.f32 %v7624_v53, %v7365_v27 }
 0x41a   : > { %v5279_v4 = vadd.f32 %v5278_v41, %v4926_v52  ;;  %v4931_v48 = vpop.f32.mrf.mxu0  ;;  %5170 = vmatmul.mubr.bf16.gmra.mxu0 %v13882_v0 }
 0x41b   : > { %v7629_v22 = vadd.f32 %v13911_v17, %v7368_v60  ;;  %v7369_v58 = vmul.f32 %v14448_v56, %v5590_v36  ;;  %v5281_v14 = vadd.f32 %v5280_v6, %v4928_v7  ;;  %v4932_v13 = vadd.f32 %v4931_v48, %v14422_v46  ;;  %v5284_v32 = vpop.f32.mrf.mxu1  ;;  %5523 = vmatmul.mubr.bf16.gmra.mxu1 %v13885_v59 }
 0x41c   : > { %v5593_v35 = vmax.f32 %v5279_v4, 0.0  ;;  %5179 = vmatprep.mubr.bf16.mxu0 %v13890_v18  ;;  %5532 = vmatprep.mubr.bf16.mxu1 %v13894_v62  ;;  %v4933_v5 = vpop.f32.mrf.mxu0 }
 0x41d   : > { %v5594_v1 = vmax.f32 %v5281_v14, 0.0  ;;  %v5285_v0 = vadd.f32 %v5284_v32, %v4932_v13  ;;  %7626 = vadd.xlane.f32.xlu1 %v7625_v49  ;;  %v4934_v17 = vadd.f32 %v4933_v5, %v14431_v29  ;;  %v5286_v63 = vpop.f32.mrf.mxu1  ;;  %v7630_v37 = vadd.f32 %v7629_v22, %v7369_v58 }
 0x41e   : > { %v7372_v31 = vmul.f32 %v14441_v54, %v5593_v35  ;;  %v4935_v47 = vpop.f32.mrf.mxu0 }
 0x41f   : > { %v7373_v59 = vmul.f32 %v14448_v56, %v5594_v1  ;;  %v5597_v18 = vmax.f32 %v5285_v0, 0.0  ;;  %v5287_v11 = vadd.f32 %v5286_v63, %v4934_v17  ;;  %v4936_v62 = vadd.f32 %v4935_v47, %v14422_v46  ;;  %v5288_v42 = vpop.f32.mrf.mxu1  ;;  %7631 = vadd.xlane.f32.xlu0 %v7630_v37 }
 0x420   : > { %v7634_v9 = vadd.f32 %v13928_v51, %v7372_v31  ;;  %v4937_v43 = vpop.f32.mrf.mxu0  ;;  %v14531_v51 = vpop.permute.xlu1 %8932 }
 0x421   : > { %v7376_v2 = vmul.f32 %v14441_v54, %v5597_v18  ;;  %v5598_v57 = vmax.f32 %v5287_v11, 0.0  ;;  %v5289_v53 = vadd.f32 %v5288_v42, %v4936_v62  ;;  %v4938_v27 = vadd.f32 %v4937_v43, %v14431_v29  ;;  %v5290_v15 = vpop.f32.mrf.mxu1  ;;  %16588 = vst [vmem:[#allocation21_spill] sm:$0xff] %v14531_v51 }
 0x422   : > { %v4941_v20 = vpop.f32.mrf.mxu0  ;;  %5180 = vmatmul.mubr.bf16.gmra.mxu0 %v13920_v10  ;;  %v7635_v41 = vadd.f32 %v7634_v9, %v7373_v59 }
 0x423   : > { %v7639_v52 = vadd.f32 %v13950_v34, %v7376_v2  ;;  %v7377_v40 = vmul.f32 %v14448_v56, %v5598_v57  ;;  %v5601_v60 = vmax.f32 %v5289_v53, 0.0  ;;  %v5291_v36 = vadd.f32 %v5290_v15, %v4938_v27  ;;  %v5294_v7 = vpop.f32.mrf.mxu1  ;;  %5533 = vmatmul.mubr.bf16.gmra.mxu1 %v13923_v12  ;;  %5189 = vmatprep.mubr.bf16.mxu0 %v13926_v33  ;;  %v14537_v12 = vpop.permute.xlu0 %8934 }
 0x424   : > { %v4942_v6 = vadd.f32 %v4941_v20, %v14422_v46  ;;  %5542 = vmatprep.mubr.bf16.mxu1 %v13932_v55  ;;  %7636 = vadd.xlane.f32.xlu1 %v7635_v41  ;;  %v4943_v10 = vpop.f32.mrf.mxu0  ;;  %16589 = vst [vmem:[#allocation141_spill] sm:$0xff] %v14537_v12  ;;  %v14549_v9 = vpop.permute.xlu1 %8936 }
 0x425   : > { %v7380_v49 = vmul.f32 %v14441_v54, %v5601_v60  ;;  %v5602_v34 = vmax.f32 %v5291_v36, 0.0  ;;  %v4944_v4 = vadd.f32 %v4943_v10, %v14431_v29  ;;  %v5296_v48 = vpop.f32.mrf.mxu1  ;;  %v7640_v22 = vadd.f32 %v7639_v52, %v7377_v40  ;;  %16590 = vst [vmem:[#allocation24_spill] sm:$0xff] %v14549_v9 }
 0x426   : > { %v5295_v58 = vadd.f32 %v5294_v7, %v4942_v6  ;;  %v4945_v14 = vpop.f32.mrf.mxu0 }
 0x427   : > { %v7644_v33 = vadd.f32 %v13964_v28, %v7380_v49  ;;  %v7381_v13 = vmul.f32 %v14448_v56, %v5602_v34  ;;  %v5297_v32 = vadd.f32 %v5296_v48, %v4944_v4  ;;  %v4946_v55 = vadd.f32 %v4945_v14, %v14422_v46  ;;  %v5298_v35 = vpop.f32.mrf.mxu1  ;;  %7641 = vadd.xlane.f32.xlu0 %v7640_v22  ;;  %v14557_v60 = vpop.permute.xlu0 %8938 }
 0x428   : > { %v5605_v5 = vmax.f32 %v5295_v58, 0.0  ;;  %v4947_v1 = vpop.f32.mrf.mxu0  ;;  %16591 = vst [vmem:[#allocation142_spill] sm:$0xff] %v14557_v60  ;;  %v16695_v60 = vld [vmem:[#allocation16_spill] sm:$0xff] }
 0x429   : > { %v5606_v0 = vmax.f32 %v5297_v32, 0.0  ;;  %v5299_v17 = vadd.f32 %v5298_v35, %v4946_v55  ;;  %v4948_v63 = vadd.f32 %v4947_v1, %v14431_v29  ;;  %v5300_v37 = vpop.f32.mrf.mxu1  ;;  %v7645_v31 = vadd.f32 %v7644_v33, %v7381_v13  ;;  %v16592_v13 = vld [vmem:[#allocation64_spill] sm:$0xff]  ;;  %v14567_v32 = vpop.permute.xlu1 %8940 }
 0x42a   : > { %v7384_v47 = vmul.f32 %v14441_v54, %v5605_v5  ;;  %v4951_v59 = vpop.f32.mrf.mxu0  ;;  %5190 = vmatmul.mubr.bf16.gmra.mxu0 %v13956_v61  ;;  %16593 = vst [vmem:[#allocation23_spill] sm:$0xff] %v14567_v32  ;;  %v16594_v5 = vld [vmem:[#allocation2_spill] sm:$0xff] }
 0x42b   : > { %v7385_v28 = vmul.f32 %v14448_v56, %v5606_v0  ;;  %v5609_v18 = vmax.f32 %v5299_v17, 0.0  ;;  %v5301_v11 = vadd.f32 %v5300_v37, %v4948_v63  ;;  %v4952_v62 = vadd.f32 %v4951_v59, %v14422_v46  ;;  %v5304_v42 = vpop.f32.mrf.mxu1  ;;  %5543 = vmatmul.mubr.bf16.gmra.mxu1 %v13959_v30  ;;  %5199 = vmatprep.mubr.bf16.mxu0 %v13962_v24 }
 0x42c   : > { %v7649_v43 = vadd.f32 %v13981_v26, %v7384_v47  ;;  %5552 = vmatprep.mubr.bf16.mxu1 %v13967_v50  ;;  %7646 = vadd.xlane.f32.xlu1 %v7645_v31  ;;  %v4953_v2 = vpop.f32.mrf.mxu0  ;;  %v14572_v31 = vpop.permute.xlu0 %8942 }
 0x42d   : > { %v7388_v61 = vmul.f32 %v14441_v54, %v5609_v18  ;;  %v5610_v57 = vmax.f32 %v5301_v11, 0.0  ;;  %v5305_v53 = vadd.f32 %v5304_v42, %v4952_v62  ;;  %v4954_v27 = vadd.f32 %v4953_v2, %v14431_v29  ;;  %v5306_v15 = vpop.f32.mrf.mxu1  ;;  %16595 = vst [vmem:[#allocation143_spill] sm:$0xff] %v14572_v31  ;;  %v16596_v62 = vld [vmem:[#allocation70_spill] sm:$0xff] }
 0x42e   : > { %v4955_v20 = vpop.f32.mrf.mxu0  ;;  %v7650_v41 = vadd.f32 %v7649_v43, %v7385_v28 }
 0x42f   : > { %v7654_v30 = vadd.f32 %v13994_v25, %v7388_v61  ;;  %v7389_v24 = vmul.f32 %v14448_v56, %v5610_v57  ;;  %v5613_v52 = vmax.f32 %v5305_v53, 0.0  ;;  %v5307_v40 = vadd.f32 %v5306_v15, %v4954_v27  ;;  %v5308_v26 = vpop.f32.mrf.mxu1 }
 0x430   : > { %v4956_v50 = vadd.f32 %v4955_v20, %v14422_v46  ;;  %7651 = vadd.xlane.f32.xlu0 %v7650_v41  ;;  %v4957_v36 = vpop.f32.mrf.mxu0  ;;  %v16597_v20 = vld [vmem:[#allocation4_spill] sm:$0xff] }
 0x431   : > { %v7392_v7 = vmul.f32 %v14441_v54, %v5613_v52  ;;  %v5614_v6 = vmax.f32 %v5307_v40, 0.0  ;;  %v4958_v10 = vadd.f32 %v4957_v36, %v14431_v29  ;;  %v5310_v49 = vpop.f32.mrf.mxu1  ;;  %v7655_v34 = vadd.f32 %v7654_v30, %v7389_v24  ;;  %v16598_v30 = vld [vmem:[#allocation69_spill] sm:$0xff] }
 0x432   : > { %v5309_v4 = vadd.f32 %v5308_v26, %v4956_v50  ;;  %v4961_v25 = vpop.f32.mrf.mxu0  ;;  %5200 = vmatmul.mubr.bf16.gmra.mxu0 %v13986_v3  ;;  %v16599_v36 = vld [vmem:[#allocation5_spill] sm:$0xff] }
 0x433   : > { %v7659_v48 = vadd.f32 %v14003_v23, %v7392_v7  ;;  %v7393_v22 = vmul.f32 %v14448_v56, %v5614_v6  ;;  %v5311_v58 = vadd.f32 %v5310_v49, %v4958_v10  ;;  %v4962_v14 = vadd.f32 %v4961_v25, %v14422_v46  ;;  %v5314_v33 = vpop.f32.mrf.mxu1  ;;  %5553 = vmatmul.mubr.bf16.gmra.mxu1 %v16592_v13  ;;  %v14583_v7 = vpop.permute.xlu1 %8944 }
 0x434   : > { %v5617_v55 = vmax.f32 %v5309_v4, 0.0  ;;  %7656 = vadd.xlane.f32.xlu1 %v7655_v34  ;;  %v4963_v35 = vpop.f32.mrf.mxu0  ;;  %9736 = vmatprep.mubr.bf16.mxu0 %v16594_v5  ;;  %16600 = vst [vmem:[#allocation26_spill] sm:$0xff] %v14583_v7 }
 0x435   : > { %v5618_v1 = vmax.f32 %v5311_v58, 0.0  ;;  %v5315_v0 = vadd.f32 %v5314_v33, %v4962_v14  ;;  %v4964_v3 = vadd.f32 %v4963_v35, %v14431_v29  ;;  %v5316_v23 = vpop.f32.mrf.mxu1  ;;  %v7660_v17 = vadd.f32 %v7659_v48, %v7393_v22  ;;  %v14588_v14 = vpop.permute.xlu0 %8946  ;;  %v16602_v33 = vld [vmem:[#allocation76_spill] sm:$0xff] }
 0x436   : > { %v7396_v63 = vmul.f32 %v14441_v54, %v5617_v55  ;;  %v4965_v37 = vpop.f32.mrf.mxu0  ;;  %16601 = vst [vmem:[#allocation144_spill] sm:$0xff] %v14588_v14 }
 0x437   : > { %v7397_v47 = vmul.f32 %v14448_v56, %v5618_v1  ;;  %v5621_v59 = vmax.f32 %v5315_v0, 0.0  ;;  %v5317_v28 = vadd.f32 %v5316_v23, %v4964_v3  ;;  %v4966_v18 = vadd.f32 %v4965_v37, %v14422_v46  ;;  %v5318_v11 = vpop.f32.mrf.mxu1  ;;  %7661 = vadd.xlane.f32.xlu0 %v7660_v17 }
 0x438   : > { %v7664_v42 = vadd.f32 %v16596_v62, %v7396_v63  ;;  %v4967_v43 = vpop.f32.mrf.mxu0 }
 0x439   : > { %v7400_v2 = vmul.f32 %v14441_v54, %v5621_v59  ;;  %v5622_v61 = vmax.f32 %v5317_v28, 0.0  ;;  %v5319_v57 = vadd.f32 %v5318_v11, %v4966_v18  ;;  %v4968_v53 = vadd.f32 %v4967_v43, %v14431_v29  ;;  %v5320_v27 = vpop.f32.mrf.mxu1  ;;  %v16603_v18 = vld [vmem:[#allocation6_spill] sm:$0xff]  ;;  %v14596_v11 = vpop.permute.xlu1 %8948 }
 0x43a   : > { %v4971_v15 = vpop.f32.mrf.mxu0  ;;  %9737 = vmatmul.mubr.bf16.vlgmr.msra.gmra.mxu0 %v16597_v20  ;;  %v7665_v41 = vadd.f32 %v7664_v42, %v7397_v47  ;;  %16604 = vst [vmem:[#allocation25_spill] sm:$0xff] %v14596_v11 }
 0x43b   : > { %v7669_v24 = vadd.f32 %v16598_v30, %v7400_v2  ;;  %v7401_v52 = vmul.f32 %v14448_v56, %v5622_v61  ;;  %v5625_v40 = vmax.f32 %v5319_v57, 0.0  ;;  %v5321_v26 = vadd.f32 %v5320_v27, %v4968_v53  ;;  %v5324_v50 = vpop.f32.mrf.mxu1  ;;  %9740 = vmatprep.mubr.bf16.mxu0 %v16599_v36  ;;  %v16605_v57 = vld [vmem:[#allocation7_spill] sm:$0xff]  ;;  %v16606_v53 = vld [vmem:[#allocation74_spill] sm:$0xff] }
 0x43c   : > { %v4972_v6 = vadd.f32 %v4971_v15, %v14422_v46  ;;  %7666 = vadd.xlane.f32.xlu1 %v7665_v41  ;;  %v4973_v10 = vpop.f32.mrf.mxu0 }
 0x43d   : > { %v7404_v49 = vmul.f32 %v14441_v54, %v5625_v40  ;;  %v5626_v34 = vmax.f32 %v5321_v26, 0.0  ;;  %v4974_v4 = vadd.f32 %v4973_v10, %v14431_v29  ;;  %v5326_v25 = vpop.f32.mrf.mxu1  ;;  %v7670_v48 = vadd.f32 %v7669_v24, %v7401_v52 }
 0x43e   : > { %v5325_v22 = vadd.f32 %v5324_v50, %v4972_v6  ;;  %v4975_v58 = vpop.f32.mrf.mxu0  ;;  %v16607_v50 = vld [vmem:[#allocation80_spill] sm:$0xff] }
 0x43f   : > { %v7674_v13 = vadd.f32 %v16602_v33, %v7404_v49  ;;  %v7405_v55 = vmul.f32 %v14448_v56, %v5626_v34  ;;  %v5327_v35 = vadd.f32 %v5326_v25, %v4974_v4  ;;  %v4976_v5 = vadd.f32 %v4975_v58, %v14422_v46  ;;  %v5328_v1 = vpop.f32.mrf.mxu1  ;;  %7671 = vadd.xlane.f32.xlu0 %v7670_v48  ;;  %v14606_v4 = vpop.permute.xlu0 %8950 }
 0x440   : > { %v5629_v0 = vmax.f32 %v5325_v22, 0.0  ;;  %v4977_v3 = vpop.f32.mrf.mxu0  ;;  %16608 = vst [vmem:[#allocation145_spill] sm:$0xff] %v14606_v4 }
 0x441   : > { %v5630_v23 = vmax.f32 %v5327_v35, 0.0  ;;  %v5329_v17 = vadd.f32 %v5328_v1, %v4976_v5  ;;  %v4978_v63 = vadd.f32 %v4977_v3, %v14431_v29  ;;  %v5330_v37 = vpop.f32.mrf.mxu1  ;;  %v7675_v47 = vadd.f32 %v7674_v13, %v7405_v55  ;;  %v16609_v1 = vld [vmem:[#allocation8_spill] sm:$0xff]  ;;  %v16611_v3 = vld [vmem:[#allocation79_spill] sm:$0xff] }
 0x442   : > { %v7408_v59 = vmul.f32 %v14441_v54, %v5629_v0  ;;  %v4981_v28 = vpop.f32.mrf.mxu0  ;;  %9741 = vmatmul.mubr.bf16.gmra.mxu0 %v16603_v18  ;;  %v14612_v0 = vpop.permute.xlu1 %8952  ;;  %v16612_v18 = vld [vmem:[#allocation9_spill] sm:$0xff] }
 0x443   : > { %v7409_v62 = vmul.f32 %v14448_v56, %v5630_v23  ;;  %v5633_v42 = vmax.f32 %v5329_v17, 0.0  ;;  %v5331_v43 = vadd.f32 %v5330_v37, %v4978_v63  ;;  %v4982_v2 = vadd.f32 %v4981_v28, %v14422_v46  ;;  %v5334_v61 = vpop.f32.mrf.mxu1  ;;  %7676 = vadd.xlane.f32.xlu1 %v7675_v47  ;;  %9744 = vmatprep.mubr.bf16.mxu0 %v16605_v57 }
 0x444   : > { %v7679_v27 = vadd.f32 %v16606_v53, %v7408_v59  ;;  %v4983_v15 = vpop.f32.mrf.mxu0  ;;  %16610 = vst [vmem:[#allocation28_spill] sm:$0xff] %v14612_v0  ;;  %v16691_v0 = vld [vmem:[#allocation109_spill] sm:$0xff] }
 0x445   : > { %v7412_v20 = vmul.f32 %v14441_v54, %v5633_v42  ;;  %v5634_v41 = vmax.f32 %v5331_v43, 0.0  ;;  %v5335_v30 = vadd.f32 %v5334_v61, %v4982_v2  ;;  %v4984_v24 = vadd.f32 %v4983_v15, %v14431_v29  ;;  %v5336_v52 = vpop.f32.mrf.mxu1 }
 0x446   : > { %v4985_v40 = vpop.f32.mrf.mxu0  ;;  %v7680_v26 = vadd.f32 %v7679_v27, %v7409_v62  ;;  %v14620_v27 = vpop.permute.xlu0 %8954 }
 0x447   : > { %v7684_v36 = vadd.f32 %v16607_v50, %v7412_v20  ;;  %v7413_v6 = vmul.f32 %v14448_v56, %v5634_v41  ;;  %v5637_v10 = vmax.f32 %v5335_v30, 0.0  ;;  %v5337_v49 = vadd.f32 %v5336_v52, %v4984_v24  ;;  %v5338_v34 = vpop.f32.mrf.mxu1  ;;  %16613 = vst [vmem:[#allocation146_spill] sm:$0xff] %v14620_v27  ;;  %v16614_v52 = vld [vmem:[#allocation85_spill] sm:$0xff] }
 0x448   : > { %v4986_v25 = vadd.f32 %v4985_v40, %v14422_v46  ;;  %7681 = vadd.xlane.f32.xlu0 %v7680_v26  ;;  %v4987_v48 = vpop.f32.mrf.mxu0 }
 0x449   : > { %v7416_v22 = vmul.f32 %v14441_v54, %v5637_v10  ;;  %v5638_v58 = vmax.f32 %v5337_v49, 0.0  ;;  %v4988_v33 = vadd.f32 %v4987_v48, %v14431_v29  ;;  %v5340_v13 = vpop.f32.mrf.mxu1  ;;  %v7685_v55 = vadd.f32 %v7684_v36, %v7413_v6 }
 0x44a   : > { %v5339_v35 = vadd.f32 %v5338_v34, %v4986_v25  ;;  %v4991_v5 = vpop.f32.mrf.mxu0  ;;  %9745 = vmatmul.mubr.bf16.gmra.mxu0 %v16609_v1  ;;  %v16615_v25 = vld [vmem:[#allocation10_spill] sm:$0xff]  ;;  %v14631_v1 = vpop.permute.xlu1 %8956 }
 0x44b   : > { %v7689_v23 = vadd.f32 %v16611_v3, %v7416_v22  ;;  %v7417_v17 = vmul.f32 %v14448_v56, %v5638_v58  ;;  %v5341_v63 = vadd.f32 %v5340_v13, %v4988_v33  ;;  %v4992_v37 = vadd.f32 %v4991_v5, %v14422_v46  ;;  %v5344_v47 = vpop.f32.mrf.mxu1  ;;  %7686 = vadd.xlane.f32.xlu1 %v7685_v55  ;;  %v16616_v22 = vld [vmem:[#allocation84_spill] sm:$0xff]  ;;  %v16617_v5 = vld [vmem:[#allocation11_spill] sm:$0xff] }
 0x44c   : > { %v5641_v59 = vmax.f32 %v5339_v35, 0.0  ;;  %v4993_v28 = vpop.f32.mrf.mxu0  ;;  %9748 = vmatprep.mubr.bf16.mxu0 %v16612_v18  ;;  %16618 = vst [vmem:[#allocation27_spill] sm:$0xff] %v14631_v1  ;;  %v16685_v1 = vld [vmem:[#allocation12_spill] sm:$0xff] }
 0x44d   : > { %v5642_v62 = vmax.f32 %v5341_v63, 0.0  ;;  %v5345_v42 = vadd.f32 %v5344_v47, %v4992_v37  ;;  %v4994_v43 = vadd.f32 %v4993_v28, %v14431_v29  ;;  %v5346_v2 = vpop.f32.mrf.mxu1  ;;  %v7690_v61 = vadd.f32 %v7689_v23, %v7417_v17 }
 0x44e   : > { %v7420_v57 = vmul.f32 %v14441_v54, %v5641_v59  ;;  %v4995_v53 = vpop.f32.mrf.mxu0 }
 0x44f   : > { %v7421_v15 = vmul.f32 %v14448_v56, %v5642_v62  ;;  %v5645_v20 = vmax.f32 %v5345_v42, 0.0  ;;  %v5347_v41 = vadd.f32 %v5346_v2, %v4994_v43  ;;  %v4996_v30 = vadd.f32 %v4995_v53, %v14422_v46  ;;  %v5348_v24 = vpop.f32.mrf.mxu1  ;;  %7691 = vadd.xlane.f32.xlu0 %v7690_v61  ;;  %v14636_v62 = vpop.permute.xlu0 %8958  ;;  %v16620_v42 = vld [vmem:[#allocation92_spill] sm:$0xff] }
 0x450   : > { %v7694_v40 = vadd.f32 %v16614_v52, %v7420_v57  ;;  %v4997_v26 = vpop.f32.mrf.mxu0  ;;  %16619 = vst [vmem:[#allocation147_spill] sm:$0xff] %v14636_v62  ;;  %v16688_v62 = vld [vmem:[#allocation140_spill] sm:$0xff] }
 0x451   : > { %v7424_v50 = vmul.f32 %v14441_v54, %v5645_v20  ;;  %v5646_v36 = vmax.f32 %v5347_v41, 0.0  ;;  %v5349_v6 = vadd.f32 %v5348_v24, %v4996_v30  ;;  %v4998_v10 = vadd.f32 %v4997_v26, %v14431_v29  ;;  %v5350_v49 = vpop.f32.mrf.mxu1 }
 0x452   : > { %v5001_v34 = vpop.f32.mrf.mxu0  ;;  %9749 = vmatmul.mubr.bf16.gmra.mxu0 %v16615_v25  ;;  %v7695_v48 = vadd.f32 %v7694_v40, %v7421_v15 }
 0x453   : > { %v7699_v58 = vadd.f32 %v16616_v22, %v7424_v50  ;;  %v7425_v33 = vmul.f32 %v14448_v56, %v5646_v36  ;;  %v5649_v13 = vmax.f32 %v5349_v6, 0.0  ;;  %v5351_v55 = vadd.f32 %v5350_v49, %v4998_v10  ;;  %v5354_v35 = vpop.f32.mrf.mxu1  ;;  %9752 = vmatprep.mubr.bf16.mxu0 %v16617_v5  ;;  %v16621_v36 = vld [vmem:[#allocation35_spill] sm:$0xff]  ;;  %v14644_v6 = vpop.permute.xlu1 %8960  ;;  %v16623_v22 = vld [vmem:[#allocation38_spill] sm:$0xff] }
 0x454   : > { %v5002_v3 = vadd.f32 %v5001_v34, %v14422_v46  ;;  %7696 = vadd.xlane.f32.xlu1 %v7695_v48  ;;  %v5003_v23 = vpop.f32.mrf.mxu0  ;;  %16622 = vst [vmem:[#allocation30_spill] sm:$0xff] %v14644_v6 }
 0x455   : > { %v7428_v17 = vmul.f32 %v14441_v54, %v5649_v13  ;;  %v5650_v63 = vmax.f32 %v5351_v55, 0.0  ;;  %v5004_v37 = vadd.f32 %v5003_v23, %v14431_v29  ;;  %v5356_v47 = vpop.f32.mrf.mxu1  ;;  %v7700_v59 = vadd.f32 %v7699_v58, %v7425_v33  ;;  %v16624_v58 = vld [vmem:[#allocation170_spill] sm:$0xff] }
 0x456   : > { %v5355_v28 = vadd.f32 %v5354_v35, %v5002_v3  ;;  %v5005_v18 = vpop.f32.mrf.mxu0 }
 0x457   : > { %v7704_v43 = vadd.f32 %v16620_v42, %v7428_v17  ;;  %v7429_v2 = vmul.f32 %v14448_v56, %v5650_v63  ;;  %v5357_v61 = vadd.f32 %v5356_v47, %v5004_v37  ;;  %v5006_v57 = vadd.f32 %v5005_v18, %v14422_v46  ;;  %v5358_v53 = vpop.f32.mrf.mxu1  ;;  %7701 = vadd.xlane.f32.xlu0 %v7700_v59  ;;  %v16625_v37 = vld [vmem:[#allocation174_spill] sm:$0xff] }
 0x458   : > { %v5653_v15 = vmax.f32 %v5355_v28, 0.0  ;;  %v5007_v20 = vpop.f32.mrf.mxu0 }
 0x459   : > { %v5654_v41 = vmax.f32 %v5357_v61, 0.0  ;;  %v5359_v30 = vadd.f32 %v5358_v53, %v5006_v57  ;;  %v5008_v24 = vadd.f32 %v5007_v20, %v14431_v29  ;;  %v5360_v52 = vpop.f32.mrf.mxu1  ;;  %v7705_v40 = vadd.f32 %v7704_v43, %v7429_v2  ;;  %v14654_v43 = vpop.permute.xlu0 %8962 }
 0x45a   : > { %v7432_v26 = vmul.f32 %v14441_v54, %v5653_v15  ;;  %v5011_v50 = vpop.f32.mrf.mxu0  ;;  %9753 = vmatmul.mubr.bf16.gmra.mxu0 %v16621_v36  ;;  %16626 = vst [vmem:[#allocation148_spill] sm:$0xff] %v14654_v43  ;;  %v16682_v43 = vld [vmem:[#allocation136_spill] sm:$0xff] }
 0x45b   : > { %v7433_v10 = vmul.f32 %v14448_v56, %v5654_v41  ;;  %v5657_v49 = vmax.f32 %v5359_v30, 0.0  ;;  %v5361_v34 = vadd.f32 %v5360_v52, %v5008_v24  ;;  %v5012_v25 = vadd.f32 %v5011_v50, %v14422_v46  ;;  %v5364_v48 = vpop.f32.mrf.mxu1  ;;  %7706 = vadd.xlane.f32.xlu1 %v7705_v40  ;;  %9756 = vmatprep.mubr.bf16.mxu0 %v16623_v22  ;;  %v16627_v52 = vld [vmem:[#allocation42_spill] sm:$0xff]  ;;  %v14660_v40 = vpop.permute.xlu1 %8964  ;;  %v16630_v22 = vld [vmem:[#allocation45_spill] sm:$0xff] }
 0x45c   : > { %v7709_v33 = vadd.f32 %v16624_v58, %v7432_v26  ;;  %v5013_v13 = vpop.f32.mrf.mxu0  ;;  %16628 = vst [vmem:[#allocation117_spill] sm:$0xff] %v14660_v40  ;;  %v16629_v26 = vld [vmem:[#allocation89_spill] sm:$0xff] }
 0x45d   : > { %v7436_v55 = vmul.f32 %v14441_v54, %v5657_v49  ;;  %v5658_v35 = vmax.f32 %v5361_v34, 0.0  ;;  %v5365_v5 = vadd.f32 %v5364_v48, %v5012_v25  ;;  %v5014_v3 = vadd.f32 %v5013_v13, %v14431_v29  ;;  %v5366_v23 = vpop.f32.mrf.mxu1 }
 0x45e   : > { %v5015_v17 = vpop.f32.mrf.mxu0  ;;  %v7710_v63 = vadd.f32 %v7709_v33, %v7433_v10 }
 0x45f   : > { %v7714_v47 = vadd.f32 %v16625_v37, %v7436_v55  ;;  %v7437_v59 = vmul.f32 %v14448_v56, %v5658_v35  ;;  %v5661_v28 = vmax.f32 %v5365_v5, 0.0  ;;  %v5367_v18 = vadd.f32 %v5366_v23, %v5014_v3  ;;  %v5368_v42 = vpop.f32.mrf.mxu1  ;;  %v14668_v23 = vpop.permute.xlu0 %8966 }
 0x460   : > { %v5016_v2 = vadd.f32 %v5015_v17, %v14422_v46  ;;  %7711 = vadd.xlane.f32.xlu0 %v7710_v63  ;;  %v5017_v61 = vpop.f32.mrf.mxu0  ;;  %16631 = vst [vmem:[#allocation105_spill] sm:$0xff] %v14668_v23 }
 0x461   : > { %v7440_v57 = vmul.f32 %v14441_v54, %v5661_v28  ;;  %v5662_v53 = vmax.f32 %v5367_v18, 0.0  ;;  %v5018_v15 = vadd.f32 %v5017_v61, %v14431_v29  ;;  %v5370_v20 = vpop.f32.mrf.mxu1  ;;  %v7715_v41 = vadd.f32 %v7714_v47, %v7437_v59  ;;  %v16632_v28 = vld [vmem:[#allocation97_spill] sm:$0xff] }
 0x462   : > { %v5369_v30 = vadd.f32 %v5368_v42, %v5016_v2  ;;  %v5021_v24 = vpop.f32.mrf.mxu0  ;;  %9757 = vmatmul.mubr.bf16.gmra.mxu0 %v16627_v52 }
 0x463   : > { %v7719_v50 = vadd.f32 %v16629_v26, %v7440_v57  ;;  %v7441_v36 = vmul.f32 %v14448_v56, %v5662_v53  ;;  %v5371_v10 = vadd.f32 %v5370_v20, %v5018_v15  ;;  %v5022_v49 = vadd.f32 %v5021_v24, %v14422_v46  ;;  %v5374_v34 = vpop.f32.mrf.mxu1  ;;  %7716 = vadd.xlane.f32.xlu1 %v7715_v41  ;;  %v16633_v41 = vld [vmem:[#allocation48_spill] sm:$0xff]  ;;  %v16634_v24 = vld [vmem:[#allocation167_spill] sm:$0xff] }
 0x464   : > { %v5665_v25 = vmax.f32 %v5369_v30, 0.0  ;;  %v5023_v48 = vpop.f32.mrf.mxu0  ;;  %9760 = vmatprep.mubr.bf16.mxu0 %v16630_v22 }
 0x465   : > { %v5666_v58 = vmax.f32 %v5371_v10, 0.0  ;;  %v5375_v33 = vadd.f32 %v5374_v34, %v5022_v49  ;;  %v5024_v13 = vadd.f32 %v5023_v48, %v14431_v29  ;;  %v5376_v55 = vpop.f32.mrf.mxu1  ;;  %v7720_v35 = vadd.f32 %v7719_v50, %v7441_v36  ;;  %v16635_v49 = vld [vmem:[#allocation51_spill] sm:$0xff]  ;;  %v14679_v34 = vpop.permute.xlu1 %8968 }
 0x466   : > { %v7444_v5 = vmul.f32 %v14441_v54, %v5665_v25  ;;  %v5025_v3 = vpop.f32.mrf.mxu0  ;;  %16636 = vst [vmem:[#allocation114_spill] sm:$0xff] %v14679_v34 }
 0x467   : > { %v7445_v17 = vmul.f32 %v14448_v56, %v5666_v58  ;;  %v5669_v63 = vmax.f32 %v5375_v33, 0.0  ;;  %v5377_v37 = vadd.f32 %v5376_v55, %v5024_v13  ;;  %v5026_v47 = vadd.f32 %v5025_v3, %v14422_v46  ;;  %v5378_v59 = vpop.f32.mrf.mxu1  ;;  %7721 = vadd.xlane.f32.xlu0 %v7720_v35  ;;  %v14684_v3 = vpop.permute.xlu0 %8970 }
 0x468   : > { %v7724_v18 = vadd.f32 %v16632_v28, %v7444_v5  ;;  %v5027_v42 = vpop.f32.mrf.mxu0  ;;  %16637 = vst [vmem:[#allocation29_spill] sm:$0xff] %v14684_v3  ;;  %v16678_v3 = vld [vmem:[#allocation120_spill] sm:$0xff] }
 0x469   : > { %v7448_v2 = vmul.f32 %v14441_v54, %v5669_v63  ;;  %v5670_v61 = vmax.f32 %v5377_v37, 0.0  ;;  %v5379_v57 = vadd.f32 %v5378_v59, %v5026_v47  ;;  %v5028_v53 = vadd.f32 %v5027_v42, %v14431_v29  ;;  %v5380_v15 = vpop.f32.mrf.mxu1 }
 0x46a   : > { %v5031_v20 = vpop.f32.mrf.mxu0  ;;  %9761 = vmatmul.mubr.bf16.gmra.mxu0 %v16633_v41  ;;  %v7725_v30 = vadd.f32 %v7724_v18, %v7445_v17  ;;  %v16638_v17 = vld [vmem:[#allocation171_spill] sm:$0xff] }
 0x46b   : > { %v7729_v52 = vadd.f32 %v16634_v24, %v7448_v2  ;;  %v7449_v26 = vmul.f32 %v14448_v56, %v5670_v61  ;;  %v5673_v50 = vmax.f32 %v5379_v57, 0.0  ;;  %v5381_v36 = vadd.f32 %v5380_v15, %v5028_v53  ;;  %v5384_v10 = vpop.f32.mrf.mxu1  ;;  %9764 = vmatprep.mubr.bf16.mxu0 %v16635_v49  ;;  %v14692_v24 = vpop.permute.xlu1 %8972  ;;  %v16641_v49 = vld [vmem:[#allocation58_spill] sm:$0xff] }
 0x46c   : > { %v5032_v25 = vadd.f32 %v5031_v20, %v14422_v46  ;;  %7726 = vadd.xlane.f32.xlu1 %v7725_v30  ;;  %v5033_v48 = vpop.f32.mrf.mxu0  ;;  %v16639_v30 = vld [vmem:[#allocation54_spill] sm:$0xff]  ;;  %16640 = vst [vmem:[#allocation118_spill] sm:$0xff] %v14692_v24 }
 0x46d   : > { %v7452_v22 = vmul.f32 %v14441_v54, %v5673_v50  ;;  %v5674_v58 = vmax.f32 %v5381_v36, 0.0  ;;  %v5034_v33 = vadd.f32 %v5033_v48, %v14431_v29  ;;  %v5386_v13 = vpop.f32.mrf.mxu1  ;;  %v7730_v55 = vadd.f32 %v7729_v52, %v7449_v26 }
 0x46e   : > { %v5385_v35 = vadd.f32 %v5384_v10, %v5032_v25  ;;  %v5035_v5 = vpop.f32.mrf.mxu0  ;;  %v16642_v25 = vld [vmem:[#allocation168_spill] sm:$0xff] }
 0x46f   : > { %v7734_v63 = vadd.f32 %v16638_v17, %v7452_v22  ;;  %v7453_v37 = vmul.f32 %v14448_v56, %v5674_v58  ;;  %v5387_v47 = vadd.f32 %v5386_v13, %v5034_v33  ;;  %v5036_v59 = vadd.f32 %v5035_v5, %v14422_v46  ;;  %v5388_v28 = vpop.f32.mrf.mxu1  ;;  %7731 = vadd.xlane.f32.xlu0 %v7730_v55 }
 0x470   : > { %v5677_v18 = vmax.f32 %v5385_v35, 0.0  ;;  %v5037_v42 = vpop.f32.mrf.mxu0 }
 0x471   : > { %v5678_v2 = vmax.f32 %v5387_v47, 0.0  ;;  %v5389_v61 = vadd.f32 %v5388_v28, %v5036_v59  ;;  %v5038_v57 = vadd.f32 %v5037_v42, %v14431_v29  ;;  %v5390_v53 = vpop.f32.mrf.mxu1  ;;  %v7735_v15 = vadd.f32 %v7734_v63, %v7453_v37  ;;  %v16643_v63 = vld [vmem:[#allocation172_spill] sm:$0xff]  ;;  %v14702_v42 = vpop.permute.xlu0 %8974 }
 0x472   : > { %v7456_v20 = vmul.f32 %v14441_v54, %v5677_v18  ;;  %v5041_v41 = vpop.f32.mrf.mxu0  ;;  %9765 = vmatmul.mubr.bf16.gmra.mxu0 %v16639_v30  ;;  %16644 = vst [vmem:[#allocation111_spill] sm:$0xff] %v14702_v42 }
 0x473   : > { %v7457_v52 = vmul.f32 %v14448_v56, %v5678_v2  ;;  %v5681_v26 = vmax.f32 %v5389_v61, 0.0  ;;  %v5391_v50 = vadd.f32 %v5390_v53, %v5038_v57  ;;  %v5042_v36 = vadd.f32 %v5041_v41, %v14422_v46  ;;  %v5394_v10 = vpop.f32.mrf.mxu1  ;;  %7736 = vadd.xlane.f32.xlu1 %v7735_v15  ;;  %9768 = vmatprep.mubr.bf16.mxu0 %v16641_v49 }
 0x474   : > { %v7739_v48 = vadd.f32 %v16642_v25, %v7456_v20  ;;  %v5043_v22 = vpop.f32.mrf.mxu0 }
 0x475   : > { %v7460_v58 = vmul.f32 %v14441_v54, %v5681_v26  ;;  %v5682_v33 = vmax.f32 %v5391_v50, 0.0  ;;  %v5395_v13 = vadd.f32 %v5394_v10, %v5042_v36  ;;  %v5044_v55 = vadd.f32 %v5043_v22, %v14431_v29  ;;  %v5396_v35 = vpop.f32.mrf.mxu1  ;;  %v16645_v26 = vld [vmem:[#allocation61_spill] sm:$0xff]  ;;  %v14708_v50 = vpop.permute.xlu1 %8976  ;;  %v16647_v36 = vld [vmem:[#allocation95_spill] sm:$0xff] }
 0x476   : > { %v5045_v5 = vpop.f32.mrf.mxu0  ;;  %v7740_v17 = vadd.f32 %v7739_v48, %v7457_v52  ;;  %16646 = vst [vmem:[#allocation31_spill] sm:$0xff] %v14708_v50 }
 0x477   : > { %v7744_v37 = vadd.f32 %v16643_v63, %v7460_v58  ;;  %v7461_v47 = vmul.f32 %v14448_v56, %v5682_v33  ;;  %v5685_v59 = vmax.f32 %v5395_v13, 0.0  ;;  %v5397_v28 = vadd.f32 %v5396_v35, %v5044_v55  ;;  %v5398_v18 = vpop.f32.mrf.mxu1  ;;  %v16648_v13 = vld [vmem:[#allocation65_spill] sm:$0xff] }
 0x478   : > { %v5046_v2 = vadd.f32 %v5045_v5, %v14422_v46  ;;  %7741 = vadd.xlane.f32.xlu0 %v7740_v17  ;;  %v5047_v61 = vpop.f32.mrf.mxu0 }
 0x479   : > { %v7464_v57 = vmul.f32 %v14441_v54, %v5685_v59  ;;  %v5686_v53 = vmax.f32 %v5397_v28, 0.0  ;;  %v5048_v15 = vadd.f32 %v5047_v61, %v14431_v29  ;;  %v5400_v20 = vpop.f32.mrf.mxu1  ;;  %v7745_v41 = vadd.f32 %v7744_v37, %v7461_v47  ;;  %v14716_v59 = vpop.permute.xlu0 %8978 }
 0x47a   : > { %v5399_v30 = vadd.f32 %v5398_v18, %v5046_v2  ;;  %v5051_v52 = vpop.f32.mrf.mxu0  ;;  %9769 = vmatmul.mubr.bf16.gmra.mxu0 %v16645_v26  ;;  %16649 = vst [vmem:[#allocation34_spill] sm:$0xff] %v14716_v59 }
 0x47b   : > { %v7749_v10 = vadd.f32 %v16647_v36, %v7464_v57  ;;  %v7465_v49 = vmul.f32 %v14448_v56, %v5686_v53  ;;  %v5401_v25 = vadd.f32 %v5400_v20, %v5048_v15  ;;  %v5052_v48 = vadd.f32 %v5051_v52, %v14422_v46  ;;  %v5404_v22 = vpop.f32.mrf.mxu1  ;;  %7746 = vadd.xlane.f32.xlu1 %v7745_v41  ;;  %v16650_v53 = vld [vmem:[#allocation121_spill] sm:$0xff] }
 0x47c   : > { %v5689_v58 = vmax.f32 %v5399_v30, 0.0  ;;  %v5053_v33 = vpop.f32.mrf.mxu0  ;;  %9772 = vmatprep.mubr.bf16.mxu0 %v16648_v13 }
 0x47d   : > { %v5690_v55 = vmax.f32 %v5401_v25, 0.0  ;;  %v5405_v35 = vadd.f32 %v5404_v22, %v5052_v48  ;;  %v5054_v5 = vadd.f32 %v5053_v33, %v14431_v29  ;;  %v5406_v17 = vpop.f32.mrf.mxu1  ;;  %v7750_v63 = vadd.f32 %v7749_v10, %v7465_v49  ;;  %v16651_v49 = vld [vmem:[#allocation71_spill] sm:$0xff]  ;;  %v16652_v48 = vld [vmem:[#allocation122_spill] sm:$0xff] }
 0x47e   : > { %v7468_v37 = vmul.f32 %v14441_v54, %v5689_v58  ;;  %v5055_v47 = vpop.f32.mrf.mxu0 }
 0x47f   : > { %v7469_v28 = vmul.f32 %v14448_v56, %v5690_v55  ;;  %v5693_v18 = vmax.f32 %v5405_v35, 0.0  ;;  %v5407_v2 = vadd.f32 %v5406_v17, %v5054_v5  ;;  %v5056_v61 = vadd.f32 %v5055_v47, %v14422_v46  ;;  %v5408_v57 = vpop.f32.mrf.mxu1  ;;  %7751 = vadd.xlane.f32.xlu0 %v7750_v63  ;;  %v16653_v35 = vld [vmem:[#allocation77_spill] sm:$0xff]  ;;  %v14727_v5 = vpop.permute.xlu1 %8980 }
 0x480   : > { %v7754_v15 = vadd.f32 %v16650_v53, %v7468_v37  ;;  %v5057_v20 = vpop.f32.mrf.mxu0  ;;  %16654 = vst [vmem:[#allocation33_spill] sm:$0xff] %v14727_v5  ;;  %v14732_v53 = vpop.permute.xlu0 %8982 }
 0x481   : > { %v7472_v41 = vmul.f32 %v14441_v54, %v5693_v18  ;;  %v5694_v30 = vmax.f32 %v5407_v2, 0.0  ;;  %v5409_v52 = vadd.f32 %v5408_v57, %v5056_v61  ;;  %v5058_v26 = vadd.f32 %v5057_v20, %v14431_v29  ;;  %v5410_v36 = vpop.f32.mrf.mxu1  ;;  %16655 = vst [vmem:[#allocation150_spill] sm:$0xff] %v14732_v53 }
 0x482   : > { %v5061_v10 = vpop.f32.mrf.mxu0  ;;  %9773 = vmatmul.mubr.bf16.gmra.mxu0 %v16651_v49  ;;  %v7755_v25 = vadd.f32 %v7754_v15, %v7469_v28  ;;  %v16656_v15 = vld [vmem:[#allocation123_spill] sm:$0xff] }
 0x483   : > { %v7759_v22 = vadd.f32 %v16652_v48, %v7472_v41  ;;  %v7473_v58 = vmul.f32 %v14448_v56, %v5694_v30  ;;  %v5697_v33 = vmax.f32 %v5409_v52, 0.0  ;;  %v5411_v13 = vadd.f32 %v5410_v36, %v5058_v26  ;;  %v5414_v55 = vpop.f32.mrf.mxu1  ;;  %9776 = vmatprep.mubr.bf16.mxu0 %v16653_v35  ;;  %v14740_v35 = vpop.permute.xlu1 %8984 }
 0x484   : > { %v5062_v17 = vadd.f32 %v5061_v10, %v14422_v46  ;;  %7756 = vadd.xlane.f32.xlu1 %v7755_v25  ;;  %v5063_v63 = vpop.f32.mrf.mxu0  ;;  %16658 = vst [vmem:[#allocation37_spill] sm:$0xff] %v14740_v35  ;;  %v16670_v35 = vld [vmem:[#allocation103_spill] sm:$0xff] }
 0x485   : > { %v7476_v37 = vmul.f32 %v14441_v54, %v5697_v33  ;;  %v5698_v47 = vmax.f32 %v5411_v13, 0.0  ;;  %v5064_v28 = vadd.f32 %v5063_v63, %v14431_v29  ;;  %v5416_v18 = vpop.f32.mrf.mxu1  ;;  %v7760_v2 = vadd.f32 %v7759_v22, %v7473_v58 }
 0x486   : > { %v5415_v61 = vadd.f32 %v5414_v55, %v5062_v17  ;;  %v5065_v57 = vpop.f32.mrf.mxu0  ;;  %v16657_v55 = vld [vmem:[#allocation81_spill] sm:$0xff] }
 0x487   : > { %v7764_v20 = vadd.f32 %v16656_v15, %v7476_v37  ;;  %v7477_v41 = vmul.f32 %v14448_v56, %v5698_v47  ;;  %v5417_v30 = vadd.f32 %v5416_v18, %v5064_v28  ;;  %v5066_v52 = vadd.f32 %v5065_v57, %v14422_v46  ;;  %v5418_v26 = vpop.f32.mrf.mxu1  ;;  %7761 = vadd.xlane.f32.xlu0 %v7760_v2  ;;  %v16659_v18 = vld [vmem:[#allocation86_spill] sm:$0xff]  ;;  %v16660_v2 = vld [vmem:[#allocation124_spill] sm:$0xff] }
 0x488   : > { %v5701_v36 = vmax.f32 %v5415_v61, 0.0  ;;  %v5067_v10 = vpop.f32.mrf.mxu0 }
 0x489   : > { %v5702_v49 = vmax.f32 %v5417_v30, 0.0  ;;  %v5419_v25 = vadd.f32 %v5418_v26, %v5066_v52  ;;  %v5068_v48 = vadd.f32 %v5067_v10, %v14431_v29  ;;  %v5420_v22 = vpop.f32.mrf.mxu1  ;;  %v7765_v58 = vadd.f32 %v7764_v20, %v7477_v41  ;;  %v16661_v10 = vld [vmem:[#allocation125_spill] sm:$0xff] }
 0x48a   : > { %v7480_v33 = vmul.f32 %v14441_v54, %v5701_v36  ;;  %v5071_v13 = vpop.f32.mrf.mxu0  ;;  %9777 = vmatmul.mubr.bf16.gmra.mxu0 %v16657_v55 }
 0x48b   : > { %v7481_v17 = vmul.f32 %v14448_v56, %v5702_v49  ;;  %v5705_v63 = vmax.f32 %v5419_v25, 0.0  ;;  %v5421_v37 = vadd.f32 %v5420_v22, %v5068_v48  ;;  %v5072_v47 = vadd.f32 %v5071_v13, %v14422_v46  ;;  %v5424_v28 = vpop.f32.mrf.mxu1  ;;  %7766 = vadd.xlane.f32.xlu1 %v7765_v58  ;;  %9780 = vmatprep.mubr.bf16.mxu0 %v16659_v18  ;;  %v14750_v13 = vpop.xlane.xlu0 %7009 }
 0x48c   : > { %v7769_v61 = vadd.f32 %v16660_v2, %v7480_v33  ;;  %v5073_v57 = vpop.f32.mrf.mxu0  ;;  %v16662_v2 = vld [vmem:[#allocation90_spill] sm:$0xff] }
 0x48d   : > { %v7484_v15 = vmul.f32 %v14441_v54, %v5705_v63  ;;  %v5706_v20 = vmax.f32 %v5421_v37, 0.0  ;;  %v5425_v41 = vadd.f32 %v5424_v28, %v5072_v47  ;;  %v5074_v30 = vadd.f32 %v5073_v57, %v14431_v29  ;;  %v5426_v52 = vpop.f32.mrf.mxu1  ;;  %v16663_v57 = vld [vmem:[#allocation126_spill] sm:$0xff] }
 0x48e   : > { %v5075_v26 = vpop.f32.mrf.mxu0  ;;  %v7770_v36 = vadd.f32 %v7769_v61, %v7481_v17 }
 0x48f   : > { %v7774_v49 = vadd.f32 %v16661_v10, %v7484_v15  ;;  %v7485_v25 = vmul.f32 %v14448_v56, %v5706_v20  ;;  %v5709_v48 = vmax.f32 %v5425_v41, 0.0  ;;  %v5427_v22 = vadd.f32 %v5426_v52, %v5074_v30  ;;  %v5428_v58 = vpop.f32.mrf.mxu1 }
 0x490   : > { %v5076_v33 = vadd.f32 %v5075_v26, %v14422_v46  ;;  %7771 = vadd.xlane.f32.xlu0 %v7770_v36  ;;  %v5077_v55 = vpop.f32.mrf.mxu0  ;;  %v16664_v26 = vld [vmem:[#allocation94_spill] sm:$0xff]  ;;  %v14760_v36 = vpop.xlane.xlu1 %7019 }
 0x491   : > { %v7488_v63 = vmul.f32 %v14441_v54, %v5709_v48  ;;  %v5710_v37 = vmax.f32 %v5427_v22, 0.0  ;;  %v5078_v47 = vadd.f32 %v5077_v55, %v14431_v29  ;;  %v5430_v28 = vpop.f32.mrf.mxu1  ;;  %v7775_v61 = vadd.f32 %v7774_v49, %v7485_v25 }
 0x492   : > { %v5429_v17 = vadd.f32 %v5428_v58, %v5076_v33  ;;  %v5081_v18 = vpop.f32.mrf.mxu0  ;;  %9781 = vmatmul.mubr.bf16.gmra.mxu0 %v16662_v2 }
 0x493   : > { %v7779_v15 = vadd.f32 %v16663_v57, %v7488_v63  ;;  %v7489_v20 = vmul.f32 %v14448_v56, %v5710_v37  ;;  %v5431_v41 = vadd.f32 %v5430_v28, %v5078_v47  ;;  %v5082_v30 = vadd.f32 %v5081_v18, %v14422_v46  ;;  %v5434_v52 = vpop.f32.mrf.mxu1  ;;  %9784 = vmatprep.mubr.bf16.mxu0 %v16664_v26  ;;  %v14764_v37 = vpop.xlane.xlu0 %7014 }
 0x494   : > { %v5713_v10 = vmax.f32 %v5429_v17, 0.0  ;;  %7776 = vadd.xlane.f32.xlu1 %v7775_v61  ;;  %v5083_v48 = vpop.f32.mrf.mxu0  ;;  %v16665_v61 = vld [vmem:[#allocation155_spill] sm:$0xff] }
 0x495   : > { %v5714_v22 = vmax.f32 %v5431_v41, 0.0  ;;  %v5435_v58 = vadd.f32 %v5434_v52, %v5082_v30  ;;  %v5084_v33 = vadd.f32 %v5083_v48, %v14431_v29  ;;  %v5436_v49 = vpop.f32.mrf.mxu1  ;;  %v7780_v25 = vadd.f32 %v7779_v15, %v7489_v20  ;;  %v16666_v48 = vld [vmem:[#allocation99_spill] sm:$0xff] }
 0x496   : > { %v7492_v55 = vmul.f32 %v14441_v54, %v5713_v10  ;;  %v5085_v63 = vpop.f32.mrf.mxu0 }
 0x497   : > { %v7493_v47 = vmul.f32 %v14448_v56, %v5714_v22  ;;  %v5717_v28 = vmax.f32 %v5435_v58, 0.0  ;;  %v5437_v18 = vadd.f32 %v5436_v49, %v5084_v33  ;;  %v5086_v2 = vadd.f32 %v5085_v63, %v14422_v46  ;;  %v5438_v17 = vpop.f32.mrf.mxu1  ;;  %7781 = vadd.xlane.f32.xlu0 %v7780_v25  ;;  %v16667_v58 = vld [vmem:[#allocation127_spill] sm:$0xff] }
 0x498   : > { %v7784_v57 = vadd.f32 %v16665_v61, %v7492_v55  ;;  %v5087_v41 = vpop.f32.mrf.mxu0  ;;  %v16668_v55 = vld [vmem:[#allocation102_spill] sm:$0xff]  ;;  %v14775_v61 = vpop.xlane.xlu1 %7024 }
 0x499   : > { %v7496_v30 = vmul.f32 %v14441_v54, %v5717_v28  ;;  %v5718_v52 = vmax.f32 %v5437_v18, 0.0  ;;  %v5439_v15 = vadd.f32 %v5438_v17, %v5086_v2  ;;  %v5088_v20 = vadd.f32 %v5087_v41, %v14431_v29  ;;  %v5440_v26 = vpop.f32.mrf.mxu1 }
 0x49a   : > { %v5091_v10 = vpop.f32.mrf.mxu0  ;;  %9785 = vmatmul.mubr.bf16.gmra.mxu0 %v16666_v48  ;;  %v7785_v22 = vadd.f32 %v7784_v57, %v7493_v47 }
 0x49b   : > { %v7789_v33 = vadd.f32 %v16667_v58, %v7496_v30  ;;  %v7497_v49 = vmul.f32 %v14448_v56, %v5718_v52  ;;  %v5721_v63 = vmax.f32 %v5439_v15, 0.0  ;;  %v5441_v25 = vadd.f32 %v5440_v26, %v5088_v20  ;;  %v5444_v5 = vpop.f32.mrf.mxu1  ;;  %9788 = vmatprep.mubr.bf16.mxu0 %v16668_v55  ;;  %v14780_v15 = vpop.xlane.xlu0 %7029  ;;  %v16669_v20 = vld [vmem:[#allocation128_spill] sm:$0xff] }
 0x49c   : > { %v5092_v28 = vadd.f32 %v5091_v10, %v14422_v46  ;;  %7786 = vadd.xlane.f32.xlu1 %v7785_v22  ;;  %v5093_v18 = vpop.f32.mrf.mxu0 }
 0x49d   : > { %v7500_v2 = vmul.f32 %v14441_v54, %v5721_v63  ;;  %v5722_v17 = vmax.f32 %v5441_v25, 0.0  ;;  %v5094_v47 = vadd.f32 %v5093_v18, %v14431_v29  ;;  %v5446_v57 = vpop.f32.mrf.mxu1  ;;  %v7790_v41 = vadd.f32 %v7789_v33, %v7497_v49 }
 0x49e   : > { %v5445_v30 = vadd.f32 %v5444_v5, %v5092_v28  ;;  %v5095_v52 = vpop.f32.mrf.mxu0 }
 0x49f   : > { %v7794_v26 = vadd.f32 %v16669_v20, %v7500_v2  ;;  %v7501_v48 = vmul.f32 %v14448_v56, %v5722_v17  ;;  %v5447_v58 = vadd.f32 %v5446_v57, %v5094_v47  ;;  %v5096_v10 = vadd.f32 %v5095_v52, %v14422_v46  ;;  %v5448_v22 = vpop.f32.mrf.mxu1  ;;  %7791 = vadd.xlane.f32.xlu0 %v7790_v41  ;;  %v14788_v2 = vpop.xlane.xlu1 %7034  ;;  %v16671_v52 = vld [vmem:[#allocation104_spill] sm:$0xff]  ;;  %v16672_v20 = vld [vmem:[#allocation129_spill] sm:$0xff] }
 0x4a0   : > { %v5725_v55 = vmax.f32 %v5445_v30, 0.0  ;;  %v5097_v63 = vpop.f32.mrf.mxu0 }
 0x4a1   : > { %v5726_v25 = vmax.f32 %v5447_v58, 0.0  ;;  %v5449_v59 = vadd.f32 %v5448_v22, %v5096_v10  ;;  %v5098_v18 = vadd.f32 %v5097_v63, %v14431_v29  ;;  %v5450_v33 = vpop.f32.mrf.mxu1  ;;  %v7795_v5 = vadd.f32 %v7794_v26, %v7501_v48 }
 0x4a2   : > { %v7504_v49 = vmul.f32 %v14441_v54, %v5725_v55  ;;  %v5101_v28 = vpop.f32.mrf.mxu0  ;;  %9789 = vmatmul.mubr.bf16.gmra.mxu0 %v16670_v35 }
 0x4a3   : > { %v7505_v17 = vmul.f32 %v14448_v56, %v5726_v25  ;;  %v5729_v47 = vmax.f32 %v5449_v59, 0.0  ;;  %v5451_v57 = vadd.f32 %v5450_v33, %v5098_v18  ;;  %v5102_v41 = vadd.f32 %v5101_v28, %v14422_v46  ;;  %v5454_v30 = vpop.f32.mrf.mxu1  ;;  %7796 = vadd.xlane.f32.xlu1 %v7795_v5  ;;  %9792 = vmatprep.mubr.bf16.mxu0 %v16671_v52  ;;  %v16673_v59 = vld [vmem:[#allocation130_spill] sm:$0xff]  ;;  %v14798_v52 = vpop.xlane.xlu0 %7039 }
 0x4a4   : > { %v7799_v58 = vadd.f32 %v16672_v20, %v7504_v49  ;;  %v5103_v26 = vpop.f32.mrf.mxu0 }
 0x4a5   : > { %v7508_v48 = vmul.f32 %v14441_v54, %v5729_v47  ;;  %v5730_v10 = vmax.f32 %v5451_v57, 0.0  ;;  %v5455_v22 = vadd.f32 %v5454_v30, %v5102_v41  ;;  %v5104_v35 = vadd.f32 %v5103_v26, %v14431_v29  ;;  %v5456_v55 = vpop.f32.mrf.mxu1  ;;  %v16674_v26 = vld [vmem:[#allocation107_spill] sm:$0xff] }
 0x4a6   : > { %v5105_v63 = vpop.f32.mrf.mxu0  ;;  %v7800_v25 = vadd.f32 %v7799_v58, %v7505_v17 }
 0x4a7   : > { %v7804_v18 = vadd.f32 %v16673_v59, %v7508_v48  ;;  %v7509_v33 = vmul.f32 %v14448_v56, %v5730_v10  ;;  %v5733_v28 = vmax.f32 %v5455_v22, 0.0  ;;  %v5457_v5 = vadd.f32 %v5456_v55, %v5104_v35  ;;  %v5458_v53 = vpop.f32.mrf.mxu1  ;;  %v16675_v10 = vld [vmem:[#allocation131_spill] sm:$0xff]  ;;  %v16676_v59 = vld [vmem:[#allocation112_spill] sm:$0xff] }
 0x4a8   : > { %v5106_v49 = vadd.f32 %v5105_v63, %v14422_v46  ;;  %7801 = vadd.xlane.f32.xlu0 %v7800_v25  ;;  %v5107_v47 = vpop.f32.mrf.mxu0 }
 0x4a9   : > { %v7512_v57 = vmul.f32 %v14441_v54, %v5733_v28  ;;  %v5734_v41 = vmax.f32 %v5457_v5, 0.0  ;;  %v5108_v30 = vadd.f32 %v5107_v47, %v14431_v29  ;;  %v5460_v20 = vpop.f32.mrf.mxu1  ;;  %v7805_v48 = vadd.f32 %v7804_v18, %v7509_v33  ;;  %v14808_v28 = vpop.xlane.xlu1 %7044 }
 0x4aa   : > { %v5459_v17 = vadd.f32 %v5458_v53, %v5106_v49  ;;  %v5111_v58 = vpop.f32.mrf.mxu0  ;;  %9793 = vmatmul.mubr.bf16.gmra.mxu0 %v16674_v26 }
 0x4ab   : > { %v7809_v22 = vadd.f32 %v16675_v10, %v7512_v57  ;;  %v7513_v35 = vmul.f32 %v14448_v56, %v5734_v41  ;;  %v5461_v55 = vadd.f32 %v5460_v20, %v5108_v30  ;;  %v5112_v63 = vadd.f32 %v5111_v58, %v14422_v46  ;;  %v5464_v25 = vpop.f32.mrf.mxu1  ;;  %9796 = vmatprep.mubr.bf16.mxu0 %v16676_v59  ;;  %v14812_v30 = vpop.xlane.xlu0 %7049 }
 0x4ac   : > { %v5737_v5 = vmax.f32 %v5459_v17, 0.0  ;;  %7806 = vadd.xlane.f32.xlu1 %v7805_v48  ;;  %v5113_v47 = vpop.f32.mrf.mxu0  ;;  %v16677_v48 = vld [vmem:[#allocation132_spill] sm:$0xff] }
 0x4ad   : > { %v5738_v53 = vmax.f32 %v5461_v55, 0.0  ;;  %v5465_v49 = vadd.f32 %v5464_v25, %v5112_v63  ;;  %v5114_v26 = vadd.f32 %v5113_v47, %v14431_v29  ;;  %v5466_v18 = vpop.f32.mrf.mxu1  ;;  %v7810_v33 = vadd.f32 %v7809_v22, %v7513_v35 }
 0x4ae   : > { %v7516_v57 = vmul.f32 %v14441_v54, %v5737_v5  ;;  %v5115_v41 = vpop.f32.mrf.mxu0 }
 0x4af   : > { %v7517_v20 = vmul.f32 %v14448_v56, %v5738_v53  ;;  %v5741_v58 = vmax.f32 %v5465_v49, 0.0  ;;  %v5467_v10 = vadd.f32 %v5466_v18, %v5114_v26  ;;  %v5116_v59 = vadd.f32 %v5115_v41, %v14422_v46  ;;  %v5468_v17 = vpop.f32.mrf.mxu1  ;;  %7811 = vadd.xlane.f32.xlu0 %v7810_v33  ;;  %v16679_v49 = vld [vmem:[#allocation133_spill] sm:$0xff] }
 0x4b0   : > { %v7814_v55 = vadd.f32 %v16677_v48, %v7516_v57  ;;  %v5117_v63 = vpop.f32.mrf.mxu0  ;;  %v14822_v57 = vpop.xlane.xlu1 %7054 }
 0x4b1   : > { %v7520_v25 = vmul.f32 %v14441_v54, %v5741_v58  ;;  %v5742_v47 = vmax.f32 %v5467_v10, 0.0  ;;  %v5469_v22 = vadd.f32 %v5468_v17, %v5116_v59  ;;  %v5118_v35 = vadd.f32 %v5117_v63, %v14431_v29  ;;  %v5470_v5 = vpop.f32.mrf.mxu1 }
 0x4b2   : > { %v5121_v24 = vpop.f32.mrf.mxu0  ;;  %9797 = vmatmul.mubr.bf16.gmra.mxu0 %v16678_v3  ;;  %v7815_v53 = vadd.f32 %v7814_v55, %v7517_v20 }
 0x4b3   : > { %v7819_v26 = vadd.f32 %v16679_v49, %v7520_v25  ;;  %v7521_v18 = vmul.f32 %v14448_v56, %v5742_v47  ;;  %v5745_v41 = vmax.f32 %v5469_v22, 0.0  ;;  %v5471_v33 = vadd.f32 %v5470_v5, %v5118_v35  ;;  %v5474_v50 = vpop.f32.mrf.mxu1  ;;  %v14827_v25 = vpop.xlane.xlu0 %7059  ;;  %v16680_v47 = vld [vmem:[#allocation134_spill] sm:$0xff] }
 0x4b4   : > { %v5122_v58 = vadd.f32 %v5121_v24, %v14422_v46  ;;  %7816 = vadd.xlane.f32.xlu1 %v7815_v53  ;;  %v5123_v10 = vpop.f32.mrf.mxu0  ;;  %v14834_v40 = vpop.xlane.xlu1 %7064 }
 0x4b5   : > { %v7524_v59 = vmul.f32 %v14441_v54, %v5745_v41  ;;  %v5746_v17 = vmax.f32 %v5471_v33, 0.0  ;;  %v5124_v48 = vadd.f32 %v5123_v10, %v14431_v29  ;;  %v5476_v3 = vpop.f32.mrf.mxu1  ;;  %v7820_v20 = vadd.f32 %v7819_v26, %v7521_v18 }
 0x4b6   : > { %v5475_v55 = vadd.f32 %v5474_v50, %v5122_v58  ;;  %v5125_v63 = vpop.f32.mrf.mxu0 }
 0x4b7   : > { %v7824_v22 = vadd.f32 %v16680_v47, %v7524_v59  ;;  %v7525_v35 = vmul.f32 %v14448_v56, %v5746_v17  ;;  %v5477_v5 = vadd.f32 %v5476_v3, %v5124_v48  ;;  %v5126_v24 = vadd.f32 %v5125_v63, %v14422_v46  ;;  %v5478_v53 = vpop.f32.mrf.mxu1  ;;  %7821 = vadd.xlane.f32.xlu0 %v7820_v20 }
 0x4b8   : > { %v5749_v49 = vmax.f32 %v5475_v55, 0.0  ;;  %v5127_v41 = vpop.f32.mrf.mxu0  ;;  %v16681_v55 = vld [vmem:[#allocation135_spill] sm:$0xff] }
 0x4b9   : > { %v5750_v33 = vmax.f32 %v5477_v5, 0.0  ;;  %v5479_v42 = vadd.f32 %v5478_v53, %v5126_v24  ;;  %v5128_v10 = vadd.f32 %v5127_v41, %v14431_v29  ;;  %v5480_v26 = vpop.f32.mrf.mxu1  ;;  %v7825_v50 = vadd.f32 %v7824_v22, %v7525_v35 }
 0x4ba   : > { %v7528_v18 = vmul.f32 %v14441_v54, %v5749_v49  ;;  %v5131_v58 = vpop.f32.mrf.mxu0 }
 0x4bb   : > { %v7529_v59 = vmul.f32 %v14448_v56, %v5750_v33  ;;  %v5753_v17 = vmax.f32 %v5479_v42, 0.0  ;;  %v5481_v48 = vadd.f32 %v5480_v26, %v5128_v10  ;;  %v5132_v3 = vadd.f32 %v5131_v58, %v14422_v46  ;;  %v5484_v20 = vpop.f32.mrf.mxu1  ;;  %7826 = vadd.xlane.f32.xlu1 %v7825_v50  ;;  %v14843_v50 = vpop.xlane.xlu0 %7069 }
 0x4bc   : > { %v7829_v63 = vadd.f32 %v16681_v55, %v7528_v18  ;;  %v5133_v47 = vpop.f32.mrf.mxu0 }
 0x4bd   : > { %v7532_v5 = vmul.f32 %v14441_v54, %v5753_v17  ;;  %v5754_v24 = vmax.f32 %v5481_v48, 0.0  ;;  %v5485_v22 = vadd.f32 %v5484_v20, %v5132_v3  ;;  %v5134_v35 = vadd.f32 %v5133_v47, %v14431_v29  ;;  %v5486_v53 = vpop.f32.mrf.mxu1  ;;  %v16683_v47 = vld [vmem:[#allocation137_spill] sm:$0xff] }
 0x4be   : > { %v5135_v49 = vpop.f32.mrf.mxu0  ;;  %v7830_v41 = vadd.f32 %v7829_v63, %v7529_v59 }
 0x4bf   : > { %v7834_v33 = vadd.f32 %v16682_v43, %v7532_v5  ;;  %v7533_v42 = vmul.f32 %v14448_v56, %v5754_v24  ;;  %v5757_v10 = vmax.f32 %v5485_v22, 0.0  ;;  %v5487_v26 = vadd.f32 %v5486_v53, %v5134_v35  ;;  %v5488_v58 = vpop.f32.mrf.mxu1 }
 0x4c0   : > { %v5136_v18 = vadd.f32 %v5135_v49, %v14422_v46  ;;  %7831 = vadd.xlane.f32.xlu0 %v7830_v41  ;;  %v5137_v17 = vpop.f32.mrf.mxu0  ;;  %v14851_v49 = vpop.xlane.xlu1 %7074 }
 0x4c1   : > { %v7536_v48 = vmul.f32 %v14441_v54, %v5757_v10  ;;  %v5758_v3 = vmax.f32 %v5487_v26, 0.0  ;;  %v5138_v20 = vadd.f32 %v5137_v17, %v14431_v29  ;;  %v5490_v55 = vpop.f32.mrf.mxu1  ;;  %v7835_v43 = vadd.f32 %v7834_v33, %v7533_v42 }
 0x4c2   : > { %v5489_v59 = vadd.f32 %v5488_v58, %v5136_v18  ;;  %v5141_v63 = vpop.f32.mrf.mxu0 }
 0x4c3   : > { %v7839_v5 = vadd.f32 %v16683_v47, %v7536_v48  ;;  %v7537_v24 = vmul.f32 %v14448_v56, %v5758_v3  ;;  %v5491_v22 = vadd.f32 %v5490_v55, %v5138_v20  ;;  %v5142_v35 = vadd.f32 %v5141_v63, %v14422_v46  ;;  %v5494_v53 = vpop.f32.mrf.mxu1  ;;  %7836 = vadd.xlane.f32.xlu1 %v7835_v43  ;;  %v14855_v48 = vpop.xlane.xlu0 %7079  ;;  %v16684_v43 = vld [vmem:[#allocation138_spill] sm:$0xff] }
 0x4c4   : > { %v5761_v41 = vmax.f32 %v5489_v59, 0.0  ;;  %v5143_v10 = vpop.f32.mrf.mxu0 }
 0x4c5   : > { %v5762_v26 = vmax.f32 %v5491_v22, 0.0  ;;  %v5495_v34 = vadd.f32 %v5494_v53, %v5142_v35  ;;  %v5144_v17 = vadd.f32 %v5143_v10, %v14431_v29  ;;  %v5496_v58 = vpop.f32.mrf.mxu1  ;;  %v7840_v18 = vadd.f32 %v7839_v5, %v7537_v24 }
 0x4c6   : > { %v7540_v33 = vmul.f32 %v14441_v54, %v5761_v41  ;;  %v5145_v42 = vpop.f32.mrf.mxu0 }
 0x4c7   : > { %v7541_v3 = vmul.f32 %v14448_v56, %v5762_v26  ;;  %v5765_v20 = vmax.f32 %v5495_v34, 0.0  ;;  %v5497_v55 = vadd.f32 %v5496_v58, %v5144_v17  ;;  %v5146_v63 = vadd.f32 %v5145_v42, %v14422_v46  ;;  %v5498_v59 = vpop.f32.mrf.mxu1  ;;  %7841 = vadd.xlane.f32.xlu0 %v7840_v18  ;;  %v14864_v18 = vpop.xlane.xlu1 %7084 }
 0x4c8   : > { %v7844_v47 = vadd.f32 %v16684_v43, %v7540_v33  ;;  %v5147_v22 = vpop.f32.mrf.mxu0 }
 0x4c9   : > { %v7544_v35 = vmul.f32 %v14441_v54, %v5765_v20  ;;  %v5766_v53 = vmax.f32 %v5497_v55, 0.0  ;;  %v5499_v5 = vadd.f32 %v5498_v59, %v5146_v63  ;;  %v5148_v24 = vadd.f32 %v5147_v22, %v14431_v29  ;;  %v5500_v41 = vpop.f32.mrf.mxu1  ;;  %v16686_v22 = vld [vmem:[#allocation139_spill] sm:$0xff] }
 0x4ca   : > { %v5151_v10 = vpop.f32.mrf.mxu0  ;;  %v7845_v23 = vadd.f32 %v7844_v47, %v7541_v3 }
 0x4cb   : > { %v7849_v26 = vadd.f32 %v16685_v1, %v7544_v35  ;;  %v7545_v34 = vmul.f32 %v14448_v56, %v5766_v53  ;;  %v5769_v17 = vmax.f32 %v5499_v5, 0.0  ;;  %v5501_v58 = vadd.f32 %v5500_v41, %v5148_v24  ;;  %v5504_v42 = vpop.f32.mrf.mxu1 }
 0x4cc   : > { %v5152_v33 = vadd.f32 %v5151_v10, %v14422_v46  ;;  %7846 = vadd.xlane.f32.xlu1 %v7845_v23  ;;  %v5153_v20 = vpop.f32.mrf.mxu0  ;;  %v14872_v10 = vpop.xlane.xlu0 %7089 }
 0x4cd   : > { %v7548_v55 = vmul.f32 %v14441_v54, %v5769_v17  ;;  %v5770_v63 = vmax.f32 %v5501_v58, 0.0  ;;  %v5154_v59 = vadd.f32 %v5153_v20, %v14431_v29  ;;  %v5506_v43 = vpop.f32.mrf.mxu1  ;;  %v7850_v1 = vadd.f32 %v7849_v26, %v7545_v34 }
 0x4ce   : > { %v5505_v3 = vadd.f32 %v5504_v42, %v5152_v33  ;;  %v5155_v47 = vpop.f32.mrf.mxu0 }
 0x4cf   : > { %v7854_v35 = vadd.f32 %v16686_v22, %v7548_v55  ;;  %v7549_v53 = vmul.f32 %v14448_v56, %v5770_v63  ;;  %v5507_v5 = vadd.f32 %v5506_v43, %v5154_v59  ;;  %v5156_v24 = vadd.f32 %v5155_v47, %v14422_v46  ;;  %v5508_v41 = vpop.f32.mrf.mxu1  ;;  %7851 = vadd.xlane.f32.xlu0 %v7850_v1  ;;  %v14876_v55 = vpop.xlane.xlu1 %7094  ;;  %v16687_v1 = vld [vmem:[#allocation14_spill] sm:$0xff] }
 0x4d0   : > { %v5773_v23 = vmax.f32 %v5505_v3, 0.0  ;;  %v5157_v17 = vpop.f32.mrf.mxu0 }
 0x4d1   : > { %v5774_v58 = vmax.f32 %v5507_v5, 0.0  ;;  %v5509_v27 = vadd.f32 %v5508_v41, %v5156_v24  ;;  %v5158_v20 = vadd.f32 %v5157_v17, %v14431_v29  ;;  %v5510_v42 = vpop.f32.mrf.mxu1  ;;  %v7855_v33 = vadd.f32 %v7854_v35, %v7549_v53 }
 0x4d2   : > { %v7552_v26 = vmul.f32 %v14441_v54, %v5773_v23  ;;  %v5161_v34 = vpop.f32.mrf.mxu0 }
 0x4d3   : > { %v7553_v63 = vmul.f32 %v14448_v56, %v5774_v58  ;;  %v5777_v59 = vmax.f32 %v5509_v27, 0.0  ;;  %v5511_v43 = vadd.f32 %v5510_v42, %v5158_v20  ;;  %v5162_v47 = vadd.f32 %v5161_v34, %v14422_v46  ;;  %v5514_v3 = vpop.f32.mrf.mxu1  ;;  %7856 = vadd.xlane.f32.xlu1 %v7855_v33  ;;  %v14885_v33 = vpop.xlane.xlu0 %7099 }
 0x4d4   : > { %v7859_v22 = vadd.f32 %v16687_v1, %v7552_v26  ;;  %v5163_v5 = vpop.f32.mrf.mxu0 }
 0x4d5   : > { %v7556_v24 = vmul.f32 %v14441_v54, %v5777_v59  ;;  %v5778_v41 = vmax.f32 %v5511_v43, 0.0  ;;  %v5515_v35 = vadd.f32 %v5514_v3, %v5162_v47  ;;  %v5164_v53 = vadd.f32 %v5163_v5, %v14431_v29  ;;  %v5516_v23 = vpop.f32.mrf.mxu1  ;;  %v16689_v5 = vld [vmem:[#allocation108_spill] sm:$0xff] }
 0x4d6   : > { %v5165_v17 = vpop.f32.mrf.mxu0  ;;  %v7860_v6 = vadd.f32 %v7859_v22, %v7553_v63 }
 0x4d7   : > { %v7864_v58 = vadd.f32 %v16688_v62, %v7556_v24  ;;  %v7557_v27 = vmul.f32 %v14448_v56, %v5778_v41  ;;  %v5781_v20 = vmax.f32 %v5515_v35, 0.0  ;;  %v5517_v42 = vadd.f32 %v5516_v23, %v5164_v53  ;;  %v5518_v34 = vpop.f32.mrf.mxu1 }
 0x4d8   : > { %v5166_v26 = vadd.f32 %v5165_v17, %v14422_v46  ;;  %7861 = vadd.xlane.f32.xlu0 %v7860_v6  ;;  %v5167_v59 = vpop.f32.mrf.mxu0  ;;  %v14893_v17 = vpop.xlane.xlu1 %7104 }
 0x4d9   : > { %v7560_v43 = vmul.f32 %v14441_v54, %v5781_v20  ;;  %v5782_v47 = vmax.f32 %v5517_v42, 0.0  ;;  %v5168_v3 = vadd.f32 %v5167_v59, %v14431_v29  ;;  %v5520_v1 = vpop.f32.mrf.mxu1  ;;  %v7865_v62 = vadd.f32 %v7864_v58, %v7557_v27 }
 0x4da   : > { %v5519_v63 = vadd.f32 %v5518_v34, %v5166_v26  ;;  %v5171_v22 = vpop.f32.mrf.mxu0 }
 0x4db   : > { %v7869_v24 = vadd.f32 %v16689_v5, %v7560_v43  ;;  %v7561_v41 = vmul.f32 %v14448_v56, %v5782_v47  ;;  %v5521_v35 = vadd.f32 %v5520_v1, %v5168_v3  ;;  %v5172_v53 = vadd.f32 %v5171_v22, %v14422_v46  ;;  %v5524_v23 = vpop.f32.mrf.mxu1  ;;  %7866 = vadd.xlane.f32.xlu1 %v7865_v62  ;;  %v14897_v43 = vpop.xlane.xlu0 %7109  ;;  %v16690_v62 = vld [vmem:[#allocation106_spill] sm:$0xff] }
 0x4dc   : > { %v5785_v6 = vmax.f32 %v5519_v63, 0.0  ;;  %v5173_v20 = vpop.f32.mrf.mxu0 }
 0x4dd   : > { %v5786_v42 = vmax.f32 %v5521_v35, 0.0  ;;  %v5525_v11 = vadd.f32 %v5524_v23, %v5172_v53  ;;  %v5174_v59 = vadd.f32 %v5173_v20, %v14431_v29  ;;  %v5526_v34 = vpop.f32.mrf.mxu1  ;;  %v7870_v26 = vadd.f32 %v7869_v24, %v7561_v41 }
 0x4de   : > { %v7564_v58 = vmul.f32 %v14441_v54, %v5785_v6  ;;  %v5175_v27 = vpop.f32.mrf.mxu0 }
 0x4df   : > { %v7565_v47 = vmul.f32 %v14448_v56, %v5786_v42  ;;  %v5789_v3 = vmax.f32 %v5525_v11, 0.0  ;;  %v5527_v1 = vadd.f32 %v5526_v34, %v5174_v59  ;;  %v5176_v22 = vadd.f32 %v5175_v27, %v14422_v46  ;;  %v5528_v63 = vpop.f32.mrf.mxu1  ;;  %7871 = vadd.xlane.f32.xlu0 %v7870_v26  ;;  %v14906_v26 = vpop.xlane.xlu1 %7114 }
 0x4e0   : > { %v7874_v5 = vadd.f32 %v16690_v62, %v7564_v58  ;;  %v5177_v35 = vpop.f32.mrf.mxu0  ;;  %16692 = vst [vmem:[#allocation151_spill] sm:$0xff] %v14906_v26 }
 0x4e1   : > { %v7568_v53 = vmul.f32 %v14441_v54, %v5789_v3  ;;  %v5790_v23 = vmax.f32 %v5527_v1, 0.0  ;;  %v5529_v24 = vadd.f32 %v5528_v63, %v5176_v22  ;;  %v5178_v41 = vadd.f32 %v5177_v35, %v14431_v29  ;;  %v5530_v6 = vpop.f32.mrf.mxu1  ;;  %v16693_v35 = vld [vmem:[#allocation113_spill] sm:$0xff] }
 0x4e2   : > { %v5181_v20 = vpop.f32.mrf.mxu0  ;;  %v7875_v14 = vadd.f32 %v7874_v5, %v7565_v47 }
 0x4e3   : > { %v7879_v42 = vadd.f32 %v16691_v0, %v7568_v53  ;;  %v7569_v11 = vmul.f32 %v14448_v56, %v5790_v23  ;;  %v5793_v59 = vmax.f32 %v5529_v24, 0.0  ;;  %v5531_v34 = vadd.f32 %v5530_v6, %v5178_v41  ;;  %v5534_v27 = vpop.f32.mrf.mxu1 }
 0x4e4   : > { %v5182_v58 = vadd.f32 %v5181_v20, %v14422_v46  ;;  %7876 = vadd.xlane.f32.xlu1 %v7875_v14  ;;  %v5183_v3 = vpop.f32.mrf.mxu0  ;;  %v14914_v20 = vpop.xlane.xlu0 %7119 }
 0x4e5   : > { %v7572_v1 = vmul.f32 %v14441_v54, %v5793_v59  ;;  %v5794_v22 = vmax.f32 %v5531_v34, 0.0  ;;  %v5184_v63 = vadd.f32 %v5183_v3, %v14431_v29  ;;  %v5536_v62 = vpop.f32.mrf.mxu1  ;;  %v7880_v0 = vadd.f32 %v7879_v42, %v7569_v11 }
 0x4e6   : > { %v5535_v47 = vadd.f32 %v5534_v27, %v5182_v58  ;;  %v5185_v5 = vpop.f32.mrf.mxu0 }
 0x4e7   : > { %v7884_v53 = vadd.f32 %v16693_v35, %v7572_v1  ;;  %v7573_v23 = vmul.f32 %v14448_v56, %v5794_v22  ;;  %v5537_v24 = vadd.f32 %v5536_v62, %v5184_v63  ;;  %v5186_v41 = vadd.f32 %v5185_v5, %v14422_v46  ;;  %v5538_v6 = vpop.f32.mrf.mxu1  ;;  %7881 = vadd.xlane.f32.xlu0 %v7880_v0  ;;  %v14918_v1 = vpop.xlane.xlu1 %7124  ;;  %v16694_v0 = vld [vmem:[#allocation13_spill] sm:$0xff] }
 0x4e8   : > { %v5797_v14 = vmax.f32 %v5535_v47, 0.0  ;;  %v5187_v59 = vpop.f32.mrf.mxu0 }
 0x4e9   : > { %v5798_v34 = vmax.f32 %v5537_v24, 0.0  ;;  %v5539_v4 = vadd.f32 %v5538_v6, %v5186_v41  ;;  %v5188_v3 = vadd.f32 %v5187_v59, %v14431_v29  ;;  %v5540_v27 = vpop.f32.mrf.mxu1  ;;  %v7885_v58 = vadd.f32 %v7884_v53, %v7573_v23 }
 0x4ea   : > { %v7576_v42 = vmul.f32 %v14441_v54, %v5797_v14  ;;  %v5191_v11 = vpop.f32.mrf.mxu0 }
 0x4eb   : > { %v7577_v22 = vmul.f32 %v14448_v56, %v5798_v34  ;;  %v5801_v63 = vmax.f32 %v5539_v4, 0.0  ;;  %v5541_v62 = vadd.f32 %v5540_v27, %v5188_v3  ;;  %v5192_v5 = vadd.f32 %v5191_v11, %v14422_v46  ;;  %v5544_v47 = vpop.f32.mrf.mxu1  ;;  %7886 = vadd.xlane.f32.xlu1 %v7885_v58  ;;  %v14927_v58 = vpop.xlane.xlu0 %7129 }
 0x4ec   : > { %v7889_v35 = vadd.f32 %v16694_v0, %v7576_v42  ;;  %v5193_v24 = vpop.f32.mrf.mxu0  ;;  %16696 = vst [vmem:[#allocation36_spill] sm:$0xff] %v14927_v58 }
 0x4ed   : > { %v7580_v41 = vmul.f32 %v14441_v54, %v5801_v63  ;;  %v5802_v6 = vmax.f32 %v5541_v62, 0.0  ;;  %v5545_v53 = vadd.f32 %v5544_v47, %v5192_v5  ;;  %v5194_v23 = vadd.f32 %v5193_v24, %v14431_v29  ;;  %v5546_v14 = vpop.f32.mrf.mxu1  ;;  %v16697_v24 = vld [vmem:[#allocation110_spill] sm:$0xff] }
 0x4ee   : > { %v5195_v59 = vpop.f32.mrf.mxu0  ;;  %v7890_v32 = vadd.f32 %v7889_v35, %v7577_v22 }
 0x4ef   : > { %v7894_v34 = vadd.f32 %v16695_v60, %v7580_v41  ;;  %v7581_v4 = vmul.f32 %v14448_v56, %v5802_v6  ;;  %v5805_v3 = vmax.f32 %v5545_v53, 0.0  ;;  %v5547_v27 = vadd.f32 %v5546_v14, %v5194_v23  ;;  %v5548_v11 = vpop.f32.mrf.mxu1 }
 0x4f0   : > { %v5196_v42 = vadd.f32 %v5195_v59, %v14422_v46  ;;  %7891 = vadd.xlane.f32.xlu0 %v7890_v32  ;;  %v5197_v63 = vpop.f32.mrf.mxu0  ;;  %v14935_v59 = vpop.xlane.xlu1 %7134 }
 0x4f1   : > { %v7584_v62 = vmul.f32 %v14441_v54, %v5805_v3  ;;  %v5806_v5 = vmax.f32 %v5547_v27, 0.0  ;;  %v5198_v47 = vadd.f32 %v5197_v63, %v14431_v29  ;;  %v5550_v0 = vpop.f32.mrf.mxu1  ;;  %v7895_v60 = vadd.f32 %v7894_v34, %v7581_v4  ;;  %16698 = vst [vmem:[#allocation152_spill] sm:$0xff] %v14935_v59 }
 0x4f2   : > { %v5549_v22 = vadd.f32 %v5548_v11, %v5196_v42  ;;  %v5201_v35 = vpop.f32.mrf.mxu0 }
 0x4f3   : > { %v7899_v41 = vadd.f32 %v16697_v24, %v7584_v62  ;;  %v7585_v6 = vmul.f32 %v14448_v56, %v5806_v5  ;;  %v5551_v53 = vadd.f32 %v5550_v0, %v5198_v47  ;;  %v5202_v23 = vadd.f32 %v5201_v35, %v14422_v46  ;;  %v5554_v14 = vpop.f32.mrf.mxu1  ;;  %7896 = vadd.xlane.f32.xlu1 %v7895_v60  ;;  %v14939_v62 = vpop.xlane.xlu0 %7139  ;;  %v16700_v60 = vld [vmem:[#allocation115_spill] sm:$0xff] }
 0x4f4   : > { %v5809_v32 = vmax.f32 %v5549_v22, 0.0  ;;  %v5203_v3 = vpop.f32.mrf.mxu0  ;;  %16699 = vst [vmem:[#allocation40_spill] sm:$0xff] %v14939_v62 }
 0x4f5   : > { %v5810_v27 = vmax.f32 %v5551_v53, 0.0  ;;  %v5555_v7 = vadd.f32 %v5554_v14, %v5202_v23  ;;  %v5204_v63 = vadd.f32 %v5203_v3, %v14431_v29  ;;  %v5556_v11 = vpop.f32.mrf.mxu1  ;;  %v7900_v42 = vadd.f32 %v7899_v41, %v7585_v6  ;;  %v16701_v23 = vld [vmem:[#allocation3_spill] sm:$0xff] }
 0x4f6   : > { %v7588_v34 = vmul.f32 %v14441_v54, %v5809_v32  ;;  %v5205_v4 = vpop.f32.mrf.mxu0  ;;  %v5837_v14 = vsub.s32 4, %v16701_v23  ;;  %v6276_v8 = vsub.s32 5, %v16701_v23 }
 0x4f7   : > { %v7589_v5 = vmul.f32 %v14448_v56, %v5810_v27  ;;  %v5813_v47 = vmax.f32 %v5555_v7, 0.0  ;;  %v5557_v0 = vadd.f32 %v5556_v11, %v5204_v63  ;;  %v5206_v35 = vadd.f32 %v5205_v4, %v14422_v46  ;;  %v5558_v22 = vpop.f32.mrf.mxu1  ;;  %7901 = vadd.xlane.f32.xlu0 %v7900_v42  ;;  %v16702_v7 = vld [vmem:[#allocation116_spill] sm:$0xff]  ;;  %v14949_v4 = vpop.xlane.xlu1 %7144 }
 0x4f8   : > { %v7904_v24 = vadd.f32 %v16700_v60, %v7588_v34  ;;  %v5207_v53 = vpop.f32.mrf.mxu0  ;;  %16703 = vst [vmem:[#allocation153_spill] sm:$0xff] %v14949_v4  ;;  %v14954_v34 = vld [vmem:[%s15891_s7] sm:$0xff] }
 0x4f9   : > { %v7592_v41 = vmul.f32 %v14441_v54, %v5813_v47  ;;  %v5814_v6 = vmax.f32 %v5557_v0, 0.0  ;;  %v5559_v32 = vadd.f32 %v5558_v22, %v5206_v35  ;;  %v5208_v3 = vadd.f32 %v5207_v53, %v14431_v29  ;;  %v5560_v31 = vpop.f32.mrf.mxu1 }
 0x4fa   : > { %v9738_v51 = vpop.f32.mrf.mxu0  ;;  %v7905_v27 = vadd.f32 %v7904_v24, %v7589_v5  ;;  %v14957_v47 = vrot.slane %v14954_v34, %v5837_v14 }
 0x4fb   : > { %v7909_v63 = vadd.f32 %v16702_v7, %v7592_v41  ;;  %v7593_v46 = vmul.f32 %v14448_v56, %v5814_v6  ;;  %v5817_v11 = vmax.f32 %v5559_v32, 0.0  ;;  %v5561_v42 = vadd.f32 %v5560_v31, %v5208_v3  ;;  %v14964_v41 = vpop.xlane.xlu0 %7149  ;;  %v14968_v7 = vpop.xlane.xlu1 %7154 }
 0x4fc   : > { %7906 = vadd.xlane.f32.xlu1 %v7905_v27  ;;  %v5921_v29 = vpop.f32.mrf.mxu0  ;;  %16704 = vst [vmem:[#allocation39_spill] sm:$0xff] %v14964_v41  ;;  %v5930_v14 = vadd.f32 %v9738_v51, %v14957_v47  ;;  %16705 = vst [vmem:[#allocation154_spill] sm:$0xff] %v14968_v7 }
 0x4fd   : > { %v7596_v5 = vmul.f32 %v14441_v54, %v5817_v11  ;;  %v5818_v0 = vmax.f32 %v5561_v42, 0.0  ;;  %v7910_v22 = vadd.f32 %v7909_v63, %v7593_v46  ;;  %v5922_v24 = vadd.f32 %v5921_v29, %v14957_v47 }
 0x4fe   : > { %v9739_v35 = vpop.f32.mrf.mxu0 }
 0x4ff   : > { %v7914_v60 = vadd.f32 %v14452_v16, %v7596_v5  ;;  %v7597_v31 = vmul.f32 %v14448_v56, %v5818_v0  ;;  %v5933_v53 = vadd.f32 %v9739_v35, %v14957_v47  ;;  %7911 = vadd.xlane.f32.xlu0 %v7910_v22  ;;  %v6176_v16 = vmax.f32 %v5922_v24, 0.0 }
 0x500   : > { %v5924_v6 = vpop.f32.mrf.mxu0  ;;  %v6178_v56 = vmax.f32 %v5930_v14, 0.0 }
 0x501   : > { %v5925_v32 = vadd.f32 %v5924_v6, %v14957_v47  ;;  %v7915_v54 = vadd.f32 %v7914_v60, %v7597_v31  ;;  %v6179_v3 = vmax.f32 %v5933_v53, 0.0 }
 0x502   : > { %v9742_v27 = vpop.f32.mrf.mxu0 }
 0x503   : > { %v6177_v63 = vmax.f32 %v5925_v32, 0.0  ;;  %7916 = vadd.xlane.f32.xlu1 %v7915_v54  ;;  %v6241_v42 = vpack.c.bf16 %v6179_v3, %v6178_v56  ;;  %v5946_v0 = vadd.f32 %v9742_v27, %v14957_v47 }
 0x504   : > { %v5937_v46 = vpop.f32.mrf.mxu0 }
 0x505   : > { %v6240_v11 = vpack.c.bf16 %v6177_v63, %v6176_v16  ;;  %v5938_v51 = vadd.f32 %v5937_v46, %v14957_v47  ;;  %v6182_v14 = vmax.f32 %v5946_v0, 0.0 }
 0x506   : > { %v9743_v29 = vpop.f32.mrf.mxu0 }
 0x507   : > { %v5949_v5 = vadd.f32 %v9743_v29, %v14957_v47  ;;  %9802 = vmatprep.mubr.msk.bf16.mxu1 %vm6284_vm0, %v6240_v11  ;;  %v6180_v24 = vmax.f32 %v5938_v51, 0.0 }
 0x508   : > { %v5940_v35 = vpop.f32.mrf.mxu0  ;;  %9803 = vmatmul.mubr.msk.bf16.vlgmr.msra.gmra.mxu1 %vm6284_vm0, %v6241_v42 }
 0x509   : > { %v5941_v22 = vadd.f32 %v5940_v35, %v14957_v47  ;;  %v6183_v60 = vmax.f32 %v5949_v5, 0.0 }
 0x50a   : > { %v9746_v31 = vpop.f32.mrf.mxu0 }
 0x50b   : > { %v6181_v53 = vmax.f32 %v5941_v22, 0.0  ;;  %v6243_v54 = vpack.c.bf16 %v6183_v60, %v6182_v14  ;;  %v5962_v27 = vadd.f32 %v9746_v31, %v14957_v47 }
 0x50c   : > { %v5953_v6 = vpop.f32.mrf.mxu0 }
 0x50d   : > { %v6242_v32 = vpack.c.bf16 %v6181_v53, %v6180_v24  ;;  %v5954_v16 = vadd.f32 %v5953_v6, %v14957_v47  ;;  %v6186_v5 = vmax.f32 %v5962_v27, 0.0 }
 0x50e   : > { %v9747_v3 = vpop.f32.mrf.mxu0 }
 0x50f   : > { %v5965_v63 = vadd.f32 %v9747_v3, %v14957_v47  ;;  %9806 = vmatprep.mubr.msk.bf16.mxu1 %vm6284_vm0, %v6242_v32  ;;  %v6184_v29 = vmax.f32 %v5954_v16, 0.0 }
 0x510   : > { %v5956_v56 = vpop.f32.mrf.mxu0  ;;  %9807 = vmatmul.mubr.msk.bf16.gmra.mxu1 %vm6284_vm0, %v6243_v54 }
 0x511   : > { %v5957_v46 = vadd.f32 %v5956_v56, %v14957_v47  ;;  %v6187_v11 = vmax.f32 %v5965_v63, 0.0 }
 0x512   : > { %v9750_v42 = vpop.f32.mrf.mxu0 }
 0x513   : > { %v6185_v51 = vmax.f32 %v5957_v46, 0.0  ;;  %v6245_v22 = vpack.c.bf16 %v6187_v11, %v6186_v5  ;;  %v5978_v31 = vadd.f32 %v9750_v42, %v14957_v47 }
 0x514   : > { %v5969_v0 = vpop.f32.mrf.mxu0 }
 0x515   : > { %v6244_v35 = vpack.c.bf16 %v6185_v51, %v6184_v29  ;;  %v5970_v24 = vadd.f32 %v5969_v0, %v14957_v47  ;;  %v6190_v63 = vmax.f32 %v5978_v31, 0.0 }
 0x516   : > { %v9751_v60 = vpop.f32.mrf.mxu0 }
 0x517   : > { %v5981_v53 = vadd.f32 %v9751_v60, %v14957_v47  ;;  %9810 = vmatprep.mubr.msk.bf16.mxu1 %vm6284_vm0, %v6244_v35  ;;  %v6188_v3 = vmax.f32 %v5970_v24, 0.0 }
 0x518   : > { %v5972_v14 = vpop.f32.mrf.mxu0  ;;  %9811 = vmatmul.mubr.msk.bf16.gmra.mxu1 %vm6284_vm0, %v6245_v22 }
 0x519   : > { %v5973_v6 = vadd.f32 %v5972_v14, %v14957_v47  ;;  %v6191_v32 = vmax.f32 %v5981_v53, 0.0 }
 0x51a   : > { %v9754_v54 = vpop.f32.mrf.mxu0 }
 0x51b   : > { %v6189_v16 = vmax.f32 %v5973_v6, 0.0  ;;  %v6247_v46 = vpack.c.bf16 %v6191_v32, %v6190_v63  ;;  %v5994_v42 = vadd.f32 %v9754_v54, %v14957_v47 }
 0x51c   : > { %v5985_v27 = vpop.f32.mrf.mxu0 }
 0x51d   : > { %v6246_v56 = vpack.c.bf16 %v6189_v16, %v6188_v3  ;;  %v5986_v29 = vadd.f32 %v5985_v27, %v14957_v47  ;;  %v6194_v53 = vmax.f32 %v5994_v42, 0.0 }
 0x51e   : > { %v9755_v11 = vpop.f32.mrf.mxu0 }
 0x51f   : > { %v5997_v51 = vadd.f32 %v9755_v11, %v14957_v47  ;;  %9814 = vmatprep.mubr.msk.bf16.mxu1 %vm6284_vm0, %v6246_v56  ;;  %v6192_v60 = vmax.f32 %v5986_v29, 0.0 }
 0x520   : > { %v5988_v5 = vpop.f32.mrf.mxu0  ;;  %9815 = vmatmul.mubr.msk.bf16.gmra.mxu1 %vm6284_vm0, %v6247_v46 }
 0x521   : > { %v5989_v0 = vadd.f32 %v5988_v5, %v14957_v47  ;;  %v6195_v35 = vmax.f32 %v5997_v51, 0.0 }
 0x522   : > { %v9758_v22 = vpop.f32.mrf.mxu0 }
 0x523   : > { %v6193_v24 = vmax.f32 %v5989_v0, 0.0  ;;  %v6249_v6 = vpack.c.bf16 %v6195_v35, %v6194_v53  ;;  %v6010_v54 = vadd.f32 %v9758_v22, %v14957_v47 }
 0x524   : > { %v6001_v31 = vpop.f32.mrf.mxu0 }
 0x525   : > { %v6248_v14 = vpack.c.bf16 %v6193_v24, %v6192_v60  ;;  %v6002_v3 = vadd.f32 %v6001_v31, %v14957_v47  ;;  %v6198_v51 = vmax.f32 %v6010_v54, 0.0 }
 0x526   : > { %v9759_v32 = vpop.f32.mrf.mxu0 }
 0x527   : > { %v6013_v16 = vadd.f32 %v9759_v32, %v14957_v47  ;;  %9818 = vmatprep.mubr.msk.bf16.mxu1 %vm6284_vm0, %v6248_v14  ;;  %v6196_v11 = vmax.f32 %v6002_v3, 0.0 }
 0x528   : > { %v6004_v63 = vpop.f32.mrf.mxu0  ;;  %9819 = vmatmul.mubr.msk.bf16.gmra.mxu1 %vm6284_vm0, %v6249_v6 }
 0x529   : > { %v6005_v27 = vadd.f32 %v6004_v63, %v14957_v47  ;;  %v6199_v56 = vmax.f32 %v6013_v16, 0.0 }
 0x52a   : > { %v9762_v46 = vpop.f32.mrf.mxu0 }
 0x52b   : > { %v6197_v29 = vmax.f32 %v6005_v27, 0.0  ;;  %v6251_v0 = vpack.c.bf16 %v6199_v56, %v6198_v51  ;;  %v6026_v22 = vadd.f32 %v9762_v46, %v14957_v47 }
 0x52c   : > { %v6017_v42 = vpop.f32.mrf.mxu0 }
 0x52d   : > { %v6250_v5 = vpack.c.bf16 %v6197_v29, %v6196_v11  ;;  %v6018_v60 = vadd.f32 %v6017_v42, %v14957_v47  ;;  %v6202_v16 = vmax.f32 %v6026_v22, 0.0 }
 0x52e   : > { %v9763_v35 = vpop.f32.mrf.mxu0 }
 0x52f   : > { %v6029_v24 = vadd.f32 %v9763_v35, %v14957_v47  ;;  %9822 = vmatprep.mubr.msk.bf16.mxu1 %vm6284_vm0, %v6250_v5  ;;  %v6200_v32 = vmax.f32 %v6018_v60, 0.0 }
 0x530   : > { %v6020_v53 = vpop.f32.mrf.mxu0  ;;  %9823 = vmatmul.mubr.msk.bf16.gmra.mxu1 %vm6284_vm0, %v6251_v0 }
 0x531   : > { %v6021_v31 = vadd.f32 %v6020_v53, %v14957_v47  ;;  %v6203_v14 = vmax.f32 %v6029_v24, 0.0 }
 0x532   : > { %v9766_v6 = vpop.f32.mrf.mxu0 }
 0x533   : > { %v6201_v3 = vmax.f32 %v6021_v31, 0.0  ;;  %v6253_v27 = vpack.c.bf16 %v6203_v14, %v6202_v16  ;;  %v6042_v46 = vadd.f32 %v9766_v6, %v14957_v47 }
 0x534   : > { %v6033_v54 = vpop.f32.mrf.mxu0 }
 0x535   : > { %v6252_v63 = vpack.c.bf16 %v6201_v3, %v6200_v32  ;;  %v6034_v11 = vadd.f32 %v6033_v54, %v14957_v47  ;;  %v6206_v24 = vmax.f32 %v6042_v46, 0.0 }
 0x536   : > { %v9767_v56 = vpop.f32.mrf.mxu0 }
 0x537   : > { %v6045_v29 = vadd.f32 %v9767_v56, %v14957_v47  ;;  %9826 = vmatprep.mubr.msk.bf16.mxu1 %vm6284_vm0, %v6252_v63  ;;  %v6204_v35 = vmax.f32 %v6034_v11, 0.0 }
 0x538   : > { %v6036_v51 = vpop.f32.mrf.mxu0  ;;  %9827 = vmatmul.mubr.msk.bf16.gmra.mxu1 %vm6284_vm0, %v6253_v27 }
 0x539   : > { %v6037_v42 = vadd.f32 %v6036_v51, %v14957_v47  ;;  %v6207_v5 = vmax.f32 %v6045_v29, 0.0 }
 0x53a   : > { %v9770_v0 = vpop.f32.mrf.mxu0 }
 0x53b   : > { %v6205_v60 = vmax.f32 %v6037_v42, 0.0  ;;  %v6255_v31 = vpack.c.bf16 %v6207_v5, %v6206_v24  ;;  %v6058_v6 = vadd.f32 %v9770_v0, %v14957_v47 }
 0x53c   : > { %v6049_v22 = vpop.f32.mrf.mxu0 }
 0x53d   : > { %v6254_v53 = vpack.c.bf16 %v6205_v60, %v6204_v35  ;;  %v6050_v32 = vadd.f32 %v6049_v22, %v14957_v47  ;;  %v6210_v29 = vmax.f32 %v6058_v6, 0.0 }
 0x53e   : > { %v9771_v14 = vpop.f32.mrf.mxu0 }
 0x53f   : > { %v6061_v3 = vadd.f32 %v9771_v14, %v14957_v47  ;;  %9830 = vmatprep.mubr.msk.bf16.mxu1 %vm6284_vm0, %v6254_v53  ;;  %v6208_v56 = vmax.f32 %v6050_v32, 0.0 }
 0x540   : > { %v6052_v16 = vpop.f32.mrf.mxu0  ;;  %9831 = vmatmul.mubr.msk.bf16.gmra.mxu1 %vm6284_vm0, %v6255_v31 }
 0x541   : > { %v6053_v54 = vadd.f32 %v6052_v16, %v14957_v47  ;;  %v6211_v63 = vmax.f32 %v6061_v3, 0.0 }
 0x542   : > { %v9774_v27 = vpop.f32.mrf.mxu0 }
 0x543   : > { %v6209_v11 = vmax.f32 %v6053_v54, 0.0  ;;  %v6257_v42 = vpack.c.bf16 %v6211_v63, %v6210_v29  ;;  %v6074_v0 = vadd.f32 %v9774_v27, %v14957_v47 }
 0x544   : > { %v6065_v46 = vpop.f32.mrf.mxu0 }
 0x545   : > { %v6256_v51 = vpack.c.bf16 %v6209_v11, %v6208_v56  ;;  %v6066_v35 = vadd.f32 %v6065_v46, %v14957_v47  ;;  %v6214_v3 = vmax.f32 %v6074_v0, 0.0 }
 0x546   : > { %v9775_v5 = vpop.f32.mrf.mxu0 }
 0x547   : > { %v6077_v60 = vadd.f32 %v9775_v5, %v14957_v47  ;;  %9834 = vmatprep.mubr.msk.bf16.mxu1 %vm6284_vm0, %v6256_v51  ;;  %v6212_v14 = vmax.f32 %v6066_v35, 0.0 }
 0x548   : > { %v6068_v24 = vpop.f32.mrf.mxu0  ;;  %9835 = vmatmul.mubr.msk.bf16.gmra.mxu1 %vm6284_vm0, %v6257_v42 }
 0x549   : > { %v6069_v22 = vadd.f32 %v6068_v24, %v14957_v47  ;;  %v6215_v53 = vmax.f32 %v6077_v60, 0.0 }
 0x54a   : > { %v9778_v31 = vpop.f32.mrf.mxu0 }
 0x54b   : > { %v6213_v32 = vmax.f32 %v6069_v22, 0.0  ;;  %v6259_v54 = vpack.c.bf16 %v6215_v53, %v6214_v3  ;;  %v6090_v27 = vadd.f32 %v9778_v31, %v14957_v47 }
 0x54c   : > { %v6081_v6 = vpop.f32.mrf.mxu0 }
 0x54d   : > { %v6258_v16 = vpack.c.bf16 %v6213_v32, %v6212_v14  ;;  %v6082_v56 = vadd.f32 %v6081_v6, %v14957_v47  ;;  %v6218_v60 = vmax.f32 %v6090_v27, 0.0 }
 0x54e   : > { %v9779_v63 = vpop.f32.mrf.mxu0 }
 0x54f   : > { %v6093_v11 = vadd.f32 %v9779_v63, %v14957_v47  ;;  %9838 = vmatprep.mubr.msk.bf16.mxu1 %vm6284_vm0, %v6258_v16  ;;  %v6216_v5 = vmax.f32 %v6082_v56, 0.0 }
 0x550   : > { %v6084_v29 = vpop.f32.mrf.mxu0  ;;  %9839 = vmatmul.mubr.msk.bf16.gmra.mxu1 %vm6284_vm0, %v6259_v54 }
 0x551   : > { %v6085_v46 = vadd.f32 %v6084_v29, %v14957_v47  ;;  %v6219_v51 = vmax.f32 %v6093_v11, 0.0 }
 0x552   : > { %v9782_v42 = vpop.f32.mrf.mxu0 }
 0x553   : > { %v6217_v35 = vmax.f32 %v6085_v46, 0.0  ;;  %v6261_v22 = vpack.c.bf16 %v6219_v51, %v6218_v60  ;;  %v6106_v31 = vadd.f32 %v9782_v42, %v14957_v47 }
 0x554   : > { %v6097_v0 = vpop.f32.mrf.mxu0 }
 0x555   : > { %v6260_v24 = vpack.c.bf16 %v6217_v35, %v6216_v5  ;;  %v6098_v14 = vadd.f32 %v6097_v0, %v14957_v47  ;;  %v6222_v11 = vmax.f32 %v6106_v31, 0.0 }
 0x556   : > { %v9783_v53 = vpop.f32.mrf.mxu0 }
 0x557   : > { %v6109_v32 = vadd.f32 %v9783_v53, %v14957_v47  ;;  %9842 = vmatprep.mubr.msk.bf16.mxu1 %vm6284_vm0, %v6260_v24  ;;  %v6220_v63 = vmax.f32 %v6098_v14, 0.0 }
 0x558   : > { %v6100_v3 = vpop.f32.mrf.mxu0  ;;  %9843 = vmatmul.mubr.msk.bf16.gmra.mxu1 %vm6284_vm0, %v6261_v22 }
 0x559   : > { %v6101_v6 = vadd.f32 %v6100_v3, %v14957_v47  ;;  %v6223_v16 = vmax.f32 %v6109_v32, 0.0 }
 0x55a   : > { %v9786_v54 = vpop.f32.mrf.mxu0 }
 0x55b   : > { %v6221_v56 = vmax.f32 %v6101_v6, 0.0  ;;  %v6263_v46 = vpack.c.bf16 %v6223_v16, %v6222_v11  ;;  %v6122_v42 = vadd.f32 %v9786_v54, %v14957_v47 }
 0x55c   : > { %v6113_v27 = vpop.f32.mrf.mxu0 }
 0x55d   : > { %v6262_v29 = vpack.c.bf16 %v6221_v56, %v6220_v63  ;;  %v6114_v5 = vadd.f32 %v6113_v27, %v14957_v47  ;;  %v6226_v32 = vmax.f32 %v6122_v42, 0.0 }
 0x55e   : > { %v9787_v51 = vpop.f32.mrf.mxu0 }
 0x55f   : > { %v6125_v35 = vadd.f32 %v9787_v51, %v14957_v47  ;;  %9846 = vmatprep.mubr.msk.bf16.mxu1 %vm6284_vm0, %v6262_v29  ;;  %v6224_v53 = vmax.f32 %v6114_v5, 0.0 }
 0x560   : > { %v6116_v60 = vpop.f32.mrf.mxu0  ;;  %9847 = vmatmul.mubr.msk.bf16.gmra.mxu1 %vm6284_vm0, %v6263_v46 }
 0x561   : > { %v6117_v0 = vadd.f32 %v6116_v60, %v14957_v47  ;;  %v6227_v24 = vmax.f32 %v6125_v35, 0.0 }
 0x562   : > { %v9790_v22 = vpop.f32.mrf.mxu0 }
 0x563   : > { %v6225_v14 = vmax.f32 %v6117_v0, 0.0  ;;  %v6265_v6 = vpack.c.bf16 %v6227_v24, %v6226_v32  ;;  %v6138_v54 = vadd.f32 %v9790_v22, %v14957_v47 }
 0x564   : > { %v6129_v31 = vpop.f32.mrf.mxu0 }
 0x565   : > { %v6264_v3 = vpack.c.bf16 %v6225_v14, %v6224_v53  ;;  %v6130_v63 = vadd.f32 %v6129_v31, %v14957_v47  ;;  %v6230_v35 = vmax.f32 %v6138_v54, 0.0 }
 0x566   : > { %v9791_v16 = vpop.f32.mrf.mxu0 }
 0x567   : > { %v6141_v56 = vadd.f32 %v9791_v16, %v14957_v47  ;;  %9850 = vmatprep.mubr.msk.bf16.mxu1 %vm6284_vm0, %v6264_v3  ;;  %v6228_v51 = vmax.f32 %v6130_v63, 0.0 }
 0x568   : > { %v6132_v11 = vpop.f32.mrf.mxu0  ;;  %9851 = vmatmul.mubr.msk.bf16.gmra.mxu1 %vm6284_vm0, %v6265_v6 }
 0x569   : > { %v6133_v27 = vadd.f32 %v6132_v11, %v14957_v47  ;;  %v6231_v29 = vmax.f32 %v6141_v56, 0.0 }
 0x56a   : > { %v9794_v46 = vpop.f32.mrf.mxu0 }
 0x56b   : > { %v6229_v5 = vmax.f32 %v6133_v27, 0.0  ;;  %v6267_v0 = vpack.c.bf16 %v6231_v29, %v6230_v35  ;;  %v6154_v22 = vadd.f32 %v9794_v46, %v14957_v47 }
 0x56c   : > { %v6145_v42 = vpop.f32.mrf.mxu0 }
 0x56d   : > { %v6266_v60 = vpack.c.bf16 %v6229_v5, %v6228_v51  ;;  %v6146_v53 = vadd.f32 %v6145_v42, %v14957_v47  ;;  %v6234_v56 = vmax.f32 %v6154_v22, 0.0 }
 0x56e   : > { %v9795_v24 = vpop.f32.mrf.mxu0 }
 0x56f   : > { %v6157_v14 = vadd.f32 %v9795_v24, %v14957_v47  ;;  %9854 = vmatprep.mubr.msk.bf16.mxu1 %vm6284_vm0, %v6266_v60  ;;  %v6232_v16 = vmax.f32 %v6146_v53, 0.0 }
 0x570   : > { %v6148_v32 = vpop.f32.mrf.mxu0  ;;  %9855 = vmatmul.mubr.msk.bf16.gmra.mxu1 %vm6284_vm0, %v6267_v0 }
 0x571   : > { %v6149_v31 = vadd.f32 %v6148_v32, %v14957_v47  ;;  %v6235_v3 = vmax.f32 %v6157_v14, 0.0  ;;  %v15062_v32 = vpop.xlane.xlu0 %7159 }
 0x572   : > { %v9798_v6 = vpop.f32.mrf.mxu0  ;;  %16706 = vst [vmem:[#allocation43_spill] sm:$0xff] %v15062_v32 }
 0x573   : > { %v6233_v63 = vmax.f32 %v6149_v31, 0.0  ;;  %v6170_v54 = vadd.f32 %v9798_v6, %v14957_v47  ;;  %v6269_v51 = vpack.c.bf16 %v6235_v3, %v6234_v56  ;;  %v15064_v31 = vpop.xlane.xlu1 %7164 }
 0x574   : > { %v6161_v11 = vpop.f32.mrf.mxu0  ;;  %16707 = vst [vmem:[#allocation156_spill] sm:$0xff] %v15064_v31 }
 0x575   : > { %v6268_v27 = vpack.c.bf16 %v6233_v63, %v6232_v16  ;;  %v6162_v29 = vadd.f32 %v6161_v11, %v14957_v47  ;;  %v6238_v35 = vmax.f32 %v6170_v54, 0.0  ;;  %v15066_v3 = vpop.xlane.xlu0 %7169 }
 0x576   : > { %v9799_v5 = vpop.f32.mrf.mxu0  ;;  %16708 = vst [vmem:[#allocation41_spill] sm:$0xff] %v15066_v3 }
 0x577   : > { %v6173_v46 = vadd.f32 %v9799_v5, %v14957_v47  ;;  %9858 = vmatprep.mubr.msk.bf16.mxu1 %vm6284_vm0, %v6268_v27  ;;  %v6236_v60 = vmax.f32 %v6162_v29, 0.0  ;;  %v15068_v6 = vpop.xlane.xlu1 %7174 }
 0x578   : > { %v6164_v42 = vpop.f32.mrf.mxu0  ;;  %9859 = vmatmul.mubr.msk.bf16.gmra.mxu1 %vm6284_vm0, %v6269_v51  ;;  %16709 = vst [vmem:[#allocation157_spill] sm:$0xff] %v15068_v6 }
 0x579   : > { %v6239_v0 = vmax.f32 %v6173_v46, 0.0  ;;  %v6165_v24 = vadd.f32 %v6164_v42, %v14957_v47  ;;  %v15070_v16 = vpop.xlane.xlu0 %7179 }
 0x57a   : > { %16710 = vst [vmem:[#allocation46_spill] sm:$0xff] %v15070_v16 }
 0x57b   : > { %v6237_v53 = vmax.f32 %v6165_v24, 0.0  ;;  %v6271_v14 = vpack.c.bf16 %v6239_v0, %v6238_v35  ;;  %v15072_v63 = vpop.xlane.xlu1 %7184 }
 0x57c   : > { %16711 = vst [vmem:[#allocation158_spill] sm:$0xff] %v15072_v63 }
 0x57d   : > { %v6270_v22 = vpack.c.bf16 %v6237_v53, %v6236_v60  ;;  %v15074_v47 = vpop.xlane.xlu0 %7189 }
 0x57e   : > { %16712 = vst [vmem:[#allocation44_spill] sm:$0xff] %v15074_v47 }
 0x57f   : > { %9862 = vmatprep.mubr.msk.bf16.mxu1 %vm6284_vm0, %v6270_v22  ;;  %v15076_v56 = vpop.xlane.xlu1 %7194 }
 0x580   : > { %9863 = vmatmul.mubr.msk.bf16.gmra.mxu1 %vm6284_vm0, %v6271_v14  ;;  %16713 = vst [vmem:[#allocation159_spill] sm:$0xff] %v15076_v56 }
 0x581   : > { %v15078_v54 = vpop.xlane.xlu0 %7199 }
 0x582   : > { %16714 = vst [vmem:[#allocation49_spill] sm:$0xff] %v15078_v54 }
 0x583   : > { %v15080_v11 = vpop.xlane.xlu1 %7204 }
 0x584   : > { %16715 = vst [vmem:[#allocation160_spill] sm:$0xff] %v15080_v11 }
 0x585   : > { %v15082_v27 = vpop.xlane.xlu0 %7209 }
 0x586   : > { %16716 = vst [vmem:[#allocation47_spill] sm:$0xff] %v15082_v27 }
 0x587   : > { %v15084_v29 = vpop.xlane.xlu1 %7214 }
 0x588   : > { %16717 = vst [vmem:[#allocation161_spill] sm:$0xff] %v15084_v29 }
 0x589   : > { %v15086_v51 = vpop.xlane.xlu0 %7219 }
 0x58a   : > { %16718 = vst [vmem:[#allocation52_spill] sm:$0xff] %v15086_v51 }
 0x58b   : > { %v15088_v5 = vpop.xlane.xlu1 %7224 }
 0x58c   : > { %16719 = vst [vmem:[#allocation162_spill] sm:$0xff] %v15088_v5 }
 0x58d   : > { %v15090_v46 = vpop.xlane.xlu0 %7229 }
 0x58e   : > { %16720 = vst [vmem:[#allocation32_spill] sm:$0xff] %v15090_v46 }
 0x58f   : > { %v15092_v35 = vpop.xlane.xlu1 %7234 }
 0x590   : > { %16721 = vst [vmem:[#allocation149_spill] sm:$0xff] %v15092_v35  ;;  %v15114_v35 = vrot.slane %v14954_v34, %v6276_v8 }
 0x591   : > { %v15094_v42 = vpop.xlane.xlu0 %7239 }
 0x592   : > { %16722 = vst [vmem:[#allocation50_spill] sm:$0xff] %v15094_v42 }
 0x593   : > { %v15096_v60 = vpop.xlane.xlu1 %7244 }
 0x594   : > { %16723 = vst [vmem:[#allocation55_spill] sm:$0xff] %v15096_v60  ;;  %v7984_v60 = vsub.s32 6, %v16701_v23 }
 0x595   : > { %v15098_v0 = vpop.xlane.xlu0 %7249 }
 0x596   : > { %16724 = vst [vmem:[#allocation53_spill] sm:$0xff] %v15098_v0 }
 0x597   : > { %v15100_v24 = vpop.xlane.xlu1 %7254 }
 0x598   : > { %16725 = vst [vmem:[#allocation163_spill] sm:$0xff] %v15100_v24 }
 0x599   : > { %v15102_v53 = vpop.xlane.xlu0 %7259 }
 0x59a   : > { %16726 = vst [vmem:[#allocation57_spill] sm:$0xff] %v15102_v53 }
 0x59b   : > { %v15104_v14 = vpop.xlane.xlu1 %7264 }
 0x59c   : > { %16727 = vst [vmem:[#allocation164_spill] sm:$0xff] %v15104_v14 }
 0x59d   : > { %v15106_v22 = vpop.xlane.xlu0 %7269 }
 0x59e   : > { %16728 = vst [vmem:[#allocation56_spill] sm:$0xff] %v15106_v22  ;;  %v15123_v22 = vrot.slane %v14954_v34, %v7984_v60 }
 0x59f   : > { %v15109_v9 = vpop.xlane.xlu1 %7274 }
 0x5a0   : > { %16729 = vst [vmem:[#allocation165_spill] sm:$0xff] %v15109_v9 }
 0x5a1   : > { %v15111_v46 = vpop.xlane.xlu0 %7279 }
 0x5a2   : > { %16730 = vst [vmem:[#allocation62_spill] sm:$0xff] %v15111_v46 }
 0x5a3   : > { %v15117_v42 = vpop.xlane.xlu1 %7284 }
 0x5a4   : > { %16731 = vst [vmem:[#allocation166_spill] sm:$0xff] %v15117_v42 }
 0x5a5   : > { %v15119_v24 = vpop.xlane.xlu0 %7289 }
 0x5a6   : > { %16732 = vst [vmem:[#allocation169_spill] sm:$0xff] %v15119_v24 }
 0x5a7   : > { %v15126_v29 = vpop.xlane.xlu1 %7294 }
 0x5a8   : > { %16733 = vst [vmem:[#allocation60_spill] sm:$0xff] %v15126_v29 }
 0x5a9   : > { %v15128_v8 = vpop.xlane.xlu0 %7299 }
 0x5aa   : > { %16734 = vst [vmem:[#allocation173_spill] sm:$0xff] %v15128_v8 }
 0x5ad   : > { %v15137_v29 = vpop.xlane.xlu0 %7309 }
 0x5ae   : > { %16736 = vst [vmem:[#allocation175_spill] sm:$0xff] %v15137_v29 }
 0x5b1   : > { %v15147_v29 = vpop.xlane.xlu0 %7319 }
 0x5b2   : > { %16738 = vst [vmem:[#allocation64_spill] sm:$0xff] %v15147_v29 }
 0x5b5   : > { %v15157_v29 = vpop.xlane.xlu0 %7601 }
 0x5b9   : > { %v15167_v44 = vpop.xlane.xlu0 %7611 }
 0x5bd   : > { %v15177_v51 = vpop.xlane.xlu0 %7621 }
 0x5c1   : > { %v15187_v19 = vpop.xlane.xlu0 %7631 }
 0x5c5   : > { %v15197_v11 = vpop.xlane.xlu0 %7641 }
 0x5c8   : > { %v9804_v0 = vpop.f32.mrf.mxu1 }
 0x5c9   : > { %v6424_v14 = vadd.f32 %v9804_v0, %v15114_v35  ;;  %v15207_v39 = vpop.xlane.xlu0 %7651 }
 0x5ca   : > { %v6415_v53 = vpop.f32.mrf.mxu1 }
 0x5cb   : > { %v6672_v12 = vmax.f32 %v6424_v14, 0.0  ;;  %v6416_v9 = vadd.f32 %v6415_v53, %v15114_v35  ;;  %v15135_v53 = vpop.xlane.xlu1 %7304 }
 0x5cc   : > { %v9805_v46 = vpop.f32.mrf.mxu1  ;;  %16735 = vst [vmem:[#allocation67_spill] sm:$0xff] %v15135_v53 }
 0x5cd   : > { %v7988_v23 = vmul.f32 %v15123_v22, %v6672_v12  ;;  %v6670_v45 = vmax.f32 %v6416_v9, 0.0  ;;  %v6427_v42 = vadd.f32 %v9805_v46, %v15114_v35  ;;  %v15217_v6 = vpop.xlane.xlu0 %7661 }
 0x5ce   : > { %v6418_v24 = vpop.f32.mrf.mxu1 }
 0x5cf   : > { %v7986_v0 = vmul.f32 %v15123_v22, %v6670_v45  ;;  %v6673_v27 = vmax.f32 %v6427_v42, 0.0  ;;  %v6419_v34 = vadd.f32 %v6418_v24, %v15114_v35  ;;  %v8056_v60 = vsel %vm6284_vm0, %v7988_v23, 0.0  ;;  %v15145_v53 = vpop.xlane.xlu1 %7314 }
 0x5d0   : > { %v9808_v14 = vpop.f32.mrf.mxu1  ;;  %8057 = vadd.xlane.f32.xlu0 %v8056_v60  ;;  %16737 = vst [vmem:[#allocation176_spill] sm:$0xff] %v15145_v53 }
 0x5d1   : > { %v7989_v8 = vmul.f32 %v15123_v22, %v6673_v27  ;;  %v6671_v12 = vmax.f32 %v6419_v34, 0.0  ;;  %v6440_v9 = vadd.f32 %v9808_v14, %v15114_v35  ;;  %v8050_v5 = vsel %vm6284_vm0, %v7986_v0, 0.0  ;;  %v15227_v63 = vpop.xlane.xlu0 %7671 }
 0x5d2   : > { %v6431_v46 = vpop.f32.mrf.mxu1 }
 0x5d3   : > { %v7987_v45 = vmul.f32 %v15123_v22, %v6671_v12  ;;  %v6676_v42 = vmax.f32 %v6440_v9, 0.0  ;;  %v6432_v24 = vadd.f32 %v6431_v46, %v15114_v35  ;;  %v8059_v23 = vsel %vm6284_vm0, %v7989_v8, 0.0  ;;  %v15155_v53 = vpop.xlane.xlu1 %7324 }
 0x5d4   : > { %v9809_v60 = vpop.f32.mrf.mxu1  ;;  %8060 = vadd.xlane.f32.xlu1 %v8059_v23  ;;  %8051 = vadd.xlane.f32.xlu0 %v8050_v5  ;;  %16739 = vst [vmem:[#allocation2_spill] sm:$0xff] %v15155_v53 }
 0x5d5   : > { %v7992_v27 = vmul.f32 %v15123_v22, %v6676_v42  ;;  %v6674_v34 = vmax.f32 %v6432_v24, 0.0  ;;  %v6443_v14 = vadd.f32 %v9809_v60, %v15114_v35  ;;  %v8053_v12 = vsel %vm6284_vm0, %v7987_v45, 0.0  ;;  %v15237_v7 = vpop.xlane.xlu0 %7681 }
 0x5d6   : > { %v6434_v0 = vpop.f32.mrf.mxu1 }
 0x5d7   : > { %v7990_v9 = vmul.f32 %v15123_v22, %v6674_v34  ;;  %v6677_v46 = vmax.f32 %v6443_v14, 0.0  ;;  %v6435_v8 = vadd.f32 %v6434_v0, %v15114_v35  ;;  %v8068_v23 = vsel %vm6284_vm0, %v7992_v27, 0.0  ;;  %v15165_v53 = vpop.xlane.xlu1 %7606 }
 0x5d8   : > { %v9812_v5 = vpop.f32.mrf.mxu1  ;;  %8054 = vadd.xlane.f32.xlu1 %v8053_v12  ;;  %8069 = vadd.xlane.f32.xlu0 %v8068_v23 }
 0x5d9   : > { %v7993_v42 = vmul.f32 %v15123_v22, %v6677_v46  ;;  %v6675_v24 = vmax.f32 %v6435_v8, 0.0  ;;  %v6456_v60 = vadd.f32 %v9812_v5, %v15114_v35  ;;  %v8062_v34 = vsel %vm6284_vm0, %v7990_v9, 0.0  ;;  %v15247_v31 = vpop.xlane.xlu0 %7691 }
 0x5da   : > { %v6447_v45 = vpop.f32.mrf.mxu1 }
 0x5db   : > { %v7991_v14 = vmul.f32 %v15123_v22, %v6675_v24  ;;  %v6680_v0 = vmax.f32 %v6456_v60, 0.0  ;;  %v6448_v27 = vadd.f32 %v6447_v45, %v15114_v35  ;;  %v8071_v12 = vsel %vm6284_vm0, %v7993_v42, 0.0  ;;  %v15175_v38 = vpop.xlane.xlu1 %7616 }
 0x5dc   : > { %v9813_v23 = vpop.f32.mrf.mxu1  ;;  %8072 = vadd.xlane.f32.xlu1 %v8071_v12  ;;  %8063 = vadd.xlane.f32.xlu0 %v8062_v34 }
 0x5dd   : > { %v7996_v46 = vmul.f32 %v15123_v22, %v6680_v0  ;;  %v6678_v8 = vmax.f32 %v6448_v27, 0.0  ;;  %v6459_v5 = vadd.f32 %v9813_v23, %v15114_v35  ;;  %v8065_v24 = vsel %vm6284_vm0, %v7991_v14, 0.0  ;;  %v15257_v59 = vpop.xlane.xlu0 %7701 }
 0x5de   : > { %v6450_v9 = vpop.f32.mrf.mxu1 }
 0x5df   : > { %v7994_v60 = vmul.f32 %v15123_v22, %v6678_v8  ;;  %v6681_v45 = vmax.f32 %v6459_v5, 0.0  ;;  %v6451_v42 = vadd.f32 %v6450_v9, %v15114_v35  ;;  %v8080_v12 = vsel %vm6284_vm0, %v7996_v46, 0.0  ;;  %v15185_v56 = vpop.xlane.xlu1 %7626 }
 0x5e0   : > { %v9816_v34 = vpop.f32.mrf.mxu1  ;;  %8066 = vadd.xlane.f32.xlu1 %v8065_v24  ;;  %8081 = vadd.xlane.f32.xlu0 %v8080_v12 }
 0x5e1   : > { %v7997_v0 = vmul.f32 %v15123_v22, %v6681_v45  ;;  %v6679_v27 = vmax.f32 %v6451_v42, 0.0  ;;  %v6472_v23 = vadd.f32 %v9816_v34, %v15114_v35  ;;  %v8074_v8 = vsel %vm6284_vm0, %v7994_v60, 0.0  ;;  %v15267_v4 = vpop.xlane.xlu0 %7711 }
 0x5e2   : > { %v6463_v14 = vpop.f32.mrf.mxu1 }
 0x5e3   : > { %v7995_v5 = vmul.f32 %v15123_v22, %v6679_v27  ;;  %v6684_v9 = vmax.f32 %v6472_v23, 0.0  ;;  %v6464_v46 = vadd.f32 %v6463_v14, %v15114_v35  ;;  %v8083_v24 = vsel %vm6284_vm0, %v7997_v0, 0.0  ;;  %v15195_v47 = vpop.xlane.xlu1 %7636 }
 0x5e4   : > { %v9817_v12 = vpop.f32.mrf.mxu1  ;;  %8084 = vadd.xlane.f32.xlu1 %v8083_v24  ;;  %8075 = vadd.xlane.f32.xlu0 %v8074_v8 }
 0x5e5   : > { %v8000_v45 = vmul.f32 %v15123_v22, %v6684_v9  ;;  %v6682_v42 = vmax.f32 %v6464_v46, 0.0  ;;  %v6475_v34 = vadd.f32 %v9817_v12, %v15114_v35  ;;  %v8077_v27 = vsel %vm6284_vm0, %v7995_v5, 0.0 }
 0x5e6   : > { %v6466_v60 = vpop.f32.mrf.mxu1 }
 0x5e7   : > { %v7998_v23 = vmul.f32 %v15123_v22, %v6682_v42  ;;  %v6685_v14 = vmax.f32 %v6475_v34, 0.0  ;;  %v6467_v0 = vadd.f32 %v6466_v60, %v15114_v35  ;;  %v8092_v24 = vsel %vm6284_vm0, %v8000_v45, 0.0  ;;  %v15205_v21 = vpop.xlane.xlu1 %7646 }
 0x5e8   : > { %v9820_v8 = vpop.f32.mrf.mxu1  ;;  %8078 = vadd.xlane.f32.xlu1 %v8077_v27  ;;  %8093 = vadd.xlane.f32.xlu0 %v8092_v24 }
 0x5e9   : > { %v8001_v9 = vmul.f32 %v15123_v22, %v6685_v14  ;;  %v6683_v46 = vmax.f32 %v6467_v0, 0.0  ;;  %v6488_v12 = vadd.f32 %v9820_v8, %v15114_v35  ;;  %v8086_v42 = vsel %vm6284_vm0, %v7998_v23, 0.0 }
 0x5ea   : > { %v6479_v5 = vpop.f32.mrf.mxu1 }
 0x5eb   : > { %v7999_v34 = vmul.f32 %v15123_v22, %v6683_v46  ;;  %v6688_v60 = vmax.f32 %v6488_v12, 0.0  ;;  %v6480_v45 = vadd.f32 %v6479_v5, %v15114_v35  ;;  %v8095_v27 = vsel %vm6284_vm0, %v8001_v9, 0.0  ;;  %v15215_v54 = vpop.xlane.xlu1 %7656 }
 0x5ec   : > { %v9821_v24 = vpop.f32.mrf.mxu1  ;;  %8096 = vadd.xlane.f32.xlu1 %v8095_v27  ;;  %8087 = vadd.xlane.f32.xlu0 %v8086_v42 }
 0x5ed   : > { %v8004_v14 = vmul.f32 %v15123_v22, %v6688_v60  ;;  %v6686_v0 = vmax.f32 %v6480_v45, 0.0  ;;  %v6491_v8 = vadd.f32 %v9821_v24, %v15114_v35  ;;  %v8089_v46 = vsel %vm6284_vm0, %v7999_v34, 0.0 }
 0x5ee   : > { %v6482_v23 = vpop.f32.mrf.mxu1 }
 0x5ef   : > { %v8002_v12 = vmul.f32 %v15123_v22, %v6686_v0  ;;  %v6689_v5 = vmax.f32 %v6491_v8, 0.0  ;;  %v6483_v9 = vadd.f32 %v6482_v23, %v15114_v35  ;;  %v8104_v27 = vsel %vm6284_vm0, %v8004_v14, 0.0  ;;  %v15225_v3 = vpop.xlane.xlu1 %7666 }
 0x5f0   : > { %v9824_v42 = vpop.f32.mrf.mxu1  ;;  %8090 = vadd.xlane.f32.xlu1 %v8089_v46  ;;  %8105 = vadd.xlane.f32.xlu0 %v8104_v27 }
 0x5f1   : > { %v8005_v60 = vmul.f32 %v15123_v22, %v6689_v5  ;;  %v6687_v45 = vmax.f32 %v6483_v9, 0.0  ;;  %v6504_v24 = vadd.f32 %v9824_v42, %v15114_v35  ;;  %v8098_v0 = vsel %vm6284_vm0, %v8002_v12, 0.0 }
 0x5f2   : > { %v6495_v34 = vpop.f32.mrf.mxu1 }
 0x5f3   : > { %v8003_v8 = vmul.f32 %v15123_v22, %v6687_v45  ;;  %v6692_v23 = vmax.f32 %v6504_v24, 0.0  ;;  %v6496_v14 = vadd.f32 %v6495_v34, %v15114_v35  ;;  %v8107_v46 = vsel %vm6284_vm0, %v8005_v60, 0.0  ;;  %v15235_v16 = vpop.xlane.xlu1 %7676 }
 0x5f4   : > { %v9825_v27 = vpop.f32.mrf.mxu1  ;;  %8108 = vadd.xlane.f32.xlu1 %v8107_v46  ;;  %8099 = vadd.xlane.f32.xlu0 %v8098_v0 }
 0x5f5   : > { %v8008_v5 = vmul.f32 %v15123_v22, %v6692_v23  ;;  %v6690_v9 = vmax.f32 %v6496_v14, 0.0  ;;  %v6507_v42 = vadd.f32 %v9825_v27, %v15114_v35  ;;  %v8101_v45 = vsel %vm6284_vm0, %v8003_v8, 0.0 }
 0x5f6   : > { %v6498_v12 = vpop.f32.mrf.mxu1 }
 0x5f7   : > { %v8006_v24 = vmul.f32 %v15123_v22, %v6690_v9  ;;  %v6693_v34 = vmax.f32 %v6507_v42, 0.0  ;;  %v6499_v60 = vadd.f32 %v6498_v12, %v15114_v35  ;;  %v8116_v46 = vsel %vm6284_vm0, %v8008_v5, 0.0  ;;  %v15245_v41 = vpop.xlane.xlu1 %7686 }
 0x5f8   : > { %v9828_v0 = vpop.f32.mrf.mxu1  ;;  %8102 = vadd.xlane.f32.xlu1 %v8101_v45  ;;  %8117 = vadd.xlane.f32.xlu0 %v8116_v46 }
 0x5f9   : > { %v8009_v23 = vmul.f32 %v15123_v22, %v6693_v34  ;;  %v6691_v14 = vmax.f32 %v6499_v60, 0.0  ;;  %v6520_v27 = vadd.f32 %v9828_v0, %v15114_v35  ;;  %v8110_v9 = vsel %vm6284_vm0, %v8006_v24, 0.0 }
 0x5fa   : > { %v6511_v8 = vpop.f32.mrf.mxu1 }
 0x5fb   : > { %v8007_v42 = vmul.f32 %v15123_v22, %v6691_v14  ;;  %v6696_v12 = vmax.f32 %v6520_v27, 0.0  ;;  %v6512_v5 = vadd.f32 %v6511_v8, %v15114_v35  ;;  %v8119_v45 = vsel %vm6284_vm0, %v8009_v23, 0.0  ;;  %v15255_v32 = vpop.xlane.xlu1 %7696 }
 0x5fc   : > { %v9829_v46 = vpop.f32.mrf.mxu1  ;;  %8120 = vadd.xlane.f32.xlu1 %v8119_v45  ;;  %8111 = vadd.xlane.f32.xlu0 %v8110_v9 }
 0x5fd   : > { %v8012_v34 = vmul.f32 %v15123_v22, %v6696_v12  ;;  %v6694_v60 = vmax.f32 %v6512_v5, 0.0  ;;  %v6523_v0 = vadd.f32 %v9829_v46, %v15114_v35  ;;  %v8113_v14 = vsel %vm6284_vm0, %v8007_v42, 0.0 }
 0x5fe   : > { %v6514_v24 = vpop.f32.mrf.mxu1 }
 0x5ff   : > { %v8010_v27 = vmul.f32 %v15123_v22, %v6694_v60  ;;  %v6697_v8 = vmax.f32 %v6523_v0, 0.0  ;;  %v6515_v23 = vadd.f32 %v6514_v24, %v15114_v35  ;;  %v8128_v45 = vsel %vm6284_vm0, %v8012_v34, 0.0  ;;  %v15265_v58 = vpop.xlane.xlu1 %7706 }
 0x600   : > { %v9832_v9 = vpop.f32.mrf.mxu1  ;;  %8114 = vadd.xlane.f32.xlu1 %v8113_v14  ;;  %8129 = vadd.xlane.f32.xlu0 %v8128_v45  ;;  %16740 = vst [vmem:[#allocation70_spill] sm:$0xff] %v15265_v58  ;;  %v15277_v58 = vpop.xlane.xlu0 %7721 }
 0x601   : > { %v8013_v12 = vmul.f32 %v15123_v22, %v6697_v8  ;;  %v6695_v5 = vmax.f32 %v6515_v23, 0.0  ;;  %v6536_v46 = vadd.f32 %v9832_v9, %v15114_v35  ;;  %v8122_v60 = vsel %vm6284_vm0, %v8010_v27, 0.0  ;;  %16741 = vst [vmem:[#allocation4_spill] sm:$0xff] %v15277_v58 }
 0x602   : > { %v6527_v42 = vpop.f32.mrf.mxu1 }
 0x603   : > { %v8011_v0 = vmul.f32 %v15123_v22, %v6695_v5  ;;  %v6700_v24 = vmax.f32 %v6536_v46, 0.0  ;;  %v6528_v34 = vadd.f32 %v6527_v42, %v15114_v35  ;;  %v8131_v14 = vsel %vm6284_vm0, %v8013_v12, 0.0  ;;  %v15275_v62 = vpop.xlane.xlu1 %7716 }
 0x604   : > { %v9833_v45 = vpop.f32.mrf.mxu1  ;;  %8132 = vadd.xlane.f32.xlu1 %v8131_v14  ;;  %8123 = vadd.xlane.f32.xlu0 %v8122_v60  ;;  %v15287_v58 = vpop.xlane.xlu0 %7731 }
 0x605   : > { %v8016_v8 = vmul.f32 %v15123_v22, %v6700_v24  ;;  %v6698_v23 = vmax.f32 %v6528_v34, 0.0  ;;  %v6539_v9 = vadd.f32 %v9833_v45, %v15114_v35  ;;  %v8125_v5 = vsel %vm6284_vm0, %v8011_v0, 0.0  ;;  %16743 = vst [vmem:[#allocation5_spill] sm:$0xff] %v15287_v58 }
 0x606   : > { %v6530_v27 = vpop.f32.mrf.mxu1 }
 0x607   : > { %v8014_v46 = vmul.f32 %v15123_v22, %v6698_v23  ;;  %v6701_v42 = vmax.f32 %v6539_v9, 0.0  ;;  %v6531_v12 = vadd.f32 %v6530_v27, %v15114_v35  ;;  %v8140_v14 = vsel %vm6284_vm0, %v8016_v8, 0.0  ;;  %v15285_v26 = vpop.xlane.xlu1 %7726 }
 0x608   : > { %v9836_v60 = vpop.f32.mrf.mxu1  ;;  %8126 = vadd.xlane.f32.xlu1 %v8125_v5  ;;  %8141 = vadd.xlane.f32.xlu0 %v8140_v14  ;;  %16742 = vst [vmem:[#allocation69_spill] sm:$0xff] %v15285_v26  ;;  %v15297_v58 = vpop.xlane.xlu0 %7741 }
 0x609   : > { %v8017_v24 = vmul.f32 %v15123_v22, %v6701_v42  ;;  %v6699_v34 = vmax.f32 %v6531_v12, 0.0  ;;  %v6552_v45 = vadd.f32 %v9836_v60, %v15114_v35  ;;  %v8134_v23 = vsel %vm6284_vm0, %v8014_v46, 0.0  ;;  %16745 = vst [vmem:[#allocation6_spill] sm:$0xff] %v15297_v58 }
 0x60a   : > { %v6543_v0 = vpop.f32.mrf.mxu1 }
 0x60b   : > { %v8015_v9 = vmul.f32 %v15123_v22, %v6699_v34  ;;  %v6704_v27 = vmax.f32 %v6552_v45, 0.0  ;;  %v6544_v8 = vadd.f32 %v6543_v0, %v15114_v35  ;;  %v8143_v5 = vsel %vm6284_vm0, %v8017_v24, 0.0  ;;  %v15295_v26 = vpop.xlane.xlu1 %7736 }
 0x60c   : > { %v9837_v14 = vpop.f32.mrf.mxu1  ;;  %8144 = vadd.xlane.f32.xlu1 %v8143_v5  ;;  %8135 = vadd.xlane.f32.xlu0 %v8134_v23  ;;  %16744 = vst [vmem:[#allocation76_spill] sm:$0xff] %v15295_v26  ;;  %v15307_v58 = vpop.xlane.xlu0 %7751 }
 0x60d   : > { %v8020_v42 = vmul.f32 %v15123_v22, %v6704_v27  ;;  %v6702_v12 = vmax.f32 %v6544_v8, 0.0  ;;  %v6555_v60 = vadd.f32 %v9837_v14, %v15114_v35  ;;  %v8137_v34 = vsel %vm6284_vm0, %v8015_v9, 0.0  ;;  %16747 = vst [vmem:[#allocation74_spill] sm:$0xff] %v15307_v58 }
 0x60e   : > { %v6546_v46 = vpop.f32.mrf.mxu1 }
 0x60f   : > { %v8018_v45 = vmul.f32 %v15123_v22, %v6702_v12  ;;  %v6705_v0 = vmax.f32 %v6555_v60, 0.0  ;;  %v6547_v24 = vadd.f32 %v6546_v46, %v15114_v35  ;;  %v8152_v5 = vsel %vm6284_vm0, %v8020_v42, 0.0  ;;  %v15305_v26 = vpop.xlane.xlu1 %7746 }
 0x610   : > { %v9840_v23 = vpop.f32.mrf.mxu1  ;;  %8138 = vadd.xlane.f32.xlu1 %v8137_v34  ;;  %8153 = vadd.xlane.f32.xlu0 %v8152_v5  ;;  %16746 = vst [vmem:[#allocation7_spill] sm:$0xff] %v15305_v26  ;;  %v15317_v58 = vpop.xlane.xlu0 %7761 }
 0x611   : > { %v8021_v27 = vmul.f32 %v15123_v22, %v6705_v0  ;;  %v6703_v8 = vmax.f32 %v6547_v24, 0.0  ;;  %v6568_v14 = vadd.f32 %v9840_v23, %v15114_v35  ;;  %v8146_v12 = vsel %vm6284_vm0, %v8018_v45, 0.0  ;;  %16749 = vst [vmem:[#allocation8_spill] sm:$0xff] %v15317_v58 }
 0x612   : > { %v6559_v9 = vpop.f32.mrf.mxu1 }
 0x613   : > { %v8019_v60 = vmul.f32 %v15123_v22, %v6703_v8  ;;  %v6708_v46 = vmax.f32 %v6568_v14, 0.0  ;;  %v6560_v42 = vadd.f32 %v6559_v9, %v15114_v35  ;;  %v8155_v34 = vsel %vm6284_vm0, %v8021_v27, 0.0  ;;  %v15315_v26 = vpop.xlane.xlu1 %7756 }
 0x614   : > { %v9841_v5 = vpop.f32.mrf.mxu1  ;;  %8156 = vadd.xlane.f32.xlu1 %v8155_v34  ;;  %8147 = vadd.xlane.f32.xlu0 %v8146_v12  ;;  %16748 = vst [vmem:[#allocation80_spill] sm:$0xff] %v15315_v26  ;;  %v15327_v58 = vpop.xlane.xlu0 %7771 }
 0x615   : > { %v8024_v0 = vmul.f32 %v15123_v22, %v6708_v46  ;;  %v6706_v24 = vmax.f32 %v6560_v42, 0.0  ;;  %v6571_v23 = vadd.f32 %v9841_v5, %v15114_v35  ;;  %v8149_v8 = vsel %vm6284_vm0, %v8019_v60, 0.0  ;;  %16751 = vst [vmem:[#allocation9_spill] sm:$0xff] %v15327_v58 }
 0x616   : > { %v6562_v45 = vpop.f32.mrf.mxu1 }
 0x617   : > { %v8022_v14 = vmul.f32 %v15123_v22, %v6706_v24  ;;  %v6709_v9 = vmax.f32 %v6571_v23, 0.0  ;;  %v6563_v27 = vadd.f32 %v6562_v45, %v15114_v35  ;;  %v8164_v34 = vsel %vm6284_vm0, %v8024_v0, 0.0  ;;  %v15325_v26 = vpop.xlane.xlu1 %7766 }
 0x618   : > { %v9844_v12 = vpop.f32.mrf.mxu1  ;;  %8150 = vadd.xlane.f32.xlu1 %v8149_v8  ;;  %8165 = vadd.xlane.f32.xlu0 %v8164_v34  ;;  %16750 = vst [vmem:[#allocation79_spill] sm:$0xff] %v15325_v26  ;;  %v15337_v58 = vpop.xlane.xlu0 %7781 }
 0x619   : > { %v8025_v46 = vmul.f32 %v15123_v22, %v6709_v9  ;;  %v6707_v42 = vmax.f32 %v6563_v27, 0.0  ;;  %v6584_v5 = vadd.f32 %v9844_v12, %v15114_v35  ;;  %v8158_v24 = vsel %vm6284_vm0, %v8022_v14, 0.0  ;;  %16753 = vst [vmem:[#allocation10_spill] sm:$0xff] %v15337_v58 }
 0x61a   : > { %v6575_v60 = vpop.f32.mrf.mxu1 }
 0x61b   : > { %v8023_v23 = vmul.f32 %v15123_v22, %v6707_v42  ;;  %v6712_v45 = vmax.f32 %v6584_v5, 0.0  ;;  %v6576_v0 = vadd.f32 %v6575_v60, %v15114_v35  ;;  %v8167_v8 = vsel %vm6284_vm0, %v8025_v46, 0.0  ;;  %v15335_v26 = vpop.xlane.xlu1 %7776 }
 0x61c   : > { %v9845_v34 = vpop.f32.mrf.mxu1  ;;  %8168 = vadd.xlane.f32.xlu1 %v8167_v8  ;;  %8159 = vadd.xlane.f32.xlu0 %v8158_v24  ;;  %16752 = vst [vmem:[#allocation85_spill] sm:$0xff] %v15335_v26  ;;  %v15347_v58 = vpop.xlane.xlu0 %7791 }
 0x61d   : > { %v8028_v9 = vmul.f32 %v15123_v22, %v6712_v45  ;;  %v6710_v27 = vmax.f32 %v6576_v0, 0.0  ;;  %v6587_v12 = vadd.f32 %v9845_v34, %v15114_v35  ;;  %v8161_v42 = vsel %vm6284_vm0, %v8023_v23, 0.0  ;;  %16755 = vst [vmem:[#allocation11_spill] sm:$0xff] %v15347_v58 }
 0x61e   : > { %v6578_v14 = vpop.f32.mrf.mxu1 }
 0x61f   : > { %v8026_v5 = vmul.f32 %v15123_v22, %v6710_v27  ;;  %v6713_v60 = vmax.f32 %v6587_v12, 0.0  ;;  %v6579_v46 = vadd.f32 %v6578_v14, %v15114_v35  ;;  %v8176_v8 = vsel %vm6284_vm0, %v8028_v9, 0.0  ;;  %v15345_v26 = vpop.xlane.xlu1 %7786 }
 0x620   : > { %v9848_v24 = vpop.f32.mrf.mxu1  ;;  %8162 = vadd.xlane.f32.xlu1 %v8161_v42  ;;  %8177 = vadd.xlane.f32.xlu0 %v8176_v8  ;;  %16754 = vst [vmem:[#allocation84_spill] sm:$0xff] %v15345_v26  ;;  %v15357_v58 = vpop.xlane.xlu0 %7801 }
 0x621   : > { %v8029_v45 = vmul.f32 %v15123_v22, %v6713_v60  ;;  %v6711_v0 = vmax.f32 %v6579_v46, 0.0  ;;  %v6600_v34 = vadd.f32 %v9848_v24, %v15114_v35  ;;  %v8170_v27 = vsel %vm6284_vm0, %v8026_v5, 0.0  ;;  %16757 = vst [vmem:[#allocation35_spill] sm:$0xff] %v15357_v58 }
 0x622   : > { %v6591_v23 = vpop.f32.mrf.mxu1 }
 0x623   : > { %v8027_v12 = vmul.f32 %v15123_v22, %v6711_v0  ;;  %v6716_v14 = vmax.f32 %v6600_v34, 0.0  ;;  %v6592_v9 = vadd.f32 %v6591_v23, %v15114_v35  ;;  %v8179_v42 = vsel %vm6284_vm0, %v8029_v45, 0.0  ;;  %v15355_v26 = vpop.xlane.xlu1 %7796 }
 0x624   : > { %v9849_v8 = vpop.f32.mrf.mxu1  ;;  %8180 = vadd.xlane.f32.xlu1 %v8179_v42  ;;  %8171 = vadd.xlane.f32.xlu0 %v8170_v27  ;;  %16756 = vst [vmem:[#allocation92_spill] sm:$0xff] %v15355_v26  ;;  %v15367_v58 = vpop.xlane.xlu0 %7811 }
 0x625   : > { %v8032_v60 = vmul.f32 %v15123_v22, %v6716_v14  ;;  %v6714_v46 = vmax.f32 %v6592_v9, 0.0  ;;  %v6603_v24 = vadd.f32 %v9849_v8, %v15114_v35  ;;  %v8173_v0 = vsel %vm6284_vm0, %v8027_v12, 0.0  ;;  %16759 = vst [vmem:[#allocation170_spill] sm:$0xff] %v15367_v58 }
 0x626   : > { %v6594_v5 = vpop.f32.mrf.mxu1 }
 0x627   : > { %v8030_v34 = vmul.f32 %v15123_v22, %v6714_v46  ;;  %v6717_v23 = vmax.f32 %v6603_v24, 0.0  ;;  %v6595_v45 = vadd.f32 %v6594_v5, %v15114_v35  ;;  %v8188_v42 = vsel %vm6284_vm0, %v8032_v60, 0.0  ;;  %v15365_v26 = vpop.xlane.xlu1 %7806 }
 0x628   : > { %v9852_v27 = vpop.f32.mrf.mxu1  ;;  %8174 = vadd.xlane.f32.xlu1 %v8173_v0  ;;  %8189 = vadd.xlane.f32.xlu0 %v8188_v42  ;;  %16758 = vst [vmem:[#allocation38_spill] sm:$0xff] %v15365_v26  ;;  %v15377_v58 = vpop.xlane.xlu0 %7821 }
 0x629   : > { %v8033_v14 = vmul.f32 %v15123_v22, %v6717_v23  ;;  %v6715_v9 = vmax.f32 %v6595_v45, 0.0  ;;  %v6616_v8 = vadd.f32 %v9852_v27, %v15114_v35  ;;  %v8182_v46 = vsel %vm6284_vm0, %v8030_v34, 0.0  ;;  %16761 = vst [vmem:[#allocation42_spill] sm:$0xff] %v15377_v58 }
 0x62a   : > { %v6607_v12 = vpop.f32.mrf.mxu1 }
 0x62b   : > { %v8031_v24 = vmul.f32 %v15123_v22, %v6715_v9  ;;  %v6720_v5 = vmax.f32 %v6616_v8, 0.0  ;;  %v6608_v60 = vadd.f32 %v6607_v12, %v15114_v35  ;;  %v8191_v0 = vsel %vm6284_vm0, %v8033_v14, 0.0  ;;  %v15375_v26 = vpop.xlane.xlu1 %7816 }
 0x62c   : > { %v9853_v42 = vpop.f32.mrf.mxu1  ;;  %8192 = vadd.xlane.f32.xlu1 %v8191_v0  ;;  %8183 = vadd.xlane.f32.xlu0 %v8182_v46  ;;  %16760 = vst [vmem:[#allocation174_spill] sm:$0xff] %v15375_v26  ;;  %v15387_v58 = vpop.xlane.xlu0 %7831 }
 0x62d   : > { %v8036_v23 = vmul.f32 %v15123_v22, %v6720_v5  ;;  %v6718_v45 = vmax.f32 %v6608_v60, 0.0  ;;  %v6619_v27 = vadd.f32 %v9853_v42, %v15114_v35  ;;  %v8185_v9 = vsel %vm6284_vm0, %v8031_v24, 0.0  ;;  %16763 = vst [vmem:[#allocation45_spill] sm:$0xff] %v15387_v58 }
 0x62e   : > { %v6610_v34 = vpop.f32.mrf.mxu1 }
 0x62f   : > { %v8034_v8 = vmul.f32 %v15123_v22, %v6718_v45  ;;  %v6721_v12 = vmax.f32 %v6619_v27, 0.0  ;;  %v6611_v14 = vadd.f32 %v6610_v34, %v15114_v35  ;;  %v8200_v0 = vsel %vm6284_vm0, %v8036_v23, 0.0  ;;  %v15385_v26 = vpop.xlane.xlu1 %7826 }
 0x630   : > { %v9856_v46 = vpop.f32.mrf.mxu1  ;;  %8186 = vadd.xlane.f32.xlu1 %v8185_v9  ;;  %8201 = vadd.xlane.f32.xlu0 %v8200_v0  ;;  %16762 = vst [vmem:[#allocation89_spill] sm:$0xff] %v15385_v26  ;;  %v15397_v58 = vpop.xlane.xlu0 %7841 }
 0x631   : > { %v8037_v5 = vmul.f32 %v15123_v22, %v6721_v12  ;;  %v6719_v60 = vmax.f32 %v6611_v14, 0.0  ;;  %v6632_v42 = vadd.f32 %v9856_v46, %v15114_v35  ;;  %v8194_v45 = vsel %vm6284_vm0, %v8034_v8, 0.0  ;;  %16765 = vst [vmem:[#allocation48_spill] sm:$0xff] %v15397_v58 }
 0x632   : > { %v6623_v24 = vpop.f32.mrf.mxu1 }
 0x633   : > { %v8035_v27 = vmul.f32 %v15123_v22, %v6719_v60  ;;  %v6724_v34 = vmax.f32 %v6632_v42, 0.0  ;;  %v6624_v23 = vadd.f32 %v6623_v24, %v15114_v35  ;;  %v8203_v9 = vsel %vm6284_vm0, %v8037_v5, 0.0  ;;  %v15395_v26 = vpop.xlane.xlu1 %7836 }
 0x634   : > { %v9857_v0 = vpop.f32.mrf.mxu1  ;;  %8204 = vadd.xlane.f32.xlu1 %v8203_v9  ;;  %8195 = vadd.xlane.f32.xlu0 %v8194_v45  ;;  %16764 = vst [vmem:[#allocation97_spill] sm:$0xff] %v15395_v26  ;;  %v15407_v58 = vpop.xlane.xlu0 %7851 }
 0x635   : > { %v8040_v12 = vmul.f32 %v15123_v22, %v6724_v34  ;;  %v6722_v14 = vmax.f32 %v6624_v23, 0.0  ;;  %v6635_v46 = vadd.f32 %v9857_v0, %v15114_v35  ;;  %v8197_v60 = vsel %vm6284_vm0, %v8035_v27, 0.0  ;;  %16767 = vst [vmem:[#allocation51_spill] sm:$0xff] %v15407_v58 }
 0x636   : > { %v6626_v8 = vpop.f32.mrf.mxu1 }
 0x637   : > { %v8038_v42 = vmul.f32 %v15123_v22, %v6722_v14  ;;  %v6725_v24 = vmax.f32 %v6635_v46, 0.0  ;;  %v6627_v5 = vadd.f32 %v6626_v8, %v15114_v35  ;;  %v8212_v9 = vsel %vm6284_vm0, %v8040_v12, 0.0  ;;  %v15405_v26 = vpop.xlane.xlu1 %7846 }
 0x638   : > { %v9860_v45 = vpop.f32.mrf.mxu1  ;;  %8198 = vadd.xlane.f32.xlu1 %v8197_v60  ;;  %8213 = vadd.xlane.f32.xlu0 %v8212_v9  ;;  %16766 = vst [vmem:[#allocation167_spill] sm:$0xff] %v15405_v26  ;;  %v15417_v58 = vpop.xlane.xlu0 %7861 }
 0x639   : > { %v8041_v34 = vmul.f32 %v15123_v22, %v6725_v24  ;;  %v6723_v23 = vmax.f32 %v6627_v5, 0.0  ;;  %v6648_v0 = vadd.f32 %v9860_v45, %v15114_v35  ;;  %v8206_v14 = vsel %vm6284_vm0, %v8038_v42, 0.0  ;;  %16768 = vst [vmem:[#allocation171_spill] sm:$0xff] %v15417_v58 }
 0x63a   : > { %v6639_v27 = vpop.f32.mrf.mxu1 }
 0x63b   : > { %v8039_v46 = vmul.f32 %v15123_v22, %v6723_v23  ;;  %v6728_v8 = vmax.f32 %v6648_v0, 0.0  ;;  %v6640_v12 = vadd.f32 %v6639_v27, %v15114_v35  ;;  %v8215_v60 = vsel %vm6284_vm0, %v8041_v34, 0.0  ;;  %v15415_v26 = vpop.xlane.xlu1 %7856 }
 0x63c   : > { %v9861_v9 = vpop.f32.mrf.mxu1  ;;  %8216 = vadd.xlane.f32.xlu1 %v8215_v60  ;;  %8207 = vadd.xlane.f32.xlu0 %v8206_v14  ;;  %v15427_v58 = vpop.xlane.xlu0 %7871 }
 0x63d   : > { %v8044_v24 = vmul.f32 %v15123_v22, %v6728_v8  ;;  %v6726_v5 = vmax.f32 %v6640_v12, 0.0  ;;  %v6651_v45 = vadd.f32 %v9861_v9, %v15114_v35  ;;  %v8209_v23 = vsel %vm6284_vm0, %v8039_v46, 0.0 }
 0x63e   : > { %v6642_v42 = vpop.f32.mrf.mxu1 }
 0x63f   : > { %v8042_v0 = vmul.f32 %v15123_v22, %v6726_v5  ;;  %v6729_v27 = vmax.f32 %v6651_v45, 0.0  ;;  %v6643_v34 = vadd.f32 %v6642_v42, %v15114_v35  ;;  %v8224_v60 = vsel %vm6284_vm0, %v8044_v24, 0.0 }
 0x640   : > { %v9864_v14 = vpop.f32.mrf.mxu1  ;;  %8210 = vadd.xlane.f32.xlu1 %v8209_v23  ;;  %8225 = vadd.xlane.f32.xlu0 %v8224_v60  ;;  %v15425_v60 = vpop.xlane.xlu1 %7866 }
 0x641   : > { %v8045_v8 = vmul.f32 %v15123_v22, %v6729_v27  ;;  %v6727_v12 = vmax.f32 %v6643_v34, 0.0  ;;  %v6664_v9 = vadd.f32 %v9864_v14, %v15114_v35  ;;  %v8218_v5 = vsel %vm6284_vm0, %v8042_v0, 0.0 }
 0x642   : > { %v6655_v46 = vpop.f32.mrf.mxu1 }
 0x643   : > { %v8043_v45 = vmul.f32 %v15123_v22, %v6727_v12  ;;  %v6732_v42 = vmax.f32 %v6664_v9, 0.0  ;;  %v6656_v24 = vadd.f32 %v6655_v46, %v15114_v35  ;;  %v8227_v23 = vsel %vm6284_vm0, %v8045_v8, 0.0  ;;  %v15435_v8 = vpop.xlane.xlu0 %7881 }
 0x644   : > { %8228 = vadd.xlane.f32.xlu1 %v8227_v23  ;;  %8219 = vadd.xlane.f32.xlu0 %v8218_v5  ;;  %v15433_v9 = vpop.xlane.xlu1 %7876  ;;  %16769 = vst [vmem:[#allocation54_spill] sm:$0xff] %v15435_v8 }
 0x645   : > { %v8048_v27 = vmul.f32 %v15123_v22, %v6732_v42  ;;  %v6730_v34 = vmax.f32 %v6656_v24, 0.0  ;;  %v8221_v0 = vsel %vm6284_vm0, %v8043_v45, 0.0 }
 0x647   : > { %v8046_v14 = vmul.f32 %v15123_v22, %v6730_v34  ;;  %v8236_v12 = vsel %vm6284_vm0, %v8048_v27, 0.0  ;;  %v15440_v42 = vpop.xlane.xlu0 %7891  ;;  %v8359_v34 = vld [vmem:[%s10770_s20 + $0x1a8] sm:$0xff] }
 0x648   : > { %8222 = vadd.xlane.f32.xlu1 %v8221_v0  ;;  %8237 = vadd.xlane.f32.xlu0 %v8236_v12  ;;  %v15438_v5 = vpop.xlane.xlu1 %7886  ;;  %v7920_v0 = vadd.f32 %v15167_v44, %v14760_v36 }
 0x649   : > { %v8230_v46 = vsel %vm6284_vm0, %v8046_v14, 0.0  ;;  %16770 = vst [vmem:[#allocation58_spill] sm:$0xff] %v15438_v5  ;;  %v8361_v5 = vld [vmem:[%s10770_s20 + $0x1b8] sm:$0xff] }
 0x64b   : > { %v15444_v45 = vpop.xlane.xlu0 %7901 }
 0x64c   : > { %8231 = vadd.xlane.f32.xlu0 %v8230_v46  ;;  %v15442_v24 = vpop.xlane.xlu1 %7896  ;;  %16772 = vst [vmem:[#allocation172_spill] sm:$0xff] %v15444_v45  ;;  %v7918_v45 = vadd.f32 %v15157_v29, %v14750_v13  ;;  %v7924_v13 = vadd.f32 %v15187_v19, %v14798_v52  ;;  %v10530_v29 = vld [vmem:[%s10770_s20] sm:$0xff]  ;;  %v7925_v19 = vadd.f32 %v15195_v47, %v14808_v28  ;;  %v10531_v52 = vld [vmem:[%s10770_s20 + $0x8] sm:$0xff] }
 0x64d   : > { %16771 = vst [vmem:[#allocation168_spill] sm:$0xff] %v15442_v24  ;;  %v8362_v28 = vld [vmem:[%s10770_s20 + $0x1c0] sm:$0xff]  ;;  %v7928_v47 = vadd.f32 %v15207_v39, %v14827_v25  ;;  %v7929_v39 = vadd.f32 %v15215_v54, %v14834_v40  ;;  %v10535_v25 = vld [vmem:[%s10770_s20 + $0x28] sm:$0xff] }
 0x64f   : > { %v15448_v27 = vpop.xlane.xlu0 %7911 }
 0x650   : > { %v15446_v23 = vpop.xlane.xlu1 %7906  ;;  %16774 = vst [vmem:[#allocation95_spill] sm:$0xff] %v15448_v27  ;;  %v10528_v27 = vld [vmem:[%s10770_s20 + $0x10] sm:$0xff] }
 0x651   : > { %16773 = vst [vmem:[#allocation61_spill] sm:$0xff] %v15446_v23  ;;  %v7921_v23 = vadd.f32 %v15175_v38, %v14775_v61  ;;  %v10529_v38 = vld [vmem:[%s10770_s20 + $0x18] sm:$0xff] }
 0x654   : > { %v15453_v12 = vpop.xlane.xlu1 %7916 }
 0x655   : > { %16775 = vst [vmem:[#allocation65_spill] sm:$0xff] %v15453_v12 }
 0x659   : > { %8988 = vrot.lane.b32.xlu1 %v8359_v34, %s10597_s25  ;;  %v8058_v14 = vpop.xlane.xlu0 %8057 }
 0x65a   : > { %v8244_v46 = vadd.f32 %v8058_v14, %v7920_v0  ;;  %v7919_v0 = vadd.f32 %v15165_v53, %v14764_v37  ;;  %v8358_v14 = vld [vmem:[%s10770_s20 + $0x1a0] sm:$0xff]  ;;  %v7922_v37 = vadd.f32 %v15177_v51, %v14780_v15  ;;  %v8360_v53 = vld [vmem:[%s10770_s20 + $0x1b0] sm:$0xff]  ;;  %v7923_v15 = vadd.f32 %v15185_v56, %v14788_v2  ;;  %v10533_v51 = vld [vmem:[%s10770_s20 + $0x38] sm:$0xff] }
 0x65b   : > { %v8364_v2 = vld [vmem:[%s10770_s20 + $0x1d0] sm:$0xff] }
 0x65c   : > { %v8372_v8 = vadd.f32 %v10528_v27, %v8244_v46 }
 0x65d   : > { %8992 = vrot.lane.b32.xlu1 %v8361_v5, %s10597_s25  ;;  %v8061_v44 = vpop.xlane.xlu1 %8060  ;;  %v8052_v36 = vpop.xlane.xlu0 %8051 }
 0x65e   : > { %v9582_v12 = vmul.f32 -1.442695, %v8372_v8  ;;  %v8245_v24 = vadd.f32 %v8061_v44, %v7921_v23  ;;  %v8242_v34 = vadd.f32 %v8052_v36, %v7918_v45 }
 0x660   : > { %10205 = vpow2.f32 %v9582_v12  ;;  %v8373_v61 = vadd.f32 %v10529_v38, %v8245_v24  ;;  %v8370_v5 = vadd.f32 %v10530_v29, %v8242_v34  ;;  %v10532_v12 = vld [vmem:[%s10770_s20 + $0x30] sm:$0xff] }
 0x661   : > { %v8055_v27 = vpop.xlane.xlu1 %8054  ;;  %v8070_v46 = vpop.xlane.xlu0 %8069 }
 0x662   : > { %v9583_v8 = vmul.f32 -1.442695, %v8373_v61  ;;  %v9580_v23 = vmul.f32 -1.442695, %v8370_v5  ;;  %v8243_v45 = vadd.f32 %v8055_v27, %v7919_v0  ;;  %v8248_v44 = vadd.f32 %v8070_v46, %v7924_v13  ;;  %8986 = vrot.lane.b32.xlu0 %v8358_v14, %s10597_s25  ;;  %v10534_v5 = vld [vmem:[%s10770_s20 + $0x20] sm:$0xff] }
 0x664   : > { %10207 = vpow2.f32 %v9583_v8  ;;  %v8371_v24 = vadd.f32 %v10531_v52, %v8243_v45  ;;  %v8376_v36 = vadd.f32 %v10532_v12, %v8248_v44 }
 0x665   : > { %10209 = vpow2.f32 %v9580_v23  ;;  %v8073_v34 = vpop.xlane.xlu1 %8072  ;;  %v8064_v0 = vpop.xlane.xlu0 %8063 }
 0x666   : > { %v9581_v13 = vmul.f32 -1.442695, %v8371_v24  ;;  %v9586_v14 = vmul.f32 -1.442695, %v8376_v36  ;;  %v8249_v38 = vadd.f32 %v8073_v34, %v7925_v19  ;;  %v8246_v61 = vadd.f32 %v8064_v0, %v7922_v37  ;;  %8990 = vrot.lane.b32.xlu0 %v8360_v53, %s10597_s25  ;;  %v10536_v53 = vld [vmem:[%s10770_s20 + $0x50] sm:$0xff] }
 0x667   : > { %v7926_v24 = vadd.f32 %v15197_v11, %v14812_v30  ;;  %v7930_v11 = vadd.f32 %v15217_v6, %v14843_v50  ;;  %v7931_v50 = vadd.f32 %v15225_v3, %v14851_v49  ;;  %v10540_v49 = vld [vmem:[%s10770_s20 + $0x70] sm:$0xff] }
 0x668   : > { %10211 = vpow2.f32 %v9581_v13  ;;  %v8377_v29 = vadd.f32 %v10533_v51, %v8249_v38  ;;  %v8374_v27 = vadd.f32 %v10534_v5, %v8246_v61  ;;  %v8366_v38 = vld [vmem:[%s10770_s20 + $0x1e0] sm:$0xff]  ;;  %v7927_v61 = vadd.f32 %v15205_v21, %v14822_v57 }
 0x669   : > { %10213 = vpow2.f32 %v9586_v14  ;;  %v8067_v46 = vpop.xlane.xlu1 %8066  ;;  %v8082_v8 = vpop.xlane.xlu0 %8081  ;;  %v10538_v51 = vld [vmem:[%s10770_s20 + $0x40] sm:$0xff] }
 0x66a   : > { %v9587_v23 = vmul.f32 -1.442695, %v8377_v29  ;;  %v9584_v45 = vmul.f32 -1.442695, %v8374_v27  ;;  %v8247_v44 = vadd.f32 %v8067_v46, %v7923_v15  ;;  %v8252_v37 = vadd.f32 %v8082_v8, %v7928_v47  ;;  %8994 = vrot.lane.b32.xlu0 %v8362_v28, %s10597_s25  ;;  %v9865_v14 = vpop.f32.mrf.mxu1  ;;  %v10537_v15 = vld [vmem:[%s10770_s20 + $0x58] sm:$0xff] }
 0x66b   : > { %v7932_v47 = vadd.f32 %v15227_v63, %v14855_v48 }
 0x66c   : > { %10215 = vpow2.f32 %v9587_v23  ;;  %v8375_v56 = vadd.f32 %v10535_v25, %v8247_v44  ;;  %v8380_v19 = vadd.f32 %v10536_v53, %v8252_v37  ;;  %v6658_v57 = vpop.f32.mrf.mxu1  ;;  %v7933_v44 = vadd.f32 %v15235_v16, %v14864_v18 }
 0x66d   : > { %v10206_v52 = vpop.eup %10205  ;;  %10217 = vpow2.f32 %v9584_v45  ;;  %v8085_v12 = vpop.xlane.xlu1 %8084  ;;  %v8368_v45 = vld [vmem:[%s10770_s20 + $0x1f0] sm:$0xff]  ;;  %v6667_v37 = vadd.f32 %v9865_v14, %v15114_v35  ;;  %v6659_v53 = vadd.f32 %v6658_v57, %v15114_v35 }
 0x66e   : > { %v8076_v36 = vpop.xlane.xlu0 %8075  ;;  %v8628_v34 = vadd.f32 1.0, %v10206_v52  ;;  %v9585_v0 = vmul.f32 -1.442695, %v8375_v56  ;;  %v9590_v13 = vmul.f32 -1.442695, %v8380_v19  ;;  %v8253_v40 = vadd.f32 %v8085_v12, %v7929_v39  ;;  %8998 = vrot.lane.b32.xlu0 %v8364_v2, %s10597_s25  ;;  %v10539_v2 = vld [vmem:[%s10770_s20 + $0x48] sm:$0xff] }
 0x66f   : > { %v8250_v54 = vadd.f32 %v8076_v36, %v7926_v24  ;;  %v7934_v56 = vadd.f32 %v15237_v7, %v14872_v10  ;;  %v15519_v7 = vadd.f32 %v15245_v41, %v14876_v55  ;;  %v6733_v35 = vmax.f32 %v6667_v37, 0.0 }
 0x670   : > { %10219 = vrcp.f32 %v8628_v34  ;;  %v8381_v28 = vadd.f32 %v10537_v15, %v8253_v40  ;;  %v7936_v40 = vadd.f32 %v15247_v31, %v14885_v33  ;;  %v7937_v33 = vadd.f32 %v15255_v32, %v14893_v17 }
 0x671   : > { %v10208_v30 = vpop.eup %10207  ;;  %10221 = vpow2.f32 %v9585_v0  ;;  %v8378_v29 = vadd.f32 %v10538_v51, %v8250_v54  ;;  %v8079_v5 = vpop.xlane.xlu1 %8078  ;;  %v10541_v0 = vld [vmem:[%s10770_s20 + $0x78] sm:$0xff]  ;;  %v6731_v54 = vmax.f32 %v6659_v53, 0.0  ;;  %v8049_v31 = vmul.f32 %v15123_v22, %v6733_v35 }
 0x672   : > { %v8094_v27 = vpop.xlane.xlu0 %8093  ;;  %v10210_v46 = vpop.eup %10209  ;;  %v8629_v8 = vadd.f32 1.0, %v10208_v30  ;;  %10223 = vpow2.f32 %v9590_v13  ;;  %v9591_v21 = vmul.f32 -1.442695, %v8381_v28  ;;  %v8251_v23 = vadd.f32 %v8079_v5, %v7927_v61  ;;  %9002 = vrot.lane.b32.xlu0 %v8366_v38, %s10597_s25  ;;  %v10542_v38 = vld [vmem:[%s10770_s20 + $0x60] sm:$0xff]  ;;  %v10543_v5 = vld [vmem:[%s10770_s20 + $0x68] sm:$0xff] }
 0x673   : > { %v8626_v48 = vadd.f32 1.0, %v10210_v46  ;;  %v9588_v6 = vmul.f32 -1.442695, %v8378_v29  ;;  %v8256_v63 = vadd.f32 %v8094_v27, %v7932_v47  ;;  %v8239_v53 = vsel %vm6284_vm0, %v8049_v31, 0.0 }
 0x674   : > { %10225 = vrcp.f32 %v8629_v8  ;;  %v8379_v39 = vadd.f32 %v10539_v2, %v8251_v23  ;;  %v8047_v8 = vmul.f32 %v15123_v22, %v6731_v54 }
 0x675   : > { %v10212_v25 = vpop.eup %10211  ;;  %10227 = vrcp.f32 %v8626_v48  ;;  %v8384_v3 = vadd.f32 %v10540_v49, %v8256_v63  ;;  %v8097_v19 = vpop.xlane.xlu1 %8096 }
 0x676   : > { %v8088_v52 = vpop.xlane.xlu0 %8087  ;;  %v10214_v24 = vpop.eup %10213  ;;  %v8627_v12 = vadd.f32 1.0, %v10212_v25  ;;  %10229 = vpow2.f32 %v9591_v21  ;;  %v9589_v18 = vmul.f32 -1.442695, %v8379_v39  ;;  %v8257_v16 = vadd.f32 %v8097_v19, %v7933_v44  ;;  %9006 = vrot.lane.b32.xlu0 %v8368_v45, %s10597_s25  ;;  %v10544_v21 = vld [vmem:[%s10770_s20 + $0x90] sm:$0xff]  ;;  %v10545_v39 = vld [vmem:[%s10770_s20 + $0x98] sm:$0xff] }
 0x677   : > { %v8632_v36 = vadd.f32 1.0, %v10214_v24  ;;  %10231 = vpow2.f32 %v9588_v6  ;;  %v9594_v34 = vmul.f32 -1.442695, %v8384_v3  ;;  %v8254_v10 = vadd.f32 %v8088_v52, %v7930_v11  ;;  %v10546_v52 = vld [vmem:[%s10770_s20 + $0x80] sm:$0xff] }
 0x678   : > { %10233 = vrcp.f32 %v8627_v12  ;;  %v8385_v13 = vadd.f32 %v10541_v0, %v8257_v16  ;;  %v7940_v3 = vadd.f32 %v15267_v4, %v14914_v20  ;;  %v7941_v19 = vadd.f32 %v15275_v62, %v14918_v1  ;;  %v16777_v16 = vld [vmem:[#allocation68_spill] sm:$0xff]  ;;  %v16778_v4 = vld [vmem:[#allocation66_spill] sm:$0xff] }
 0x679   : > { %v10216_v14 = vpop.eup %10215  ;;  %10235 = vrcp.f32 %v8632_v36  ;;  %v8382_v61 = vadd.f32 %v10542_v38, %v8254_v10  ;;  %v8091_v15 = vpop.xlane.xlu1 %8090  ;;  %v8233_v54 = vsel %vm6284_vm0, %v8047_v8, 0.0  ;;  %v16782_v8 = vld [vmem:[#allocation70_spill] sm:$0xff] }
 0x67a   : > { %v8106_v28 = vpop.xlane.xlu0 %8105  ;;  %v10218_v30 = vpop.eup %10217  ;;  %v8633_v11 = vadd.f32 1.0, %v10216_v14  ;;  %10237 = vpow2.f32 %v9589_v18  ;;  %v9595_v55 = vmul.f32 -1.442695, %v8385_v13  ;;  %v8255_v41 = vadd.f32 %v8091_v15, %v7931_v50  ;;  %v16776_v50 = vld [vmem:[#allocation63_spill] sm:$0xff]  ;;  %v10548_v15 = vld [vmem:[%s10770_s20 + $0xb0] sm:$0xff] }
 0x67b   : > { %v8630_v47 = vadd.f32 1.0, %v10218_v30  ;;  %10239 = vpow2.f32 %v9594_v34  ;;  %v9592_v51 = vmul.f32 -1.442695, %v8382_v61  ;;  %v8260_v29 = vadd.f32 %v8106_v28, %v7936_v40  ;;  %v10547_v14 = vld [vmem:[%s10770_s20 + $0x88] sm:$0xff] }
 0x67c   : > { %10241 = vrcp.f32 %v8633_v11  ;;  %v8383_v27 = vadd.f32 %v10543_v5, %v8255_v41  ;;  %v16779_v41 = vld [vmem:[#allocation59_spill] sm:$0xff] }
 0x67d   : > { %v10220_v46 = vpop.eup %10219  ;;  %10243 = vrcp.f32 %v8630_v47  ;;  %v8388_v57 = vadd.f32 %v10544_v21, %v8260_v29  ;;  %v8109_v17 = vpop.xlane.xlu1 %8108 }
 0x67e   : > { %v8100_v32 = vpop.xlane.xlu0 %8099  ;;  %v10222_v23 = vpop.eup %10221  ;;  %v9076_v48 = vmul.f32 %v10220_v46, %v16776_v50  ;;  %10245 = vpow2.f32 %v9595_v55  ;;  %v9593_v6 = vmul.f32 -1.442695, %v8383_v27  ;;  %v8261_v63 = vadd.f32 %v8109_v17, %v7937_v33  ;;  %v16781_v46 = vld [vmem:[#allocation151_spill] sm:$0xff]  ;;  %v10549_v17 = vld [vmem:[%s10770_s20 + $0xb8] sm:$0xff]  ;;  %v16783_v50 = vld [vmem:[#allocation40_spill] sm:$0xff] }
 0x67f   : > { %v10224_v45 = vpop.eup %10223  ;;  %v8631_v44 = vadd.f32 1.0, %v10222_v23  ;;  %10247 = vpow2.f32 %v9592_v51  ;;  %v9598_v37 = vmul.f32 -1.442695, %v8388_v57  ;;  %v8258_v2 = vadd.f32 %v8100_v32, %v7934_v56 }
 0x680   : > { %9141 = vst.msk [vmem:[%s15533_s9 + $0x10] sm:$0xff] %vm9138_vm1, %v9076_v48  ;;  %v8636_v22 = vadd.f32 1.0, %v10224_v45  ;;  %10249 = vpow2.f32 %v9593_v6  ;;  %v8389_v25 = vadd.f32 %v10545_v39, %v8261_v63  ;;  %v7939_v21 = vadd.f32 %v16782_v8, %v16781_v46  ;;  %v16784_v48 = vld [vmem:[#allocation5_spill] sm:$0xff]  ;;  %v10550_v45 = vld [vmem:[%s10770_s20 + $0xa0] sm:$0xff]  ;;  %v16795_v46 = vld [vmem:[#allocation43_spill] sm:$0xff] }
 0x681   : > { %v10226_v49 = vpop.eup %10225  ;;  %10251 = vrcp.f32 %v8631_v44  ;;  %v8386_v24 = vadd.f32 %v10546_v52, %v8258_v2  ;;  %8240 = vadd.xlane.f32.xlu1 %v8239_v53  ;;  %v8103_v56 = vpop.xlane.xlu1 %8102  ;;  %v7944_v6 = vadd.f32 %v16784_v48, %v16783_v50  ;;  %v16785_v39 = vld [vmem:[#allocation78_spill] sm:$0xff] }
 0x682   : > { %v8118_v12 = vpop.xlane.xlu0 %8117  ;;  %v10228_v18 = vpop.eup %10227  ;;  %v9077_v36 = vmul.f32 %v10226_v49, %v16777_v16  ;;  %10253 = vrcp.f32 %v8636_v22  ;;  %v9599_v34 = vmul.f32 -1.442695, %v8389_v25  ;;  %v8259_v10 = vadd.f32 %v8103_v56, %v15519_v7  ;;  %v16788_v16 = vld [vmem:[#allocation76_spill] sm:$0xff]  ;;  %v16796_v8 = vld [vmem:[#allocation74_spill] sm:$0xff] }
 0x683   : > { %v10230_v20 = vpop.eup %10229  ;;  %v9074_v35 = vmul.f32 %v10228_v18, %v16778_v4  ;;  %10255 = vpow2.f32 %v9598_v37  ;;  %v9596_v1 = vmul.f32 -1.442695, %v8386_v24  ;;  %v8264_v62 = vadd.f32 %v8118_v12, %v7940_v3  ;;  %v16787_v18 = vld [vmem:[#allocation153_spill] sm:$0xff] }
 0x684   : > { %v10232_v0 = vpop.eup %10231  ;;  %9142 = vst.msk [vmem:[%s15533_s9 + $0x18] sm:$0xff] %vm9138_vm1, %v9077_v36  ;;  %v8637_v13 = vadd.f32 1.0, %v10230_v20  ;;  %10257 = vpow2.f32 %v9599_v34  ;;  %v8387_v40 = vadd.f32 %v10547_v14, %v8259_v10  ;;  %v7938_v7 = vadd.f32 %v15257_v59, %v14897_v43  ;;  %v16780_v43 = vld [vmem:[#allocation75_spill] sm:$0xff] }
 0x685   : > { %v10234_v38 = vpop.eup %10233  ;;  %9139 = vst.msk [vmem:[%s15533_s9] sm:$0xff] %vm9138_vm1, %v9074_v35  ;;  %v8634_v61 = vadd.f32 1.0, %v10232_v0  ;;  %10259 = vpow2.f32 %v9596_v1  ;;  %v8392_v28 = vadd.f32 %v10548_v15, %v8264_v62  ;;  %8234 = vadd.xlane.f32.xlu1 %v8233_v54  ;;  %v8121_v30 = vpop.xlane.xlu1 %8120  ;;  %v7945_v36 = vadd.f32 %v16788_v16, %v16787_v18  ;;  %v10551_v10 = vld [vmem:[%s10770_s20 + $0xa8] sm:$0xff]  ;;  %v16789_v35 = vld [vmem:[#allocation36_spill] sm:$0xff]  ;;  %v16801_v16 = vld [vmem:[#allocation6_spill] sm:$0xff] }
 0x686   : > { %v8112_v11 = vpop.xlane.xlu0 %8111  ;;  %v10236_v55 = vpop.eup %10235  ;;  %v9075_v47 = vmul.f32 %v10234_v38, %v16779_v41  ;;  %10261 = vrcp.f32 %v8637_v13  ;;  %v9597_v51 = vmul.f32 -1.442695, %v8387_v40  ;;  %v8265_v29 = vadd.f32 %v8121_v30, %v7941_v19  ;;  %v16786_v19 = vld [vmem:[#allocation72_spill] sm:$0xff]  ;;  %v16791_v30 = vld [vmem:[#allocation73_spill] sm:$0xff]  ;;  %v16800_v18 = vld [vmem:[#allocation39_spill] sm:$0xff] }
 0x687   : > { %v10238_v33 = vpop.eup %10237  ;;  %v9080_v59 = vmul.f32 %v10236_v55, %v16780_v43  ;;  %10263 = vrcp.f32 %v8634_v61  ;;  %v9602_v31 = vmul.f32 -1.442695, %v8392_v28  ;;  %v8262_v5 = vadd.f32 %v8112_v11, %v7938_v7  ;;  %v16790_v1 = vld [vmem:[#allocation4_spill] sm:$0xff]  ;;  %v16794_v43 = vld [vmem:[#allocation87_spill] sm:$0xff] }
 0x688   : > { %v10240_v27 = vpop.eup %10239  ;;  %9140 = vst.msk [vmem:[%s15533_s9 + $0x8] sm:$0xff] %vm9138_vm1, %v9075_v47  ;;  %v8635_v57 = vadd.f32 1.0, %v10238_v33  ;;  %10265 = vpow2.f32 %v9597_v51  ;;  %v8393_v32 = vadd.f32 %v10549_v17, %v8265_v29  ;;  %v7942_v62 = vadd.f32 %v16790_v1, %v16789_v35  ;;  %v10552_v13 = vld [vmem:[%s10770_s20 + $0xd0] sm:$0xff]  ;;  %v16793_v29 = vld [vmem:[#allocation69_spill] sm:$0xff]  ;;  %v10554_v17 = vld [vmem:[%s10770_s20 + $0xc0] sm:$0xff] }
 0x689   : > { %v10242_v23 = vpop.eup %10241  ;;  %9145 = vst.msk [vmem:[%s15533_s9 + $0x30] sm:$0xff] %vm9138_vm1, %v9080_v59  ;;  %v8640_v63 = vadd.f32 1.0, %v10240_v27  ;;  %10267 = vpow2.f32 %v9602_v31  ;;  %v8390_v44 = vadd.f32 %v10550_v45, %v8262_v5  ;;  %v8115_v37 = vpop.xlane.xlu1 %8114  ;;  %v16792_v51 = vld [vmem:[#allocation152_spill] sm:$0xff]  ;;  %v10553_v31 = vld [vmem:[%s10770_s20 + $0xd8] sm:$0xff] }
 0x68a   : > { %v8130_v2 = vpop.xlane.xlu0 %8129  ;;  %v10244_v22 = vpop.eup %10243  ;;  %v9081_v25 = vmul.f32 %v10242_v23, %v16785_v39  ;;  %10269 = vrcp.f32 %v8635_v57  ;;  %v9603_v53 = vmul.f32 -1.442695, %v8393_v32  ;;  %v8263_v49 = vadd.f32 %v8115_v37, %v7939_v21  ;;  %v15596_v39 = vld [vmem:[%s10770_s20 + $0x1c8] sm:$0xff] }
 0x68b   : > { %v10246_v3 = vpop.eup %10245  ;;  %v9078_v52 = vmul.f32 %v10244_v22, %v16786_v19  ;;  %10271 = vrcp.f32 %v8640_v63  ;;  %v9600_v24 = vmul.f32 -1.442695, %v8390_v44  ;;  %v8268_v56 = vadd.f32 %v8130_v2, %v7944_v6  ;;  %v16799_v19 = vld [vmem:[#allocation88_spill] sm:$0xff] }
 0x68c   : > { %v10248_v12 = vpop.eup %10247  ;;  %9146 = vst.msk [vmem:[%s15533_s9 + $0x38] sm:$0xff] %vm9138_vm1, %v9081_v25  ;;  %v8641_v34 = vadd.f32 1.0, %v10246_v3  ;;  %10273 = vpow2.f32 %v9603_v53  ;;  %v8391_v20 = vadd.f32 %v10551_v10, %v8263_v49  ;;  %v7943_v33 = vadd.f32 %v16793_v29, %v16792_v51  ;;  %v16797_v53 = vld [vmem:[#allocation156_spill] sm:$0xff] }
 0x68d   : > { %v10250_v4 = vpop.eup %10249  ;;  %9143 = vst.msk [vmem:[%s15533_s9 + $0x20] sm:$0xff] %vm9138_vm1, %v9078_v52  ;;  %v8638_v0 = vadd.f32 1.0, %v10248_v12  ;;  %10275 = vpow2.f32 %v9600_v24  ;;  %v8396_v14 = vadd.f32 %v10552_v13, %v8268_v56  ;;  %v8133_v40 = vpop.xlane.xlu1 %8132  ;;  %v7948_v21 = vadd.f32 %v16796_v8, %v16795_v46  ;;  %v16798_v49 = vld [vmem:[#allocation80_spill] sm:$0xff]  ;;  %v10555_v24 = vld [vmem:[%s10770_s20 + $0xc8] sm:$0xff] }
 0x68e   : > { %v8124_v54 = vpop.xlane.xlu0 %8123  ;;  %v10252_v38 = vpop.eup %10251  ;;  %10277 = vrcp.f32 %v8641_v34  ;;  %v8639_v7 = vadd.f32 1.0, %v10250_v4  ;;  %v9601_v61 = vmul.f32 -1.442695, %v8391_v20  ;;  %v8269_v15 = vadd.f32 %v8133_v40, %v7945_v36  ;;  %v16802_v34 = vld [vmem:[#allocation82_spill] sm:$0xff]  ;;  %v10556_v20 = vld [vmem:[%s10770_s20 + $0xf0] sm:$0xff] }
 0x68f   : > { %v10254_v28 = vpop.eup %10253  ;;  %v9079_v11 = vmul.f32 %v10252_v38, %v16791_v30  ;;  %10279 = vrcp.f32 %v8638_v0  ;;  %v9606_v55 = vmul.f32 -1.442695, %v8396_v14  ;;  %v8266_v41 = vadd.f32 %v8124_v54, %v7942_v62  ;;  %v16804_v30 = vld [vmem:[#allocation7_spill] sm:$0xff] }
 0x690   : > { %v10256_v47 = vpop.eup %10255  ;;  %v9084_v59 = vmul.f32 %v10254_v28, %v16794_v43  ;;  %10281 = vrcp.f32 %v8639_v7  ;;  %v8397_v5 = vadd.f32 %v10553_v31, %v8269_v15  ;;  %v7949_v3 = vadd.f32 %v16798_v49, %v16797_v53  ;;  %v16803_v28 = vld [vmem:[#allocation154_spill] sm:$0xff]  ;;  %v16807_v43 = vld [vmem:[#allocation9_spill] sm:$0xff]  ;;  %v16808_v31 = vld [vmem:[#allocation96_spill] sm:$0xff] }
 0x691   : > { %v10258_v27 = vpop.eup %10257  ;;  %9144 = vst.msk [vmem:[%s15533_s9 + $0x28] sm:$0xff] %vm9138_vm1, %v9079_v11  ;;  %v8644_v57 = vadd.f32 1.0, %v10256_v47  ;;  %10283 = vpow2.f32 %v9601_v61  ;;  %v8394_v32 = vadd.f32 %v10554_v17, %v8266_v41  ;;  %v8127_v23 = vpop.xlane.xlu1 %8126  ;;  %v7946_v36 = vadd.f32 %v16801_v16, %v16800_v18  ;;  %v15613_v61 = vld [vmem:[%s10770_s20 + $0x1d8] sm:$0xff]  ;;  %v10559_v49 = vld [vmem:[%s10770_s20 + $0xe8] sm:$0xff]  ;;  %v10560_v16 = vld [vmem:[%s10770_s20 + $0x110] sm:$0xff] }
 0x692   : > { %v8142_v50 = vpop.xlane.xlu0 %8141  ;;  %v10260_v48 = vpop.eup %10259  ;;  %9149 = vst.msk [vmem:[%s15533_s9 + $0x50] sm:$0xff] %vm9138_vm1, %v9084_v59  ;;  %v8645_v6 = vadd.f32 1.0, %v10258_v27  ;;  %10285 = vpow2.f32 %v9606_v55  ;;  %v9607_v63 = vmul.f32 -1.442695, %v8397_v5  ;;  %v8267_v45 = vadd.f32 %v8127_v23, %v7943_v33  ;;  %v16805_v55 = vld [vmem:[#allocation83_spill] sm:$0xff]  ;;  %v10557_v47 = vld [vmem:[%s10770_s20 + $0xf8] sm:$0xff] }
 0x693   : > { %v10262_v44 = vpop.eup %10261  ;;  %10287 = vrcp.f32 %v8644_v57  ;;  %v8642_v37 = vadd.f32 1.0, %v10260_v48  ;;  %v9604_v2 = vmul.f32 -1.442695, %v8394_v32  ;;  %v8272_v22 = vadd.f32 %v8142_v50, %v7948_v21  ;;  %v16806_v33 = vld [vmem:[#allocation46_spill] sm:$0xff] }
 0x694   : > { %v10264_v25 = vpop.eup %10263  ;;  %v9085_v52 = vmul.f32 %v10262_v44, %v16799_v19  ;;  %10289 = vrcp.f32 %v8645_v6  ;;  %v8395_v56 = vadd.f32 %v10555_v24, %v8267_v45  ;;  %v7947_v11 = vadd.f32 %v16804_v30, %v16803_v28  ;;  %v10558_v27 = vld [vmem:[%s10770_s20 + $0xe0] sm:$0xff]  ;;  %v15630_v45 = vld [vmem:[%s10770_s20 + $0x1e8] sm:$0xff]  ;;  %v16813_v24 = vld [vmem:[#allocation8_spill] sm:$0xff] }
 0x695   : > { %v10266_v12 = vpop.eup %10265  ;;  %v9082_v10 = vmul.f32 %v10264_v25, %v16802_v34  ;;  %10291 = vrcp.f32 %v8642_v37  ;;  %v8400_v4 = vadd.f32 %v10556_v20, %v8272_v22  ;;  %v8145_v35 = vpop.xlane.xlu1 %8144  ;;  %v7952_v59 = vadd.f32 %v16807_v43, %v16806_v33  ;;  %v16809_v37 = vld [vmem:[#allocation158_spill] sm:$0xff]  ;;  %v16820_v33 = vld [vmem:[#allocation15_spill] sm:$0xff] }
 0x696   : > { %v8136_v1 = vpop.xlane.xlu0 %8135  ;;  %v10268_v62 = vpop.eup %10267  ;;  %9150 = vst.msk [vmem:[%s15533_s9 + $0x58] sm:$0xff] %vm9138_vm1, %v9085_v52  ;;  %v8643_v0 = vadd.f32 1.0, %v10266_v12  ;;  %10293 = vpow2.f32 %v9607_v63  ;;  %v9605_v13 = vmul.f32 -1.442695, %v8395_v56  ;;  %v8273_v14 = vadd.f32 %v8145_v35, %v7949_v3  ;;  %8996 = vrot.lane.b32.xlu1 %v15596_v39, %s10597_s25  ;;  %v16811_v25 = vld [vmem:[#allocation98_spill] sm:$0xff]  ;;  %v16812_v52 = vld [vmem:[#allocation41_spill] sm:$0xff] }
 0x697   : > { %v10270_v40 = vpop.eup %10269  ;;  %9147 = vst.msk [vmem:[%s15533_s9 + $0x40] sm:$0xff] %vm9138_vm1, %v9082_v10  ;;  %v8648_v54 = vadd.f32 1.0, %v10268_v62  ;;  %10295 = vpow2.f32 %v9604_v2  ;;  %v9610_v38 = vmul.f32 -1.442695, %v8400_v4  ;;  %v8270_v7 = vadd.f32 %v8136_v1, %v7946_v36  ;;  %v16810_v2 = vld [vmem:[#allocation85_spill] sm:$0xff]  ;;  %v16814_v12 = vld [vmem:[#allocation91_spill] sm:$0xff] }
 0x698   : > { %v10272_v15 = vpop.eup %10271  ;;  %v9083_v41 = vmul.f32 %v10270_v40, %v16805_v55  ;;  %10297 = vrcp.f32 %v8643_v0  ;;  %v8401_v51 = vadd.f32 %v10557_v47, %v8273_v14  ;;  %v7953_v22 = vadd.f32 %v16810_v2, %v16809_v37  ;;  %v16815_v4 = vld [vmem:[#allocation93_spill] sm:$0xff]  ;;  %v16824_v37 = vld [vmem:[#allocation92_spill] sm:$0xff] }
 0x699   : > { %v10274_v29 = vpop.eup %10273  ;;  %v9088_v5 = vmul.f32 %v10272_v15, %v16808_v31  ;;  %10299 = vrcp.f32 %v8648_v54  ;;  %v8398_v46 = vadd.f32 %v10558_v27, %v8270_v7  ;;  %v8139_v8 = vpop.xlane.xlu1 %8138  ;;  %v7950_v56 = vadd.f32 %v16813_v24, %v16812_v52  ;;  %v15648_v54 = vld [vmem:[%s10770_s20 + $0x1f8] sm:$0xff]  ;;  %v16817_v15 = vld [vmem:[#allocation79_spill] sm:$0xff] }
 0x69a   : > { %v8154_v21 = vpop.xlane.xlu0 %8153  ;;  %v10276_v57 = vpop.eup %10275  ;;  %9148 = vst.msk [vmem:[%s15533_s9 + $0x48] sm:$0xff] %vm9138_vm1, %v9083_v41  ;;  %v8649_v17 = vadd.f32 1.0, %v10274_v29  ;;  %10301 = vpow2.f32 %v9605_v13  ;;  %v9611_v32 = vmul.f32 -1.442695, %v8401_v51  ;;  %v8271_v23 = vadd.f32 %v8139_v8, %v7947_v11  ;;  %9000 = vrot.lane.b32.xlu1 %v15613_v61, %s10597_s25  ;;  %v16816_v7 = vld [vmem:[#allocation157_spill] sm:$0xff]  ;;  %v16819_v51 = vld [vmem:[#allocation11_spill] sm:$0xff] }
 0x69b   : > { %v10278_v50 = vpop.eup %10277  ;;  %9153 = vst.msk [vmem:[%s15533_s9 + $0x70] sm:$0xff] %vm9138_vm1, %v9088_v5  ;;  %v8646_v48 = vadd.f32 1.0, %v10276_v57  ;;  %10303 = vpow2.f32 %v9610_v38  ;;  %v9608_v6 = vmul.f32 -1.442695, %v8398_v46  ;;  %v8276_v63 = vadd.f32 %v8154_v21, %v7952_v59  ;;  %v10561_v11 = vld [vmem:[%s10770_s20 + $0x118] sm:$0xff]  ;;  %v10562_v59 = vld [vmem:[%s10770_s20 + $0x100] sm:$0xff] }
 0x69c   : > { %v10280_v44 = vpop.eup %10279  ;;  %v9089_v53 = vmul.f32 %v10278_v50, %v16811_v25  ;;  %10305 = vrcp.f32 %v8649_v17  ;;  %v8399_v3 = vadd.f32 %v10559_v49, %v8271_v23  ;;  %v7951_v28 = vadd.f32 %v16817_v15, %v16816_v7  ;;  %v16818_v47 = vld [vmem:[#allocation49_spill] sm:$0xff]  ;;  %v16821_v8 = vld [vmem:[#allocation18_spill] sm:$0xff]  ;;  %v16822_v23 = vld [vmem:[#allocation100_spill] sm:$0xff] }
 0x69d   : > { %v10282_v19 = vpop.eup %10281  ;;  %v9086_v18 = vmul.f32 %v10280_v44, %v16814_v12  ;;  %10307 = vrcp.f32 %v8646_v48  ;;  %v8404_v36 = vadd.f32 %v10560_v16, %v8276_v63  ;;  %v8157_v34 = vpop.xlane.xlu1 %8156  ;;  %v7956_v29 = vadd.f32 %v16819_v51, %v16818_v47  ;;  %v16823_v44 = vld [vmem:[#allocation160_spill] sm:$0xff]  ;;  %v10563_v25 = vld [vmem:[%s10770_s20 + $0x108] sm:$0xff] }
 0x69e   : > { %v8148_v10 = vpop.xlane.xlu0 %8147  ;;  %v10284_v20 = vpop.eup %10283  ;;  %9154 = vst.msk [vmem:[%s15533_s9 + $0x78] sm:$0xff] %vm9138_vm1, %v9089_v53  ;;  %v9087_v35 = vmul.f32 %v10282_v19, %v16815_v4  ;;  %10309 = vpow2.f32 %v9611_v32  ;;  %v9609_v1 = vmul.f32 -1.442695, %v8399_v3  ;;  %v8277_v62 = vadd.f32 %v8157_v34, %v7953_v22  ;;  %9004 = vrot.lane.b32.xlu1 %v15630_v45, %s10597_s25  ;;  %v16825_v3 = vld [vmem:[#allocation44_spill] sm:$0xff]  ;;  %v16826_v19 = vld [vmem:[#allocation10_spill] sm:$0xff]  ;;  %v16827_v34 = vld [vmem:[#allocation101_spill] sm:$0xff] }
 0x69f   : > { %v10286_v0 = vpop.eup %10285  ;;  %9151 = vst.msk [vmem:[%s15533_s9 + $0x60] sm:$0xff] %vm9138_vm1, %v9086_v18  ;;  %v8647_v13 = vadd.f32 1.0, %v10284_v20  ;;  %10311 = vpow2.f32 %v9608_v6  ;;  %v9614_v14 = vmul.f32 -1.442695, %v8404_v36  ;;  %v8274_v40 = vadd.f32 %v8148_v10, %v7950_v56  ;;  %v10564_v56 = vld [vmem:[%s10770_s20 + $0x130] sm:$0xff] }
 0x6a0   : > { %v10288_v38 = vpop.eup %10287  ;;  %9152 = vst.msk [vmem:[%s15533_s9 + $0x68] sm:$0xff] %vm9138_vm1, %v9087_v35  ;;  %v8652_v30 = vadd.f32 1.0, %v10286_v0  ;;  %10313 = vpow2.f32 %v9609_v1  ;;  %v8405_v55 = vadd.f32 %v10561_v11, %v8277_v62  ;;  %v7957_v2 = vadd.f32 %v16824_v37, %v16823_v44  ;;  %v16828_v1 = vld [vmem:[#allocation20_spill] sm:$0xff]  ;;  %v10567_v37 = vld [vmem:[%s10770_s20 + $0x128] sm:$0xff] }
 0x6a1   : > { %v10290_v41 = vpop.eup %10289  ;;  %v9092_v43 = vmul.f32 %v10288_v38, %v16820_v33  ;;  %10315 = vrcp.f32 %v8647_v13  ;;  %v8402_v31 = vadd.f32 %v10562_v59, %v8274_v40  ;;  %v8151_v5 = vpop.xlane.xlu1 %8150  ;;  %v7954_v52 = vadd.f32 %v16826_v19, %v16825_v3  ;;  %v16829_v40 = vld [vmem:[#allocation159_spill] sm:$0xff]  ;;  %v16830_v38 = vld [vmem:[#allocation84_spill] sm:$0xff] }
 0x6a2   : > { %v8166_v27 = vpop.xlane.xlu0 %8165  ;;  %v10292_v46 = vpop.eup %10291  ;;  %v9093_v21 = vmul.f32 %v10290_v41, %v16821_v8  ;;  %10317 = vrcp.f32 %v8652_v30  ;;  %v9615_v57 = vmul.f32 -1.442695, %v8405_v55  ;;  %v8275_v17 = vadd.f32 %v8151_v5, %v7951_v28  ;;  %9008 = vrot.lane.b32.xlu1 %v15648_v54, %s10597_s25  ;;  %v10565_v28 = vld [vmem:[%s10770_s20 + $0x138] sm:$0xff]  ;;  %v16831_v55 = vld [vmem:[#allocation52_spill] sm:$0xff]  ;;  %v16832_v41 = vld [vmem:[#allocation170_spill] sm:$0xff] }
 0x6a3   : > { %v10294_v32 = vpop.eup %10293  ;;  %9157 = vst.msk [vmem:[%s15533_s9 + $0x90] sm:$0xff] %vm9138_vm1, %v9092_v43  ;;  %v9090_v50 = vmul.f32 %v10292_v46, %v16822_v23  ;;  %10319 = vpow2.f32 %v9614_v14  ;;  %v9612_v48 = vmul.f32 -1.442695, %v8402_v31  ;;  %v8280_v6 = vadd.f32 %v8166_v27, %v7956_v29  ;;  %v10566_v29 = vld [vmem:[%s10770_s20 + $0x120] sm:$0xff]  ;;  %v16833_v5 = vld [vmem:[#allocation19_spill] sm:$0xff]  ;;  %v10568_v19 = vld [vmem:[%s10770_s20 + $0x150] sm:$0xff] }
 0x6a4   : > { %v10296_v63 = vpop.eup %10295  ;;  %9158 = vst.msk [vmem:[%s15533_s9 + $0x98] sm:$0xff] %vm9138_vm1, %v9093_v21  ;;  %v8653_v22 = vadd.f32 1.0, %v10294_v32  ;;  %10321 = vpow2.f32 %v9615_v57  ;;  %v8403_v53 = vadd.f32 %v10563_v25, %v8275_v17  ;;  %v7955_v7 = vadd.f32 %v16830_v38, %v16829_v40  ;;  %v16834_v57 = vld [vmem:[#allocation119_spill] sm:$0xff]  ;;  %v10569_v38 = vld [vmem:[%s10770_s20 + $0x158] sm:$0xff] }
 0x6a5   : > { %v10298_v49 = vpop.eup %10297  ;;  %9155 = vst.msk [vmem:[%s15533_s9 + $0x80] sm:$0xff] %vm9138_vm1, %v9090_v50  ;;  %v8650_v24 = vadd.f32 1.0, %v10296_v63  ;;  %10323 = vpow2.f32 %v9612_v48  ;;  %v8408_v12 = vadd.f32 %v10564_v56, %v8280_v6  ;;  %v8169_v18 = vpop.xlane.xlu1 %8168  ;;  %v7960_v47 = vadd.f32 %v16832_v41, %v16831_v55  ;;  %v16835_v48 = vld [vmem:[#allocation162_spill] sm:$0xff]  ;;  %v16837_v25 = vld [vmem:[#allocation47_spill] sm:$0xff] }
 0x6a6   : > { %v8160_v16 = vpop.xlane.xlu0 %8159  ;;  %v10300_v36 = vpop.eup %10299  ;;  %v9091_v10 = vmul.f32 %v10298_v49, %v16827_v34  ;;  %10325 = vrcp.f32 %v8653_v22  ;;  %v9613_v20 = vmul.f32 -1.442695, %v8403_v53  ;;  %v8281_v4 = vadd.f32 %v8169_v18, %v7957_v2  ;;  %v16836_v6 = vld [vmem:[#allocation174_spill] sm:$0xff]  ;;  %v16838_v53 = vld [vmem:[#allocation35_spill] sm:$0xff] }
 0x6a7   : > { %v10302_v35 = vpop.eup %10301  ;;  %v9096_v62 = vmul.f32 %v10300_v36, %v16828_v1  ;;  %10327 = vrcp.f32 %v8650_v24  ;;  %v9618_v0 = vmul.f32 -1.442695, %v8408_v12  ;;  %v8278_v13 = vadd.f32 %v8160_v16, %v7954_v52  ;;  %v10570_v41 = vld [vmem:[%s10770_s20 + $0x140] sm:$0xff] }
 0x6a8   : > { %v10304_v14 = vpop.eup %10303  ;;  %9156 = vst.msk [vmem:[%s15533_s9 + $0x88] sm:$0xff] %vm9138_vm1, %v9091_v10  ;;  %v8651_v15 = vadd.f32 1.0, %v10302_v35  ;;  %10329 = vpow2.f32 %v9613_v20  ;;  %v8409_v30 = vadd.f32 %v10565_v28, %v8281_v4  ;;  %v7961_v63 = vadd.f32 %v16836_v6, %v16835_v48  ;;  %v16839_v10 = vld [vmem:[#allocation17_spill] sm:$0xff]  ;;  %v16843_v28 = vld [vmem:[#allocation50_spill] sm:$0xff]  ;;  %v10571_v48 = vld [vmem:[%s10770_s20 + $0x148] sm:$0xff] }
 0x6a9   : > { %v10306_v11 = vpop.eup %10305  ;;  %9161 = vst.msk [vmem:[%s15533_s9 + $0xb0] sm:$0xff] %vm9138_vm1, %v9096_v62  ;;  %v8656_v51 = vadd.f32 1.0, %v10304_v14  ;;  %10331 = vpow2.f32 %v9618_v0  ;;  %v8406_v33 = vadd.f32 %v10566_v29, %v8278_v13  ;;  %v8163_v43 = vpop.xlane.xlu1 %8162  ;;  %v7958_v49 = vadd.f32 %v16838_v53, %v16837_v25  ;;  %v16840_v62 = vld [vmem:[#allocation161_spill] sm:$0xff]  ;;  %v16841_v0 = vld [vmem:[#allocation38_spill] sm:$0xff]  ;;  %v10572_v53 = vld [vmem:[%s10770_s20 + $0x170] sm:$0xff] }
 0x6aa   : > { %v8178_v59 = vpop.xlane.xlu0 %8177  ;;  %v10308_v31 = vpop.eup %10307  ;;  %v9097_v27 = vmul.f32 %v10306_v11, %v16833_v5  ;;  %10333 = vrcp.f32 %v8651_v15  ;;  %v9619_v46 = vmul.f32 -1.442695, %v8409_v30  ;;  %v8279_v8 = vadd.f32 %v8163_v43, %v7955_v7  ;;  %v16842_v14 = vld [vmem:[#allocation141_spill] sm:$0xff] }
 0x6ab   : > { %v10310_v21 = vpop.eup %10309  ;;  %v9094_v17 = vmul.f32 %v10308_v31, %v16834_v57  ;;  %10335 = vrcp.f32 %v8656_v51  ;;  %v9616_v32 = vmul.f32 -1.442695, %v8406_v33  ;;  %v8284_v23 = vadd.f32 %v8178_v59, %v7960_v47  ;;  %v16844_v30 = vld [vmem:[#allocation45_spill] sm:$0xff]  ;;  %v16845_v57 = vld [vmem:[#allocation55_spill] sm:$0xff] }
 0x6ac   : > { %v10312_v50 = vpop.eup %10311  ;;  %9162 = vst.msk [vmem:[%s15533_s9 + $0xb8] sm:$0xff] %vm9138_vm1, %v9097_v27  ;;  %v8657_v44 = vadd.f32 1.0, %v10310_v21  ;;  %10337 = vpow2.f32 %v9619_v46  ;;  %v8407_v2 = vadd.f32 %v10567_v37, %v8279_v8  ;;  %v7959_v13 = vadd.f32 %v16841_v0, %v16840_v62  ;;  %v16849_v37 = vld [vmem:[#allocation42_spill] sm:$0xff]  ;;  %v10573_v0 = vld [vmem:[%s10770_s20 + $0x178] sm:$0xff] }
 0x6ad   : > { %v10314_v22 = vpop.eup %10313  ;;  %9159 = vst.msk [vmem:[%s15533_s9 + $0xa0] sm:$0xff] %vm9138_vm1, %v9094_v17  ;;  %v8654_v3 = vadd.f32 1.0, %v10312_v50  ;;  %10339 = vpow2.f32 %v9616_v32  ;;  %v8412_v52 = vadd.f32 %v10568_v19, %v8284_v23  ;;  %v8181_v24 = vpop.xlane.xlu1 %8180  ;;  %v7964_v11 = vadd.f32 %v16844_v30, %v16843_v28  ;;  %v16846_v17 = vld [vmem:[#allocation97_spill] sm:$0xff]  ;;  %v16847_v23 = vld [vmem:[#allocation24_spill] sm:$0xff]  ;;  %v10574_v30 = vld [vmem:[%s10770_s20 + $0x160] sm:$0xff] }
 0x6ae   : > { %v8172_v56 = vpop.xlane.xlu0 %8171  ;;  %v10316_v12 = vpop.eup %10315  ;;  %10341 = vrcp.f32 %v8657_v44  ;;  %v8655_v18 = vadd.f32 1.0, %v10314_v22  ;;  %v9617_v16 = vmul.f32 -1.442695, %v8407_v2  ;;  %v8285_v36 = vadd.f32 %v8181_v24, %v7961_v63  ;;  %v16848_v44 = vld [vmem:[#allocation32_spill] sm:$0xff]  ;;  %v16850_v22 = vld [vmem:[#allocation22_spill] sm:$0xff] }
 0x6af   : > { %v10318_v34 = vpop.eup %10317  ;;  %v9095_v20 = vmul.f32 %v10316_v12, %v16839_v10  ;;  %10343 = vrcp.f32 %v8654_v3  ;;  %v9622_v4 = vmul.f32 -1.442695, %v8412_v52  ;;  %v8282_v35 = vadd.f32 %v8172_v56, %v7958_v49 }
 0x6b0   : > { %v10320_v1 = vpop.eup %10319  ;;  %v9100_v40 = vmul.f32 %v10318_v34, %v16842_v14  ;;  %10345 = vrcp.f32 %v8655_v18  ;;  %v8413_v7 = vadd.f32 %v10569_v38, %v8285_v36  ;;  %v7965_v32 = vadd.f32 %v16846_v17, %v16845_v57  ;;  %v16855_v38 = vld [vmem:[#allocation51_spill] sm:$0xff] }
 0x6b1   : > { %v10322_v15 = vpop.eup %10321  ;;  %9160 = vst.msk [vmem:[%s15533_s9 + $0xa8] sm:$0xff] %vm9138_vm1, %v9095_v20  ;;  %v8660_v55 = vadd.f32 1.0, %v10320_v1  ;;  %10347 = vpow2.f32 %v9617_v16  ;;  %v8410_v47 = vadd.f32 %v10570_v41, %v8282_v35  ;;  %v8175_v51 = vpop.xlane.xlu1 %8174  ;;  %v7962_v2 = vadd.f32 %v16849_v37, %v16848_v44  ;;  %v16851_v20 = vld [vmem:[#allocation149_spill] sm:$0xff]  ;;  %v10575_v17 = vld [vmem:[%s10770_s20 + $0x168] sm:$0xff]  ;;  %v10576_v37 = vld [vmem:[%s10770_s20 + $0x190] sm:$0xff] }
 0x6b2   : > { %v8190_v29 = vpop.xlane.xlu0 %8189  ;;  %v10324_v33 = vpop.eup %10323  ;;  %9165 = vst.msk [vmem:[%s15533_s9 + $0xd0] sm:$0xff] %vm9138_vm1, %v9100_v40  ;;  %v8661_v43 = vadd.f32 1.0, %v10322_v15  ;;  %10349 = vpow2.f32 %v9622_v4  ;;  %v9623_v59 = vmul.f32 -1.442695, %v8413_v7  ;;  %v8283_v31 = vadd.f32 %v8175_v51, %v7959_v13  ;;  %v16852_v4 = vld [vmem:[#allocation89_spill] sm:$0xff]  ;;  %v16856_v15 = vld [vmem:[#allocation143_spill] sm:$0xff] }
 0x6b3   : > { %v10326_v5 = vpop.eup %10325  ;;  %10351 = vrcp.f32 %v8660_v55  ;;  %v8658_v27 = vadd.f32 1.0, %v10324_v33  ;;  %v9620_v46 = vmul.f32 -1.442695, %v8410_v47  ;;  %v8288_v8 = vadd.f32 %v8190_v29, %v7964_v11  ;;  %v16853_v1 = vld [vmem:[#allocation21_spill] sm:$0xff] }
 0x6b4   : > { %v10328_v21 = vpop.eup %10327  ;;  %v9101_v50 = vmul.f32 %v10326_v5, %v16847_v23  ;;  %10353 = vrcp.f32 %v8661_v43  ;;  %v8411_v6 = vadd.f32 %v10571_v48, %v8283_v31  ;;  %v7963_v35 = vadd.f32 %v16852_v4, %v16851_v20  ;;  %v16854_v40 = vld [vmem:[#allocation57_spill] sm:$0xff]  ;;  %v16860_v48 = vld [vmem:[#allocation48_spill] sm:$0xff] }
 0x6b5   : > { %v10330_v63 = vpop.eup %10329  ;;  %v9098_v25 = vmul.f32 %v10328_v21, %v16850_v22  ;;  %10355 = vrcp.f32 %v8658_v27  ;;  %v8416_v49 = vadd.f32 %v10572_v53, %v8288_v8  ;;  %v8193_v3 = vpop.xlane.xlu1 %8192  ;;  %v7968_v7 = vadd.f32 %v16855_v38, %v16854_v40  ;;  %v16858_v21 = vld [vmem:[#allocation26_spill] sm:$0xff]  ;;  %v10577_v20 = vld [vmem:[%s10770_s20 + $0x198] sm:$0xff] }
 0x6b6   : > { %v8184_v19 = vpop.xlane.xlu0 %8183  ;;  %v10332_v52 = vpop.eup %10331  ;;  %9166 = vst.msk [vmem:[%s15533_s9 + $0xd8] sm:$0xff] %vm9138_vm1, %v9101_v50  ;;  %v8659_v24 = vadd.f32 1.0, %v10330_v63  ;;  %10357 = vpow2.f32 %v9623_v59  ;;  %v9621_v56 = vmul.f32 -1.442695, %v8411_v6  ;;  %v8289_v12 = vadd.f32 %v8193_v3, %v7965_v32  ;;  %v16859_v50 = vld [vmem:[#allocation53_spill] sm:$0xff]  ;;  %v16861_v63 = vld [vmem:[#allocation142_spill] sm:$0xff] }
 0x6b7   : > { %v10334_v18 = vpop.eup %10333  ;;  %9163 = vst.msk [vmem:[%s15533_s9 + $0xc0] sm:$0xff] %vm9138_vm1, %v9098_v25  ;;  %v8664_v16 = vadd.f32 1.0, %v10332_v52  ;;  %10359 = vpow2.f32 %v9620_v46  ;;  %v9626_v36 = vmul.f32 -1.442695, %v8416_v49  ;;  %v8286_v34 = vadd.f32 %v8184_v19, %v7962_v2  ;;  %v16857_v46 = vld [vmem:[#allocation164_spill] sm:$0xff] }
 0x6b8   : > { %v10336_v10 = vpop.eup %10335  ;;  %v9099_v62 = vmul.f32 %v10334_v18, %v16853_v1  ;;  %10361 = vrcp.f32 %v8659_v24  ;;  %v8417_v13 = vadd.f32 %v10573_v0, %v8289_v12  ;;  %v7969_v8 = vadd.f32 %v15415_v26, %v16857_v46  ;;  %v16862_v26 = vld [vmem:[#allocation23_spill] sm:$0xff]  ;;  %v16865_v1 = vld [vmem:[#allocation62_spill] sm:$0xff]  ;;  %v16866_v0 = vld [vmem:[#allocation145_spill] sm:$0xff] }
 0x6b9   : > { %v10338_v14 = vpop.eup %10337  ;;  %v9104_v28 = vmul.f32 %v10336_v10, %v16856_v15  ;;  %10363 = vrcp.f32 %v8664_v16  ;;  %v8414_v11 = vadd.f32 %v10574_v30, %v8286_v34  ;;  %v8187_v55 = vpop.xlane.xlu1 %8186  ;;  %v7966_v6 = vadd.f32 %v16860_v48, %v16859_v50  ;;  %v16863_v16 = vld [vmem:[#allocation163_spill] sm:$0xff] }
 0x6ba   : > { %v8202_v41 = vpop.xlane.xlu0 %8201  ;;  %v10340_v47 = vpop.eup %10339  ;;  %9164 = vst.msk [vmem:[%s15533_s9 + $0xc8] sm:$0xff] %vm9138_vm1, %v9099_v62  ;;  %v8665_v51 = vadd.f32 1.0, %v10338_v14  ;;  %10365 = vpow2.f32 %v9621_v56  ;;  %v9627_v29 = vmul.f32 -1.442695, %v8417_v13  ;;  %v8287_v33 = vadd.f32 %v8187_v55, %v7963_v35  ;;  %v10578_v14 = vld [vmem:[%s10770_s20 + $0x180] sm:$0xff] }
 0x6bb   : > { %v10342_v43 = vpop.eup %10341  ;;  %9169 = vst.msk [vmem:[%s15533_s9 + $0xf0] sm:$0xff] %vm9138_vm1, %v9104_v28  ;;  %v8662_v59 = vadd.f32 1.0, %v10340_v47  ;;  %10367 = vpow2.f32 %v9626_v36  ;;  %v9624_v31 = vmul.f32 -1.442695, %v8414_v11  ;;  %v8292_v5 = vadd.f32 %v8202_v41, %v7968_v7  ;;  %v16864_v36 = vld [vmem:[#allocation167_spill] sm:$0xff]  ;;  %v16867_v28 = vld [vmem:[#allocation28_spill] sm:$0xff] }
 0x6bc   : > { %v10344_v27 = vpop.eup %10343  ;;  %v9105_v57 = vmul.f32 %v10342_v43, %v16858_v21  ;;  %10369 = vrcp.f32 %v8665_v51  ;;  %v8415_v32 = vadd.f32 %v10575_v17, %v8287_v33  ;;  %v7967_v34 = vadd.f32 %v16864_v36, %v16863_v16  ;;  %v16869_v43 = vld [vmem:[#allocation166_spill] sm:$0xff]  ;;  %v16871_v21 = vld [vmem:[#allocation171_spill] sm:$0xff] }
 0x6bd   : > { %v10346_v23 = vpop.eup %10345  ;;  %v9102_v44 = vmul.f32 %v10344_v27, %v16861_v63  ;;  %10371 = vrcp.f32 %v8662_v59  ;;  %v8420_v2 = vadd.f32 %v10576_v37, %v8292_v5  ;;  %v8205_v22 = vpop.xlane.xlu1 %8204  ;;  %v7972_v62 = vadd.f32 %v15427_v58, %v16865_v1  ;;  %v16868_v58 = vld [vmem:[#allocation144_spill] sm:$0xff]  ;;  %v10579_v5 = vld [vmem:[%s10770_s20 + $0x188] sm:$0xff] }
 0x6be   : > { %v8196_v25 = vpop.xlane.xlu0 %8195  ;;  %v10348_v53 = vpop.eup %10347  ;;  %9170 = vst.msk [vmem:[%s15533_s9 + $0xf8] sm:$0xff] %vm9138_vm1, %v9105_v57  ;;  %v9103_v49 = vmul.f32 %v10346_v23, %v16862_v26  ;;  %10373 = vpow2.f32 %v9627_v29  ;;  %v9625_v3 = vmul.f32 -1.442695, %v8415_v32  ;;  %v8293_v19 = vadd.f32 %v8205_v22, %v7969_v8  ;;  %v16870_v8 = vld [vmem:[#allocation56_spill] sm:$0xff]  ;;  %v16873_v22 = vld [vmem:[#allocation147_spill] sm:$0xff] }
 0x6bf   : > { %v10350_v52 = vpop.eup %10349  ;;  %9167 = vst.msk [vmem:[%s15533_s9 + $0xe0] sm:$0xff] %vm9138_vm1, %v9102_v44  ;;  %v8663_v24 = vadd.f32 1.0, %v10348_v53  ;;  %10375 = vpow2.f32 %v9624_v31  ;;  %v9630_v56 = vmul.f32 -1.442695, %v8420_v2  ;;  %v8290_v12 = vadd.f32 %v8196_v25, %v7966_v6  ;;  %v10580_v32 = vld [vmem:[%s10770_s20 + $0x1b0] sm:$0xff]  ;;  %v16872_v6 = vld [vmem:[#allocation25_spill] sm:$0xff] }
 0x6c0   : > { %v10352_v18 = vpop.eup %10351  ;;  %9168 = vst.msk [vmem:[%s15533_s9 + $0xe8] sm:$0xff] %vm9138_vm1, %v9103_v49  ;;  %v8668_v10 = vadd.f32 1.0, %v10350_v52  ;;  %10377 = vpow2.f32 %v9625_v3  ;;  %v8421_v4 = vadd.f32 %v10577_v20, %v8293_v19  ;;  %v7973_v59 = vadd.f32 %v15433_v9, %v16869_v43  ;;  %v16874_v3 = vld [vmem:[#allocation165_spill] sm:$0xff]  ;;  %v10584_v43 = vld [vmem:[%s10770_s20 + $0x1d0] sm:$0xff] }
 0x6c1   : > { %v10354_v35 = vpop.eup %10353  ;;  %v9108_v13 = vmul.f32 %v10352_v18, %v16866_v0  ;;  %10379 = vrcp.f32 %v8663_v24  ;;  %v8418_v40 = vadd.f32 %v10578_v14, %v8290_v12  ;;  %v8199_v38 = vpop.xlane.xlu1 %8198  ;;  %v7970_v57 = vadd.f32 %v16871_v21, %v16870_v8  ;;  %v10581_v24 = vld [vmem:[%s10770_s20 + $0x1b8] sm:$0xff]  ;;  %v16877_v14 = vld [vmem:[#allocation146_spill] sm:$0xff] }
 0x6c2   : > { %v8214_v7 = vpop.xlane.xlu0 %8213  ;;  %v10356_v15 = vpop.eup %10355  ;;  %v9109_v30 = vmul.f32 %v10354_v35, %v16867_v28  ;;  %10381 = vrcp.f32 %v8668_v10  ;;  %v9631_v11 = vmul.f32 -1.442695, %v8421_v4  ;;  %v8291_v55 = vadd.f32 %v8199_v38, %v7967_v34  ;;  %v16875_v18 = vld [vmem:[#allocation173_spill] sm:$0xff]  ;;  %v10582_v34 = vld [vmem:[%s10770_s20 + $0x1a0] sm:$0xff]  ;;  %v16879_v28 = vld [vmem:[#allocation168_spill] sm:$0xff] }
 0x6c3   : > { %v10358_v41 = vpop.eup %10357  ;;  %9173 = vst.msk [vmem:[%s15533_s9 + $0x110] sm:$0xff] %vm9138_vm1, %v9108_v13  ;;  %v9106_v47 = vmul.f32 %v10356_v15, %v16868_v58  ;;  %10383 = vpow2.f32 %v9630_v56  ;;  %v9628_v51 = vmul.f32 -1.442695, %v8418_v40  ;;  %v8296_v29 = vadd.f32 %v8214_v7, %v7972_v62  ;;  %v16876_v35 = vld [vmem:[#allocation30_spill] sm:$0xff]  ;;  %v16878_v15 = vld [vmem:[#allocation67_spill] sm:$0xff] }
 0x6c4   : > { %v10360_v33 = vpop.eup %10359  ;;  %9174 = vst.msk [vmem:[%s15533_s9 + $0x118] sm:$0xff] %vm9138_vm1, %v9109_v30  ;;  %v8669_v31 = vadd.f32 1.0, %v10358_v41  ;;  %10385 = vpow2.f32 %v9631_v11  ;;  %v8419_v27 = vadd.f32 %v10579_v5, %v8291_v55  ;;  %v7971_v19 = vadd.f32 %v15425_v60, %v16874_v3  ;;  %v10583_v55 = vld [vmem:[%s10770_s20 + $0x1a8] sm:$0xff]  ;;  %v10585_v3 = vld [vmem:[%s10770_s20 + $0x1c0] sm:$0xff] }
 0x6c5   : > { %v10362_v46 = vpop.eup %10361  ;;  %9171 = vst.msk [vmem:[%s15533_s9 + $0x100] sm:$0xff] %vm9138_vm1, %v9106_v47  ;;  %v8666_v17 = vadd.f32 1.0, %v10360_v33  ;;  %10387 = vpow2.f32 %v9628_v51  ;;  %v8424_v23 = vadd.f32 %v10580_v32, %v8296_v29  ;;  %v8217_v50 = vpop.xlane.xlu1 %8216  ;;  %v7976_v16 = vadd.f32 %v15440_v42, %v16875_v18  ;;  %v16880_v47 = vld [vmem:[#allocation169_spill] sm:$0xff]  ;;  %v16881_v51 = vld [vmem:[#allocation54_spill] sm:$0xff] }
 0x6c6   : > { %v8208_v48 = vpop.xlane.xlu0 %8207  ;;  %v10364_v9 = vpop.eup %10363  ;;  %v9107_v63 = vmul.f32 %v10362_v46, %v16872_v6  ;;  %10389 = vrcp.f32 %v8669_v31  ;;  %v9629_v44 = vmul.f32 -1.442695, %v8419_v27  ;;  %v8297_v37 = vadd.f32 %v8217_v50, %v7973_v59  ;;  %v16884_v6 = vld [vmem:[#allocation58_spill] sm:$0xff] }
 0x6c7   : > { %v10366_v2 = vpop.eup %10365  ;;  %v9112_v25 = vmul.f32 %v10364_v9, %v16873_v22  ;;  %10391 = vrcp.f32 %v8666_v17  ;;  %v9634_v53 = vmul.f32 -1.442695, %v8424_v23  ;;  %v8294_v26 = vadd.f32 %v8208_v48, %v7970_v57  ;;  %v16882_v17 = vld [vmem:[#allocation27_spill] sm:$0xff]  ;;  %v16883_v9 = vld [vmem:[#allocation60_spill] sm:$0xff] }
 0x6c8   : > { %v10368_v49 = vpop.eup %10367  ;;  %9172 = vst.msk [vmem:[%s15533_s9 + $0x108] sm:$0xff] %vm9138_vm1, %v9107_v63  ;;  %v8667_v52 = vadd.f32 1.0, %v10366_v2  ;;  %10393 = vpow2.f32 %v9629_v44  ;;  %v8425_v56 = vadd.f32 %v10581_v24, %v8297_v37  ;;  %v7977_v30 = vadd.f32 %v16879_v28, %v16878_v15  ;;  %v16885_v44 = vld [vmem:[#allocation105_spill] sm:$0xff] }
 0x6c9   : > { %v10370_v12 = vpop.eup %10369  ;;  %9177 = vst.msk [vmem:[%s15533_s9 + $0x130] sm:$0xff] %vm9138_vm1, %v9112_v25  ;;  %v8672_v36 = vadd.f32 1.0, %v10368_v49  ;;  %10395 = vpow2.f32 %v9634_v53  ;;  %v8422_v10 = vadd.f32 %v10582_v34, %v8294_v26  ;;  %v8211_v20 = vpop.xlane.xlu1 %8210  ;;  %v7974_v29 = vadd.f32 %v16881_v51, %v16880_v47  ;;  %v16886_v25 = vld [vmem:[#allocation64_spill] sm:$0xff]  ;;  %v16887_v53 = vld [vmem:[#allocation95_spill] sm:$0xff]  ;;  %v10587_v47 = vld [vmem:[%s10770_s20 + $0x1e0] sm:$0xff] }
 0x6ca   : > { %v8226_v4 = vpop.xlane.xlu0 %8225  ;;  %v10372_v60 = vpop.eup %10371  ;;  %v9113_v1 = vmul.f32 %v10370_v12, %v16876_v35  ;;  %10397 = vrcp.f32 %v8667_v52  ;;  %v9635_v62 = vmul.f32 -1.442695, %v8425_v56  ;;  %v8295_v0 = vadd.f32 %v8211_v20, %v7971_v19  ;;  %v16888_v20 = vld [vmem:[#allocation175_spill] sm:$0xff]  ;;  %v16890_v35 = vld [vmem:[#allocation114_spill] sm:$0xff] }
 0x6cb   : > { %v10374_v13 = vpop.eup %10373  ;;  %v9110_v42 = vmul.f32 %v10372_v60, %v16877_v14  ;;  %10399 = vrcp.f32 %v8672_v36  ;;  %v9632_v40 = vmul.f32 -1.442695, %v8422_v10  ;;  %v8300_v38 = vadd.f32 %v8226_v4, %v7976_v16  ;;  %v16889_v4 = vld [vmem:[#allocation172_spill] sm:$0xff] }
 0x6cc   : > { %v10376_v7 = vpop.eup %10375  ;;  %9178 = vst.msk [vmem:[%s15533_s9 + $0x138] sm:$0xff] %vm9138_vm1, %v9113_v1  ;;  %v8673_v11 = vadd.f32 1.0, %v10374_v13  ;;  %10401 = vpow2.f32 %v9635_v62  ;;  %v8423_v41 = vadd.f32 %v10583_v55, %v8295_v0  ;;  %v7975_v63 = vadd.f32 %v16884_v6, %v16883_v9  ;;  %v16891_v13 = vld [vmem:[#allocation148_spill] sm:$0xff]  ;;  %v16896_v9 = vld [vmem:[#allocation118_spill] sm:$0xff] }
 0x6cd   : > { %v10378_v58 = vpop.eup %10377  ;;  %9175 = vst.msk [vmem:[%s15533_s9 + $0x120] sm:$0xff] %vm9138_vm1, %v9110_v42  ;;  %v8670_v33 = vadd.f32 1.0, %v10376_v7  ;;  %10403 = vpow2.f32 %v9632_v40  ;;  %v8428_v59 = vadd.f32 %v10584_v43, %v8300_v38  ;;  %v8229_v31 = vpop.xlane.xlu1 %8228  ;;  %v7980_v26 = vadd.f32 %v16887_v53, %v16886_v25  ;;  %v10586_v42 = vld [vmem:[%s10770_s20 + $0x1f0] sm:$0xff] }
 0x6ce   : > { %v8220_v5 = vpop.xlane.xlu0 %8219  ;;  %v10380_v27 = vpop.eup %10379  ;;  %10405 = vrcp.f32 %v8673_v11  ;;  %v8671_v46 = vadd.f32 1.0, %v10378_v58  ;;  %v9633_v8 = vmul.f32 -1.442695, %v8423_v41  ;;  %v8301_v21 = vadd.f32 %v8229_v31, %v7977_v30  ;;  %v16892_v41 = vld [vmem:[#allocation117_spill] sm:$0xff] }
 0x6cf   : > { %v10382_v57 = vpop.eup %10381  ;;  %v9111_v32 = vmul.f32 %v10380_v27, %v16882_v17  ;;  %10407 = vrcp.f32 %v8670_v33  ;;  %v9638_v23 = vmul.f32 -1.442695, %v8428_v59  ;;  %v8298_v50 = vadd.f32 %v8220_v5, %v7974_v29  ;;  %v16893_v33 = vld [vmem:[#allocation111_spill] sm:$0xff] }
 0x6d0   : > { %v10384_v48 = vpop.eup %10383  ;;  %v9116_v37 = vmul.f32 %v10382_v57, %v16885_v44  ;;  %10409 = vrcp.f32 %v8671_v46  ;;  %v15800_v2 = vadd.f32 %v15613_v61, %v8301_v21  ;;  %v7978_v60 = vadd.f32 %v16889_v4, %v16888_v20  ;;  %v16894_v57 = vld [vmem:[#allocation31_spill] sm:$0xff] }
 0x6d1   : > { %v10386_v22 = vpop.eup %10385  ;;  %9176 = vst.msk [vmem:[%s15533_s9 + $0x128] sm:$0xff] %vm9138_vm1, %v9111_v32  ;;  %v8676_v49 = vadd.f32 1.0, %v10384_v48  ;;  %10411 = vpow2.f32 %v9633_v8  ;;  %v8426_v19 = vadd.f32 %v10585_v3, %v8298_v50  ;;  %v8223_v52 = vpop.xlane.xlu1 %8222 }
 0x6d2   : > { %v8238_v24 = vpop.xlane.xlu0 %8237  ;;  %v10388_v56 = vpop.eup %10387  ;;  %9181 = vst.msk [vmem:[%s15533_s9 + $0x150] sm:$0xff] %vm9138_vm1, %v9116_v37  ;;  %v8677_v12 = vadd.f32 1.0, %v10386_v22  ;;  %10413 = vpow2.f32 %v9638_v23  ;;  %v8299_v61 = vadd.f32 %v8223_v52, %v7975_v63  ;;  %v16895_v23 = vld [vmem:[#allocation29_spill] sm:$0xff] }
 0x6d3   : > { %v10390_v18 = vpop.eup %10389  ;;  %10415 = vrcp.f32 %v8676_v49  ;;  %v8674_v16 = vadd.f32 1.0, %v10388_v56  ;;  %v9636_v36 = vmul.f32 -1.442695, %v8426_v19  ;;  %v8304_v34 = vadd.f32 %v8238_v24, %v7980_v26  ;;  %v16897_v26 = vld [vmem:[#allocation150_spill] sm:$0xff]  ;;  %v16898_v19 = vld [vmem:[#allocation37_spill] sm:$0xff] }
 0x6d4   : > { %v10392_v10 = vpop.eup %10391  ;;  %v9117_v1 = vmul.f32 %v10390_v18, %v16890_v35  ;;  %10417 = vrcp.f32 %v8677_v12  ;;  %v15813_v62 = vadd.f32 %v15596_v39, %v8299_v61  ;;  %v16899_v24 = vld [vmem:[#allocation34_spill] sm:$0xff] }
 0x6d5   : > { %v10394_v0 = vpop.eup %10393  ;;  %v9114_v14 = vmul.f32 %v10392_v10, %v16891_v13  ;;  %10419 = vrcp.f32 %v8674_v16  ;;  %v8432_v40 = vadd.f32 %v10586_v42, %v8304_v34  ;;  %v8989_v12 = vpop.permute.xlu1 %8988  ;;  %v16900_v10 = vld [vmem:[#allocation33_spill] sm:$0xff] }
 0x6d6   : > { %v8232_v38 = vpop.xlane.xlu0 %8231  ;;  %v10396_v7 = vpop.eup %10395  ;;  %9182 = vst.msk [vmem:[%s15533_s9 + $0x158] sm:$0xff] %vm9138_vm1, %v9117_v1  ;;  %v8675_v15 = vadd.f32 1.0, %v10394_v0  ;;  %10421 = vpow2.f32 %v9636_v36 }
 0x6d7   : > { %v8302_v28 = vadd.f32 %v8232_v38, %v7978_v60  ;;  %v10398_v30 = vpop.eup %10397  ;;  %9179 = vst.msk [vmem:[%s15533_s9 + $0x140] sm:$0xff] %vm9138_vm1, %v9114_v14  ;;  %v8680_v11 = vadd.f32 1.0, %v10396_v7  ;;  %v9642_v39 = vmul.f32 -1.442695, %v8432_v40 }
 0x6d8   : > { %v10400_v55 = vpop.eup %10399  ;;  %v9115_v58 = vmul.f32 %v10398_v30, %v16892_v41  ;;  %10423 = vrcp.f32 %v8675_v15  ;;  %v9637_v15 = vmul.f32 -1.442695, %v15813_v62  ;;  %v9639_v41 = vmul.f32 -1.442695, %v15800_v2 }
 0x6d9   : > { %v8430_v51 = vadd.f32 %v10587_v47, %v8302_v28  ;;  %v10402_v29 = vpop.eup %10401  ;;  %v9120_v43 = vmul.f32 %v10400_v55, %v16893_v33  ;;  %10425 = vrcp.f32 %v8680_v11  ;;  %v8993_v0 = vpop.permute.xlu1 %8992 }
 0x6da   : > { %v8987_v59 = vpop.permute.xlu0 %8986  ;;  %v10404_v31 = vpop.eup %10403  ;;  %9180 = vst.msk [vmem:[%s15533_s9 + $0x148] sm:$0xff] %vm9138_vm1, %v9115_v58  ;;  %v8681_v5 = vadd.f32 1.0, %v10402_v29  ;;  %10427 = vpow2.f32 %v9642_v39 }
 0x6db   : > { %v9640_v27 = vmul.f32 -1.442695, %v8430_v51  ;;  %v10406_v46 = vpop.eup %10405  ;;  %9185 = vst.msk [vmem:[%s15533_s9 + $0x170] sm:$0xff] %vm9138_vm1, %v9120_v43  ;;  %v8678_v8 = vadd.f32 1.0, %v10404_v31 }
 0x6dc   : > { %v10408_v21 = vpop.eup %10407  ;;  %v9121_v17 = vmul.f32 %v10406_v46, %v16894_v57  ;;  %10429 = vrcp.f32 %v8681_v5  ;;  %v16902_v46 = vld [vmem:[#allocation65_spill] sm:$0xff] }
 0x6dd   : > { %v10410_v32 = vpop.eup %10409  ;;  %v9118_v50 = vmul.f32 %v10408_v21, %v16895_v23  ;;  %10431 = vrcp.f32 %v8678_v8 }
 0x6de   : > { %v10412_v48 = vpop.eup %10411  ;;  %9186 = vst.msk [vmem:[%s15533_s9 + $0x178] sm:$0xff] %vm9138_vm1, %v9121_v17  ;;  %v9119_v6 = vmul.f32 %v10410_v32, %v16896_v9  ;;  %10433 = vpow2.f32 %v9640_v27  ;;  %v8991_v63 = vpop.permute.xlu0 %8990  ;;  %v16901_v27 = vld [vmem:[#allocation2_spill] sm:$0xff]  ;;  %v16903_v17 = vld [vmem:[#allocation176_spill] sm:$0xff]  ;;  %v16904_v32 = vld [vmem:[#allocation61_spill] sm:$0xff] }
 0x6df   : > { %v10414_v44 = vpop.eup %10413  ;;  %9183 = vst.msk [vmem:[%s15533_s9 + $0x160] sm:$0xff] %vm9138_vm1, %v9118_v50  ;;  %v8679_v37 = vadd.f32 1.0, %v10412_v48  ;;  %v7981_v8 = vadd.f32 %v16902_v46, %v16901_v27  ;;  %v7979_v23 = vadd.f32 %v16904_v32, %v16903_v17 }
 0x6e0   : > { %v10416_v22 = vpop.eup %10415  ;;  %9184 = vst.msk [vmem:[%s15533_s9 + $0x168] sm:$0xff] %vm9138_vm1, %v9119_v6  ;;  %v8684_v25 = vadd.f32 1.0, %v10414_v44 }
 0x6e1   : > { %v10418_v53 = vpop.eup %10417  ;;  %v9124_v49 = vmul.f32 %v10416_v22, %v16897_v26  ;;  %10435 = vrcp.f32 %v8679_v37 }
 0x6e2   : > { %v10420_v3 = vpop.eup %10419  ;;  %v9125_v52 = vmul.f32 %v10418_v53, %v16898_v19  ;;  %10437 = vrcp.f32 %v8684_v25  ;;  %v8995_v18 = vpop.permute.xlu0 %8994 }
 0x6e3   : > { %9189 = vst.msk [vmem:[%s15533_s9 + $0x190] sm:$0xff] %vm9138_vm1, %v9124_v49  ;;  %v9122_v56 = vmul.f32 %v10420_v3, %v16899_v24  ;;  %v10422_v61 = vpop.eup %10421 }
 0x6e4   : > { %9190 = vst.msk [vmem:[%s15533_s9 + $0x198] sm:$0xff] %vm9138_vm1, %v9125_v52  ;;  %v8682_v36 = vadd.f32 1.0, %v10422_v61 }
 0x6e5   : > { %v10424_v16 = vpop.eup %10423  ;;  %9187 = vst.msk [vmem:[%s15533_s9 + $0x180] sm:$0xff] %vm9138_vm1, %v9122_v56 }
 0x6e6   : > { %v10426_v34 = vpop.eup %10425  ;;  %v9123_v20 = vmul.f32 %v10424_v16, %v16900_v10  ;;  %10439 = vrcp.f32 %v8682_v36  ;;  %v8999_v42 = vpop.permute.xlu0 %8998 }
 0x6e7   : > { %v9128_v4 = vmul.f32 %v10426_v34, %v8991_v63  ;;  %v10428_v60 = vpop.eup %10427 }
 0x6e8   : > { %9188 = vst.msk [vmem:[%s15533_s9 + $0x188] sm:$0xff] %vm9138_vm1, %v9123_v20  ;;  %v8688_v1 = vadd.f32 1.0, %v10428_v60 }
 0x6e9   : > { %v10430_v35 = vpop.eup %10429  ;;  %9193 = vst.msk [vmem:[%s15533_s9 + $0x1b0] sm:$0xff] %vm9138_vm1, %v9128_v4 }
 0x6ea   : > { %v10432_v13 = vpop.eup %10431  ;;  %v9129_v14 = vmul.f32 %v10430_v35, %v8993_v0  ;;  %10441 = vrcp.f32 %v8688_v1  ;;  %v9003_v55 = vpop.permute.xlu0 %9002 }
 0x6eb   : > { %v10434_v40 = vpop.eup %10433  ;;  %v9126_v38 = vmul.f32 %v10432_v13, %v8987_v59 }
 0x6ec   : > { %v8686_v7 = vadd.f32 1.0, %v10434_v40  ;;  %9194 = vst.msk [vmem:[%s15533_s9 + $0x1b8] sm:$0xff] %vm9138_vm1, %v9129_v14 }
 0x6ed   : > { %9191 = vst.msk [vmem:[%s15533_s9 + $0x1a0] sm:$0xff] %vm9138_vm1, %v9126_v38 }
 0x6ee   : > { %v10436_v28 = vpop.eup %10435  ;;  %10443 = vrcp.f32 %v8686_v7  ;;  %v9007_v47 = vpop.permute.xlu0 %9006 }
 0x6ef   : > { %v10438_v30 = vpop.eup %10437  ;;  %v9127_v11 = vmul.f32 %v10436_v28, %v8989_v12  ;;  %10445 = vpow2.f32 %v9637_v15 }
 0x6f0   : > { %v9132_v39 = vmul.f32 %v10438_v30, %v8999_v42  ;;  %10447 = vpow2.f32 %v9639_v41 }
 0x6f1   : > { %9192 = vst.msk [vmem:[%s15533_s9 + $0x1a8] sm:$0xff] %vm9138_vm1, %v9127_v11 }
 0x6f2   : > { %9197 = vst.msk [vmem:[%s15533_s9 + $0x1d0] sm:$0xff] %vm9138_vm1, %v9132_v39 }
 0x6f3   : > { %v10440_v58 = vpop.eup %10439 }
 0x6f4   : > { %v9130_v62 = vmul.f32 %v10440_v58, %v8995_v18 }
 0x6f6   : > { %9195 = vst.msk [vmem:[%s15533_s9 + $0x1c0] sm:$0xff] %vm9138_vm1, %v9130_v62 }
 0x6f7   : > { %v10442_v51 = vpop.eup %10441 }
 0x6f8   : > { %v9136_v29 = vmul.f32 %v10442_v51, %v9007_v47 }
 0x6fa   : > { %9201 = vst.msk [vmem:[%s15533_s9 + $0x1f0] sm:$0xff] %vm9138_vm1, %v9136_v29 }
 0x6fb   : > { %v10444_v33 = vpop.eup %10443 }
 0x6fc   : > { %v9134_v43 = vmul.f32 %v10444_v33, %v9003_v55  ;;  %v10446_v59 = vpop.eup %10445 }
 0x6fd   : > { %v8683_v2 = vadd.f32 1.0, %v10446_v59  ;;  %v10448_v31 = vpop.eup %10447 }
 0x6fe   : > { %9199 = vst.msk [vmem:[%s15533_s9 + $0x1e0] sm:$0xff] %vm9138_vm1, %v9134_v43  ;;  %v8685_v5 = vadd.f32 1.0, %v10448_v31 }
 0x6ff   : > { %10449 = vrcp.f32 %v8683_v2 }
 0x700   : > { %10451 = vrcp.f32 %v8685_v5 }
 0x70a   : > { %v8241_v21 = vpop.xlane.xlu1 %8240 }
 0x70b   : > { %v8305_v57 = vadd.f32 %v8241_v21, %v7981_v8 }
 0x70c   : > { %v10450_v44 = vpop.eup %10449 }
 0x70d   : > { %v8433_v50 = vadd.f32 %v15648_v54, %v8305_v57  ;;  %v10452_v53 = vpop.eup %10451 }
 0x70e   : > { %v8235_v48 = vpop.xlane.xlu1 %8234 }
 0x70f   : > { %v9643_v9 = vmul.f32 -1.442695, %v8433_v50  ;;  %v8303_v6 = vadd.f32 %v8235_v48, %v7979_v23 }
 0x711   : > { %10453 = vpow2.f32 %v9643_v9  ;;  %v8431_v63 = vadd.f32 %v15630_v45, %v8303_v6 }
 0x712   : > { %v8997_v37 = vpop.permute.xlu1 %8996 }
 0x713   : > { %v9641_v22 = vmul.f32 -1.442695, %v8431_v63  ;;  %v9131_v25 = vmul.f32 %v10450_v44, %v8997_v37 }
 0x715   : > { %10455 = vpow2.f32 %v9641_v22  ;;  %9196 = vst.msk [vmem:[%s15533_s9 + $0x1c8] sm:$0xff] %vm9138_vm1, %v9131_v25 }
 0x716   : > { %v9001_v26 = vpop.permute.xlu1 %9000 }
 0x717   : > { %v9133_v49 = vmul.f32 %v10452_v53, %v9001_v26 }
 0x719   : > { %9198 = vst.msk [vmem:[%s15533_s9 + $0x1d8] sm:$0xff] %vm9138_vm1, %v9133_v49 }
 0x71a   : > { %v9005_v45 = vpop.permute.xlu1 %9004 }
 0x71e   : > { %v10454_v54 = vpop.eup %10453  ;;  %v9009_v24 = vpop.permute.xlu1 %9008 }
 0x71f   : > { %v8689_v3 = vadd.f32 1.0, %v10454_v54 }
 0x721   : > { %10457 = vrcp.f32 %v8689_v3 }
 0x722   : > { %v10456_v19 = vpop.eup %10455 }
 0x723   : > { %v8687_v52 = vadd.f32 1.0, %v10456_v19 }
 0x725   : > { %10459 = vrcp.f32 %v8687_v52 }
 0x72e   : > { %v10458_v56 = vpop.eup %10457 }
 0x72f   : > { %v9137_v12 = vmul.f32 %v10458_v56, %v9009_v24 }
 0x731   : > { %9202 = vst.msk [vmem:[%s15533_s9 + $0x1f8] sm:$0xff] %vm9138_vm1, %v9137_v12 }
 0x732   : > { %v10460_v61 = vpop.eup %10459 }
 0x733   : > { %v9135_v18 = vmul.f32 %v10460_v61, %v9005_v45 }
 0x735   : > { %9200 = vst.msk [vmem:[%s15533_s9 + $0x1e8] sm:$0xff] %vm9138_vm1, %v9135_v18 }
 0x736 PF: > { %s18_s27 = sadd.s32 1, %s10594_s27  }
 0x737   : > { %p15_p4 = scmp.ge.s32.totalorder %s18_s27, 4  }
 0x739   :  { %17 = sbr.rel (!%p15_p4) target bundleno = 1 (0x1), region = 85 }

</bundles_post_ra>
